<compile_context>
chip_gen: v6e
topology: v6e:2x2x1
jax: 0.10.0
libtpu: 0.0.40
codegen_flags: <defaults>
</compile_context>

<pallas_src>
import functools

import jax
import jax.numpy as jnp
import numpy as np
from jax.experimental import pallas as pl
from jax.experimental.pallas import tpu as pltpu


_XOFF = 8  # sublane-aligned column offset of the interior in the halo buffers


def _fused_dip4_kernel(x_ref, w1_ref, wr_ref, b_ref, o_ref,
                       pad_in_ref, pad_ref, patch_ref, *, H, W, C, Cin):
    """Fused 4x (3x3 'same' conv + bias [+ ReLU]) for one batch element.

    x_ref      : (1, H, W, Cin)          input tile (VMEM)
    w1_ref     : (9*Cin, C)              layer-1 im2col weights (VMEM, pinned)
    wr_ref     : (3, 9*C, C)             layer-2..4 im2col weights (VMEM, pinned)
    b_ref      : (4, C)                  biases (VMEM, pinned)
    o_ref      : (1, H, W, C)            output tile (VMEM)
    pad_in_ref : (H+2, _XOFF+W+1, Cin)   zero-halo input scratch
    pad_ref    : (H+2, _XOFF+W+1, C)     zero-halo activation scratch
    patch_ref  : (H*W, 9*C)              im2col patch scratch
    """
    f32 = jnp.float32
    wbuf = _XOFF + W + 1

    # ---- zero only the 1-pixel halo ring that the taps read (O(H+W) work).
    # The interiors are fully overwritten every grid step, so no O(H*W) clear
    # is needed; safe for any grid-iteration order / core assignment.
    for ring_ref, rc in ((pad_in_ref, Cin), (pad_ref, C)):
        zrow = jnp.zeros((1, wbuf, rc), f32)
        zcol = jnp.zeros((H + 2, 1, rc), f32)
        ring_ref[0:1, :, :] = zrow
        ring_ref[H + 1:H + 2, :, :] = zrow
        ring_ref[:, _XOFF - 1:_XOFF, :] = zcol
        ring_ref[:, _XOFF + W:_XOFF + W + 1, :] = zcol

    # ---- place the input in the interior of its small Cin-channel halo buffer
    pad_in_ref[1:1 + H, _XOFF:_XOFF + W, :] = x_ref[0].astype(f32)

    def im2col(src_ref, c):
        # Gather the 9 shifted taps into one (H*W, 9*c) patch matrix so the
        # layer is a single fat MXU matmul (K = 9*c) instead of nine skinny
        # K = c pushes.
        for dy in range(3):
            for dx in range(3):
                k = dy * 3 + dx
                col0 = _XOFF - 1 + dx
                tap = src_ref[dy:dy + H, col0:col0 + W, :]        # (H, W, c)
                patch_ref[:, k * c:(k + 1) * c] = tap.reshape(H * W, c)

    # ---- layer 1: K = 9*Cin (no zero-padded input channels -> no wasted MXU K)
    im2col(pad_in_ref, Cin)
    y = jnp.dot(patch_ref[:, :9 * Cin], w1_ref[...],
                preferred_element_type=f32)                        # (H*W, C)
    y = jnp.maximum(y + b_ref[0][None, :], 0.0)
    pad_ref[1:1 + H, _XOFF:_XOFF + W, :] = y.reshape(H, W, C)

    # ---- layers 2..4: K = 9*C, activations stay resident in VMEM
    n_rest = wr_ref.shape[0]
    for li in range(n_rest):
        im2col(pad_ref, C)
        y = jnp.dot(patch_ref[...], wr_ref[li],
                    preferred_element_type=f32)                    # (H*W, C)
        y = y + b_ref[li + 1][None, :]
        if li < n_rest - 1:
            y = jnp.maximum(y, 0.0)
            # Aligned interior write-back; halo ring stays zero.
            pad_ref[1:1 + H, _XOFF:_XOFF + W, :] = y.reshape(H, W, C)
        else:
            o_ref[0] = y.reshape(H, W, C).astype(o_ref.dtype)


def _pack_params(params):
    """Pack per-layer (HWIO weight, bias) for the kernel.

    Returns:
      w1 : (9*Cin, C)   layer-1 im2col weights (rows ordered dy, dx, cin)
      wr : (3, 9*C, C)  layer-2..4 im2col weights
      b  : (4, C)       biases
    """
    n_feat = params[0][0].shape[-1]
    w1, b1 = params[0]
    kh, kw, cin, cout = w1.shape
    assert (kh, kw) == (3, 3) and cout == n_feat
    w1p = w1.reshape(9 * cin, n_feat)
    ws, bs = [], [b1]
    for (w, b) in params[1:]:
        kh, kw, ci, co = w.shape
        assert (kh, kw) == (3, 3) and ci == n_feat and co == n_feat
        ws.append(w.reshape(9 * n_feat, n_feat))   # rows ordered (dy, dx, cin)
        bs.append(b)
    return w1p, jnp.stack(ws), jnp.stack(bs)


@jax.jit
def forward(x_nchw, params):
    """Forward pass matching the PyTorch module. Input/output are NCHW."""
    x = jnp.transpose(x_nchw, (0, 2, 3, 1))              # NCHW -> NHWC
    N, H, W, Cin = x.shape
    w1, wr, b = _pack_params(params)
    L_rest, _, C = wr.shape

    kernel = functools.partial(_fused_dip4_kernel, H=H, W=W, C=C, Cin=Cin)

    out = pl.pallas_call(
        kernel,
        out_shape=jax.ShapeDtypeStruct((N, H, W, C), jnp.float32),
        grid_spec=pltpu.PrefetchScalarGridSpec(
            num_scalar_prefetch=0,
            grid=(N,),
            in_specs=[
                pl.BlockSpec((1, H, W, Cin), lambda n: (n, 0, 0, 0)),
                pl.BlockSpec((9 * Cin, C), lambda n: (0, 0)),           # pinned
                pl.BlockSpec((L_rest, 9 * C, C), lambda n: (0, 0, 0)),  # pinned
                pl.BlockSpec((L_rest + 1, C), lambda n: (0, 0)),        # pinned
            ],
            out_specs=pl.BlockSpec((1, H, W, C), lambda n: (n, 0, 0, 0)),
            scratch_shapes=[
                pltpu.VMEM((H + 2, _XOFF + W + 1, Cin), jnp.float32),  # in halo
                pltpu.VMEM((H + 2, _XOFF + W + 1, C), jnp.float32),    # act halo
                pltpu.VMEM((H * W, 9 * C), jnp.float32),               # im2col
            ],
        ),
        compiler_params=pltpu.CompilerParams(
            dimension_semantics=("parallel",)),
    )(x, w1, wr, b)

    return jnp.transpose(out, (0, 3, 1, 2))              # NHWC -> NCHW


def init_params(key, num_image_channels, n_features):
    """Deterministic init mirroring the PyTorch module's shapes.

    conv weights: kaiming_uniform_ (fan_in = Cin*3*3, gain=sqrt(2))
    conv biases : default Conv2d init, U(-1/sqrt(fan_in), 1/sqrt(fan_in))
    Stored layout: weights (3, 3, Cin, Cout) [HWIO], biases (Cout,).
    """
    params = []
    cin = num_image_channels
    for _ in range(4):
        key, kw, kb = jax.random.split(key, 3)
        fan_in = cin * 3 * 3
        w_bound = np.sqrt(2.0) * np.sqrt(3.0 / fan_in)
        b_bound = 1.0 / np.sqrt(fan_in)
        w = jax.random.uniform(kw, (3, 3, cin, n_features),
                               minval=-w_bound, maxval=w_bound,
                               dtype=jnp.float32)
        b = jax.random.uniform(kb, (n_features,),
                               minval=-b_bound, maxval=b_bound,
                               dtype=jnp.float32)
        params.append((w, b))
        cin = n_features
    return params


def _reference_forward(x_nchw, params):
    """Pure-JAX reference (lax conv) for correctness checking."""
    x = x_nchw
    for i, (w, b) in enumerate(params):
        y = jax.lax.conv_general_dilated(
            x, w, window_strides=(1, 1), padding="SAME",
            dimension_numbers=("NCHW", "HWIO", "NCHW"))
        y = y + b[None, :, None, None]
        x = jnp.maximum(y, 0.0) if i < 3 else y
    return x


if __name__ == "__main__":
    num_image_channels = 4
    n_features = 32
    N, H, W = 2, 16, 16

    key = jax.random.PRNGKey(0)
    key_x, key_p = jax.random.split(key)
    x = jax.random.normal(key_x, (N, num_image_channels, H, W),
                          dtype=jnp.float32)
    params = init_params(key_p, num_image_channels, n_features)

    out = forward(x, params)
    out = jax.block_until_ready(out)

    ref = jax.block_until_ready(_reference_forward(x, params))
    assert out.shape == (N, n_features, H, W)
    np.testing.assert_allclose(np.asarray(out), np.asarray(ref),
                               rtol=1e-4, atol=1e-4)

    print("KERNEL_OK")
</pallas_src>

<mosaic_0001>
module attributes {stable_mosaic.version = 11 : i64} {
  func.func @_fused_dip4_kernel(%arg0: i32, %arg1: memref<1x16x16x4xf32, #tpu.memory_space<vmem>>, %arg2: memref<36x32xf32, #tpu.memory_space<vmem>>, %arg3: memref<3x288x32xf32, #tpu.memory_space<vmem>>, %arg4: memref<4x32xf32, #tpu.memory_space<vmem>>, %arg5: memref<1x16x16x32xf32, #tpu.memory_space<vmem>>, %arg6: memref<18x25x4xf32, #tpu.memory_space<vmem>>, %arg7: memref<18x25x32xf32, #tpu.memory_space<vmem>>, %arg8: memref<256x288xf32, #tpu.memory_space<vmem>>) attributes {dimension_semantics = [#tpu.dimension_semantics<parallel>], iteration_bounds = array<i64: 2>, scalar_prefetch = 0 : i64, scratch_operands = 3 : i64, tpu.core_type = #tpu.core_type<tc>, window_params = [{transform_indices = @transform_0, window_bounds = array<i64: 1, 16, 16, 4>}, {pipeline_mode = #tpu.pipeline_mode<synchronous>, transform_indices = @transform_1, window_bounds = array<i64: 36, 32>}, {pipeline_mode = #tpu.pipeline_mode<synchronous>, transform_indices = @transform_2, window_bounds = array<i64: 3, 288, 32>}, {pipeline_mode = #tpu.pipeline_mode<synchronous>, transform_indices = @transform_3, window_bounds = array<i64: 4, 32>}, {transform_indices = @transform_4, window_bounds = array<i64: 1, 16, 16, 32>}]} {
    %cst = arith.constant 0.000000e+00 : f32
    %0 = vector.broadcast %cst : f32 to vector<1x25x4xf32>
    %cst_0 = arith.constant 0.000000e+00 : f32
    %1 = vector.broadcast %cst_0 : f32 to vector<18x1x4xf32>
    %c0 = arith.constant 0 : index
    %c0_1 = arith.constant 0 : index
    %c0_2 = arith.constant 0 : index
    %2 = vector.load %arg6[%c0, %c0_1, %c0_2] : memref<18x25x4xf32, #tpu.memory_space<vmem>>, vector<1x25x4xf32>
    tpu.vector_store %arg6[%c0, %c0_1, %c0_2], %0 {strides = array<i32>} : memref<18x25x4xf32, #tpu.memory_space<vmem>>, vector<1x25x4xf32>,
    %c17 = arith.constant 17 : index
    %c0_3 = arith.constant 0 : index
    %c0_4 = arith.constant 0 : index
    %3 = vector.load %arg6[%c17, %c0_3, %c0_4] : memref<18x25x4xf32, #tpu.memory_space<vmem>>, vector<1x25x4xf32>
    tpu.vector_store %arg6[%c17, %c0_3, %c0_4], %0 {strides = array<i32>} : memref<18x25x4xf32, #tpu.memory_space<vmem>>, vector<1x25x4xf32>,
    %c0_5 = arith.constant 0 : index
    %c7 = arith.constant 7 : index
    %c0_6 = arith.constant 0 : index
    %4 = vector.load %arg6[%c0_5, %c7, %c0_6] : memref<18x25x4xf32, #tpu.memory_space<vmem>>, vector<18x1x4xf32>
    tpu.vector_store %arg6[%c0_5, %c7, %c0_6], %1 {strides = array<i32>} : memref<18x25x4xf32, #tpu.memory_space<vmem>>, vector<18x1x4xf32>,
    %c0_7 = arith.constant 0 : index
    %c24 = arith.constant 24 : index
    %c0_8 = arith.constant 0 : index
    %5 = vector.load %arg6[%c0_7, %c24, %c0_8] : memref<18x25x4xf32, #tpu.memory_space<vmem>>, vector<18x1x4xf32>
    tpu.vector_store %arg6[%c0_7, %c24, %c0_8], %1 {strides = array<i32>} : memref<18x25x4xf32, #tpu.memory_space<vmem>>, vector<18x1x4xf32>,
    %cst_9 = arith.constant 0.000000e+00 : f32
    %6 = vector.broadcast %cst_9 : f32 to vector<1x25x32xf32>
    %cst_10 = arith.constant 0.000000e+00 : f32
    %7 = vector.broadcast %cst_10 : f32 to vector<18x1x32xf32>
    %c0_11 = arith.constant 0 : index
    %c0_12 = arith.constant 0 : index
    %c0_13 = arith.constant 0 : index
    %8 = vector.load %arg7[%c0_11, %c0_12, %c0_13] : memref<18x25x32xf32, #tpu.memory_space<vmem>>, vector<1x25x32xf32>
    tpu.vector_store %arg7[%c0_11, %c0_12, %c0_13], %6 {strides = array<i32>} : memref<18x25x32xf32, #tpu.memory_space<vmem>>, vector<1x25x32xf32>,
    %c17_14 = arith.constant 17 : index
    %c0_15 = arith.constant 0 : index
    %c0_16 = arith.constant 0 : index
    %9 = vector.load %arg7[%c17_14, %c0_15, %c0_16] : memref<18x25x32xf32, #tpu.memory_space<vmem>>, vector<1x25x32xf32>
    tpu.vector_store %arg7[%c17_14, %c0_15, %c0_16], %6 {strides = array<i32>} : memref<18x25x32xf32, #tpu.memory_space<vmem>>, vector<1x25x32xf32>,
    %c0_17 = arith.constant 0 : index
    %c7_18 = arith.constant 7 : index
    %c0_19 = arith.constant 0 : index
    %10 = vector.load %arg7[%c0_17, %c7_18, %c0_19] : memref<18x25x32xf32, #tpu.memory_space<vmem>>, vector<18x1x32xf32>
    tpu.vector_store %arg7[%c0_17, %c7_18, %c0_19], %7 {strides = array<i32>} : memref<18x25x32xf32, #tpu.memory_space<vmem>>, vector<18x1x32xf32>,
    %c0_20 = arith.constant 0 : index
    %c24_21 = arith.constant 24 : index
    %c0_22 = arith.constant 0 : index
    %11 = vector.load %arg7[%c0_20, %c24_21, %c0_22] : memref<18x25x32xf32, #tpu.memory_space<vmem>>, vector<18x1x32xf32>
    tpu.vector_store %arg7[%c0_20, %c24_21, %c0_22], %7 {strides = array<i32>} : memref<18x25x32xf32, #tpu.memory_space<vmem>>, vector<18x1x32xf32>,
    %c0_23 = arith.constant 0 : index
    %c0_24 = arith.constant 0 : index
    %c0_25 = arith.constant 0 : index
    %c0_26 = arith.constant 0 : index
    %12 = vector.load %arg1[%c0_23, %c0_24, %c0_25, %c0_26] : memref<1x16x16x4xf32, #tpu.memory_space<vmem>>, vector<1x16x16x4xf32>
    %13 = vector.shape_cast %12 : vector<1x16x16x4xf32> to vector<16x16x4xf32>
    %c1 = arith.constant 1 : index
    %c8 = arith.constant 8 : index
    %c0_27 = arith.constant 0 : index
    %14 = vector.load %arg6[%c1, %c8, %c0_27] : memref<18x25x4xf32, #tpu.memory_space<vmem>>, vector<16x16x4xf32>
    tpu.vector_store %arg6[%c1, %c8, %c0_27], %13 {strides = array<i32>} : memref<18x25x4xf32, #tpu.memory_space<vmem>>, vector<16x16x4xf32>,
    %c0_28 = arith.constant 0 : index
    %c7_29 = arith.constant 7 : index
    %c0_30 = arith.constant 0 : index
    %15 = vector.load %arg6[%c0_28, %c7_29, %c0_30] : memref<18x25x4xf32, #tpu.memory_space<vmem>>, vector<16x16x4xf32>
    %16 = vector.shape_cast %15 : vector<16x16x4xf32> to vector<256x4xf32>
    %c0_31 = arith.constant 0 : index
    %c0_32 = arith.constant 0 : index
    %17 = vector.load %arg8[%c0_31, %c0_32] : memref<256x288xf32, #tpu.memory_space<vmem>>, vector<256x4xf32>
    tpu.vector_store %arg8[%c0_31, %c0_32], %16 {strides = array<i32>} : memref<256x288xf32, #tpu.memory_space<vmem>>, vector<256x4xf32>,
    %c0_33 = arith.constant 0 : index
    %c8_34 = arith.constant 8 : index
    %c0_35 = arith.constant 0 : index
    %18 = vector.load %arg6[%c0_33, %c8_34, %c0_35] : memref<18x25x4xf32, #tpu.memory_space<vmem>>, vector<16x16x4xf32>
    %19 = vector.shape_cast %18 : vector<16x16x4xf32> to vector<256x4xf32>
    %c0_36 = arith.constant 0 : index
    %c4 = arith.constant 4 : index
    %20 = vector.load %arg8[%c0_36, %c4] : memref<256x288xf32, #tpu.memory_space<vmem>>, vector<256x4xf32>
    tpu.vector_store %arg8[%c0_36, %c4], %19 {strides = array<i32>} : memref<256x288xf32, #tpu.memory_space<vmem>>, vector<256x4xf32>,
    %c0_37 = arith.constant 0 : index
    %c9 = arith.constant 9 : index
    %c0_38 = arith.constant 0 : index
    %21 = vector.load %arg6[%c0_37, %c9, %c0_38] : memref<18x25x4xf32, #tpu.memory_space<vmem>>, vector<16x16x4xf32>
    %22 = vector.shape_cast %21 : vector<16x16x4xf32> to vector<256x4xf32>
    %c0_39 = arith.constant 0 : index
    %c8_40 = arith.constant 8 : index
    %23 = vector.load %arg8[%c0_39, %c8_40] : memref<256x288xf32, #tpu.memory_space<vmem>>, vector<256x4xf32>
    tpu.vector_store %arg8[%c0_39, %c8_40], %22 {strides = array<i32>} : memref<256x288xf32, #tpu.memory_space<vmem>>, vector<256x4xf32>,
    %c1_41 = arith.constant 1 : index
    %c7_42 = arith.constant 7 : index
    %c0_43 = arith.constant 0 : index
    %24 = vector.load %arg6[%c1_41, %c7_42, %c0_43] : memref<18x25x4xf32, #tpu.memory_space<vmem>>, vector<16x16x4xf32>
    %25 = vector.shape_cast %24 : vector<16x16x4xf32> to vector<256x4xf32>
    %c0_44 = arith.constant 0 : index
    %c12 = arith.constant 12 : index
    %26 = vector.load %arg8[%c0_44, %c12] : memref<256x288xf32, #tpu.memory_space<vmem>>, vector<256x4xf32>
    tpu.vector_store %arg8[%c0_44, %c12], %25 {strides = array<i32>} : memref<256x288xf32, #tpu.memory_space<vmem>>, vector<256x4xf32>,
    %c1_45 = arith.constant 1 : index
    %c8_46 = arith.constant 8 : index
    %c0_47 = arith.constant 0 : index
    %27 = vector.load %arg6[%c1_45, %c8_46, %c0_47] : memref<18x25x4xf32, #tpu.memory_space<vmem>>, vector<16x16x4xf32>
    %28 = vector.shape_cast %27 : vector<16x16x4xf32> to vector<256x4xf32>
    %c0_48 = arith.constant 0 : index
    %c16 = arith.constant 16 : index
    %29 = vector.load %arg8[%c0_48, %c16] : memref<256x288xf32, #tpu.memory_space<vmem>>, vector<256x4xf32>
    tpu.vector_store %arg8[%c0_48, %c16], %28 {strides = array<i32>} : memref<256x288xf32, #tpu.memory_space<vmem>>, vector<256x4xf32>,
    %c1_49 = arith.constant 1 : index
    %c9_50 = arith.constant 9 : index
    %c0_51 = arith.constant 0 : index
    %30 = vector.load %arg6[%c1_49, %c9_50, %c0_51] : memref<18x25x4xf32, #tpu.memory_space<vmem>>, vector<16x16x4xf32>
    %31 = vector.shape_cast %30 : vector<16x16x4xf32> to vector<256x4xf32>
    %c0_52 = arith.constant 0 : index
    %c20 = arith.constant 20 : index
    %32 = vector.load %arg8[%c0_52, %c20] : memref<256x288xf32, #tpu.memory_space<vmem>>, vector<256x4xf32>
    tpu.vector_store %arg8[%c0_52, %c20], %31 {strides = array<i32>} : memref<256x288xf32, #tpu.memory_space<vmem>>, vector<256x4xf32>,
    %c2 = arith.constant 2 : index
    %c7_53 = arith.constant 7 : index
    %c0_54 = arith.constant 0 : index
    %33 = vector.load %arg6[%c2, %c7_53, %c0_54] : memref<18x25x4xf32, #tpu.memory_space<vmem>>, vector<16x16x4xf32>
    %34 = vector.shape_cast %33 : vector<16x16x4xf32> to vector<256x4xf32>
    %c0_55 = arith.constant 0 : index
    %c24_56 = arith.constant 24 : index
    %35 = vector.load %arg8[%c0_55, %c24_56] : memref<256x288xf32, #tpu.memory_space<vmem>>, vector<256x4xf32>
    tpu.vector_store %arg8[%c0_55, %c24_56], %34 {strides = array<i32>} : memref<256x288xf32, #tpu.memory_space<vmem>>, vector<256x4xf32>,
    %c2_57 = arith.constant 2 : index
    %c8_58 = arith.constant 8 : index
    %c0_59 = arith.constant 0 : index
    %36 = vector.load %arg6[%c2_57, %c8_58, %c0_59] : memref<18x25x4xf32, #tpu.memory_space<vmem>>, vector<16x16x4xf32>
    %37 = vector.shape_cast %36 : vector<16x16x4xf32> to vector<256x4xf32>
    %c0_60 = arith.constant 0 : index
    %c28 = arith.constant 28 : index
    %38 = vector.load %arg8[%c0_60, %c28] : memref<256x288xf32, #tpu.memory_space<vmem>>, vector<256x4xf32>
    tpu.vector_store %arg8[%c0_60, %c28], %37 {strides = array<i32>} : memref<256x288xf32, #tpu.memory_space<vmem>>, vector<256x4xf32>,
    %c2_61 = arith.constant 2 : index
    %c9_62 = arith.constant 9 : index
    %c0_63 = arith.constant 0 : index
    %39 = vector.load %arg6[%c2_61, %c9_62, %c0_63] : memref<18x25x4xf32, #tpu.memory_space<vmem>>, vector<16x16x4xf32>
    %40 = vector.shape_cast %39 : vector<16x16x4xf32> to vector<256x4xf32>
    %c0_64 = arith.constant 0 : index
    %c32 = arith.constant 32 : index
    %41 = vector.load %arg8[%c0_64, %c32] : memref<256x288xf32, #tpu.memory_space<vmem>>, vector<256x4xf32>
    tpu.vector_store %arg8[%c0_64, %c32], %40 {strides = array<i32>} : memref<256x288xf32, #tpu.memory_space<vmem>>, vector<256x4xf32>,
    %c0_65 = arith.constant 0 : index
    %c0_66 = arith.constant 0 : index
    %42 = vector.load %arg8[%c0_65, %c0_66] : memref<256x288xf32, #tpu.memory_space<vmem>>, vector<256x36xf32>
    %c0_67 = arith.constant 0 : index
    %c0_68 = arith.constant 0 : index
    %43 = vector.load %arg2[%c0_67, %c0_68] : memref<36x32xf32, #tpu.memory_space<vmem>>, vector<36x32xf32>
    %cst_69 = arith.constant dense<0.000000e+00> : vector<256x32xf32>
    %44 = tpu.matmul %42, %43, %cst_69 {dimension_numbers = #tpu.dot_dimension_numbers<[1], [0], [0], [1], [0, 0, 1, 1], [], []>} : vector<256x36xf32>, vector<36x32xf32>, vector<256x32xf32> -> vector<256x32xf32>
    %c0_70 = arith.constant 0 : index
    %c0_71 = arith.constant 0 : index
    %45 = vector.load %arg4[%c0_70, %c0_71] : memref<4x32xf32, #tpu.memory_space<vmem>>, vector<1x32xf32>
    %46 = vector.shape_cast %45 : vector<1x32xf32> to vector<32xf32>
    %47 = vector.shape_cast %46 : vector<32xf32> to vector<1x32xf32>
    %48 = vector.broadcast %47 : vector<1x32xf32> to vector<256x32xf32>
    %49 = arith.addf %44, %48 : vector<256x32xf32>
    %cst_72 = arith.constant 0.000000e+00 : f32
    %50 = vector.broadcast %cst_72 : f32 to vector<256x32xf32>
    %51 = arith.maximumf %49, %50 : vector<256x32xf32>
    %52 = vector.shape_cast %51 : vector<256x32xf32> to vector<16x16x32xf32>
    %c1_73 = arith.constant 1 : index
    %c8_74 = arith.constant 8 : index
    %c0_75 = arith.constant 0 : index
    %53 = vector.load %arg7[%c1_73, %c8_74, %c0_75] : memref<18x25x32xf32, #tpu.memory_space<vmem>>, vector<16x16x32xf32>
    tpu.vector_store %arg7[%c1_73, %c8_74, %c0_75], %52 {strides = array<i32>} : memref<18x25x32xf32, #tpu.memory_space<vmem>>, vector<16x16x32xf32>,
    %c0_76 = arith.constant 0 : index
    %c7_77 = arith.constant 7 : index
    %c0_78 = arith.constant 0 : index
    %54 = vector.load %arg7[%c0_76, %c7_77, %c0_78] : memref<18x25x32xf32, #tpu.memory_space<vmem>>, vector<16x16x32xf32>
    %55 = vector.shape_cast %54 : vector<16x16x32xf32> to vector<256x32xf32>
    %c0_79 = arith.constant 0 : index
    %c0_80 = arith.constant 0 : index
    %56 = vector.load %arg8[%c0_79, %c0_80] : memref<256x288xf32, #tpu.memory_space<vmem>>, vector<256x32xf32>
    tpu.vector_store %arg8[%c0_79, %c0_80], %55 {strides = array<i32>} : memref<256x288xf32, #tpu.memory_space<vmem>>, vector<256x32xf32>,
    %c0_81 = arith.constant 0 : index
    %c8_82 = arith.constant 8 : index
    %c0_83 = arith.constant 0 : index
    %57 = vector.load %arg7[%c0_81, %c8_82, %c0_83] : memref<18x25x32xf32, #tpu.memory_space<vmem>>, vector<16x16x32xf32>
    %58 = vector.shape_cast %57 : vector<16x16x32xf32> to vector<256x32xf32>
    %c0_84 = arith.constant 0 : index
    %c32_85 = arith.constant 32 : index
    %59 = vector.load %arg8[%c0_84, %c32_85] : memref<256x288xf32, #tpu.memory_space<vmem>>, vector<256x32xf32>
    tpu.vector_store %arg8[%c0_84, %c32_85], %58 {strides = array<i32>} : memref<256x288xf32, #tpu.memory_space<vmem>>, vector<256x32xf32>,
    %c0_86 = arith.constant 0 : index
    %c9_87 = arith.constant 9 : index
    %c0_88 = arith.constant 0 : index
    %60 = vector.load %arg7[%c0_86, %c9_87, %c0_88] : memref<18x25x32xf32, #tpu.memory_space<vmem>>, vector<16x16x32xf32>
    %61 = vector.shape_cast %60 : vector<16x16x32xf32> to vector<256x32xf32>
    %c0_89 = arith.constant 0 : index
    %c64 = arith.constant 64 : index
    %62 = vector.load %arg8[%c0_89, %c64] : memref<256x288xf32, #tpu.memory_space<vmem>>, vector<256x32xf32>
    tpu.vector_store %arg8[%c0_89, %c64], %61 {strides = array<i32>} : memref<256x288xf32, #tpu.memory_space<vmem>>, vector<256x32xf32>,
    %c1_90 = arith.constant 1 : index
    %c7_91 = arith.constant 7 : index
    %c0_92 = arith.constant 0 : index
    %63 = vector.load %arg7[%c1_90, %c7_91, %c0_92] : memref<18x25x32xf32, #tpu.memory_space<vmem>>, vector<16x16x32xf32>
    %64 = vector.shape_cast %63 : vector<16x16x32xf32> to vector<256x32xf32>
    %c0_93 = arith.constant 0 : index
    %c96 = arith.constant 96 : index
    %65 = vector.load %arg8[%c0_93, %c96] : memref<256x288xf32, #tpu.memory_space<vmem>>, vector<256x32xf32>
    tpu.vector_store %arg8[%c0_93, %c96], %64 {strides = array<i32>} : memref<256x288xf32, #tpu.memory_space<vmem>>, vector<256x32xf32>,
    %c1_94 = arith.constant 1 : index
    %c8_95 = arith.constant 8 : index
    %c0_96 = arith.constant 0 : index
    %66 = vector.load %arg7[%c1_94, %c8_95, %c0_96] : memref<18x25x32xf32, #tpu.memory_space<vmem>>, vector<16x16x32xf32>
    %67 = vector.shape_cast %66 : vector<16x16x32xf32> to vector<256x32xf32>
    %c0_97 = arith.constant 0 : index
    %c128 = arith.constant 128 : index
    %68 = vector.load %arg8[%c0_97, %c128] : memref<256x288xf32, #tpu.memory_space<vmem>>, vector<256x32xf32>
    tpu.vector_store %arg8[%c0_97, %c128], %67 {strides = array<i32>} : memref<256x288xf32, #tpu.memory_space<vmem>>, vector<256x32xf32>,
    %c1_98 = arith.constant 1 : index
    %c9_99 = arith.constant 9 : index
    %c0_100 = arith.constant 0 : index
    %69 = vector.load %arg7[%c1_98, %c9_99, %c0_100] : memref<18x25x32xf32, #tpu.memory_space<vmem>>, vector<16x16x32xf32>
    %70 = vector.shape_cast %69 : vector<16x16x32xf32> to vector<256x32xf32>
    %c0_101 = arith.constant 0 : index
    %c160 = arith.constant 160 : index
    %71 = vector.load %arg8[%c0_101, %c160] : memref<256x288xf32, #tpu.memory_space<vmem>>, vector<256x32xf32>
    tpu.vector_store %arg8[%c0_101, %c160], %70 {strides = array<i32>} : memref<256x288xf32, #tpu.memory_space<vmem>>, vector<256x32xf32>,
    %c2_102 = arith.constant 2 : index
    %c7_103 = arith.constant 7 : index
    %c0_104 = arith.constant 0 : index
    %72 = vector.load %arg7[%c2_102, %c7_103, %c0_104] : memref<18x25x32xf32, #tpu.memory_space<vmem>>, vector<16x16x32xf32>
    %73 = vector.shape_cast %72 : vector<16x16x32xf32> to vector<256x32xf32>
    %c0_105 = arith.constant 0 : index
    %c192 = arith.constant 192 : index
    %74 = vector.load %arg8[%c0_105, %c192] : memref<256x288xf32, #tpu.memory_space<vmem>>, vector<256x32xf32>
    tpu.vector_store %arg8[%c0_105, %c192], %73 {strides = array<i32>} : memref<256x288xf32, #tpu.memory_space<vmem>>, vector<256x32xf32>,
    %c2_106 = arith.constant 2 : index
    %c8_107 = arith.constant 8 : index
    %c0_108 = arith.constant 0 : index
    %75 = vector.load %arg7[%c2_106, %c8_107, %c0_108] : memref<18x25x32xf32, #tpu.memory_space<vmem>>, vector<16x16x32xf32>
    %76 = vector.shape_cast %75 : vector<16x16x32xf32> to vector<256x32xf32>
    %c0_109 = arith.constant 0 : index
    %c224 = arith.constant 224 : index
    %77 = vector.load %arg8[%c0_109, %c224] : memref<256x288xf32, #tpu.memory_space<vmem>>, vector<256x32xf32>
    tpu.vector_store %arg8[%c0_109, %c224], %76 {strides = array<i32>} : memref<256x288xf32, #tpu.memory_space<vmem>>, vector<256x32xf32>,
    %c2_110 = arith.constant 2 : index
    %c9_111 = arith.constant 9 : index
    %c0_112 = arith.constant 0 : index
    %78 = vector.load %arg7[%c2_110, %c9_111, %c0_112] : memref<18x25x32xf32, #tpu.memory_space<vmem>>, vector<16x16x32xf32>
    %79 = vector.shape_cast %78 : vector<16x16x32xf32> to vector<256x32xf32>
    %c0_113 = arith.constant 0 : index
    %c256 = arith.constant 256 : index
    %80 = vector.load %arg8[%c0_113, %c256] : memref<256x288xf32, #tpu.memory_space<vmem>>, vector<256x32xf32>
    tpu.vector_store %arg8[%c0_113, %c256], %79 {strides = array<i32>} : memref<256x288xf32, #tpu.memory_space<vmem>>, vector<256x32xf32>,
    %c0_114 = arith.constant 0 : index
    %c0_115 = arith.constant 0 : index
    %81 = vector.load %arg8[%c0_114, %c0_115] : memref<256x288xf32, #tpu.memory_space<vmem>>, vector<256x288xf32>
    %c0_116 = arith.constant 0 : index
    %c0_117 = arith.constant 0 : index
    %c0_118 = arith.constant 0 : index
    %82 = vector.load %arg3[%c0_116, %c0_117, %c0_118] : memref<3x288x32xf32, #tpu.memory_space<vmem>>, vector<1x288x32xf32>
    %83 = vector.shape_cast %82 : vector<1x288x32xf32> to vector<288x32xf32>
    %cst_119 = arith.constant dense<0.000000e+00> : vector<256x32xf32>
    %84 = tpu.matmul %81, %83, %cst_119 {dimension_numbers = #tpu.dot_dimension_numbers<[1], [0], [0], [1], [0, 0, 1, 1], [], []>} : vector<256x288xf32>, vector<288x32xf32>, vector<256x32xf32> -> vector<256x32xf32>
    %c1_120 = arith.constant 1 : index
    %c0_121 = arith.constant 0 : index
    %85 = vector.load %arg4[%c1_120, %c0_121] : memref<4x32xf32, #tpu.memory_space<vmem>>, vector<1x32xf32>
    %86 = vector.shape_cast %85 : vector<1x32xf32> to vector<32xf32>
    %87 = vector.shape_cast %86 : vector<32xf32> to vector<1x32xf32>
    %88 = vector.broadcast %87 : vector<1x32xf32> to vector<256x32xf32>
    %89 = arith.addf %84, %88 : vector<256x32xf32>
    %cst_122 = arith.constant 0.000000e+00 : f32
    %90 = vector.broadcast %cst_122 : f32 to vector<256x32xf32>
    %91 = arith.maximumf %89, %90 : vector<256x32xf32>
    %92 = vector.shape_cast %91 : vector<256x32xf32> to vector<16x16x32xf32>
    %c1_123 = arith.constant 1 : index
    %c8_124 = arith.constant 8 : index
    %c0_125 = arith.constant 0 : index
    %93 = vector.load %arg7[%c1_123, %c8_124, %c0_125] : memref<18x25x32xf32, #tpu.memory_space<vmem>>, vector<16x16x32xf32>
    tpu.vector_store %arg7[%c1_123, %c8_124, %c0_125], %92 {strides = array<i32>} : memref<18x25x32xf32, #tpu.memory_space<vmem>>, vector<16x16x32xf32>,
    %c0_126 = arith.constant 0 : index
    %c7_127 = arith.constant 7 : index
    %c0_128 = arith.constant 0 : index
    %94 = vector.load %arg7[%c0_126, %c7_127, %c0_128] : memref<18x25x32xf32, #tpu.memory_space<vmem>>, vector<16x16x32xf32>
    %95 = vector.shape_cast %94 : vector<16x16x32xf32> to vector<256x32xf32>
    %c0_129 = arith.constant 0 : index
    %c0_130 = arith.constant 0 : index
    %96 = vector.load %arg8[%c0_129, %c0_130] : memref<256x288xf32, #tpu.memory_space<vmem>>, vector<256x32xf32>
    tpu.vector_store %arg8[%c0_129, %c0_130], %95 {strides = array<i32>} : memref<256x288xf32, #tpu.memory_space<vmem>>, vector<256x32xf32>,
    %c0_131 = arith.constant 0 : index
    %c8_132 = arith.constant 8 : index
    %c0_133 = arith.constant 0 : index
    %97 = vector.load %arg7[%c0_131, %c8_132, %c0_133] : memref<18x25x32xf32, #tpu.memory_space<vmem>>, vector<16x16x32xf32>
    %98 = vector.shape_cast %97 : vector<16x16x32xf32> to vector<256x32xf32>
    %c0_134 = arith.constant 0 : index
    %c32_135 = arith.constant 32 : index
    %99 = vector.load %arg8[%c0_134, %c32_135] : memref<256x288xf32, #tpu.memory_space<vmem>>, vector<256x32xf32>
    tpu.vector_store %arg8[%c0_134, %c32_135], %98 {strides = array<i32>} : memref<256x288xf32, #tpu.memory_space<vmem>>, vector<256x32xf32>,
    %c0_136 = arith.constant 0 : index
    %c9_137 = arith.constant 9 : index
    %c0_138 = arith.constant 0 : index
    %100 = vector.load %arg7[%c0_136, %c9_137, %c0_138] : memref<18x25x32xf32, #tpu.memory_space<vmem>>, vector<16x16x32xf32>
    %101 = vector.shape_cast %100 : vector<16x16x32xf32> to vector<256x32xf32>
    %c0_139 = arith.constant 0 : index
    %c64_140 = arith.constant 64 : index
    %102 = vector.load %arg8[%c0_139, %c64_140] : memref<256x288xf32, #tpu.memory_space<vmem>>, vector<256x32xf32>
    tpu.vector_store %arg8[%c0_139, %c64_140], %101 {strides = array<i32>} : memref<256x288xf32, #tpu.memory_space<vmem>>, vector<256x32xf32>,
    %c1_141 = arith.constant 1 : index
    %c7_142 = arith.constant 7 : index
    %c0_143 = arith.constant 0 : index
    %103 = vector.load %arg7[%c1_141, %c7_142, %c0_143] : memref<18x25x32xf32, #tpu.memory_space<vmem>>, vector<16x16x32xf32>
    %104 = vector.shape_cast %103 : vector<16x16x32xf32> to vector<256x32xf32>
    %c0_144 = arith.constant 0 : index
    %c96_145 = arith.constant 96 : index
    %105 = vector.load %arg8[%c0_144, %c96_145] : memref<256x288xf32, #tpu.memory_space<vmem>>, vector<256x32xf32>
    tpu.vector_store %arg8[%c0_144, %c96_145], %104 {strides = array<i32>} : memref<256x288xf32, #tpu.memory_space<vmem>>, vector<256x32xf32>,
    %c1_146 = arith.constant 1 : index
    %c8_147 = arith.constant 8 : index
    %c0_148 = arith.constant 0 : index
    %106 = vector.load %arg7[%c1_146, %c8_147, %c0_148] : memref<18x25x32xf32, #tpu.memory_space<vmem>>, vector<16x16x32xf32>
    %107 = vector.shape_cast %106 : vector<16x16x32xf32> to vector<256x32xf32>
    %c0_149 = arith.constant 0 : index
    %c128_150 = arith.constant 128 : index
    %108 = vector.load %arg8[%c0_149, %c128_150] : memref<256x288xf32, #tpu.memory_space<vmem>>, vector<256x32xf32>
    tpu.vector_store %arg8[%c0_149, %c128_150], %107 {strides = array<i32>} : memref<256x288xf32, #tpu.memory_space<vmem>>, vector<256x32xf32>,
    %c1_151 = arith.constant 1 : index
    %c9_152 = arith.constant 9 : index
    %c0_153 = arith.constant 0 : index
    %109 = vector.load %arg7[%c1_151, %c9_152, %c0_153] : memref<18x25x32xf32, #tpu.memory_space<vmem>>, vector<16x16x32xf32>
    %110 = vector.shape_cast %109 : vector<16x16x32xf32> to vector<256x32xf32>
    %c0_154 = arith.constant 0 : index
    %c160_155 = arith.constant 160 : index
    %111 = vector.load %arg8[%c0_154, %c160_155] : memref<256x288xf32, #tpu.memory_space<vmem>>, vector<256x32xf32>
    tpu.vector_store %arg8[%c0_154, %c160_155], %110 {strides = array<i32>} : memref<256x288xf32, #tpu.memory_space<vmem>>, vector<256x32xf32>,
    %c2_156 = arith.constant 2 : index
    %c7_157 = arith.constant 7 : index
    %c0_158 = arith.constant 0 : index
    %112 = vector.load %arg7[%c2_156, %c7_157, %c0_158] : memref<18x25x32xf32, #tpu.memory_space<vmem>>, vector<16x16x32xf32>
    %113 = vector.shape_cast %112 : vector<16x16x32xf32> to vector<256x32xf32>
    %c0_159 = arith.constant 0 : index
    %c192_160 = arith.constant 192 : index
    %114 = vector.load %arg8[%c0_159, %c192_160] : memref<256x288xf32, #tpu.memory_space<vmem>>, vector<256x32xf32>
    tpu.vector_store %arg8[%c0_159, %c192_160], %113 {strides = array<i32>} : memref<256x288xf32, #tpu.memory_space<vmem>>, vector<256x32xf32>,
    %c2_161 = arith.constant 2 : index
    %c8_162 = arith.constant 8 : index
    %c0_163 = arith.constant 0 : index
    %115 = vector.load %arg7[%c2_161, %c8_162, %c0_163] : memref<18x25x32xf32, #tpu.memory_space<vmem>>, vector<16x16x32xf32>
    %116 = vector.shape_cast %115 : vector<16x16x32xf32> to vector<256x32xf32>
    %c0_164 = arith.constant 0 : index
    %c224_165 = arith.constant 224 : index
    %117 = vector.load %arg8[%c0_164, %c224_165] : memref<256x288xf32, #tpu.memory_space<vmem>>, vector<256x32xf32>
    tpu.vector_store %arg8[%c0_164, %c224_165], %116 {strides = array<i32>} : memref<256x288xf32, #tpu.memory_space<vmem>>, vector<256x32xf32>,
    %c2_166 = arith.constant 2 : index
    %c9_167 = arith.constant 9 : index
    %c0_168 = arith.constant 0 : index
    %118 = vector.load %arg7[%c2_166, %c9_167, %c0_168] : memref<18x25x32xf32, #tpu.memory_space<vmem>>, vector<16x16x32xf32>
    %119 = vector.shape_cast %118 : vector<16x16x32xf32> to vector<256x32xf32>
    %c0_169 = arith.constant 0 : index
    %c256_170 = arith.constant 256 : index
    %120 = vector.load %arg8[%c0_169, %c256_170] : memref<256x288xf32, #tpu.memory_space<vmem>>, vector<256x32xf32>
    tpu.vector_store %arg8[%c0_169, %c256_170], %119 {strides = array<i32>} : memref<256x288xf32, #tpu.memory_space<vmem>>, vector<256x32xf32>,
    %c0_171 = arith.constant 0 : index
    %c0_172 = arith.constant 0 : index
    %121 = vector.load %arg8[%c0_171, %c0_172] : memref<256x288xf32, #tpu.memory_space<vmem>>, vector<256x288xf32>
    %c1_173 = arith.constant 1 : index
    %c0_174 = arith.constant 0 : index
    %c0_175 = arith.constant 0 : index
    %122 = vector.load %arg3[%c1_173, %c0_174, %c0_175] : memref<3x288x32xf32, #tpu.memory_space<vmem>>, vector<1x288x32xf32>
    %123 = vector.shape_cast %122 : vector<1x288x32xf32> to vector<288x32xf32>
    %cst_176 = arith.constant dense<0.000000e+00> : vector<256x32xf32>
    %124 = tpu.matmul %121, %123, %cst_176 {dimension_numbers = #tpu.dot_dimension_numbers<[1], [0], [0], [1], [0, 0, 1, 1], [], []>} : vector<256x288xf32>, vector<288x32xf32>, vector<256x32xf32> -> vector<256x32xf32>
    %c2_177 = arith.constant 2 : index
    %c0_178 = arith.constant 0 : index
    %125 = vector.load %arg4[%c2_177, %c0_178] : memref<4x32xf32, #tpu.memory_space<vmem>>, vector<1x32xf32>
    %126 = vector.shape_cast %125 : vector<1x32xf32> to vector<32xf32>
    %127 = vector.shape_cast %126 : vector<32xf32> to vector<1x32xf32>
    %128 = vector.broadcast %127 : vector<1x32xf32> to vector<256x32xf32>
    %129 = arith.addf %124, %128 : vector<256x32xf32>
    %cst_179 = arith.constant 0.000000e+00 : f32
    %130 = vector.broadcast %cst_179 : f32 to vector<256x32xf32>
    %131 = arith.maximumf %129, %130 : vector<256x32xf32>
    %132 = vector.shape_cast %131 : vector<256x32xf32> to vector<16x16x32xf32>
    %c1_180 = arith.constant 1 : index
    %c8_181 = arith.constant 8 : index
    %c0_182 = arith.constant 0 : index
    %133 = vector.load %arg7[%c1_180, %c8_181, %c0_182] : memref<18x25x32xf32, #tpu.memory_space<vmem>>, vector<16x16x32xf32>
    tpu.vector_store %arg7[%c1_180, %c8_181, %c0_182], %132 {strides = array<i32>} : memref<18x25x32xf32, #tpu.memory_space<vmem>>, vector<16x16x32xf32>,
    %c0_183 = arith.constant 0 : index
    %c7_184 = arith.constant 7 : index
    %c0_185 = arith.constant 0 : index
    %134 = vector.load %arg7[%c0_183, %c7_184, %c0_185] : memref<18x25x32xf32, #tpu.memory_space<vmem>>, vector<16x16x32xf32>
    %135 = vector.shape_cast %134 : vector<16x16x32xf32> to vector<256x32xf32>
    %c0_186 = arith.constant 0 : index
    %c0_187 = arith.constant 0 : index
    %136 = vector.load %arg8[%c0_186, %c0_187] : memref<256x288xf32, #tpu.memory_space<vmem>>, vector<256x32xf32>
    tpu.vector_store %arg8[%c0_186, %c0_187], %135 {strides = array<i32>} : memref<256x288xf32, #tpu.memory_space<vmem>>, vector<256x32xf32>,
    %c0_188 = arith.constant 0 : index
    %c8_189 = arith.constant 8 : index
    %c0_190 = arith.constant 0 : index
    %137 = vector.load %arg7[%c0_188, %c8_189, %c0_190] : memref<18x25x32xf32, #tpu.memory_space<vmem>>, vector<16x16x32xf32>
    %138 = vector.shape_cast %137 : vector<16x16x32xf32> to vector<256x32xf32>
    %c0_191 = arith.constant 0 : index
    %c32_192 = arith.constant 32 : index
    %139 = vector.load %arg8[%c0_191, %c32_192] : memref<256x288xf32, #tpu.memory_space<vmem>>, vector<256x32xf32>
    tpu.vector_store %arg8[%c0_191, %c32_192], %138 {strides = array<i32>} : memref<256x288xf32, #tpu.memory_space<vmem>>, vector<256x32xf32>,
    %c0_193 = arith.constant 0 : index
    %c9_194 = arith.constant 9 : index
    %c0_195 = arith.constant 0 : index
    %140 = vector.load %arg7[%c0_193, %c9_194, %c0_195] : memref<18x25x32xf32, #tpu.memory_space<vmem>>, vector<16x16x32xf32>
    %141 = vector.shape_cast %140 : vector<16x16x32xf32> to vector<256x32xf32>
    %c0_196 = arith.constant 0 : index
    %c64_197 = arith.constant 64 : index
    %142 = vector.load %arg8[%c0_196, %c64_197] : memref<256x288xf32, #tpu.memory_space<vmem>>, vector<256x32xf32>
    tpu.vector_store %arg8[%c0_196, %c64_197], %141 {strides = array<i32>} : memref<256x288xf32, #tpu.memory_space<vmem>>, vector<256x32xf32>,
    %c1_198 = arith.constant 1 : index
    %c7_199 = arith.constant 7 : index
    %c0_200 = arith.constant 0 : index
    %143 = vector.load %arg7[%c1_198, %c7_199, %c0_200] : memref<18x25x32xf32, #tpu.memory_space<vmem>>, vector<16x16x32xf32>
    %144 = vector.shape_cast %143 : vector<16x16x32xf32> to vector<256x32xf32>
    %c0_201 = arith.constant 0 : index
    %c96_202 = arith.constant 96 : index
    %145 = vector.load %arg8[%c0_201, %c96_202] : memref<256x288xf32, #tpu.memory_space<vmem>>, vector<256x32xf32>
    tpu.vector_store %arg8[%c0_201, %c96_202], %144 {strides = array<i32>} : memref<256x288xf32, #tpu.memory_space<vmem>>, vector<256x32xf32>,
    %c1_203 = arith.constant 1 : index
    %c8_204 = arith.constant 8 : index
    %c0_205 = arith.constant 0 : index
    %146 = vector.load %arg7[%c1_203, %c8_204, %c0_205] : memref<18x25x32xf32, #tpu.memory_space<vmem>>, vector<16x16x32xf32>
    %147 = vector.shape_cast %146 : vector<16x16x32xf32> to vector<256x32xf32>
    %c0_206 = arith.constant 0 : index
    %c128_207 = arith.constant 128 : index
    %148 = vector.load %arg8[%c0_206, %c128_207] : memref<256x288xf32, #tpu.memory_space<vmem>>, vector<256x32xf32>
    tpu.vector_store %arg8[%c0_206, %c128_207], %147 {strides = array<i32>} : memref<256x288xf32, #tpu.memory_space<vmem>>, vector<256x32xf32>,
    %c1_208 = arith.constant 1 : index
    %c9_209 = arith.constant 9 : index
    %c0_210 = arith.constant 0 : index
    %149 = vector.load %arg7[%c1_208, %c9_209, %c0_210] : memref<18x25x32xf32, #tpu.memory_space<vmem>>, vector<16x16x32xf32>
    %150 = vector.shape_cast %149 : vector<16x16x32xf32> to vector<256x32xf32>
    %c0_211 = arith.constant 0 : index
    %c160_212 = arith.constant 160 : index
    %151 = vector.load %arg8[%c0_211, %c160_212] : memref<256x288xf32, #tpu.memory_space<vmem>>, vector<256x32xf32>
    tpu.vector_store %arg8[%c0_211, %c160_212], %150 {strides = array<i32>} : memref<256x288xf32, #tpu.memory_space<vmem>>, vector<256x32xf32>,
    %c2_213 = arith.constant 2 : index
    %c7_214 = arith.constant 7 : index
    %c0_215 = arith.constant 0 : index
    %152 = vector.load %arg7[%c2_213, %c7_214, %c0_215] : memref<18x25x32xf32, #tpu.memory_space<vmem>>, vector<16x16x32xf32>
    %153 = vector.shape_cast %152 : vector<16x16x32xf32> to vector<256x32xf32>
    %c0_216 = arith.constant 0 : index
    %c192_217 = arith.constant 192 : index
    %154 = vector.load %arg8[%c0_216, %c192_217] : memref<256x288xf32, #tpu.memory_space<vmem>>, vector<256x32xf32>
    tpu.vector_store %arg8[%c0_216, %c192_217], %153 {strides = array<i32>} : memref<256x288xf32, #tpu.memory_space<vmem>>, vector<256x32xf32>,
    %c2_218 = arith.constant 2 : index
    %c8_219 = arith.constant 8 : index
    %c0_220 = arith.constant 0 : index
    %155 = vector.load %arg7[%c2_218, %c8_219, %c0_220] : memref<18x25x32xf32, #tpu.memory_space<vmem>>, vector<16x16x32xf32>
    %156 = vector.shape_cast %155 : vector<16x16x32xf32> to vector<256x32xf32>
    %c0_221 = arith.constant 0 : index
    %c224_222 = arith.constant 224 : index
    %157 = vector.load %arg8[%c0_221, %c224_222] : memref<256x288xf32, #tpu.memory_space<vmem>>, vector<256x32xf32>
    tpu.vector_store %arg8[%c0_221, %c224_222], %156 {strides = array<i32>} : memref<256x288xf32, #tpu.memory_space<vmem>>, vector<256x32xf32>,
    %c2_223 = arith.constant 2 : index
    %c9_224 = arith.constant 9 : index
    %c0_225 = arith.constant 0 : index
    %158 = vector.load %arg7[%c2_223, %c9_224, %c0_225] : memref<18x25x32xf32, #tpu.memory_space<vmem>>, vector<16x16x32xf32>
    %159 = vector.shape_cast %158 : vector<16x16x32xf32> to vector<256x32xf32>
    %c0_226 = arith.constant 0 : index
    %c256_227 = arith.constant 256 : index
    %160 = vector.load %arg8[%c0_226, %c256_227] : memref<256x288xf32, #tpu.memory_space<vmem>>, vector<256x32xf32>
    tpu.vector_store %arg8[%c0_226, %c256_227], %159 {strides = array<i32>} : memref<256x288xf32, #tpu.memory_space<vmem>>, vector<256x32xf32>,
    %c0_228 = arith.constant 0 : index
    %c0_229 = arith.constant 0 : index
    %161 = vector.load %arg8[%c0_228, %c0_229] : memref<256x288xf32, #tpu.memory_space<vmem>>, vector<256x288xf32>
    %c2_230 = arith.constant 2 : index
    %c0_231 = arith.constant 0 : index
    %c0_232 = arith.constant 0 : index
    %162 = vector.load %arg3[%c2_230, %c0_231, %c0_232] : memref<3x288x32xf32, #tpu.memory_space<vmem>>, vector<1x288x32xf32>
    %163 = vector.shape_cast %162 : vector<1x288x32xf32> to vector<288x32xf32>
    %cst_233 = arith.constant dense<0.000000e+00> : vector<256x32xf32>
    %164 = tpu.matmul %161, %163, %cst_233 {dimension_numbers = #tpu.dot_dimension_numbers<[1], [0], [0], [1], [0, 0, 1, 1], [], []>} : vector<256x288xf32>, vector<288x32xf32>, vector<256x32xf32> -> vector<256x32xf32>
    %c3 = arith.constant 3 : index
    %c0_234 = arith.constant 0 : index
    %165 = vector.load %arg4[%c3, %c0_234] : memref<4x32xf32, #tpu.memory_space<vmem>>, vector<1x32xf32>
    %166 = vector.shape_cast %165 : vector<1x32xf32> to vector<32xf32>
    %167 = vector.shape_cast %166 : vector<32xf32> to vector<1x32xf32>
    %168 = vector.broadcast %167 : vector<1x32xf32> to vector<256x32xf32>
    %169 = arith.addf %164, %168 : vector<256x32xf32>
    %170 = vector.shape_cast %169 : vector<256x32xf32> to vector<16x16x32xf32>
    %c0_235 = arith.constant 0 : index
    %c0_236 = arith.constant 0 : index
    %c0_237 = arith.constant 0 : index
    %c0_238 = arith.constant 0 : index
    %171 = vector.load %arg5[%c0_235, %c0_236, %c0_237, %c0_238] : memref<1x16x16x32xf32, #tpu.memory_space<vmem>>, vector<1x16x16x32xf32>
    %172 = vector.shape_cast %171 : vector<1x16x16x32xf32> to vector<16x16x32xf32>
    %173 = vector.shape_cast %170 : vector<16x16x32xf32> to vector<1x16x16x32xf32>
    tpu.vector_store %arg5[%c0_235, %c0_236, %c0_237, %c0_238], %173 {strides = array<i32>} : memref<1x16x16x32xf32, #tpu.memory_space<vmem>>, vector<1x16x16x32xf32>,
    return
  }
  func.func @transform_0(%arg0: i32) -> (i32, i32, i32, i32) {
    %c0_i32 = arith.constant 0 : i32
    %c0_i32_0 = arith.constant 0 : i32
    %c0_i32_1 = arith.constant 0 : i32
    %c0_i32_2 = arith.constant 0 : i32
    return %arg0, %c0_i32, %c0_i32_0, %c0_i32_1 : i32, i32, i32, i32
  }
  func.func @transform_1(%arg0: i32) -> (i32, i32) {
    %c0_i32 = arith.constant 0 : i32
    %c0_i32_0 = arith.constant 0 : i32
    %c0_i32_1 = arith.constant 0 : i32
    return %c0_i32, %c0_i32_0 : i32, i32
  }
  func.func @transform_2(%arg0: i32) -> (i32, i32, i32) {
    %c0_i32 = arith.constant 0 : i32
    %c0_i32_0 = arith.constant 0 : i32
    %c0_i32_1 = arith.constant 0 : i32
    %c0_i32_2 = arith.constant 0 : i32
    return %c0_i32, %c0_i32_0, %c0_i32_1 : i32, i32, i32
  }
  func.func @transform_3(%arg0: i32) -> (i32, i32) {
    %c0_i32 = arith.constant 0 : i32
    %c0_i32_0 = arith.constant 0 : i32
    %c0_i32_1 = arith.constant 0 : i32
    return %c0_i32, %c0_i32_0 : i32, i32
  }
  func.func @transform_4(%arg0: i32) -> (i32, i32, i32, i32) {
    %c0_i32 = arith.constant 0 : i32
    %c0_i32_0 = arith.constant 0 : i32
    %c0_i32_1 = arith.constant 0 : i32
    %c0_i32_2 = arith.constant 0 : i32
    return %arg0, %c0_i32, %c0_i32_0, %c0_i32_1 : i32, i32, i32, i32
  }
}

</mosaic_0001>

<bundles_post_ra>
// kernel: forward.1
= control target key start
LH: loop header
LB: loop body
LE: loop exit
PB: predicated region body
PF: predicated region fallthrough
CT: control target
= control target key end

     0   :  { %9 = vsyncpa [#allocation6], 0  ;;  %s14314_s0 = inlined_call_operand.vmem [shape: f32[2,16,16,4], index: 0, kind: input, shape index: {}]   ;;  %s14315_s1 = inlined_call_operand.vmem [shape: f32[36,32], index: 1, kind: input, shape index: {}]   ;;  %s14316_s2 = inlined_call_operand.vmem [shape: f32[3,288,32], index: 2, kind: input, shape index: {}]   ;;  %s14317_s3 = inlined_call_operand.vmem [shape: f32[4,32], index: 3, kind: input, shape index: {}]   ;;  %s14318_s4 = inlined_call_operand.hbm [shape: f32[2,16,16,32], index: 4, kind: output, shape index: {}]  }
   0x1   :  { %11 = vsyncpa [#allocation6 + $0x1], 0  ;;  %s9549_s15 = smov 0   ;;  %s9551_s16 = smov 0  }
   0x2   :  { %s9553_s17 = smov 0   ;;  %s9555_s18 = smov 0  }
   0x3 LB: > { %s9570_s19 = sadd.s32 4294967295, %s9509_s18   ;;  %s8720_s20 = sadd.s32 4294967294, %s9509_s18   ;;  %s9509_s18 = sphi %s9555_s18, %s14477_s18   ;;  %s9505_s17 = sphi %s9553_s17, %s14476_s17   ;;  %s9501_s16 = sphi %s9551_s16, %s14475_s16   ;;  %s9497_s15 = sphi %s9549_s15, %s14474_s15  }
   0x4   : > { %s9574_s21 = sadd.s32 1, %s9509_s18   ;;  %s113_s22 = sadd.s32 1, %s9505_s17 }
   0x5   : > { %s110_s23 = ssub.s32 %s9509_s18, %s9574_s21  ;;  %p123_p0 = scmp.ne.s32.totalorder %s9505_s17, %s9501_s16 }
   0x6   : > { %p111_p1 = scmp.eq.s32.totalorder %s110_s23, 0  ;;  %p124_p2 = scmp.eq.s32.totalorder %s9570_s19, 1 }
   0x7   : > { %p129_p3 = scmp.ne.s32.totalorder %s9501_s16, %s9497_s15  ;;  %p130_p4 = scmp.eq.s32.totalorder %s8720_s20, 1 }
   0x8   : > { %s9585_s24 = scalar_select %p111_p1, %s9505_s17, %s113_s22  }
   0x9   : > { %p9587_p5 = por %p124_p2, %p123_p0  ;;  %p9591_p6 = por %p130_p4, %p129_p3 }
   0xa   : > { %p8723_p7 = scmp.ge.s32.totalorder %s9509_s18, 1  ;;  %p165_p8 = scmp.lt.s32.totalorder %s9509_s18, 3 }
   0xc   : > { %p166_p9 = pnand %p8723_p7, %p165_p8 }
   0xe   : > { %169 = sbr.rel (%p166_p9) target bundleno = 2619 (0xa3b), region = 36 }
  0x13   : > { %vm196_vm0 = vcmask 31744   ;;  %p191_p10 = scmp.lt.s32.totalorder %s9570_s19, 1  ;;  %vm200_vm1 = vcmask 24576   ;;  %v14319_v0 = vmov 0.0   ;;  %s9512_s6 = smov 4   ;;  %vm579_vm2 = vcmask 64544  }
  0x14   : > { %198 = vst.msk [vmem:[#allocation2 + $0x8] sm:$0xff] %vm196_vm0, %v14319_v0  ;;  %197 = vst.msk [vmem:[#allocation2] sm:$0xff] %vm196_vm0, %v14319_v0  ;;  %9310 = vmatprep.subr.mxu1 %v14319_v0  ;;  %s9513_s7 = smov 8   ;;  %s9514_s8 = smov 12   ;;  %vm772_vm3 = vcmask 97344   ;;  %vm965_vm4 = vcmask 130144  }
  0x15   : > { %199 = vst.msk [vmem:[#allocation2 + $0x10] sm:$0xff] %vm196_vm0, %v14319_v0  ;;  %203 = vst.msk [vmem:[#allocation2 + $0x220] sm:$0xff] %vm196_vm0, %v14319_v0  ;;  %s192_s27 = scalar_select %p191_p10, %s9570_s19, 1  ;;  %vm1158_vm5 = vcmask 162944   ;;  %vm1351_vm6 = vcmask 195744   ;;  %vm2103_vm7 = vcmask 1043456  }
  0x16   : > { %204 = vst.msk [vmem:[#allocation2 + $0x228] sm:$0xff] %vm196_vm0, %v14319_v0  ;;  %205 = vst.msk [vmem:[#allocation2 + $0x230] sm:$0xff] %vm196_vm0, %v14319_v0  ;;  %s9515_s9 = smov 16   ;;  %s9516_s10 = smov 20   ;;  %vm1545_vm8 = vcmask 228544   ;;  %vm1738_vm9 = vcmask 261344  }
  0x17   : > { %201 = vst.msk [vmem:[#allocation2 + $0x18] sm:$0x1] %vm200_vm1, %v14319_v0  ;;  %206 = vst.msk [vmem:[#allocation2 + $0x238] sm:$0x1] %vm200_vm1, %v14319_v0  ;;  %s8937_s28 = sshll.u32 %s192_s27, 8  ;;  %s9517_s11 = smov 24  }
  0x18   : > { %208 = vst.msk [vmem:[#allocation2 + $0x27] sm:$0x1] %vm200_vm1, %v14319_v0  ;;  %209 = vst.msk [vmem:[#allocation2 + $0x47] sm:$0x1] %vm200_vm1, %v14319_v0  ;;  %s9693_s5 = scalar_lea.vmem %s14314_s0, %s8937_s28  ;;  %s9518_s12 = smov 28   ;;  %vm243_vm10 = vcmask 261120  }
  0x19   : > { %210 = vst.msk [vmem:[#allocation2 + $0x67] sm:$0x1] %vm200_vm1, %v14319_v0  ;;  %211 = vst.msk [vmem:[#allocation2 + $0x87] sm:$0x1] %vm200_vm1, %v14319_v0  ;;  %v290_v1 = vld [vmem:[%s9693_s5] sm:$0xff]  ;;  %v291_v2 = vld [vmem:[%s9693_s5 + $0x8] sm:$0xff] }
  0x1a   : > { %212 = vst.msk [vmem:[#allocation2 + $0xa7] sm:$0x1] %vm200_vm1, %v14319_v0  ;;  %213 = vst.msk [vmem:[#allocation2 + $0xc7] sm:$0x1] %vm200_vm1, %v14319_v0  ;;  %v292_v3 = vld [vmem:[%s9693_s5 + $0x10] sm:$0xff]  ;;  %v293_v4 = vld [vmem:[%s9693_s5 + $0x18] sm:$0xff] }
  0x1b   : > { %214 = vst.msk [vmem:[#allocation2 + $0xe7] sm:$0x1] %vm200_vm1, %v14319_v0  ;;  %215 = vst.msk [vmem:[#allocation2 + $0x107] sm:$0x1] %vm200_vm1, %v14319_v0  ;;  %v294_v5 = vld [vmem:[%s9693_s5 + $0x20] sm:$0xff]  ;;  %v295_v6 = vld [vmem:[%s9693_s5 + $0x28] sm:$0xff] }
  0x1c   : > { %216 = vst.msk [vmem:[#allocation2 + $0x127] sm:$0x1] %vm200_vm1, %v14319_v0  ;;  %217 = vst.msk [vmem:[#allocation2 + $0x147] sm:$0x1] %vm200_vm1, %v14319_v0  ;;  %v419_v7 = vld [vmem:[#allocation2 + $0x8] sm:$0xff]  ;;  %v420_v8 = vld [vmem:[#allocation2 + $0x10] sm:$0xff] }
  0x1d   : > { %218 = vst.msk [vmem:[#allocation2 + $0x167] sm:$0x1] %vm200_vm1, %v14319_v0  ;;  %219 = vst.msk [vmem:[#allocation2 + $0x187] sm:$0x1] %vm200_vm1, %v14319_v0  ;;  %v296_v9 = vld [vmem:[%s9693_s5 + $0x30] sm:$0xff]  ;;  %483 = vrot.lane.b32.xlu0 %v419_v7, %s9512_s6  ;;  %v297_v10 = vld [vmem:[%s9693_s5 + $0x38] sm:$0xff] }
  0x1e   : > { %220 = vst.msk [vmem:[#allocation2 + $0x1a7] sm:$0x1] %vm200_vm1, %v14319_v0  ;;  %221 = vst.msk [vmem:[#allocation2 + $0x1c7] sm:$0x1] %vm200_vm1, %v14319_v0  ;;  %v298_v11 = vld [vmem:[%s9693_s5 + $0x40] sm:$0xff]  ;;  %v299_v12 = vld [vmem:[%s9693_s5 + $0x48] sm:$0xff] }
  0x1f   : > { %222 = vst.msk [vmem:[#allocation2 + $0x1e7] sm:$0x1] %vm200_vm1, %v14319_v0  ;;  %223 = vst.msk [vmem:[#allocation2 + $0x207] sm:$0x1] %vm200_vm1, %v14319_v0  ;;  %v300_v13 = vld [vmem:[%s9693_s5 + $0x50] sm:$0xff]  ;;  %v301_v14 = vld [vmem:[%s9693_s5 + $0x58] sm:$0xff] }
  0x20   : > { %226 = vst.msk [vmem:[#allocation2 + $0x38] sm:$0x1] %vm200_vm1, %v14319_v0  ;;  %227 = vst.msk [vmem:[#allocation2 + $0x58] sm:$0x1] %vm200_vm1, %v14319_v0  ;;  %v302_v15 = vld [vmem:[%s9693_s5 + $0x60] sm:$0xff]  ;;  %v303_v16 = vld [vmem:[%s9693_s5 + $0x68] sm:$0xff] }
  0x21   : > { %228 = vst.msk [vmem:[#allocation2 + $0x78] sm:$0x1] %vm200_vm1, %v14319_v0  ;;  %229 = vst.msk [vmem:[#allocation2 + $0x98] sm:$0x1] %vm200_vm1, %v14319_v0  ;;  %v304_v17 = vld [vmem:[%s9693_s5 + $0x70] sm:$0xff]  ;;  %v305_v18 = vld [vmem:[%s9693_s5 + $0x78] sm:$0xff]  ;;  %485 = vrot.lane.b32.xlu0 %v420_v8, %s9512_s6 }
  0x22   : > { %230 = vst.msk [vmem:[#allocation2 + $0xb8] sm:$0x1] %vm200_vm1, %v14319_v0  ;;  %231 = vst.msk [vmem:[#allocation2 + $0xd8] sm:$0x1] %vm200_vm1, %v14319_v0  ;;  %v306_v19 = vld [vmem:[%s9693_s5 + $0x80] sm:$0xff]  ;;  %v307_v20 = vld [vmem:[%s9693_s5 + $0x88] sm:$0xff] }
  0x23   : > { %232 = vst.msk [vmem:[#allocation2 + $0xf8] sm:$0x1] %vm200_vm1, %v14319_v0  ;;  %233 = vst.msk [vmem:[#allocation2 + $0x118] sm:$0x1] %vm200_vm1, %v14319_v0  ;;  %v308_v21 = vld [vmem:[%s9693_s5 + $0x90] sm:$0xff]  ;;  %v309_v22 = vld [vmem:[%s9693_s5 + $0x98] sm:$0xff] }
  0x24   : > { %234 = vst.msk [vmem:[#allocation2 + $0x138] sm:$0x1] %vm200_vm1, %v14319_v0  ;;  %235 = vst.msk [vmem:[#allocation2 + $0x158] sm:$0x1] %vm200_vm1, %v14319_v0  ;;  %v310_v23 = vld [vmem:[%s9693_s5 + $0xa0] sm:$0xff]  ;;  %v311_v24 = vld [vmem:[%s9693_s5 + $0xa8] sm:$0xff] }
  0x25   : > { %236 = vst.msk [vmem:[#allocation2 + $0x178] sm:$0x1] %vm200_vm1, %v14319_v0  ;;  %237 = vst.msk [vmem:[#allocation2 + $0x198] sm:$0x1] %vm200_vm1, %v14319_v0  ;;  %v312_v28 = vld [vmem:[%s9693_s5 + $0xb0] sm:$0xff]  ;;  %v313_v29 = vld [vmem:[%s9693_s5 + $0xb8] sm:$0xff] }
  0x26   : > { %238 = vst.msk [vmem:[#allocation2 + $0x1b8] sm:$0x1] %vm200_vm1, %v14319_v0  ;;  %239 = vst.msk [vmem:[#allocation2 + $0x1d8] sm:$0x1] %vm200_vm1, %v14319_v0  ;;  %v314_v33 = vld [vmem:[%s9693_s5 + $0xc0] sm:$0xff]  ;;  %v315_v34 = vld [vmem:[%s9693_s5 + $0xc8] sm:$0xff] }
  0x27   : > { %240 = vst.msk [vmem:[#allocation2 + $0x1f8] sm:$0x1] %vm200_vm1, %v14319_v0  ;;  %241 = vst.msk [vmem:[#allocation2 + $0x218] sm:$0x1] %vm200_vm1, %v14319_v0  ;;  %v316_v35 = vld [vmem:[%s9693_s5 + $0xd0] sm:$0xff]  ;;  %v317_v36 = vld [vmem:[%s9693_s5 + $0xd8] sm:$0xff] }
  0x28   : > { %225 = vst.msk [vmem:[#allocation2 + $0x18] sm:$0x1] %vm200_vm1, %v14319_v0  ;;  %207 = vst.msk [vmem:[#allocation2 + $0x7] sm:$0x1] %vm200_vm1, %v14319_v0  ;;  %v318_v37 = vld [vmem:[%s9693_s5 + $0xe0] sm:$0xff]  ;;  %v319_v38 = vld [vmem:[%s9693_s5 + $0xe8] sm:$0xff] }
  0x29   : > { %224 = vst.msk [vmem:[#allocation2 + $0x227] sm:$0x1] %vm200_vm1, %v14319_v0  ;;  %242 = vst.msk [vmem:[#allocation2 + $0x238] sm:$0x1] %vm200_vm1, %v14319_v0  ;;  %v356_v48 = vld [vmem:[#allocation2 + $0xf] sm:$0xff]  ;;  %vm1931_vm11 = vcmask 294144  }
  0x2a   : > { %323 = vst.msk [vmem:[#allocation2 + $0x28] sm:$0xff] %vm196_vm0, %v290_v1  ;;  %324 = vst.msk [vmem:[#allocation2 + $0x30] sm:$0xff] %vm196_vm0, %v291_v2  ;;  %vm2006_vm12 = vcmask 293888   ;;  %vm247_vm13 = vcmask 253952   ;;  %vm2621_vm14 = vcmask 523520   ;;  %vm2814_vm15 = vcmask 785920  }
  0x2b   : > { %325 = vst.msk [vmem:[#allocation2 + $0x48] sm:$0xff] %vm196_vm0, %v292_v3  ;;  %326 = vst.msk [vmem:[#allocation2 + $0x50] sm:$0xff] %vm196_vm0, %v293_v4  ;;  %s188_s22 = sand.u32 1, %s9501_s16  }
  0x2c   : > { %327 = vst.msk [vmem:[#allocation2 + $0x68] sm:$0xff] %vm196_vm0, %v294_v5  ;;  %328 = vst.msk [vmem:[#allocation2 + $0x70] sm:$0xff] %vm196_vm0, %v295_v6  ;;  %s8724_s28 = sshll.u32 %s188_s22, 8 }
  0x2d   : > { %329 = vst.msk [vmem:[#allocation2 + $0x88] sm:$0xff] %vm196_vm0, %v296_v9  ;;  %330 = vst.msk [vmem:[#allocation2 + $0x90] sm:$0xff] %vm196_vm0, %v297_v10  ;;  %s14045_s29 = scalar_lea.vmem [#allocation5], %s8724_s28 }
  0x2e   : > { %331 = vst.msk [vmem:[#allocation2 + $0xa8] sm:$0xff] %vm196_vm0, %v298_v11  ;;  %332 = vst.msk [vmem:[#allocation2 + $0xb0] sm:$0xff] %vm196_vm0, %v299_v12 }
  0x2f   : > { %333 = vst.msk [vmem:[#allocation2 + $0xc8] sm:$0xff] %vm196_vm0, %v300_v13  ;;  %334 = vst.msk [vmem:[#allocation2 + $0xd0] sm:$0xff] %vm196_vm0, %v301_v14  ;;  %v355_v45 = vld [vmem:[#allocation2 + $0x7] sm:$0xff] }
  0x30   : > { %335 = vst.msk [vmem:[#allocation2 + $0xe8] sm:$0xff] %vm196_vm0, %v302_v15  ;;  %336 = vst.msk [vmem:[#allocation2 + $0xf0] sm:$0xff] %vm196_vm0, %v303_v16 }
  0x31   : > { %337 = vst.msk [vmem:[#allocation2 + $0x108] sm:$0xff] %vm196_vm0, %v304_v17  ;;  %338 = vst.msk [vmem:[#allocation2 + $0x110] sm:$0xff] %vm196_vm0, %v305_v18  ;;  %v9738_v25 = vld [vmem:[#allocation2 + $0x28] sm:$0xff]  ;;  %v9747_v27 = vld [vmem:[#allocation2 + $0x30] sm:$0xff] }
  0x32   : > { %339 = vst.msk [vmem:[#allocation2 + $0x128] sm:$0xff] %vm196_vm0, %v306_v19  ;;  %340 = vst.msk [vmem:[#allocation2 + $0x130] sm:$0xff] %vm196_vm0, %v307_v20  ;;  %v9740_v26 = vld [vmem:[#allocation2 + $0x48] sm:$0xff]  ;;  %487 = vrot.lane.b32.xlu1 %v9738_v25, %s9512_s6  ;;  %v9759_v31 = vld [vmem:[#allocation2 + $0x50] sm:$0xff] }
  0x33   : > { %341 = vst.msk [vmem:[#allocation2 + $0x148] sm:$0xff] %vm196_vm0, %v308_v21  ;;  %342 = vst.msk [vmem:[#allocation2 + $0x150] sm:$0xff] %vm196_vm0, %v309_v22  ;;  %491 = vrot.lane.b32.xlu0 %v9740_v26, %s9512_s6  ;;  %v9755_v30 = vld [vmem:[#allocation2 + $0x68] sm:$0xff]  ;;  %v9776_v39 = vld [vmem:[#allocation2 + $0x70] sm:$0xff] }
  0x34   : > { %343 = vst.msk [vmem:[#allocation2 + $0x168] sm:$0xff] %vm196_vm0, %v310_v23  ;;  %344 = vst.msk [vmem:[#allocation2 + $0x170] sm:$0xff] %vm196_vm0, %v311_v24  ;;  %v9763_v32 = vld [vmem:[#allocation2 + $0x88] sm:$0xff]  ;;  %v9787_v41 = vld [vmem:[#allocation2 + $0x90] sm:$0xff] }
  0x35   : > { %345 = vst.msk [vmem:[#allocation2 + $0x188] sm:$0xff] %vm196_vm0, %v312_v28  ;;  %346 = vst.msk [vmem:[#allocation2 + $0x190] sm:$0xff] %vm196_vm0, %v313_v29  ;;  %v9783_v40 = vld [vmem:[#allocation2 + $0xa8] sm:$0xff]  ;;  %v9795_v43 = vld [vmem:[#allocation2 + $0xb0] sm:$0xff] }
  0x36   : > { %489 = vrot.lane.b32.xlu1 %v9747_v27, %s9512_s6  ;;  %347 = vst.msk [vmem:[#allocation2 + $0x1a8] sm:$0xff] %vm196_vm0, %v314_v33  ;;  %348 = vst.msk [vmem:[#allocation2 + $0x1b0] sm:$0xff] %vm196_vm0, %v315_v34  ;;  %v9791_v42 = vld [vmem:[#allocation2 + $0xc8] sm:$0xff]  ;;  %v9803_v46 = vld [vmem:[#allocation2 + $0xd0] sm:$0xff] }
  0x37   : > { %495 = vrot.lane.b32.xlu0 %v9755_v30, %s9512_s6  ;;  %349 = vst.msk [vmem:[#allocation2 + $0x1c8] sm:$0xff] %vm196_vm0, %v316_v35  ;;  %350 = vst.msk [vmem:[#allocation2 + $0x1d0] sm:$0xff] %vm196_vm0, %v317_v36  ;;  %v9799_v44 = vld [vmem:[#allocation2 + $0xe8] sm:$0xff]  ;;  %v9827_v53 = vld [vmem:[#allocation2 + $0xf0] sm:$0xff] }
  0x38   : > { %351 = vst.msk [vmem:[#allocation2 + $0x1e8] sm:$0xff] %vm196_vm0, %v318_v37  ;;  %352 = vst.msk [vmem:[#allocation2 + $0x1f0] sm:$0xff] %vm196_vm0, %v319_v38  ;;  %v9806_v47 = vld [vmem:[#allocation2 + $0x27] sm:$0xff]  ;;  %v9813_v49 = vld [vmem:[#allocation2 + $0x2f] sm:$0xff] }
  0x39   : > { %387 = vst.msk [vmem:[#allocation4] sm:$0xff] %vm196_vm0, %v355_v45  ;;  %389 = vst.msk [vmem:[#allocation4 + $0x30] sm:$0xff] %vm196_vm0, %v9806_v47  ;;  %v9815_v50 = vld [vmem:[#allocation2 + $0x47] sm:$0xff]  ;;  %v9823_v52 = vld [vmem:[#allocation2 + $0x4f] sm:$0xff] }
  0x3a   : > { %493 = vrot.lane.b32.xlu1 %v9759_v31, %s9512_s6  ;;  %388 = vst.msk [vmem:[#allocation4 + $0x18] sm:$0xff] %vm196_vm0, %v356_v48  ;;  %v9817_v51 = vld [vmem:[#allocation2 + $0x108] sm:$0xff]  ;;  %390 = vst.msk [vmem:[#allocation4 + $0x48] sm:$0xff] %vm196_vm0, %v9813_v49  ;;  %v9861_v63 = vld [vmem:[#allocation2 + $0x110] sm:$0xff] }
  0x3b   : > { %499 = vrot.lane.b32.xlu0 %v9763_v32, %s9512_s6  ;;  %391 = vst.msk [vmem:[#allocation4 + $0x60] sm:$0xff] %vm196_vm0, %v9815_v50  ;;  %392 = vst.msk [vmem:[#allocation4 + $0x78] sm:$0xff] %vm196_vm0, %v9823_v52  ;;  %v9831_v54 = vld [vmem:[#allocation2 + $0x67] sm:$0xff]  ;;  %v9833_v55 = vld [vmem:[#allocation2 + $0x6f] sm:$0xff] }
  0x3c   : > { %v9835_v56 = vld [vmem:[#allocation2 + $0x128] sm:$0xff]  ;;  %393 = vst.msk [vmem:[#allocation4 + $0x90] sm:$0xff] %vm196_vm0, %v9831_v54  ;;  %394 = vst.msk [vmem:[#allocation4 + $0xa8] sm:$0xff] %vm196_vm0, %v9833_v55  ;;  %v9923_v14 = vld [vmem:[#allocation2 + $0x130] sm:$0xff] }
  0x3d   : > { %v9841_v57 = vld [vmem:[#allocation2 + $0x87] sm:$0xff]  ;;  %v9843_v58 = vld [vmem:[#allocation2 + $0x8f] sm:$0xff]  ;;  %v321_v37 = vld [vmem:[%s9693_s5 + $0xf8] sm:$0xff] }
  0x3e   : > { %497 = vrot.lane.b32.xlu1 %v9776_v39, %s9512_s6  ;;  %v9845_v59 = vld [vmem:[#allocation2 + $0xa7] sm:$0xff]  ;;  %395 = vst.msk [vmem:[#allocation4 + $0xc0] sm:$0xff] %vm196_vm0, %v9841_v57  ;;  %396 = vst.msk [vmem:[#allocation4 + $0xd8] sm:$0xff] %vm196_vm0, %v9843_v58  ;;  %v9855_v60 = vld [vmem:[#allocation2 + $0xaf] sm:$0xff] }
  0x3f   : > { %503 = vrot.lane.b32.xlu0 %v9783_v40, %s9512_s6  ;;  %397 = vst.msk [vmem:[#allocation4 + $0xf0] sm:$0xff] %vm196_vm0, %v9845_v59  ;;  %v9857_v61 = vld [vmem:[#allocation2 + $0xc7] sm:$0xff]  ;;  %v9859_v62 = vld [vmem:[#allocation2 + $0xcf] sm:$0xff]  ;;  %398 = vst.msk [vmem:[#allocation4 + $0x108] sm:$0xff] %vm196_vm0, %v9855_v60 }
  0x40   : > { %399 = vst.msk [vmem:[#allocation4 + $0x120] sm:$0xff] %vm196_vm0, %v9857_v61  ;;  %400 = vst.msk [vmem:[#allocation4 + $0x138] sm:$0xff] %vm196_vm0, %v9859_v62  ;;  %v9869_v1 = vld [vmem:[#allocation2 + $0xe7] sm:$0xff]  ;;  %v9871_v2 = vld [vmem:[#allocation2 + $0xef] sm:$0xff] }
  0x41   : > { %v9873_v3 = vld [vmem:[#allocation2 + $0x107] sm:$0xff]  ;;  %401 = vst.msk [vmem:[#allocation4 + $0x150] sm:$0xff] %vm196_vm0, %v9869_v1  ;;  %402 = vst.msk [vmem:[#allocation4 + $0x168] sm:$0xff] %vm196_vm0, %v9871_v2  ;;  %v9883_v4 = vld [vmem:[#allocation2 + $0x10f] sm:$0xff] }
  0x42   : > { %501 = vrot.lane.b32.xlu1 %v9787_v41, %s9512_s6  ;;  %403 = vst.msk [vmem:[#allocation4 + $0x180] sm:$0xff] %vm196_vm0, %v9873_v3  ;;  %v9885_v5 = vld [vmem:[#allocation2 + $0x127] sm:$0xff]  ;;  %v9887_v6 = vld [vmem:[#allocation2 + $0x12f] sm:$0xff]  ;;  %404 = vst.msk [vmem:[#allocation4 + $0x198] sm:$0xff] %vm196_vm0, %v9883_v4 }
  0x43   : > { %507 = vrot.lane.b32.xlu0 %v9791_v42, %s9512_s6  ;;  %405 = vst.msk [vmem:[#allocation4 + $0x1b0] sm:$0xff] %vm196_vm0, %v9885_v5  ;;  %406 = vst.msk [vmem:[#allocation4 + $0x1c8] sm:$0xff] %vm196_vm0, %v9887_v6  ;;  %v9895_v7 = vld [vmem:[#allocation2 + $0x147] sm:$0xff]  ;;  %v9897_v8 = vld [vmem:[#allocation2 + $0x14f] sm:$0xff] }
  0x44   : > { %v9899_v9 = vld [vmem:[#allocation2 + $0x167] sm:$0xff]  ;;  %407 = vst.msk [vmem:[#allocation4 + $0x1e0] sm:$0xff] %vm196_vm0, %v9895_v7  ;;  %408 = vst.msk [vmem:[#allocation4 + $0x1f8] sm:$0xff] %vm196_vm0, %v9897_v8  ;;  %v9909_v10 = vld [vmem:[#allocation2 + $0x16f] sm:$0xff] }
  0x45   : > { %409 = vst.msk [vmem:[#allocation4 + $0x210] sm:$0xff] %vm196_vm0, %v9899_v9  ;;  %v9911_v11 = vld [vmem:[#allocation2 + $0x148] sm:$0xff]  ;;  %410 = vst.msk [vmem:[#allocation4 + $0x228] sm:$0xff] %vm196_vm0, %v9909_v10  ;;  %v9939_v18 = vld [vmem:[#allocation2 + $0x150] sm:$0xff] }
  0x46   : > { %505 = vrot.lane.b32.xlu1 %v9795_v43, %s9512_s6  ;;  %v9915_v12 = vld [vmem:[#allocation2 + $0x187] sm:$0xff]  ;;  %v9921_v13 = vld [vmem:[#allocation2 + $0x18f] sm:$0xff]  ;;  %354 = vst.msk [vmem:[#allocation2 + $0x210] sm:$0xff] %vm196_vm0, %v321_v37 }
  0x47   : > { %511 = vrot.lane.b32.xlu0 %v9799_v44, %s9512_s6  ;;  %411 = vst.msk [vmem:[#allocation4 + $0x240] sm:$0xff] %vm196_vm0, %v9915_v12  ;;  %412 = vst.msk [vmem:[#allocation4 + $0x258] sm:$0xff] %vm196_vm0, %v9921_v13  ;;  %v9929_v15 = vld [vmem:[#allocation2 + $0x168] sm:$0xff]  ;;  %v9955_v22 = vld [vmem:[#allocation2 + $0x170] sm:$0xff] }
  0x48   : > { %v9931_v16 = vld [vmem:[#allocation2 + $0x1a7] sm:$0xff]  ;;  %v9937_v17 = vld [vmem:[#allocation2 + $0x1af] sm:$0xff] }
  0x49   : > { %413 = vst.msk [vmem:[#allocation4 + $0x270] sm:$0xff] %vm196_vm0, %v9931_v16  ;;  %414 = vst.msk [vmem:[#allocation4 + $0x288] sm:$0xff] %vm196_vm0, %v9937_v17  ;;  %v9945_v19 = vld [vmem:[#allocation2 + $0x188] sm:$0xff]  ;;  %v9971_v29 = vld [vmem:[#allocation2 + $0x190] sm:$0xff] }
  0x4a   : > { %509 = vrot.lane.b32.xlu1 %v9803_v46, %s9512_s6  ;;  %v9947_v20 = vld [vmem:[#allocation2 + $0x1c7] sm:$0xff]  ;;  %v9953_v21 = vld [vmem:[#allocation2 + $0x1cf] sm:$0xff] }
  0x4b   : > { %515 = vrot.lane.b32.xlu0 %v9817_v51, %s9512_s6  ;;  %415 = vst.msk [vmem:[#allocation4 + $0x2a0] sm:$0xff] %vm196_vm0, %v9947_v20  ;;  %416 = vst.msk [vmem:[#allocation4 + $0x2b8] sm:$0xff] %vm196_vm0, %v9953_v21  ;;  %v9961_v23 = vld [vmem:[#allocation2 + $0x1a8] sm:$0xff]  ;;  %v320_v34 = vld [vmem:[%s9693_s5 + $0xf0] sm:$0xff] }
  0x4c   : > { %v9963_v24 = vld [vmem:[#allocation2 + $0x1e7] sm:$0xff]  ;;  %v9969_v28 = vld [vmem:[#allocation2 + $0x1ef] sm:$0xff]  ;;  %353 = vst.msk [vmem:[#allocation2 + $0x208] sm:$0xff] %vm196_vm0, %v320_v34 }
  0x4d   : > { %417 = vst.msk [vmem:[#allocation4 + $0x2d0] sm:$0xff] %vm196_vm0, %v9963_v24  ;;  %418 = vst.msk [vmem:[#allocation4 + $0x2e8] sm:$0xff] %vm196_vm0, %v9969_v28  ;;  %v9977_v33 = vld [vmem:[#allocation2 + $0x1c8] sm:$0xff]  ;;  %v9982_v35 = vld [vmem:[#allocation2 + $0x1b0] sm:$0xff]  ;;  %vm3007_vm0 = vcmask 1048320  }
  0x4e   : > { %513 = vrot.lane.b32.xlu1 %v9827_v53, %s9512_s6  ;;  %14373 = vst [vmem:[#allocation8_spill] sm:$0xff] %v9982_v35  ;;  %v9987_v36 = vld [vmem:[#allocation2 + $0x1e8] sm:$0xff]  ;;  %v9993_v38 = vld [vmem:[#allocation2 + $0x1d0] sm:$0xff] }
  0x4f   : > { %519 = vrot.lane.b32.xlu0 %v9835_v56, %s9512_s6  ;;  %14374 = vst [vmem:[#allocation9_spill] sm:$0xff] %v9987_v36  ;;  %14375 = vst [vmem:[#allocation10_spill] sm:$0xff] %v9993_v38  ;;  %v612_v45 = vld [vmem:[#allocation2 + $0x9] sm:$0xff]  ;;  %v613_v37 = vld [vmem:[#allocation2 + $0x11] sm:$0xff] }
  0x50   : > { %v9999_v48 = vld [vmem:[#allocation2 + $0x1f0] sm:$0xff] }
  0x51   : > { %14376 = vst [vmem:[#allocation11_spill] sm:$0xff] %v9999_v48  ;;  %v10002_v34 = vld [vmem:[#allocation2 + $0x29] sm:$0xff] }
  0x52   : > { %517 = vrot.lane.b32.xlu1 %v9861_v63, %s9512_s6  ;;  %14377 = vst [vmem:[#allocation12_spill] sm:$0xff] %v10002_v34  ;;  %v10008_v0 = vld [vmem:[#allocation2 + $0x49] sm:$0xff] }
  0x53   : > { %523 = vrot.lane.b32.xlu0 %v9911_v11, %s9512_s6  ;;  %14378 = vst [vmem:[#allocation13_spill] sm:$0xff] %v10008_v0 }
  0x56   : > { %521 = vrot.lane.b32.xlu1 %v9923_v14, %s9512_s6 }
  0x57   : > { %527 = vrot.lane.b32.xlu0 %v9929_v15, %s9512_s6 }
  0x5a   : > { %525 = vrot.lane.b32.xlu1 %v9939_v18, %s9512_s6 }
  0x5b   : > { %531 = vrot.lane.b32.xlu0 %v9945_v19, %s9512_s6 }
  0x5e   : > { %529 = vrot.lane.b32.xlu1 %v9955_v22, %s9512_s6 }
  0x5f   : > { %535 = vrot.lane.b32.xlu0 %v9961_v23, %s9512_s6 }
  0x62   : > { %533 = vrot.lane.b32.xlu1 %v9971_v29, %s9512_s6 }
  0x63   : > { %539 = vrot.lane.b32.xlu0 %v9977_v33, %s9512_s6 }
  0x66   : > { %537 = vrot.lane.b32.xlu1 %v9982_v35, %s9512_s6 }
  0x67   : > { %543 = vrot.lane.b32.xlu0 %v9987_v36, %s9512_s6  ;;  %v10011_v36 = vld [vmem:[#allocation2 + $0x31] sm:$0xff] }
  0x68   : > { %14379 = vst [vmem:[#allocation14_spill] sm:$0xff] %v10011_v36 }
  0x6a   : > { %541 = vrot.lane.b32.xlu1 %v9993_v38, %s9512_s6  ;;  %v10015_v38 = vld [vmem:[#allocation2 + $0x69] sm:$0xff] }
  0x6b   : > { %676 = vrot.lane.b32.xlu0 %v612_v45, %s9513_s7  ;;  %14380 = vst [vmem:[#allocation15_spill] sm:$0xff] %v10015_v38  ;;  %v10019_v45 = vld [vmem:[#allocation2 + $0x51] sm:$0xff] }
  0x6c   : > { %14381 = vst [vmem:[#allocation16_spill] sm:$0xff] %v10019_v45 }
  0x6e   : > { %545 = vrot.lane.b32.xlu1 %v9999_v48, %s9512_s6  ;;  %v10109_v48 = vld [vmem:[#allocation2 + $0x1b1] sm:$0xff]  ;;  %s9519_s6 = smov 32  }
  0x6f   : > { %680 = vrot.lane.b32.xlu0 %v10002_v34, %s9513_s7  ;;  %v10023_v34 = vld [vmem:[#allocation2 + $0x89] sm:$0xff]  ;;  %14402 = vst [vmem:[#allocation37_spill] sm:$0xff] %v10109_v48 }
  0x70   : > { %14382 = vst [vmem:[#allocation17_spill] sm:$0xff] %v10023_v34 }
  0x72   : > { %678 = vrot.lane.b32.xlu1 %v613_v37, %s9513_s7  ;;  %v10027_v37 = vld [vmem:[#allocation2 + $0x71] sm:$0xff] }
  0x73   : > { %684 = vrot.lane.b32.xlu0 %v10008_v0, %s9513_s7  ;;  %14383 = vst [vmem:[#allocation18_spill] sm:$0xff] %v10027_v37  ;;  %v10031_v0 = vld [vmem:[#allocation2 + $0xa9] sm:$0xff] }
  0x74   : > { %14384 = vst [vmem:[#allocation19_spill] sm:$0xff] %v10031_v0 }
  0x76   : > { %682 = vrot.lane.b32.xlu1 %v10011_v36, %s9513_s7  ;;  %v10035_v36 = vld [vmem:[#allocation2 + $0x91] sm:$0xff] }
  0x77   : > { %688 = vrot.lane.b32.xlu0 %v10015_v38, %s9513_s7  ;;  %14385 = vst [vmem:[#allocation20_spill] sm:$0xff] %v10035_v36  ;;  %v10039_v38 = vld [vmem:[#allocation2 + $0xc9] sm:$0xff] }
  0x78   : > { %14386 = vst [vmem:[#allocation21_spill] sm:$0xff] %v10039_v38 }
  0x7a   : > { %686 = vrot.lane.b32.xlu1 %v10019_v45, %s9513_s7  ;;  %v10043_v45 = vld [vmem:[#allocation2 + $0xb1] sm:$0xff] }
  0x7b   : > { %692 = vrot.lane.b32.xlu0 %v10023_v34, %s9513_s7  ;;  %14387 = vst [vmem:[#allocation22_spill] sm:$0xff] %v10043_v45  ;;  %v10047_v34 = vld [vmem:[#allocation2 + $0xe9] sm:$0xff] }
  0x7c   : > { %14388 = vst [vmem:[#allocation23_spill] sm:$0xff] %v10047_v34 }
  0x7e   : > { %690 = vrot.lane.b32.xlu1 %v10027_v37, %s9513_s7  ;;  %v10051_v37 = vld [vmem:[#allocation2 + $0xd1] sm:$0xff] }
  0x7f   : > { %696 = vrot.lane.b32.xlu0 %v10031_v0, %s9513_s7  ;;  %14389 = vst [vmem:[#allocation24_spill] sm:$0xff] %v10051_v37  ;;  %v10055_v0 = vld [vmem:[#allocation2 + $0x109] sm:$0xff] }
  0x80   : > { %14390 = vst [vmem:[#allocation25_spill] sm:$0xff] %v10055_v0 }
  0x82   : > { %694 = vrot.lane.b32.xlu1 %v10035_v36, %s9513_s7  ;;  %v10059_v36 = vld [vmem:[#allocation2 + $0xf1] sm:$0xff] }
  0x83   : > { %700 = vrot.lane.b32.xlu0 %v10039_v38, %s9513_s7  ;;  %14391 = vst [vmem:[#allocation26_spill] sm:$0xff] %v10059_v36  ;;  %v10063_v38 = vld [vmem:[#allocation2 + $0x129] sm:$0xff] }
  0x84   : > { %14392 = vst [vmem:[#allocation27_spill] sm:$0xff] %v10063_v38 }
  0x86   : > { %698 = vrot.lane.b32.xlu1 %v10043_v45, %s9513_s7  ;;  %v10067_v45 = vld [vmem:[#allocation2 + $0x111] sm:$0xff] }
  0x87   : > { %704 = vrot.lane.b32.xlu0 %v10047_v34, %s9513_s7  ;;  %14393 = vst [vmem:[#allocation28_spill] sm:$0xff] %v10067_v45  ;;  %v10071_v34 = vld [vmem:[#allocation2 + $0x149] sm:$0xff] }
  0x88   : > { %14394 = vst [vmem:[#allocation29_spill] sm:$0xff] %v10071_v34 }
  0x8a   : > { %702 = vrot.lane.b32.xlu1 %v10051_v37, %s9513_s7  ;;  %v10075_v37 = vld [vmem:[#allocation2 + $0x131] sm:$0xff] }
  0x8b   : > { %708 = vrot.lane.b32.xlu0 %v10055_v0, %s9513_s7  ;;  %14395 = vst [vmem:[#allocation30_spill] sm:$0xff] %v10075_v37  ;;  %v10079_v0 = vld [vmem:[#allocation2 + $0x169] sm:$0xff] }
  0x8c   : > { %14396 = vst [vmem:[#allocation31_spill] sm:$0xff] %v10079_v0 }
  0x8e   : > { %706 = vrot.lane.b32.xlu1 %v10059_v36, %s9513_s7  ;;  %v10083_v36 = vld [vmem:[#allocation2 + $0x151] sm:$0xff] }
  0x8f   : > { %712 = vrot.lane.b32.xlu0 %v10063_v38, %s9513_s7  ;;  %14397 = vst [vmem:[#allocation32_spill] sm:$0xff] %v10083_v36  ;;  %v10087_v38 = vld [vmem:[#allocation2 + $0x189] sm:$0xff] }
  0x90   : > { %14398 = vst [vmem:[#allocation33_spill] sm:$0xff] %v10087_v38 }
  0x92   : > { %710 = vrot.lane.b32.xlu1 %v10067_v45, %s9513_s7  ;;  %v10091_v45 = vld [vmem:[#allocation2 + $0x171] sm:$0xff] }
  0x93   : > { %716 = vrot.lane.b32.xlu0 %v10071_v34, %s9513_s7  ;;  %14399 = vst [vmem:[#allocation34_spill] sm:$0xff] %v10091_v45  ;;  %v10095_v34 = vld [vmem:[#allocation2 + $0x1a9] sm:$0xff] }
  0x94   : > { %14400 = vst [vmem:[#allocation35_spill] sm:$0xff] %v10095_v34 }
  0x96   : > { %714 = vrot.lane.b32.xlu1 %v10075_v37, %s9513_s7  ;;  %v484_v37 = vpop.permute.xlu0 %483 }
  0x97   : > { %720 = vrot.lane.b32.xlu0 %v10079_v0, %s9513_s7  ;;  %580 = vst.msk [vmem:[#allocation4] sm:$0xff] %vm579_vm2, %v484_v37  ;;  %v10100_v0 = vld [vmem:[#allocation2 + $0x191] sm:$0xff]  ;;  %v10114_v37 = vld [vmem:[#allocation2 + $0x1e9] sm:$0xff] }
  0x98   : > { %14401 = vst [vmem:[#allocation36_spill] sm:$0xff] %v10100_v0 }
  0x9a   : > { %718 = vrot.lane.b32.xlu1 %v10083_v36, %s9513_s7  ;;  %v10104_v36 = vld [vmem:[#allocation2 + $0x1c9] sm:$0xff] }
  0x9b   : > { %724 = vrot.lane.b32.xlu0 %v10087_v38, %s9513_s7  ;;  %v486_v38 = vpop.permute.xlu0 %485 }
  0x9c   : > { %581 = vst.msk [vmem:[#allocation4 + $0x18] sm:$0xff] %vm579_vm2, %v486_v38  ;;  %v10127_v38 = vld [vmem:[#allocation2 + $0x1f1] sm:$0xff] }
  0x9e   : > { %722 = vrot.lane.b32.xlu1 %v10091_v45, %s9513_s7 }
  0x9f   : > { %728 = vrot.lane.b32.xlu0 %v10095_v34, %s9513_s7 }
  0xa2   : > { %726 = vrot.lane.b32.xlu1 %v10100_v0, %s9513_s7  ;;  %v10119_v0 = vld [vmem:[#allocation2 + $0x1d1] sm:$0xff] }
  0xa3   : > { %732 = vrot.lane.b32.xlu0 %v10104_v36, %s9513_s7 }
  0xa4   : > { %v488_v35 = vpop.permute.xlu1 %487 }
  0xa5   : > { %582 = vst.msk [vmem:[#allocation4 + $0x30] sm:$0xff] %vm579_vm2, %v488_v35  ;;  %v492_v34 = vpop.permute.xlu0 %491 }
  0xa6   : > { %730 = vrot.lane.b32.xlu1 %v10109_v48, %s9513_s7  ;;  %584 = vst.msk [vmem:[#allocation4 + $0x60] sm:$0xff] %vm579_vm2, %v492_v34 }
  0xa7   : > { %736 = vrot.lane.b32.xlu0 %v10114_v37, %s9513_s7 }
  0xa8   : > { %v490_v45 = vpop.permute.xlu1 %489 }
  0xa9   : > { %583 = vst.msk [vmem:[#allocation4 + $0x48] sm:$0xff] %vm579_vm2, %v490_v45  ;;  %v496_v35 = vpop.permute.xlu0 %495 }
  0xaa   : > { %734 = vrot.lane.b32.xlu1 %v10119_v0, %s9513_s7  ;;  %586 = vst.msk [vmem:[#allocation4 + $0x90] sm:$0xff] %vm579_vm2, %v496_v35 }
  0xab   : > { %869 = vrot.lane.b32.xlu0 %v9806_v47, %s9514_s8 }
  0xac   : > { %v494_v48 = vpop.permute.xlu1 %493 }
  0xad   : > { %585 = vst.msk [vmem:[#allocation4 + $0x78] sm:$0xff] %vm579_vm2, %v494_v48  ;;  %v500_v34 = vpop.permute.xlu0 %499 }
  0xae   : > { %738 = vrot.lane.b32.xlu1 %v10127_v38, %s9513_s7  ;;  %588 = vst.msk [vmem:[#allocation4 + $0xc0] sm:$0xff] %vm579_vm2, %v500_v34 }
  0xaf   : > { %873 = vrot.lane.b32.xlu0 %v9815_v50, %s9514_s8 }
  0xb0   : > { %v498_v45 = vpop.permute.xlu1 %497 }
  0xb1   : > { %587 = vst.msk [vmem:[#allocation4 + $0xa8] sm:$0xff] %vm579_vm2, %v498_v45  ;;  %v504_v35 = vpop.permute.xlu0 %503 }
  0xb2   : > { %871 = vrot.lane.b32.xlu1 %v9813_v49, %s9514_s8  ;;  %590 = vst.msk [vmem:[#allocation4 + $0xf0] sm:$0xff] %vm579_vm2, %v504_v35 }
  0xb3   : > { %877 = vrot.lane.b32.xlu0 %v9831_v54, %s9514_s8 }
  0xb4   : > { %v502_v47 = vpop.permute.xlu1 %501 }
  0xb5   : > { %589 = vst.msk [vmem:[#allocation4 + $0xd8] sm:$0xff] %vm579_vm2, %v502_v47  ;;  %v508_v48 = vpop.permute.xlu0 %507 }
  0xb6   : > { %875 = vrot.lane.b32.xlu1 %v9823_v52, %s9514_s8  ;;  %592 = vst.msk [vmem:[#allocation4 + $0x120] sm:$0xff] %vm579_vm2, %v508_v48 }
  0xb7   : > { %881 = vrot.lane.b32.xlu0 %v9841_v57, %s9514_s8 }
  0xb8   : > { %v506_v34 = vpop.permute.xlu1 %505 }
  0xb9   : > { %591 = vst.msk [vmem:[#allocation4 + $0x108] sm:$0xff] %vm579_vm2, %v506_v34  ;;  %v512_v49 = vpop.permute.xlu0 %511 }
  0xba   : > { %879 = vrot.lane.b32.xlu1 %v9833_v55, %s9514_s8  ;;  %594 = vst.msk [vmem:[#allocation4 + $0x150] sm:$0xff] %vm579_vm2, %v512_v49 }
  0xbb   : > { %885 = vrot.lane.b32.xlu0 %v9845_v59, %s9514_s8 }
  0xbc   : > { %v510_v45 = vpop.permute.xlu1 %509 }
  0xbd   : > { %593 = vst.msk [vmem:[#allocation4 + $0x138] sm:$0xff] %vm579_vm2, %v510_v45  ;;  %v516_v35 = vpop.permute.xlu0 %515 }
  0xbe   : > { %883 = vrot.lane.b32.xlu1 %v9843_v58, %s9514_s8  ;;  %596 = vst.msk [vmem:[#allocation4 + $0x180] sm:$0xff] %vm579_vm2, %v516_v35 }
  0xbf   : > { %889 = vrot.lane.b32.xlu0 %v9857_v61, %s9514_s8 }
  0xc0   : > { %v514_v47 = vpop.permute.xlu1 %513 }
  0xc1   : > { %595 = vst.msk [vmem:[#allocation4 + $0x168] sm:$0xff] %vm579_vm2, %v514_v47  ;;  %v520_v48 = vpop.permute.xlu0 %519 }
  0xc2   : > { %887 = vrot.lane.b32.xlu1 %v9855_v60, %s9514_s8  ;;  %598 = vst.msk [vmem:[#allocation4 + $0x1b0] sm:$0xff] %vm579_vm2, %v520_v48 }
  0xc3   : > { %893 = vrot.lane.b32.xlu0 %v9869_v1, %s9514_s8 }
  0xc4   : > { %v518_v34 = vpop.permute.xlu1 %517 }
  0xc5   : > { %597 = vst.msk [vmem:[#allocation4 + $0x198] sm:$0xff] %vm579_vm2, %v518_v34  ;;  %v524_v49 = vpop.permute.xlu0 %523 }
  0xc6   : > { %891 = vrot.lane.b32.xlu1 %v9859_v62, %s9514_s8  ;;  %600 = vst.msk [vmem:[#allocation4 + $0x1e0] sm:$0xff] %vm579_vm2, %v524_v49 }
  0xc7   : > { %897 = vrot.lane.b32.xlu0 %v9873_v3, %s9514_s8 }
  0xc8   : > { %v522_v45 = vpop.permute.xlu1 %521 }
  0xc9   : > { %599 = vst.msk [vmem:[#allocation4 + $0x1c8] sm:$0xff] %vm579_vm2, %v522_v45  ;;  %v528_v35 = vpop.permute.xlu0 %527 }
  0xca   : > { %895 = vrot.lane.b32.xlu1 %v9871_v2, %s9514_s8  ;;  %602 = vst.msk [vmem:[#allocation4 + $0x210] sm:$0xff] %vm579_vm2, %v528_v35 }
  0xcb   : > { %901 = vrot.lane.b32.xlu0 %v9885_v5, %s9514_s8 }
  0xcc   : > { %v526_v47 = vpop.permute.xlu1 %525 }
  0xcd   : > { %601 = vst.msk [vmem:[#allocation4 + $0x1f8] sm:$0xff] %vm579_vm2, %v526_v47  ;;  %v532_v48 = vpop.permute.xlu0 %531 }
  0xce   : > { %899 = vrot.lane.b32.xlu1 %v9883_v4, %s9514_s8  ;;  %604 = vst.msk [vmem:[#allocation4 + $0x240] sm:$0xff] %vm579_vm2, %v532_v48 }
  0xcf   : > { %905 = vrot.lane.b32.xlu0 %v9895_v7, %s9514_s8 }
  0xd0   : > { %v530_v34 = vpop.permute.xlu1 %529 }
  0xd1   : > { %603 = vst.msk [vmem:[#allocation4 + $0x228] sm:$0xff] %vm579_vm2, %v530_v34  ;;  %v536_v49 = vpop.permute.xlu0 %535 }
  0xd2   : > { %903 = vrot.lane.b32.xlu1 %v9887_v6, %s9514_s8  ;;  %606 = vst.msk [vmem:[#allocation4 + $0x270] sm:$0xff] %vm579_vm2, %v536_v49 }
  0xd3   : > { %909 = vrot.lane.b32.xlu0 %v9899_v9, %s9514_s8 }
  0xd4   : > { %v534_v45 = vpop.permute.xlu1 %533 }
  0xd5   : > { %605 = vst.msk [vmem:[#allocation4 + $0x258] sm:$0xff] %vm579_vm2, %v534_v45  ;;  %v540_v35 = vpop.permute.xlu0 %539 }
  0xd6   : > { %907 = vrot.lane.b32.xlu1 %v9897_v8, %s9514_s8  ;;  %608 = vst.msk [vmem:[#allocation4 + $0x2a0] sm:$0xff] %vm579_vm2, %v540_v35 }
  0xd7   : > { %913 = vrot.lane.b32.xlu0 %v9915_v12, %s9514_s8 }
  0xd8   : > { %v538_v47 = vpop.permute.xlu1 %537 }
  0xd9   : > { %607 = vst.msk [vmem:[#allocation4 + $0x288] sm:$0xff] %vm579_vm2, %v538_v47  ;;  %v544_v48 = vpop.permute.xlu0 %543 }
  0xda   : > { %911 = vrot.lane.b32.xlu1 %v9909_v10, %s9514_s8  ;;  %610 = vst.msk [vmem:[#allocation4 + $0x2d0] sm:$0xff] %vm579_vm2, %v544_v48  ;;  %v10216_v48 = vld [vmem:[#allocation2 + $0x207] sm:$0xff] }
  0xdb   : > { %917 = vrot.lane.b32.xlu0 %v9931_v16, %s9514_s8 }
  0xdc   : > { %v542_v34 = vpop.permute.xlu1 %541 }
  0xdd   : > { %609 = vst.msk [vmem:[#allocation4 + $0x2b8] sm:$0xff] %vm579_vm2, %v542_v34  ;;  %v677_v49 = vpop.permute.xlu0 %676 }
  0xde   : > { %915 = vrot.lane.b32.xlu1 %v9921_v13, %s9514_s8  ;;  %773 = vst.msk [vmem:[#allocation4] sm:$0xff] %vm772_vm3, %v677_v49 }
  0xdf   : > { %921 = vrot.lane.b32.xlu0 %v9947_v20, %s9514_s8 }
  0xe0   : > { %v546_v45 = vpop.permute.xlu1 %545 }
  0xe1   : > { %611 = vst.msk [vmem:[#allocation4 + $0x2e8] sm:$0xff] %vm579_vm2, %v546_v45  ;;  %v681_v35 = vpop.permute.xlu0 %680 }
  0xe2   : > { %919 = vrot.lane.b32.xlu1 %v9937_v17, %s9514_s8  ;;  %775 = vst.msk [vmem:[#allocation4 + $0x30] sm:$0xff] %vm772_vm3, %v681_v35  ;;  %v10227_v35 = vld [vmem:[#allocation2 + $0x20f] sm:$0xff] }
  0xe3   : > { %925 = vrot.lane.b32.xlu0 %v9963_v24, %s9514_s8 }
  0xe4   : > { %v679_v47 = vpop.permute.xlu1 %678 }
  0xe5   : > { %774 = vst.msk [vmem:[#allocation4 + $0x18] sm:$0xff] %vm772_vm3, %v679_v47  ;;  %v685_v34 = vpop.permute.xlu0 %684 }
  0xe6   : > { %923 = vrot.lane.b32.xlu1 %v9953_v21, %s9514_s8  ;;  %777 = vst.msk [vmem:[#allocation4 + $0x60] sm:$0xff] %vm772_vm3, %v685_v34 }
  0xe7   : > { %929 = vrot.lane.b32.xlu0 %v10216_v48, %s9514_s8 }
  0xe8   : > { %v683_v49 = vpop.permute.xlu1 %682 }
  0xe9   : > { %776 = vst.msk [vmem:[#allocation4 + $0x48] sm:$0xff] %vm772_vm3, %v683_v49  ;;  %v689_v45 = vpop.permute.xlu0 %688 }
  0xea   : > { %927 = vrot.lane.b32.xlu1 %v9969_v28, %s9514_s8  ;;  %779 = vst.msk [vmem:[#allocation4 + $0x90] sm:$0xff] %vm772_vm3, %v689_v45 }
  0xeb   : > { %1062 = vrot.lane.b32.xlu0 %v9738_v25, %s9515_s9 }
  0xec   : > { %v687_v47 = vpop.permute.xlu1 %686 }
  0xed   : > { %778 = vst.msk [vmem:[#allocation4 + $0x78] sm:$0xff] %vm772_vm3, %v687_v47  ;;  %v693_v34 = vpop.permute.xlu0 %692 }
  0xee   : > { %931 = vrot.lane.b32.xlu1 %v10227_v35, %s9514_s8  ;;  %781 = vst.msk [vmem:[#allocation4 + $0xc0] sm:$0xff] %vm772_vm3, %v693_v34 }
  0xef   : > { %1066 = vrot.lane.b32.xlu0 %v9740_v26, %s9515_s9 }
  0xf0   : > { %v691_v49 = vpop.permute.xlu1 %690 }
  0xf1   : > { %780 = vst.msk [vmem:[#allocation4 + $0xa8] sm:$0xff] %vm772_vm3, %v691_v49  ;;  %v697_v45 = vpop.permute.xlu0 %696  ;;  %v14404_v49 = vld [vmem:[#allocation9_spill] sm:$0xff] }
  0xf2   : > { %1064 = vrot.lane.b32.xlu1 %v9747_v27, %s9515_s9  ;;  %783 = vst.msk [vmem:[#allocation4 + $0xf0] sm:$0xff] %vm772_vm3, %v697_v45  ;;  %v14405_v45 = vld [vmem:[#allocation10_spill] sm:$0xff] }
  0xf3   : > { %1070 = vrot.lane.b32.xlu0 %v9755_v30, %s9515_s9 }
  0xf4   : > { %v695_v25 = vpop.permute.xlu1 %694 }
  0xf5   : > { %782 = vst.msk [vmem:[#allocation4 + $0xd8] sm:$0xff] %vm772_vm3, %v695_v25  ;;  %v701_v47 = vpop.permute.xlu0 %700 }
  0xf6   : > { %1068 = vrot.lane.b32.xlu1 %v9759_v31, %s9515_s9  ;;  %785 = vst.msk [vmem:[#allocation4 + $0x120] sm:$0xff] %vm772_vm3, %v701_v47  ;;  %v14406_v47 = vld [vmem:[#allocation11_spill] sm:$0xff] }
  0xf7   : > { %1074 = vrot.lane.b32.xlu0 %v9763_v32, %s9515_s9 }
  0xf8   : > { %v699_v26 = vpop.permute.xlu1 %698 }
  0xf9   : > { %784 = vst.msk [vmem:[#allocation4 + $0x108] sm:$0xff] %vm772_vm3, %v699_v26  ;;  %v705_v27 = vpop.permute.xlu0 %704 }
  0xfa   : > { %1072 = vrot.lane.b32.xlu1 %v9776_v39, %s9515_s9  ;;  %787 = vst.msk [vmem:[#allocation4 + $0x150] sm:$0xff] %vm772_vm3, %v705_v27  ;;  %v10327_v27 = vld [vmem:[#allocation2 + $0x210] sm:$0xff] }
  0xfb   : > { %1078 = vrot.lane.b32.xlu0 %v9783_v40, %s9515_s9 }
  0xfc   : > { %v703_v30 = vpop.permute.xlu1 %702 }
  0xfd   : > { %786 = vst.msk [vmem:[#allocation4 + $0x138] sm:$0xff] %vm772_vm3, %v703_v30  ;;  %v709_v31 = vpop.permute.xlu0 %708 }
  0xfe   : > { %1076 = vrot.lane.b32.xlu1 %v9787_v41, %s9515_s9  ;;  %789 = vst.msk [vmem:[#allocation4 + $0x180] sm:$0xff] %vm772_vm3, %v709_v31  ;;  %v14407_v31 = vld [vmem:[#allocation12_spill] sm:$0xff] }
  0xff   : > { %1082 = vrot.lane.b32.xlu0 %v9791_v42, %s9515_s9 }
 0x100   : > { %v707_v32 = vpop.permute.xlu1 %706 }
 0x101   : > { %788 = vst.msk [vmem:[#allocation4 + $0x168] sm:$0xff] %vm772_vm3, %v707_v32  ;;  %v713_v39 = vpop.permute.xlu0 %712 }
 0x102   : > { %1080 = vrot.lane.b32.xlu1 %v9795_v43, %s9515_s9  ;;  %791 = vst.msk [vmem:[#allocation4 + $0x1b0] sm:$0xff] %vm772_vm3, %v713_v39 }
 0x103   : > { %1086 = vrot.lane.b32.xlu0 %v9799_v44, %s9515_s9 }
 0x104   : > { %v711_v40 = vpop.permute.xlu1 %710 }
 0x105   : > { %790 = vst.msk [vmem:[#allocation4 + $0x198] sm:$0xff] %vm772_vm3, %v711_v40  ;;  %v717_v41 = vpop.permute.xlu0 %716  ;;  %v14408_v40 = vld [vmem:[#allocation13_spill] sm:$0xff] }
 0x106   : > { %1084 = vrot.lane.b32.xlu1 %v9803_v46, %s9515_s9  ;;  %793 = vst.msk [vmem:[#allocation4 + $0x1e0] sm:$0xff] %vm772_vm3, %v717_v41  ;;  %v14409_v41 = vld [vmem:[#allocation14_spill] sm:$0xff] }
 0x107   : > { %1090 = vrot.lane.b32.xlu0 %v9817_v51, %s9515_s9 }
 0x108   : > { %v715_v42 = vpop.permute.xlu1 %714 }
 0x109   : > { %792 = vst.msk [vmem:[#allocation4 + $0x1c8] sm:$0xff] %vm772_vm3, %v715_v42  ;;  %v721_v43 = vpop.permute.xlu0 %720 }
 0x10a   : > { %1088 = vrot.lane.b32.xlu1 %v9827_v53, %s9515_s9  ;;  %795 = vst.msk [vmem:[#allocation4 + $0x210] sm:$0xff] %vm772_vm3, %v721_v43 }
 0x10b   : > { %1094 = vrot.lane.b32.xlu0 %v9835_v56, %s9515_s9 }
 0x10c   : > { %v719_v44 = vpop.permute.xlu1 %718 }
 0x10d   : > { %794 = vst.msk [vmem:[#allocation4 + $0x1f8] sm:$0xff] %vm772_vm3, %v719_v44  ;;  %v725_v46 = vpop.permute.xlu0 %724  ;;  %v14410_v44 = vld [vmem:[#allocation15_spill] sm:$0xff] }
 0x10e   : > { %1092 = vrot.lane.b32.xlu1 %v9861_v63, %s9515_s9  ;;  %797 = vst.msk [vmem:[#allocation4 + $0x240] sm:$0xff] %vm772_vm3, %v725_v46  ;;  %v14411_v46 = vld [vmem:[#allocation16_spill] sm:$0xff] }
 0x10f   : > { %1098 = vrot.lane.b32.xlu0 %v9911_v11, %s9515_s9 }
 0x110   : > { %v723_v51 = vpop.permute.xlu1 %722 }
 0x111   : > { %796 = vst.msk [vmem:[#allocation4 + $0x228] sm:$0xff] %vm772_vm3, %v723_v51  ;;  %v729_v53 = vpop.permute.xlu0 %728 }
 0x112   : > { %1096 = vrot.lane.b32.xlu1 %v9923_v14, %s9515_s9  ;;  %799 = vst.msk [vmem:[#allocation4 + $0x270] sm:$0xff] %vm772_vm3, %v729_v53 }
 0x113   : > { %1102 = vrot.lane.b32.xlu0 %v9929_v15, %s9515_s9 }
 0x114   : > { %v727_v56 = vpop.permute.xlu1 %726 }
 0x115   : > { %798 = vst.msk [vmem:[#allocation4 + $0x258] sm:$0xff] %vm772_vm3, %v727_v56  ;;  %v733_v63 = vpop.permute.xlu0 %732  ;;  %v14412_v56 = vld [vmem:[#allocation17_spill] sm:$0xff] }
 0x116   : > { %1100 = vrot.lane.b32.xlu1 %v9939_v18, %s9515_s9  ;;  %801 = vst.msk [vmem:[#allocation4 + $0x2a0] sm:$0xff] %vm772_vm3, %v733_v63  ;;  %v14413_v63 = vld [vmem:[#allocation18_spill] sm:$0xff] }
 0x117   : > { %1106 = vrot.lane.b32.xlu0 %v9945_v19, %s9515_s9 }
 0x118   : > { %v731_v11 = vpop.permute.xlu1 %730 }
 0x119   : > { %800 = vst.msk [vmem:[#allocation4 + $0x288] sm:$0xff] %vm772_vm3, %v731_v11  ;;  %v737_v14 = vpop.permute.xlu0 %736 }
 0x11a   : > { %1104 = vrot.lane.b32.xlu1 %v9955_v22, %s9515_s9  ;;  %803 = vst.msk [vmem:[#allocation4 + $0x2d0] sm:$0xff] %vm772_vm3, %v737_v14  ;;  %v14403_v22 = vld [vmem:[#allocation8_spill] sm:$0xff] }
 0x11b   : > { %1110 = vrot.lane.b32.xlu0 %v9961_v23, %s9515_s9 }
 0x11c   : > { %v735_v15 = vpop.permute.xlu1 %734 }
 0x11d   : > { %802 = vst.msk [vmem:[#allocation4 + $0x2b8] sm:$0xff] %vm772_vm3, %v735_v15  ;;  %v870_v18 = vpop.permute.xlu0 %869  ;;  %v14414_v15 = vld [vmem:[#allocation19_spill] sm:$0xff] }
 0x11e   : > { %1108 = vrot.lane.b32.xlu1 %v9971_v29, %s9515_s9  ;;  %966 = vst.msk [vmem:[#allocation4] sm:$0xff] %vm965_vm4, %v870_v18  ;;  %v10316_v29 = vld [vmem:[#allocation2 + $0x208] sm:$0xff]  ;;  %v14415_v18 = vld [vmem:[#allocation20_spill] sm:$0xff] }
 0x11f   : > { %1114 = vrot.lane.b32.xlu0 %v9977_v33, %s9515_s9 }
 0x120   : > { %v739_v19 = vpop.permute.xlu1 %738 }
 0x121   : > { %804 = vst.msk [vmem:[#allocation4 + $0x2e8] sm:$0xff] %vm772_vm3, %v739_v19  ;;  %v874_v34 = vpop.permute.xlu0 %873 }
 0x122   : > { %1112 = vrot.lane.b32.xlu1 %v14403_v22, %s9515_s9  ;;  %968 = vst.msk [vmem:[#allocation4 + $0x30] sm:$0xff] %vm965_vm4, %v874_v34  ;;  %v14416_v34 = vld [vmem:[#allocation21_spill] sm:$0xff] }
 0x123   : > { %1118 = vrot.lane.b32.xlu0 %v14404_v49, %s9515_s9 }
 0x124   : > { %v872_v23 = vpop.permute.xlu1 %871 }
 0x125   : > { %967 = vst.msk [vmem:[#allocation4 + $0x18] sm:$0xff] %vm965_vm4, %v872_v23  ;;  %v878_v33 = vpop.permute.xlu0 %877  ;;  %v14417_v23 = vld [vmem:[#allocation22_spill] sm:$0xff] }
 0x126   : > { %1116 = vrot.lane.b32.xlu1 %v14405_v45, %s9515_s9  ;;  %970 = vst.msk [vmem:[#allocation4 + $0x60] sm:$0xff] %vm965_vm4, %v878_v33  ;;  %v14418_v33 = vld [vmem:[#allocation23_spill] sm:$0xff] }
 0x127   : > { %1122 = vrot.lane.b32.xlu0 %v10316_v29, %s9515_s9 }
 0x128   : > { %v876_v25 = vpop.permute.xlu1 %875 }
 0x129   : > { %969 = vst.msk [vmem:[#allocation4 + $0x48] sm:$0xff] %vm965_vm4, %v876_v25  ;;  %v882_v26 = vpop.permute.xlu0 %881  ;;  %v14419_v25 = vld [vmem:[#allocation24_spill] sm:$0xff] }
 0x12a   : > { %1120 = vrot.lane.b32.xlu1 %v14406_v47, %s9515_s9  ;;  %972 = vst.msk [vmem:[#allocation4 + $0x90] sm:$0xff] %vm965_vm4, %v882_v26 }
 0x12b   : > { %1255 = vrot.lane.b32.xlu0 %v14407_v31, %s9516_s10  ;;  %v14421_v31 = vld [vmem:[#allocation26_spill] sm:$0xff] }
 0x12c   : > { %v880_v30 = vpop.permute.xlu1 %879 }
 0x12d   : > { %971 = vst.msk [vmem:[#allocation4 + $0x78] sm:$0xff] %vm965_vm4, %v880_v30  ;;  %v886_v32 = vpop.permute.xlu0 %885  ;;  %v14420_v30 = vld [vmem:[#allocation25_spill] sm:$0xff] }
 0x12e   : > { %1124 = vrot.lane.b32.xlu1 %v10327_v27, %s9515_s9  ;;  %974 = vst.msk [vmem:[#allocation4 + $0xc0] sm:$0xff] %vm965_vm4, %v886_v32  ;;  %s9522_s9 = smov [#allocation5]  }
 0x12f   : > { %1259 = vrot.lane.b32.xlu0 %v14408_v40, %s9516_s10  ;;  %v14422_v40 = vld [vmem:[#allocation27_spill] sm:$0xff] }
 0x130   : > { %v884_v39 = vpop.permute.xlu1 %883 }
 0x131   : > { %973 = vst.msk [vmem:[#allocation4 + $0xa8] sm:$0xff] %vm965_vm4, %v884_v39  ;;  %v890_v42 = vpop.permute.xlu0 %889 }
 0x132   : > { %1257 = vrot.lane.b32.xlu1 %v14409_v41, %s9516_s10  ;;  %976 = vst.msk [vmem:[#allocation4 + $0xf0] sm:$0xff] %vm965_vm4, %v890_v42  ;;  %v14423_v41 = vld [vmem:[#allocation28_spill] sm:$0xff] }
 0x133   : > { %1263 = vrot.lane.b32.xlu0 %v14410_v44, %s9516_s10  ;;  %v14424_v44 = vld [vmem:[#allocation29_spill] sm:$0xff] }
 0x134   : > { %v888_v43 = vpop.permute.xlu1 %887 }
 0x135   : > { %975 = vst.msk [vmem:[#allocation4 + $0xd8] sm:$0xff] %vm965_vm4, %v888_v43  ;;  %v894_v51 = vpop.permute.xlu0 %893 }
 0x136   : > { %1261 = vrot.lane.b32.xlu1 %v14411_v46, %s9516_s10  ;;  %978 = vst.msk [vmem:[#allocation4 + $0x120] sm:$0xff] %vm965_vm4, %v894_v51  ;;  %v14425_v46 = vld [vmem:[#allocation30_spill] sm:$0xff] }
 0x137   : > { %1267 = vrot.lane.b32.xlu0 %v14412_v56, %s9516_s10  ;;  %v14426_v56 = vld [vmem:[#allocation31_spill] sm:$0xff] }
 0x138   : > { %v892_v53 = vpop.permute.xlu1 %891 }
 0x139   : > { %977 = vst.msk [vmem:[#allocation4 + $0x108] sm:$0xff] %vm965_vm4, %v892_v53  ;;  %v898_v11 = vpop.permute.xlu0 %897 }
 0x13a   : > { %1265 = vrot.lane.b32.xlu1 %v14413_v63, %s9516_s10  ;;  %980 = vst.msk [vmem:[#allocation4 + $0x150] sm:$0xff] %vm965_vm4, %v898_v11  ;;  %v14427_v63 = vld [vmem:[#allocation32_spill] sm:$0xff] }
 0x13b   : > { %1271 = vrot.lane.b32.xlu0 %v14414_v15, %s9516_s10  ;;  %v14428_v15 = vld [vmem:[#allocation33_spill] sm:$0xff] }
 0x13c   : > { %v896_v14 = vpop.permute.xlu1 %895 }
 0x13d   : > { %979 = vst.msk [vmem:[#allocation4 + $0x138] sm:$0xff] %vm965_vm4, %v896_v14  ;;  %v902_v19 = vpop.permute.xlu0 %901 }
 0x13e   : > { %1269 = vrot.lane.b32.xlu1 %v14415_v18, %s9516_s10  ;;  %982 = vst.msk [vmem:[#allocation4 + $0x180] sm:$0xff] %vm965_vm4, %v902_v19  ;;  %v14429_v18 = vld [vmem:[#allocation34_spill] sm:$0xff] }
 0x13f   : > { %1275 = vrot.lane.b32.xlu0 %v14416_v34, %s9516_s10  ;;  %v14430_v34 = vld [vmem:[#allocation35_spill] sm:$0xff] }
 0x140   : > { %v900_v22 = vpop.permute.xlu1 %899 }
 0x141   : > { %981 = vst.msk [vmem:[#allocation4 + $0x168] sm:$0xff] %vm965_vm4, %v900_v22  ;;  %v906_v49 = vpop.permute.xlu0 %905 }
 0x142   : > { %1273 = vrot.lane.b32.xlu1 %v14417_v23, %s9516_s10  ;;  %984 = vst.msk [vmem:[#allocation4 + $0x1b0] sm:$0xff] %vm965_vm4, %v906_v49  ;;  %v14431_v23 = vld [vmem:[#allocation36_spill] sm:$0xff] }
 0x143   : > { %1279 = vrot.lane.b32.xlu0 %v14418_v33, %s9516_s10  ;;  %v14432_v33 = vld [vmem:[#allocation37_spill] sm:$0xff] }
 0x144   : > { %v904_v45 = vpop.permute.xlu1 %903 }
 0x145   : > { %983 = vst.msk [vmem:[#allocation4 + $0x198] sm:$0xff] %vm965_vm4, %v904_v45  ;;  %v910_v47 = vpop.permute.xlu0 %909 }
 0x146   : > { %1277 = vrot.lane.b32.xlu1 %v14419_v25, %s9516_s10  ;;  %986 = vst.msk [vmem:[#allocation4 + $0x1e0] sm:$0xff] %vm965_vm4, %v910_v47 }
 0x147   : > { %1283 = vrot.lane.b32.xlu0 %v14420_v30, %s9516_s10 }
 0x148   : > { %v908_v26 = vpop.permute.xlu1 %907 }
 0x149   : > { %985 = vst.msk [vmem:[#allocation4 + $0x1c8] sm:$0xff] %vm965_vm4, %v908_v26  ;;  %v914_v32 = vpop.permute.xlu0 %913  ;;  %v10416_v26 = vld [vmem:[#allocation2 + $0x209] sm:$0xff] }
 0x14a   : > { %1281 = vrot.lane.b32.xlu1 %v14421_v31, %s9516_s10  ;;  %988 = vst.msk [vmem:[#allocation4 + $0x210] sm:$0xff] %vm965_vm4, %v914_v32  ;;  %v10427_v31 = vld [vmem:[#allocation2 + $0x211] sm:$0xff] }
 0x14b   : > { %1287 = vrot.lane.b32.xlu0 %v14422_v40, %s9516_s10 }
 0x14c   : > { %v912_v39 = vpop.permute.xlu1 %911 }
 0x14d   : > { %987 = vst.msk [vmem:[#allocation4 + $0x1f8] sm:$0xff] %vm965_vm4, %v912_v39  ;;  %v918_v42 = vpop.permute.xlu0 %917 }
 0x14e   : > { %1285 = vrot.lane.b32.xlu1 %v14423_v41, %s9516_s10  ;;  %990 = vst.msk [vmem:[#allocation4 + $0x240] sm:$0xff] %vm965_vm4, %v918_v42 }
 0x14f   : > { %1291 = vrot.lane.b32.xlu0 %v14424_v44, %s9516_s10 }
 0x150   : > { %v916_v43 = vpop.permute.xlu1 %915 }
 0x151   : > { %989 = vst.msk [vmem:[#allocation4 + $0x228] sm:$0xff] %vm965_vm4, %v916_v43  ;;  %v922_v51 = vpop.permute.xlu0 %921 }
 0x152   : > { %1289 = vrot.lane.b32.xlu1 %v14425_v46, %s9516_s10  ;;  %992 = vst.msk [vmem:[#allocation4 + $0x270] sm:$0xff] %vm965_vm4, %v922_v51  ;;  %v1579_v46 = vld [vmem:[#allocation2 + $0x50] sm:$0xff] }
 0x153   : > { %1295 = vrot.lane.b32.xlu0 %v14426_v56, %s9516_s10  ;;  %v1581_v56 = vld [vmem:[#allocation2 + $0x70] sm:$0xff] }
 0x154   : > { %v920_v53 = vpop.permute.xlu1 %919 }
 0x155   : > { %991 = vst.msk [vmem:[#allocation4 + $0x258] sm:$0xff] %vm965_vm4, %v920_v53  ;;  %v926_v11 = vpop.permute.xlu0 %925 }
 0x156   : > { %1293 = vrot.lane.b32.xlu1 %v14427_v63, %s9516_s10  ;;  %994 = vst.msk [vmem:[#allocation4 + $0x2a0] sm:$0xff] %vm965_vm4, %v926_v11  ;;  %v1584_v11 = vld [vmem:[#allocation2 + $0xa8] sm:$0xff] }
 0x157   : > { %1299 = vrot.lane.b32.xlu0 %v14428_v15, %s9516_s10  ;;  %v1583_v15 = vld [vmem:[#allocation2 + $0x90] sm:$0xff] }
 0x158   : > { %v924_v14 = vpop.permute.xlu1 %923 }
 0x159   : > { %993 = vst.msk [vmem:[#allocation4 + $0x288] sm:$0xff] %vm965_vm4, %v924_v14  ;;  %v930_v19 = vpop.permute.xlu0 %929 }
 0x15a   : > { %1297 = vrot.lane.b32.xlu1 %v14429_v18, %s9516_s10  ;;  %996 = vst.msk [vmem:[#allocation4 + $0x2d0] sm:$0xff] %vm965_vm4, %v930_v19  ;;  %v1586_v19 = vld [vmem:[#allocation2 + $0xc8] sm:$0xff] }
 0x15b   : > { %1303 = vrot.lane.b32.xlu0 %v14430_v34, %s9516_s10 }
 0x15c   : > { %v928_v22 = vpop.permute.xlu1 %927 }
 0x15d   : > { %995 = vst.msk [vmem:[#allocation4 + $0x2b8] sm:$0xff] %vm965_vm4, %v928_v22  ;;  %v1063_v49 = vpop.permute.xlu0 %1062  ;;  %v2000_v22 = vld [vmem:[%s14315_s1 + $0x20] sm:$0xf] }
 0x15e   : > { %1301 = vrot.lane.b32.xlu1 %v14431_v23, %s9516_s10  ;;  %1159 = vst.msk [vmem:[#allocation4] sm:$0xff] %vm1158_vm5, %v1063_v49  ;;  %9084 = vmatprep.subr.msk.mxu0 %vm2103_vm7, %v2000_v22  ;;  %v1585_v23 = vld [vmem:[#allocation2 + $0xb0] sm:$0xff] }
 0x15f   : > { %1307 = vrot.lane.b32.xlu0 %v10104_v36, %s9516_s10  ;;  %9085 = vmatpush3.msk.msra.mxu0 %vm2103_vm7, %v2000_v22 }
 0x160   : > { %v932_v45 = vpop.permute.xlu1 %931 }
 0x161   : > { %997 = vst.msk [vmem:[#allocation4 + $0x2e8] sm:$0xff] %vm965_vm4, %v932_v45  ;;  %v1067_v25 = vpop.permute.xlu0 %1066  ;;  %v1588_v45 = vld [vmem:[#allocation2 + $0xe8] sm:$0xff] }
 0x162   : > { %1305 = vrot.lane.b32.xlu1 %v14432_v33, %s9516_s10  ;;  %1161 = vst.msk [vmem:[#allocation4 + $0x30] sm:$0xff] %vm1158_vm5, %v1067_v25  ;;  %v1999_v33 = vld [vmem:[%s14315_s1 + $0x18] sm:$0xff]  ;;  %v1998_v25 = vld [vmem:[%s14315_s1 + $0x10] sm:$0xff] }
 0x163   : > { %1311 = vrot.lane.b32.xlu0 %v10114_v37, %s9516_s10  ;;  %9086 = vmatprep.subr.mxu0 %v1999_v33 }
 0x164   : > { %v1065_v47 = vpop.permute.xlu1 %1064  ;;  %9087 = vmatpush3.msra.mxu0 %v1999_v33 }
 0x165   : > { %1160 = vst.msk [vmem:[#allocation4 + $0x18] sm:$0xff] %vm1158_vm5, %v1065_v47  ;;  %v1071_v36 = vpop.permute.xlu0 %1070  ;;  %9088 = vmatprep.subr.mxu0 %v1998_v25 }
 0x166   : > { %1309 = vrot.lane.b32.xlu1 %v10119_v0, %s9516_s10  ;;  %1163 = vst.msk [vmem:[#allocation4 + $0x60] sm:$0xff] %vm1158_vm5, %v1071_v36  ;;  %v1587_v36 = vld [vmem:[#allocation2 + $0xd0] sm:$0xff]  ;;  %9089 = vmatpush3.msra.mxu0 %v1998_v25 }
 0x167   : > { %1315 = vrot.lane.b32.xlu0 %v10416_v26, %s9516_s10  ;;  %v1779_v25 = vld [vmem:[#allocation2 + $0xc9] sm:$0xff] }
 0x168   : > { %v1069_v30 = vpop.permute.xlu1 %1068 }
 0x169   : > { %1162 = vst.msk [vmem:[#allocation4 + $0x48] sm:$0xff] %vm1158_vm5, %v1069_v30  ;;  %v1075_v37 = vpop.permute.xlu0 %1074 }
 0x16a   : > { %1313 = vrot.lane.b32.xlu1 %v10127_v38, %s9516_s10  ;;  %1165 = vst.msk [vmem:[#allocation4 + $0x90] sm:$0xff] %vm1158_vm5, %v1075_v37  ;;  %v1590_v37 = vld [vmem:[#allocation2 + $0x108] sm:$0xff] }
 0x16b   : > { %1449 = vrot.lane.b32.xlu0 %v9815_v50, %s9517_s11 }
 0x16c   : > { %v1073_v32 = vpop.permute.xlu1 %1072 }
 0x16d   : > { %1164 = vst.msk [vmem:[#allocation4 + $0x78] sm:$0xff] %vm1158_vm5, %v1073_v32  ;;  %v1079_v0 = vpop.permute.xlu0 %1078  ;;  %v1997_v32 = vld [vmem:[%s14315_s1 + $0x8] sm:$0xff] }
 0x16e   : > { %1317 = vrot.lane.b32.xlu1 %v10427_v31, %s9516_s10  ;;  %1167 = vst.msk [vmem:[#allocation4 + $0xc0] sm:$0xff] %vm1158_vm5, %v1079_v0  ;;  %v1996_v0 = vld [vmem:[%s14315_s1] sm:$0xff]  ;;  %9090 = vmatprep.subr.mxu0 %v1997_v32  ;;  %s9520_s10 = smov 64  }
 0x16f   : > { %1453 = vrot.lane.b32.xlu0 %v9831_v54, %s9517_s11  ;;  %9091 = vmatpush3.msra.mxu0 %v1997_v32 }
 0x170   : > { %v1077_v39 = vpop.permute.xlu1 %1076  ;;  %9092 = vmatprep.subr.mxu0 %v1996_v0 }
 0x171   : > { %1166 = vst.msk [vmem:[#allocation4 + $0xa8] sm:$0xff] %vm1158_vm5, %v1077_v39  ;;  %v1083_v38 = vpop.permute.xlu0 %1082  ;;  %9093 = vmatpush3.msra.mxu0 %v1996_v0  ;;  %v1781_v0 = vld [vmem:[#allocation2 + $0xe9] sm:$0xff] }
 0x172   : > { %1451 = vrot.lane.b32.xlu1 %v9823_v52, %s9517_s11  ;;  %1169 = vst.msk [vmem:[#allocation4 + $0xf0] sm:$0xff] %vm1158_vm5, %v1083_v38  ;;  %v1589_v38 = vld [vmem:[#allocation2 + $0xf0] sm:$0xff] }
 0x173   : > { %1457 = vrot.lane.b32.xlu0 %v9841_v57, %s9517_s11 }
 0x174   : > { %v1081_v50 = vpop.permute.xlu1 %1080 }
 0x175   : > { %1168 = vst.msk [vmem:[#allocation4 + $0xd8] sm:$0xff] %vm1158_vm5, %v1081_v50  ;;  %v1087_v40 = vpop.permute.xlu0 %1086 }
 0x176   : > { %1455 = vrot.lane.b32.xlu1 %v9833_v55, %s9517_s11  ;;  %1171 = vst.msk [vmem:[#allocation4 + $0x120] sm:$0xff] %vm1158_vm5, %v1087_v40  ;;  %v1772_v40 = vld [vmem:[#allocation2 + $0x51] sm:$0xff] }
 0x177   : > { %1461 = vrot.lane.b32.xlu0 %v9845_v59, %s9517_s11 }
 0x178   : > { %v1085_v54 = vpop.permute.xlu1 %1084 }
 0x179   : > { %1170 = vst.msk [vmem:[#allocation4 + $0x108] sm:$0xff] %vm1158_vm5, %v1085_v54  ;;  %v1091_v52 = vpop.permute.xlu0 %1090 }
 0x17a   : > { %1459 = vrot.lane.b32.xlu1 %v9843_v58, %s9517_s11  ;;  %1173 = vst.msk [vmem:[#allocation4 + $0x150] sm:$0xff] %vm1158_vm5, %v1091_v52  ;;  %v14433_v52 = vmov 0.0  }
 0x17b   : > { %1465 = vrot.lane.b32.xlu0 %v9857_v61, %s9517_s11  ;;  %3978 = vmatprep.subr.mxu0 %v14433_v52  ;;  %244 = vst.msk [vmem:[#allocation3] sm:$0xff] %vm243_vm10, %v14433_v52  ;;  %245 = vst.msk [vmem:[#allocation3 + $0x8] sm:$0xff] %vm243_vm10, %v14433_v52 }
 0x17c   : > { %v1089_v57 = vpop.permute.xlu1 %1088  ;;  %246 = vst.msk [vmem:[#allocation3 + $0x10] sm:$0xff] %vm243_vm10, %v14433_v52  ;;  %250 = vst.msk [vmem:[#allocation3 + $0x220] sm:$0xff] %vm243_vm10, %v14433_v52 }
 0x17d   : > { %1172 = vst.msk [vmem:[#allocation4 + $0x138] sm:$0xff] %vm1158_vm5, %v1089_v57  ;;  %v1095_v55 = vpop.permute.xlu0 %1094  ;;  %v1771_v57 = vld [vmem:[#allocation2 + $0x49] sm:$0xff] }
 0x17e   : > { %1463 = vrot.lane.b32.xlu1 %v9855_v60, %s9517_s11  ;;  %1175 = vst.msk [vmem:[#allocation4 + $0x180] sm:$0xff] %vm1158_vm5, %v1095_v55 }
 0x17f   : > { %1469 = vrot.lane.b32.xlu0 %v9869_v1, %s9517_s11  ;;  %251 = vst.msk [vmem:[#allocation3 + $0x228] sm:$0xff] %vm243_vm10, %v14433_v52  ;;  %252 = vst.msk [vmem:[#allocation3 + $0x230] sm:$0xff] %vm243_vm10, %v14433_v52 }
 0x180   : > { %v1093_v59 = vpop.permute.xlu1 %1092  ;;  %274 = vst.msk [vmem:[#allocation3 + $0x58] sm:$0x1] %vm247_vm13, %v14433_v52  ;;  %248 = vst.msk [vmem:[#allocation3 + $0x18] sm:$0x1] %vm247_vm13, %v14433_v52 }
 0x181   : > { %1174 = vst.msk [vmem:[#allocation4 + $0x168] sm:$0xff] %vm1158_vm5, %v1093_v59  ;;  %v1099_v58 = vpop.permute.xlu0 %1098  ;;  %v1774_v59 = vld [vmem:[#allocation2 + $0x71] sm:$0xff] }
 0x182   : > { %1467 = vrot.lane.b32.xlu1 %v9859_v62, %s9517_s11  ;;  %1177 = vst.msk [vmem:[#allocation4 + $0x1b0] sm:$0xff] %vm1158_vm5, %v1099_v58 }
 0x183   : > { %1473 = vrot.lane.b32.xlu0 %v9873_v3, %s9517_s11  ;;  %253 = vst.msk [vmem:[#allocation3 + $0x238] sm:$0x1] %vm247_vm13, %v14433_v52  ;;  %254 = vst.msk [vmem:[#allocation3 + $0x7] sm:$0x1] %vm247_vm13, %v14433_v52 }
 0x184   : > { %v1097_v61 = vpop.permute.xlu1 %1096  ;;  %255 = vst.msk [vmem:[#allocation3 + $0x27] sm:$0x1] %vm247_vm13, %v14433_v52  ;;  %256 = vst.msk [vmem:[#allocation3 + $0x47] sm:$0x1] %vm247_vm13, %v14433_v52 }
 0x185   : > { %1176 = vst.msk [vmem:[#allocation4 + $0x198] sm:$0xff] %vm1158_vm5, %v1097_v61  ;;  %v1103_v60 = vpop.permute.xlu0 %1102  ;;  %v1773_v61 = vld [vmem:[#allocation2 + $0x69] sm:$0xff] }
 0x186   : > { %1471 = vrot.lane.b32.xlu1 %v9871_v2, %s9517_s11  ;;  %1179 = vst.msk [vmem:[#allocation4 + $0x1e0] sm:$0xff] %vm1158_vm5, %v1103_v60 }
 0x187   : > { %1477 = vrot.lane.b32.xlu0 %v9885_v5, %s9517_s11  ;;  %257 = vst.msk [vmem:[#allocation3 + $0x67] sm:$0x1] %vm247_vm13, %v14433_v52  ;;  %258 = vst.msk [vmem:[#allocation3 + $0x87] sm:$0x1] %vm247_vm13, %v14433_v52 }
 0x188   : > { %v1101_v1 = vpop.permute.xlu1 %1100  ;;  %259 = vst.msk [vmem:[#allocation3 + $0xa7] sm:$0x1] %vm247_vm13, %v14433_v52  ;;  %260 = vst.msk [vmem:[#allocation3 + $0xc7] sm:$0x1] %vm247_vm13, %v14433_v52 }
 0x189   : > { %1178 = vst.msk [vmem:[#allocation4 + $0x1c8] sm:$0xff] %vm1158_vm5, %v1101_v1  ;;  %v1107_v62 = vpop.permute.xlu0 %1106  ;;  %v1592_v1 = vld [vmem:[#allocation2 + $0x128] sm:$0xff] }
 0x18a   : > { %1475 = vrot.lane.b32.xlu1 %v9883_v4, %s9517_s11  ;;  %1181 = vst.msk [vmem:[#allocation4 + $0x210] sm:$0xff] %vm1158_vm5, %v1107_v62 }
 0x18b   : > { %1481 = vrot.lane.b32.xlu0 %v9895_v7, %s9517_s11  ;;  %261 = vst.msk [vmem:[#allocation3 + $0xe7] sm:$0x1] %vm247_vm13, %v14433_v52  ;;  %262 = vst.msk [vmem:[#allocation3 + $0x107] sm:$0x1] %vm247_vm13, %v14433_v52 }
 0x18c   : > { %v1105_v3 = vpop.permute.xlu1 %1104  ;;  %263 = vst.msk [vmem:[#allocation3 + $0x127] sm:$0x1] %vm247_vm13, %v14433_v52  ;;  %264 = vst.msk [vmem:[#allocation3 + $0x147] sm:$0x1] %vm247_vm13, %v14433_v52 }
 0x18d   : > { %1180 = vst.msk [vmem:[#allocation4 + $0x1f8] sm:$0xff] %vm1158_vm5, %v1105_v3  ;;  %v1111_v2 = vpop.permute.xlu0 %1110  ;;  %v1591_v3 = vld [vmem:[#allocation2 + $0x110] sm:$0xff] }
 0x18e   : > { %1479 = vrot.lane.b32.xlu1 %v9887_v6, %s9517_s11  ;;  %1183 = vst.msk [vmem:[#allocation4 + $0x240] sm:$0xff] %vm1158_vm5, %v1111_v2 }
 0x18f   : > { %1485 = vrot.lane.b32.xlu0 %v9899_v9, %s9517_s11  ;;  %265 = vst.msk [vmem:[#allocation3 + $0x167] sm:$0x1] %vm247_vm13, %v14433_v52  ;;  %266 = vst.msk [vmem:[#allocation3 + $0x187] sm:$0x1] %vm247_vm13, %v14433_v52 }
 0x190   : > { %v1109_v5 = vpop.permute.xlu1 %1108  ;;  %267 = vst.msk [vmem:[#allocation3 + $0x1a7] sm:$0x1] %vm247_vm13, %v14433_v52  ;;  %268 = vst.msk [vmem:[#allocation3 + $0x1c7] sm:$0x1] %vm247_vm13, %v14433_v52 }
 0x191   : > { %1182 = vst.msk [vmem:[#allocation4 + $0x228] sm:$0xff] %vm1158_vm5, %v1109_v5  ;;  %v1115_v4 = vpop.permute.xlu0 %1114  ;;  %v1776_v5 = vld [vmem:[#allocation2 + $0x91] sm:$0xff] }
 0x192   : > { %1483 = vrot.lane.b32.xlu1 %v9897_v8, %s9517_s11  ;;  %1185 = vst.msk [vmem:[#allocation4 + $0x270] sm:$0xff] %vm1158_vm5, %v1115_v4 }
 0x193   : > { %1489 = vrot.lane.b32.xlu0 %v9915_v12, %s9517_s11  ;;  %269 = vst.msk [vmem:[#allocation3 + $0x1e7] sm:$0x1] %vm247_vm13, %v14433_v52  ;;  %270 = vst.msk [vmem:[#allocation3 + $0x207] sm:$0x1] %vm247_vm13, %v14433_v52 }
 0x194   : > { %v1113_v7 = vpop.permute.xlu1 %1112  ;;  %271 = vst.msk [vmem:[#allocation3 + $0x227] sm:$0x1] %vm247_vm13, %v14433_v52  ;;  %273 = vst.msk [vmem:[#allocation3 + $0x38] sm:$0x1] %vm247_vm13, %v14433_v52 }
 0x195   : > { %1184 = vst.msk [vmem:[#allocation4 + $0x258] sm:$0xff] %vm1158_vm5, %v1113_v7  ;;  %v1119_v6 = vpop.permute.xlu0 %1118  ;;  %v1775_v7 = vld [vmem:[#allocation2 + $0x89] sm:$0xff] }
 0x196   : > { %1487 = vrot.lane.b32.xlu1 %v9909_v10, %s9517_s11  ;;  %1187 = vst.msk [vmem:[#allocation4 + $0x2a0] sm:$0xff] %vm1158_vm5, %v1119_v6 }
 0x197   : > { %1493 = vrot.lane.b32.xlu0 %v9931_v16, %s9517_s11  ;;  %275 = vst.msk [vmem:[#allocation3 + $0x78] sm:$0x1] %vm247_vm13, %v14433_v52  ;;  %276 = vst.msk [vmem:[#allocation3 + $0x98] sm:$0x1] %vm247_vm13, %v14433_v52 }
 0x198   : > { %v1117_v9 = vpop.permute.xlu1 %1116  ;;  %277 = vst.msk [vmem:[#allocation3 + $0xb8] sm:$0x1] %vm247_vm13, %v14433_v52  ;;  %278 = vst.msk [vmem:[#allocation3 + $0xd8] sm:$0x1] %vm247_vm13, %v14433_v52 }
 0x199   : > { %1186 = vst.msk [vmem:[#allocation4 + $0x288] sm:$0xff] %vm1158_vm5, %v1117_v9  ;;  %v1123_v8 = vpop.permute.xlu0 %1122  ;;  %v1594_v9 = vld [vmem:[#allocation2 + $0x148] sm:$0xff] }
 0x19a   : > { %1491 = vrot.lane.b32.xlu1 %v9921_v13, %s9517_s11  ;;  %1189 = vst.msk [vmem:[#allocation4 + $0x2d0] sm:$0xff] %vm1158_vm5, %v1123_v8 }
 0x19b   : > { %1497 = vrot.lane.b32.xlu0 %v9947_v20, %s9517_s11  ;;  %279 = vst.msk [vmem:[#allocation3 + $0xf8] sm:$0x1] %vm247_vm13, %v14433_v52  ;;  %280 = vst.msk [vmem:[#allocation3 + $0x118] sm:$0x1] %vm247_vm13, %v14433_v52 }
 0x19c   : > { %v1121_v12 = vpop.permute.xlu1 %1120  ;;  %281 = vst.msk [vmem:[#allocation3 + $0x138] sm:$0x1] %vm247_vm13, %v14433_v52  ;;  %282 = vst.msk [vmem:[#allocation3 + $0x158] sm:$0x1] %vm247_vm13, %v14433_v52 }
 0x19d   : > { %1188 = vst.msk [vmem:[#allocation4 + $0x2b8] sm:$0xff] %vm1158_vm5, %v1121_v12  ;;  %v1256_v10 = vpop.permute.xlu0 %1255  ;;  %v1593_v12 = vld [vmem:[#allocation2 + $0x130] sm:$0xff] }
 0x19e   : > { %1495 = vrot.lane.b32.xlu1 %v9937_v17, %s9517_s11  ;;  %1352 = vst.msk [vmem:[#allocation4] sm:$0xff] %vm1351_vm6, %v1256_v10  ;;  %v1415_v17 = vld [vmem:[#allocation2 + $0x227] sm:$0xff] }
 0x19f   : > { %1501 = vrot.lane.b32.xlu0 %v9963_v24, %s9517_s11  ;;  %283 = vst.msk [vmem:[#allocation3 + $0x178] sm:$0x1] %vm247_vm13, %v14433_v52  ;;  %284 = vst.msk [vmem:[#allocation3 + $0x198] sm:$0x1] %vm247_vm13, %v14433_v52 }
 0x1a0   : > { %v1125_v16 = vpop.permute.xlu1 %1124  ;;  %285 = vst.msk [vmem:[#allocation3 + $0x1b8] sm:$0x1] %vm247_vm13, %v14433_v52  ;;  %286 = vst.msk [vmem:[#allocation3 + $0x1d8] sm:$0x1] %vm247_vm13, %v14433_v52 }
 0x1a1   : > { %1190 = vst.msk [vmem:[#allocation4 + $0x2e8] sm:$0xff] %vm1158_vm5, %v1125_v16  ;;  %v1260_v13 = vpop.permute.xlu0 %1259  ;;  %v1778_v16 = vld [vmem:[#allocation2 + $0xb1] sm:$0xff] }
 0x1a2   : > { %1499 = vrot.lane.b32.xlu1 %v9953_v21, %s9517_s11  ;;  %1354 = vst.msk [vmem:[#allocation4 + $0x30] sm:$0xff] %vm1351_vm6, %v1260_v13  ;;  %v1578_v21 = vld [vmem:[#allocation2 + $0x48] sm:$0xff] }
 0x1a3   : > { %1505 = vrot.lane.b32.xlu0 %v10216_v48, %s9517_s11  ;;  %v1416_v48 = vld [vmem:[#allocation2 + $0x22f] sm:$0xff]  ;;  %287 = vst.msk [vmem:[#allocation3 + $0x1f8] sm:$0x1] %vm247_vm13, %v14433_v52  ;;  %288 = vst.msk [vmem:[#allocation3 + $0x218] sm:$0x1] %vm247_vm13, %v14433_v52 }
 0x1a4   : > { %v1258_v20 = vpop.permute.xlu1 %1257  ;;  %272 = vst.msk [vmem:[#allocation3 + $0x18] sm:$0x1] %vm247_vm13, %v14433_v52  ;;  %289 = vst.msk [vmem:[#allocation3 + $0x238] sm:$0x1] %vm247_vm13, %v14433_v52 }
 0x1a5   : > { %1353 = vst.msk [vmem:[#allocation4 + $0x18] sm:$0xff] %vm1351_vm6, %v1258_v20  ;;  %v1264_v41 = vpop.permute.xlu0 %1263  ;;  %v1777_v20 = vld [vmem:[#allocation2 + $0xa9] sm:$0xff] }
 0x1a6   : > { %1503 = vrot.lane.b32.xlu1 %v9969_v28, %s9517_s11  ;;  %1356 = vst.msk [vmem:[#allocation4 + $0x60] sm:$0xff] %vm1351_vm6, %v1264_v41  ;;  %v1580_v28 = vld [vmem:[#allocation2 + $0x68] sm:$0xff] }
 0x1a7   : > { %1509 = vrot.lane.b32.xlu0 %v1415_v17, %s9517_s11  ;;  %v1596_v41 = vld [vmem:[#allocation2 + $0x168] sm:$0xff] }
 0x1a8   : > { %v1262_v24 = vpop.permute.xlu1 %1261 }
 0x1a9   : > { %1355 = vst.msk [vmem:[#allocation4 + $0x48] sm:$0xff] %vm1351_vm6, %v1262_v24  ;;  %v1268_v42 = vpop.permute.xlu0 %1267 }
 0x1aa   : > { %1507 = vrot.lane.b32.xlu1 %v10227_v35, %s9517_s11  ;;  %1358 = vst.msk [vmem:[#allocation4 + $0x90] sm:$0xff] %vm1351_vm6, %v1268_v42  ;;  %v1582_v35 = vld [vmem:[#allocation2 + $0x88] sm:$0xff] }
 0x1ab   : > { %1642 = vrot.lane.b32.xlu0 %v1578_v21, %s9518_s12  ;;  %v1595_v21 = vld [vmem:[#allocation2 + $0x150] sm:$0xff] }
 0x1ac   : > { %v1266_v43 = vpop.permute.xlu1 %1265 }
 0x1ad   : > { %1357 = vst.msk [vmem:[#allocation4 + $0x78] sm:$0xff] %vm1351_vm6, %v1266_v43  ;;  %v1272_v44 = vpop.permute.xlu0 %1271 }
 0x1ae   : > { %1511 = vrot.lane.b32.xlu1 %v1416_v48, %s9517_s11  ;;  %1360 = vst.msk [vmem:[#allocation4 + $0xc0] sm:$0xff] %vm1351_vm6, %v1272_v44  ;;  %v1598_v48 = vld [vmem:[#allocation2 + $0x188] sm:$0xff]  ;;  %s9521_s11 = smov 96  }
 0x1af   : > { %1646 = vrot.lane.b32.xlu0 %v1580_v28, %s9518_s12  ;;  %v1597_v28 = vld [vmem:[#allocation2 + $0x170] sm:$0xff] }
 0x1b0   : > { %v1270_v51 = vpop.permute.xlu1 %1269 }
 0x1b1   : > { %1359 = vst.msk [vmem:[#allocation4 + $0xa8] sm:$0xff] %vm1351_vm6, %v1270_v51  ;;  %v1276_v53 = vpop.permute.xlu0 %1275 }
 0x1b2   : > { %1644 = vrot.lane.b32.xlu1 %v1579_v46, %s9518_s12  ;;  %1362 = vst.msk [vmem:[#allocation4 + $0xf0] sm:$0xff] %vm1351_vm6, %v1276_v53  ;;  %v1600_v46 = vld [vmem:[#allocation2 + $0x1a8] sm:$0xff] }
 0x1b3   : > { %1650 = vrot.lane.b32.xlu0 %v1582_v35, %s9518_s12  ;;  %v1599_v35 = vld [vmem:[#allocation2 + $0x190] sm:$0xff] }
 0x1b4   : > { %v1274_v63 = vpop.permute.xlu1 %1273 }
 0x1b5   : > { %1361 = vst.msk [vmem:[#allocation4 + $0xd8] sm:$0xff] %vm1351_vm6, %v1274_v63  ;;  %v1280_v14 = vpop.permute.xlu0 %1279 }
 0x1b6   : > { %1648 = vrot.lane.b32.xlu1 %v1581_v56, %s9518_s12  ;;  %1364 = vst.msk [vmem:[#allocation4 + $0x120] sm:$0xff] %vm1351_vm6, %v1280_v14  ;;  %v1602_v56 = vld [vmem:[#allocation2 + $0x1c8] sm:$0xff] }
 0x1b7   : > { %1654 = vrot.lane.b32.xlu0 %v1584_v11, %s9518_s12  ;;  %v1601_v11 = vld [vmem:[#allocation2 + $0x1b0] sm:$0xff] }
 0x1b8   : > { %v1278_v18 = vpop.permute.xlu1 %1277 }
 0x1b9   : > { %1363 = vst.msk [vmem:[#allocation4 + $0x108] sm:$0xff] %vm1351_vm6, %v1278_v18  ;;  %v1284_v34 = vpop.permute.xlu0 %1283 }
 0x1ba   : > { %1652 = vrot.lane.b32.xlu1 %v1583_v15, %s9518_s12  ;;  %1366 = vst.msk [vmem:[#allocation4 + $0x150] sm:$0xff] %vm1351_vm6, %v1284_v34  ;;  %v1604_v15 = vld [vmem:[#allocation2 + $0x1e8] sm:$0xff] }
 0x1bb   : > { %1658 = vrot.lane.b32.xlu0 %v1586_v19, %s9518_s12  ;;  %v1603_v19 = vld [vmem:[#allocation2 + $0x1d0] sm:$0xff] }
 0x1bc   : > { %v1282_v49 = vpop.permute.xlu1 %1281 }
 0x1bd   : > { %1365 = vst.msk [vmem:[#allocation4 + $0x138] sm:$0xff] %vm1351_vm6, %v1282_v49  ;;  %v1288_v47 = vpop.permute.xlu0 %1287 }
 0x1be   : > { %1656 = vrot.lane.b32.xlu1 %v1585_v23, %s9518_s12  ;;  %1368 = vst.msk [vmem:[#allocation4 + $0x180] sm:$0xff] %vm1351_vm6, %v1288_v47  ;;  %v1605_v23 = vld [vmem:[#allocation2 + $0x1f0] sm:$0xff] }
 0x1bf   : > { %1662 = vrot.lane.b32.xlu0 %v1588_v45, %s9518_s12  ;;  %v1780_v45 = vld [vmem:[#allocation2 + $0xd1] sm:$0xff] }
 0x1c0   : > { %v1286_v30 = vpop.permute.xlu1 %1285 }
 0x1c1   : > { %1367 = vst.msk [vmem:[#allocation4 + $0x168] sm:$0xff] %vm1351_vm6, %v1286_v30  ;;  %v1292_v39 = vpop.permute.xlu0 %1291 }
 0x1c2   : > { %1660 = vrot.lane.b32.xlu1 %v1587_v36, %s9518_s12  ;;  %1370 = vst.msk [vmem:[#allocation4 + $0x1b0] sm:$0xff] %vm1351_vm6, %v1292_v39  ;;  %v1608_v36 = vld [vmem:[#allocation2 + $0x228] sm:$0xff] }
 0x1c3   : > { %1666 = vrot.lane.b32.xlu0 %v1590_v37, %s9518_s12  ;;  %v1782_v37 = vld [vmem:[#allocation2 + $0xf1] sm:$0xff] }
 0x1c4   : > { %v1290_v50 = vpop.permute.xlu1 %1289 }
 0x1c5   : > { %1369 = vst.msk [vmem:[#allocation4 + $0x198] sm:$0xff] %vm1351_vm6, %v1290_v50  ;;  %v1296_v54 = vpop.permute.xlu0 %1295 }
 0x1c6   : > { %1664 = vrot.lane.b32.xlu1 %v1589_v38, %s9518_s12  ;;  %1372 = vst.msk [vmem:[#allocation4 + $0x1e0] sm:$0xff] %vm1351_vm6, %v1296_v54  ;;  %v1783_v38 = vld [vmem:[#allocation2 + $0x109] sm:$0xff] }
 0x1c7   : > { %1837 = vrot.lane.b32.xlu0 %v1772_v40, %s9519_s6  ;;  %v1609_v40 = vld [vmem:[#allocation2 + $0x230] sm:$0xff] }
 0x1c8   : > { %v1294_v55 = vpop.permute.xlu1 %1293 }
 0x1c9   : > { %1371 = vst.msk [vmem:[#allocation4 + $0x1c8] sm:$0xff] %vm1351_vm6, %v1294_v55  ;;  %v1300_v58 = vpop.permute.xlu0 %1299  ;;  %v1784_v55 = vld [vmem:[#allocation2 + $0x111] sm:$0xff] }
 0x1ca   : > { %1835 = vrot.lane.b32.xlu1 %v1771_v57, %s9519_s6  ;;  %1374 = vst.msk [vmem:[#allocation4 + $0x210] sm:$0xff] %vm1351_vm6, %v1300_v58  ;;  %v1787_v58 = vld [vmem:[#allocation2 + $0x149] sm:$0xff] }
 0x1cb   : > { %1841 = vrot.lane.b32.xlu0 %v1774_v59, %s9519_s6 }
 0x1cc   : > { %v1298_v60 = vpop.permute.xlu1 %1297 }
 0x1cd   : > { %1373 = vst.msk [vmem:[#allocation4 + $0x1f8] sm:$0xff] %vm1351_vm6, %v1298_v60  ;;  %v1304_v62 = vpop.permute.xlu0 %1303  ;;  %v1786_v60 = vld [vmem:[#allocation2 + $0x131] sm:$0xff] }
 0x1ce   : > { %1839 = vrot.lane.b32.xlu1 %v1773_v61, %s9519_s6  ;;  %1376 = vst.msk [vmem:[#allocation4 + $0x240] sm:$0xff] %vm1351_vm6, %v1304_v62  ;;  %v1789_v62 = vld [vmem:[#allocation2 + $0x169] sm:$0xff] }
 0x1cf   : > { %1670 = vrot.lane.b32.xlu0 %v1592_v1, %s9518_s12 }
 0x1d0   : > { %v1302_v2 = vpop.permute.xlu1 %1301 }
 0x1d1   : > { %1375 = vst.msk [vmem:[#allocation4 + $0x228] sm:$0xff] %vm1351_vm6, %v1302_v2  ;;  %v1308_v4 = vpop.permute.xlu0 %1307  ;;  %v1788_v2 = vld [vmem:[#allocation2 + $0x151] sm:$0xff] }
 0x1d2   : > { %1668 = vrot.lane.b32.xlu1 %v1591_v3, %s9518_s12  ;;  %1378 = vst.msk [vmem:[#allocation4 + $0x270] sm:$0xff] %vm1351_vm6, %v1308_v4  ;;  %v1791_v4 = vld [vmem:[#allocation2 + $0x189] sm:$0xff] }
 0x1d3   : > { %1845 = vrot.lane.b32.xlu0 %v1776_v5, %s9519_s6 }
 0x1d4   : > { %v1306_v6 = vpop.permute.xlu1 %1305 }
 0x1d5   : > { %1377 = vst.msk [vmem:[#allocation4 + $0x258] sm:$0xff] %vm1351_vm6, %v1306_v6  ;;  %v1312_v8 = vpop.permute.xlu0 %1311  ;;  %v1790_v6 = vld [vmem:[#allocation2 + $0x171] sm:$0xff] }
 0x1d6   : > { %1843 = vrot.lane.b32.xlu1 %v1775_v7, %s9519_s6  ;;  %1380 = vst.msk [vmem:[#allocation4 + $0x2a0] sm:$0xff] %vm1351_vm6, %v1312_v8  ;;  %v1793_v8 = vld [vmem:[#allocation2 + $0x1a9] sm:$0xff] }
 0x1d7   : > { %1674 = vrot.lane.b32.xlu0 %v1594_v9, %s9518_s12 }
 0x1d8   : > { %v1310_v10 = vpop.permute.xlu1 %1309 }
 0x1d9   : > { %1379 = vst.msk [vmem:[#allocation4 + $0x288] sm:$0xff] %vm1351_vm6, %v1310_v10  ;;  %v1316_v13 = vpop.permute.xlu0 %1315  ;;  %v1792_v10 = vld [vmem:[#allocation2 + $0x191] sm:$0xff] }
 0x1da   : > { %1672 = vrot.lane.b32.xlu1 %v1593_v12, %s9518_s12  ;;  %1382 = vst.msk [vmem:[#allocation4 + $0x2d0] sm:$0xff] %vm1351_vm6, %v1316_v13  ;;  %v1795_v13 = vld [vmem:[#allocation2 + $0x1c9] sm:$0xff] }
 0x1db   : > { %1849 = vrot.lane.b32.xlu0 %v1778_v16, %s9519_s6 }
 0x1dc   : > { %v1314_v17 = vpop.permute.xlu1 %1313 }
 0x1dd   : > { %1381 = vst.msk [vmem:[#allocation4 + $0x2b8] sm:$0xff] %vm1351_vm6, %v1314_v17  ;;  %v1450_v24 = vpop.permute.xlu0 %1449  ;;  %v1794_v17 = vld [vmem:[#allocation2 + $0x1b1] sm:$0xff] }
 0x1de   : > { %1847 = vrot.lane.b32.xlu1 %v1777_v20, %s9519_s6  ;;  %1546 = vst.msk [vmem:[#allocation4] sm:$0xff] %vm1545_vm8, %v1450_v24  ;;  %v1797_v24 = vld [vmem:[#allocation2 + $0x1e9] sm:$0xff] }
 0x1df   : > { %1678 = vrot.lane.b32.xlu0 %v1596_v41, %s9518_s12 }
 0x1e0   : > { %v1318_v42 = vpop.permute.xlu1 %1317 }
 0x1e1   : > { %1383 = vst.msk [vmem:[#allocation4 + $0x2e8] sm:$0xff] %vm1351_vm6, %v1318_v42  ;;  %v1454_v43 = vpop.permute.xlu0 %1453  ;;  %v1796_v42 = vld [vmem:[#allocation2 + $0x1d1] sm:$0xff] }
 0x1e2   : > { %1676 = vrot.lane.b32.xlu1 %v1595_v21, %s9518_s12  ;;  %1548 = vst.msk [vmem:[#allocation4 + $0x30] sm:$0xff] %vm1545_vm8, %v1454_v43 }
 0x1e3   : > { %1682 = vrot.lane.b32.xlu0 %v1598_v48, %s9518_s12 }
 0x1e4   : > { %v1452_v44 = vpop.permute.xlu1 %1451 }
 0x1e5   : > { %1547 = vst.msk [vmem:[#allocation4 + $0x18] sm:$0xff] %vm1545_vm8, %v1452_v44  ;;  %v1458_v51 = vpop.permute.xlu0 %1457 }
 0x1e6   : > { %1680 = vrot.lane.b32.xlu1 %v1597_v28, %s9518_s12  ;;  %1550 = vst.msk [vmem:[#allocation4 + $0x60] sm:$0xff] %vm1545_vm8, %v1458_v51  ;;  %v1798_v28 = vld [vmem:[#allocation2 + $0x1f1] sm:$0xff] }
 0x1e7   : > { %1686 = vrot.lane.b32.xlu0 %v1600_v46, %s9518_s12  ;;  %v1801_v46 = vld [vmem:[#allocation2 + $0x229] sm:$0xff] }
 0x1e8   : > { %v1456_v53 = vpop.permute.xlu1 %1455 }
 0x1e9   : > { %1549 = vst.msk [vmem:[#allocation4 + $0x48] sm:$0xff] %vm1545_vm8, %v1456_v53  ;;  %v1462_v63 = vpop.permute.xlu0 %1461  ;;  %v1802_v53 = vld [vmem:[#allocation2 + $0x231] sm:$0xff] }
 0x1ea   : > { %1684 = vrot.lane.b32.xlu1 %v1599_v35, %s9518_s12  ;;  %1552 = vst.msk [vmem:[#allocation4 + $0x90] sm:$0xff] %vm1545_vm8, %v1462_v63 }
 0x1eb   : > { %1690 = vrot.lane.b32.xlu0 %v1602_v56, %s9518_s12 }
 0x1ec   : > { %v1460_v14 = vpop.permute.xlu1 %1459 }
 0x1ed   : > { %1551 = vst.msk [vmem:[#allocation4 + $0x78] sm:$0xff] %vm1545_vm8, %v1460_v14  ;;  %v1466_v18 = vpop.permute.xlu0 %1465 }
 0x1ee   : > { %1688 = vrot.lane.b32.xlu1 %v1601_v11, %s9518_s12  ;;  %1554 = vst.msk [vmem:[#allocation4 + $0xc0] sm:$0xff] %vm1545_vm8, %v1466_v18 }
 0x1ef   : > { %1694 = vrot.lane.b32.xlu0 %v1604_v15, %s9518_s12 }
 0x1f0   : > { %v1464_v22 = vpop.permute.xlu1 %1463 }
 0x1f1   : > { %1553 = vst.msk [vmem:[#allocation4 + $0xa8] sm:$0xff] %vm1545_vm8, %v1464_v22  ;;  %v1470_v34 = vpop.permute.xlu0 %1469 }
 0x1f2   : > { %1692 = vrot.lane.b32.xlu1 %v1603_v19, %s9518_s12  ;;  %1556 = vst.msk [vmem:[#allocation4 + $0xf0] sm:$0xff] %vm1545_vm8, %v1470_v34 }
 0x1f3   : > { %1698 = vrot.lane.b32.xlu0 %v10316_v29, %s9518_s12 }
 0x1f4   : > { %v1468_v49 = vpop.permute.xlu1 %1467 }
 0x1f5   : > { %1555 = vst.msk [vmem:[#allocation4 + $0xd8] sm:$0xff] %vm1545_vm8, %v1468_v49  ;;  %v1474_v33 = vpop.permute.xlu0 %1473 }
 0x1f6   : > { %1696 = vrot.lane.b32.xlu1 %v1605_v23, %s9518_s12  ;;  %1558 = vst.msk [vmem:[#allocation4 + $0x120] sm:$0xff] %vm1545_vm8, %v1474_v33 }
 0x1f7   : > { %1853 = vrot.lane.b32.xlu0 %v1780_v45, %s9519_s6 }
 0x1f8   : > { %v1472_v47 = vpop.permute.xlu1 %1471 }
 0x1f9   : > { %1557 = vst.msk [vmem:[#allocation4 + $0x108] sm:$0xff] %vm1545_vm8, %v1472_v47  ;;  %v1478_v30 = vpop.permute.xlu0 %1477 }
 0x1fa   : > { %1851 = vrot.lane.b32.xlu1 %v1779_v25, %s9519_s6  ;;  %1560 = vst.msk [vmem:[#allocation4 + $0x150] sm:$0xff] %vm1545_vm8, %v1478_v30 }
 0x1fb   : > { %1702 = vrot.lane.b32.xlu0 %v1608_v36, %s9518_s12 }
 0x1fc   : > { %v1476_v29 = vpop.permute.xlu1 %1475 }
 0x1fd   : > { %1559 = vst.msk [vmem:[#allocation4 + $0x138] sm:$0xff] %vm1545_vm8, %v1476_v29  ;;  %v1482_v32 = vpop.permute.xlu0 %1481 }
 0x1fe   : > { %1700 = vrot.lane.b32.xlu1 %v10327_v27, %s9518_s12  ;;  %1562 = vst.msk [vmem:[#allocation4 + $0x180] sm:$0xff] %vm1545_vm8, %v1482_v32  ;;  %v1785_v27 = vld [vmem:[#allocation2 + $0x129] sm:$0xff] }
 0x1ff   : > { %1857 = vrot.lane.b32.xlu0 %v1782_v37, %s9519_s6 }
 0x200   : > { %v1480_v39 = vpop.permute.xlu1 %1479 }
 0x201   : > { %1561 = vst.msk [vmem:[#allocation4 + $0x168] sm:$0xff] %vm1545_vm8, %v1480_v39  ;;  %v1486_v50 = vpop.permute.xlu0 %1485 }
 0x202   : > { %1855 = vrot.lane.b32.xlu1 %v1781_v0, %s9519_s6  ;;  %1564 = vst.msk [vmem:[#allocation4 + $0x1b0] sm:$0xff] %vm1545_vm8, %v1486_v50 }
 0x203   : > { %1859 = vrot.lane.b32.xlu0 %v1783_v38, %s9519_s6 }
 0x204   : > { %v1484_v54 = vpop.permute.xlu1 %1483 }
 0x205   : > { %1563 = vst.msk [vmem:[#allocation4 + $0x198] sm:$0xff] %vm1545_vm8, %v1484_v54  ;;  %v1490_v57 = vpop.permute.xlu0 %1489 }
 0x206   : > { %1704 = vrot.lane.b32.xlu1 %v1609_v40, %s9518_s12  ;;  %1566 = vst.msk [vmem:[#allocation4 + $0x1e0] sm:$0xff] %vm1545_vm8, %v1490_v57  ;;  %s9453_s12 = sshll.u32 %s9522_s9, 4  ;;  %s9454_s12 = int_to_ptr.vmem [resolvable:$false] %s9453_s12 }
 0x207   : > { %1863 = vrot.lane.b32.xlu0 %v1785_v27, %s9519_s6  ;;  %s9455_s13 = scalar_lea.vmem %s9454_s12, 8192 }
 0x208   : > { %v1488_v59 = vpop.permute.xlu1 %1487 }
 0x209   : > { %1565 = vst.msk [vmem:[#allocation4 + $0x1c8] sm:$0xff] %vm1545_vm8, %v1488_v59  ;;  %v1494_v61 = vpop.permute.xlu0 %1493 }
 0x20a   : > { %1861 = vrot.lane.b32.xlu1 %v1784_v55, %s9519_s6  ;;  %1568 = vst.msk [vmem:[#allocation4 + $0x210] sm:$0xff] %vm1545_vm8, %v1494_v61 }
 0x20b   : > { %1867 = vrot.lane.b32.xlu0 %v1787_v58, %s9519_s6 }
 0x20c   : > { %v1492_v1 = vpop.permute.xlu1 %1491 }
 0x20d   : > { %1567 = vst.msk [vmem:[#allocation4 + $0x1f8] sm:$0xff] %vm1545_vm8, %v1492_v1  ;;  %v1498_v3 = vpop.permute.xlu0 %1497 }
 0x20e   : > { %1865 = vrot.lane.b32.xlu1 %v1786_v60, %s9519_s6  ;;  %1570 = vst.msk [vmem:[#allocation4 + $0x240] sm:$0xff] %vm1545_vm8, %v1498_v3 }
 0x20f   : > { %1871 = vrot.lane.b32.xlu0 %v1789_v62, %s9519_s6 }
 0x210   : > { %v1496_v5 = vpop.permute.xlu1 %1495 }
 0x211   : > { %1569 = vst.msk [vmem:[#allocation4 + $0x228] sm:$0xff] %vm1545_vm8, %v1496_v5  ;;  %v1502_v7 = vpop.permute.xlu0 %1501 }
 0x212   : > { %1869 = vrot.lane.b32.xlu1 %v1788_v2, %s9519_s6  ;;  %1572 = vst.msk [vmem:[#allocation4 + $0x270] sm:$0xff] %vm1545_vm8, %v1502_v7 }
 0x213   : > { %1875 = vrot.lane.b32.xlu0 %v1791_v4, %s9519_s6 }
 0x214   : > { %v1500_v9 = vpop.permute.xlu1 %1499 }
 0x215   : > { %1571 = vst.msk [vmem:[#allocation4 + $0x258] sm:$0xff] %vm1545_vm8, %v1500_v9  ;;  %v1506_v12 = vpop.permute.xlu0 %1505 }
 0x216   : > { %1873 = vrot.lane.b32.xlu1 %v1790_v6, %s9519_s6  ;;  %1574 = vst.msk [vmem:[#allocation4 + $0x2a0] sm:$0xff] %vm1545_vm8, %v1506_v12 }
 0x217   : > { %1879 = vrot.lane.b32.xlu0 %v1793_v8, %s9519_s6 }
 0x218   : > { %v1504_v16 = vpop.permute.xlu1 %1503 }
 0x219   : > { %1573 = vst.msk [vmem:[#allocation4 + $0x288] sm:$0xff] %vm1545_vm8, %v1504_v16  ;;  %v1510_v20 = vpop.permute.xlu0 %1509 }
 0x21a   : > { %1877 = vrot.lane.b32.xlu1 %v1792_v10, %s9519_s6  ;;  %1576 = vst.msk [vmem:[#allocation4 + $0x2d0] sm:$0xff] %vm1545_vm8, %v1510_v20 }
 0x21b   : > { %1883 = vrot.lane.b32.xlu0 %v1795_v13, %s9519_s6 }
 0x21c   : > { %v1508_v41 = vpop.permute.xlu1 %1507 }
 0x21d   : > { %1575 = vst.msk [vmem:[#allocation4 + $0x2b8] sm:$0xff] %vm1545_vm8, %v1508_v41  ;;  %v1643_v21 = vpop.permute.xlu0 %1642 }
 0x21e   : > { %1881 = vrot.lane.b32.xlu1 %v1794_v17, %s9519_s6  ;;  %1739 = vst.msk [vmem:[#allocation4] sm:$0xff] %vm1738_vm9, %v1643_v21 }
 0x21f   : > { %1887 = vrot.lane.b32.xlu0 %v1797_v24, %s9519_s6 }
 0x220   : > { %v1512_v48 = vpop.permute.xlu1 %1511 }
 0x221   : > { %1577 = vst.msk [vmem:[#allocation4 + $0x2e8] sm:$0xff] %vm1545_vm8, %v1512_v48  ;;  %v1647_v43 = vpop.permute.xlu0 %1646 }
 0x222   : > { %1885 = vrot.lane.b32.xlu1 %v1796_v42, %s9519_s6  ;;  %1741 = vst.msk [vmem:[#allocation4 + $0x30] sm:$0xff] %vm1738_vm9, %v1647_v43 }
 0x223   : > { %1891 = vrot.lane.b32.xlu0 %v10416_v26, %s9519_s6 }
 0x224   : > { %v1645_v44 = vpop.permute.xlu1 %1644 }
 0x225   : > { %1740 = vst.msk [vmem:[#allocation4 + $0x18] sm:$0xff] %vm1738_vm9, %v1645_v44  ;;  %v1651_v51 = vpop.permute.xlu0 %1650 }
 0x226   : > { %1889 = vrot.lane.b32.xlu1 %v1798_v28, %s9519_s6  ;;  %1743 = vst.msk [vmem:[#allocation4 + $0x60] sm:$0xff] %vm1738_vm9, %v1651_v51 }
 0x227   : > { %1895 = vrot.lane.b32.xlu0 %v1801_v46, %s9519_s6 }
 0x228   : > { %v1649_v26 = vpop.permute.xlu1 %1648 }
 0x229   : > { %1742 = vst.msk [vmem:[#allocation4 + $0x48] sm:$0xff] %vm1738_vm9, %v1649_v26  ;;  %v1655_v35 = vpop.permute.xlu0 %1654 }
 0x22a   : > { %1893 = vrot.lane.b32.xlu1 %v10427_v31, %s9519_s6  ;;  %1745 = vst.msk [vmem:[#allocation4 + $0x90] sm:$0xff] %vm1738_vm9, %v1655_v35 }
 0x22c   : > { %v1653_v56 = vpop.permute.xlu1 %1652 }
 0x22d   : > { %1744 = vst.msk [vmem:[#allocation4 + $0x78] sm:$0xff] %vm1738_vm9, %v1653_v56  ;;  %v1659_v63 = vpop.permute.xlu0 %1658 }
 0x22e   : > { %1897 = vrot.lane.b32.xlu1 %v1802_v53, %s9519_s6  ;;  %1747 = vst.msk [vmem:[#allocation4 + $0xc0] sm:$0xff] %vm1738_vm9, %v1659_v63 }
 0x230   : > { %v1657_v11 = vpop.permute.xlu1 %1656 }
 0x231   : > { %1746 = vst.msk [vmem:[#allocation4 + $0xa8] sm:$0xff] %vm1738_vm9, %v1657_v11  ;;  %v1663_v14 = vpop.permute.xlu0 %1662 }
 0x232   : > { %1749 = vst.msk [vmem:[#allocation4 + $0xf0] sm:$0xff] %vm1738_vm9, %v1663_v14 }
 0x234   : > { %v1661_v15 = vpop.permute.xlu1 %1660 }
 0x235   : > { %1748 = vst.msk [vmem:[#allocation4 + $0xd8] sm:$0xff] %vm1738_vm9, %v1661_v15  ;;  %v1667_v31 = vpop.permute.xlu0 %1666 }
 0x236   : > { %1751 = vst.msk [vmem:[#allocation4 + $0x120] sm:$0xff] %vm1738_vm9, %v1667_v31 }
 0x238   : > { %v1665_v18 = vpop.permute.xlu1 %1664 }
 0x239   : > { %1750 = vst.msk [vmem:[#allocation4 + $0x108] sm:$0xff] %vm1738_vm9, %v1665_v18  ;;  %v1838_v19 = vpop.permute.xlu0 %1837 }
 0x23a   : > { %1933 = vst.msk [vmem:[#allocation4 + $0x18] sm:$0xff] %vm1931_vm11, %v1838_v19 }
 0x23c   : > { %v1836_v22 = vpop.permute.xlu1 %1835 }
 0x23d   : > { %1932 = vst.msk [vmem:[#allocation4] sm:$0xff] %vm1931_vm11, %v1836_v22  ;;  %v1842_v34 = vpop.permute.xlu0 %1841 }
 0x23e   : > { %1935 = vst.msk [vmem:[#allocation4 + $0x48] sm:$0xff] %vm1931_vm11, %v1842_v34  ;;  %v2461_v34 = vld [vmem:[#allocation3 + $0x8] sm:$0xff] }
 0x23f   : > { %2525 = vrot.lane.b32.xlu0 %v2461_v34, %s9519_s6 }
 0x240   : > { %v1840_v23 = vpop.permute.xlu1 %1839 }
 0x241   : > { %1934 = vst.msk [vmem:[#allocation4 + $0x30] sm:$0xff] %vm1931_vm11, %v1840_v23  ;;  %v1671_v49 = vpop.permute.xlu0 %1670  ;;  %v1965_v45 = vld [vmem:[#allocation4 + $0x18] sm:$0xff]  ;;  %v2462_v23 = vld [vmem:[#allocation3 + $0x10] sm:$0xff] }
 0x242   : > { %1753 = vst.msk [vmem:[#allocation4 + $0x150] sm:$0xff] %vm1738_vm9, %v1671_v49  ;;  %2527 = vrot.lane.b32.xlu1 %v2462_v23, %s9519_s6 }
 0x244   : > { %v1669_v33 = vpop.permute.xlu1 %1668  ;;  %v1964_v25 = vld [vmem:[#allocation4] sm:$0xff] }
 0x245   : > { %1752 = vst.msk [vmem:[#allocation4 + $0x138] sm:$0xff] %vm1738_vm9, %v1669_v33  ;;  %9094 = vmatprep.mubr.msk.f32.mxu0 %vm2006_vm12, %v1964_v25  ;;  %v1846_v47 = vpop.permute.xlu0 %1845  ;;  %v1967_v36 = vld [vmem:[#allocation4 + $0x48] sm:$0xff] }
 0x246   : > { %9095 = vmatmul.mubr.msk.f32.vlgmr.msra.gmra.mxu0 %vm2006_vm12, %v1965_v45  ;;  %1937 = vst.msk [vmem:[#allocation4 + $0x78] sm:$0xff] %vm1931_vm11, %v1846_v47 }
 0x248   : > { %v1844_v30 = vpop.permute.xlu1 %1843  ;;  %v1966_v29 = vld [vmem:[#allocation4 + $0x30] sm:$0xff] }
 0x249   : > { %1936 = vst.msk [vmem:[#allocation4 + $0x60] sm:$0xff] %vm1931_vm11, %v1844_v30  ;;  %9097 = vmatprep.mubr.msk.f32.mxu0 %vm2006_vm12, %v1966_v29  ;;  %v1675_v37 = vpop.permute.xlu0 %1674 }
 0x24a   : > { %9098 = vmatmul.mubr.msk.f32.gmra.mxu0 %vm2006_vm12, %v1967_v36  ;;  %1755 = vst.msk [vmem:[#allocation4 + $0x180] sm:$0xff] %vm1738_vm9, %v1675_v37 }
 0x24c   : > { %v1673_v32 = vpop.permute.xlu1 %1672 }
 0x24d   : > { %1754 = vst.msk [vmem:[#allocation4 + $0x168] sm:$0xff] %vm1738_vm9, %v1673_v32  ;;  %v1850_v0 = vpop.permute.xlu0 %1849  ;;  %v1969_v39 = vld [vmem:[#allocation4 + $0x78] sm:$0xff] }
 0x24e   : > { %1939 = vst.msk [vmem:[#allocation4 + $0xa8] sm:$0xff] %vm1931_vm11, %v1850_v0 }
 0x250   : > { %v1848_v38 = vpop.permute.xlu1 %1847  ;;  %v1968_v50 = vld [vmem:[#allocation4 + $0x60] sm:$0xff] }
 0x251   : > { %1938 = vst.msk [vmem:[#allocation4 + $0x90] sm:$0xff] %vm1931_vm11, %v1848_v38  ;;  %9100 = vmatprep.mubr.msk.f32.mxu0 %vm2006_vm12, %v1968_v50  ;;  %v1679_v40 = vpop.permute.xlu0 %1678 }
 0x252   : > { %9101 = vmatmul.mubr.msk.f32.gmra.mxu0 %vm2006_vm12, %v1969_v39  ;;  %1757 = vst.msk [vmem:[#allocation4 + $0x1b0] sm:$0xff] %vm1738_vm9, %v1679_v40 }
 0x254   : > { %v1677_v54 = vpop.permute.xlu1 %1676 }
 0x255   : > { %1756 = vst.msk [vmem:[#allocation4 + $0x198] sm:$0xff] %vm1738_vm9, %v1677_v54  ;;  %v1683_v27 = vpop.permute.xlu0 %1682  ;;  %v1971_v57 = vld [vmem:[#allocation4 + $0xa8] sm:$0xff] }
 0x256   : > { %1759 = vst.msk [vmem:[#allocation4 + $0x1e0] sm:$0xff] %vm1738_vm9, %v1683_v27 }
 0x258   : > { %v1681_v55 = vpop.permute.xlu1 %1680  ;;  %v1970_v59 = vld [vmem:[#allocation4 + $0x90] sm:$0xff] }
 0x259   : > { %1758 = vst.msk [vmem:[#allocation4 + $0x1c8] sm:$0xff] %vm1738_vm9, %v1681_v55  ;;  %9103 = vmatprep.mubr.msk.f32.mxu0 %vm2006_vm12, %v1970_v59  ;;  %v1687_v58 = vpop.permute.xlu0 %1686  ;;  %v2397_v55 = vld [vmem:[#allocation3 + $0x7] sm:$0xff]  ;;  %v2398_v59 = vld [vmem:[#allocation3 + $0xf] sm:$0xff] }
 0x25a   : > { %9104 = vmatmul.mubr.msk.f32.gmra.mxu0 %vm2006_vm12, %v1971_v57  ;;  %1761 = vst.msk [vmem:[#allocation4 + $0x210] sm:$0xff] %vm1738_vm9, %v1687_v58 }
 0x25b   : > { %2429 = vst.msk [vmem:[#allocation4] sm:$0xff] %vm243_vm10, %v2397_v55  ;;  %2430 = vst.msk [vmem:[#allocation4 + $0x18] sm:$0xff] %vm243_vm10, %v2398_v59 }
 0x25c   : > { %v1685_v61 = vpop.permute.xlu1 %1684 }
 0x25d   : > { %1760 = vst.msk [vmem:[#allocation4 + $0x1f8] sm:$0xff] %vm1738_vm9, %v1685_v61  ;;  %v1691_v60 = vpop.permute.xlu0 %1690  ;;  %v10858_v61 = vld [vmem:[%s14317_s3] ss:$0 sm:$0xff] }
 0x25e   : > { %1763 = vst.msk [vmem:[#allocation4 + $0x240] sm:$0xff] %vm1738_vm9, %v1691_v60 }
 0x260   : > { %v1689_v1 = vpop.permute.xlu1 %1688 }
 0x261   : > { %1762 = vst.msk [vmem:[#allocation4 + $0x228] sm:$0xff] %vm1738_vm9, %v1689_v1  ;;  %v1695_v62 = vpop.permute.xlu0 %1694 }
 0x262   : > { %1765 = vst.msk [vmem:[#allocation4 + $0x270] sm:$0xff] %vm1738_vm9, %v1695_v62 }
 0x264   : > { %v1693_v3 = vpop.permute.xlu1 %1692 }
 0x265   : > { %1764 = vst.msk [vmem:[#allocation4 + $0x258] sm:$0xff] %vm1738_vm9, %v1693_v3  ;;  %v1699_v2 = vpop.permute.xlu0 %1698 }
 0x266   : > { %1767 = vst.msk [vmem:[#allocation4 + $0x2a0] sm:$0xff] %vm1738_vm9, %v1699_v2 }
 0x268   : > { %v1697_v5 = vpop.permute.xlu1 %1696 }
 0x269   : > { %1766 = vst.msk [vmem:[#allocation4 + $0x288] sm:$0xff] %vm1738_vm9, %v1697_v5  ;;  %v1854_v4 = vpop.permute.xlu0 %1853 }
 0x26a   : > { %1941 = vst.msk [vmem:[#allocation4 + $0xd8] sm:$0xff] %vm1931_vm11, %v1854_v4 }
 0x26c   : > { %v1852_v7 = vpop.permute.xlu1 %1851 }
 0x26d   : > { %1940 = vst.msk [vmem:[#allocation4 + $0xc0] sm:$0xff] %vm1931_vm11, %v1852_v7  ;;  %v1703_v6 = vpop.permute.xlu0 %1702 }
 0x26e   : > { %1769 = vst.msk [vmem:[#allocation4 + $0x2d0] sm:$0xff] %vm1738_vm9, %v1703_v6 }
 0x270   : > { %v1701_v9 = vpop.permute.xlu1 %1700 }
 0x271   : > { %1768 = vst.msk [vmem:[#allocation4 + $0x2b8] sm:$0xff] %vm1738_vm9, %v1701_v9  ;;  %v1858_v8 = vpop.permute.xlu0 %1857  ;;  %v1973_v12 = vld [vmem:[#allocation4 + $0xd8] sm:$0xff] }
 0x272   : > { %1943 = vst.msk [vmem:[#allocation4 + $0x108] sm:$0xff] %vm1931_vm11, %v1858_v8 }
 0x274   : > { %v1856_v10 = vpop.permute.xlu1 %1855  ;;  %v1972_v16 = vld [vmem:[#allocation4 + $0xc0] sm:$0xff] }
 0x275   : > { %1942 = vst.msk [vmem:[#allocation4 + $0xf0] sm:$0xff] %vm1931_vm11, %v1856_v10  ;;  %9106 = vmatprep.mubr.msk.f32.mxu0 %vm2006_vm12, %v1972_v16  ;;  %v1860_v13 = vpop.permute.xlu0 %1859 }
 0x276   : > { %9107 = vmatmul.mubr.msk.f32.gmra.mxu0 %vm2006_vm12, %v1973_v12  ;;  %1944 = vst.msk [vmem:[#allocation4 + $0x120] sm:$0xff] %vm1931_vm11, %v1860_v13 }
 0x278   : > { %v1705_v20 = vpop.permute.xlu1 %1704 }
 0x279   : > { %1770 = vst.msk [vmem:[#allocation4 + $0x2e8] sm:$0xff] %vm1738_vm9, %v1705_v20  ;;  %v1864_v17 = vpop.permute.xlu0 %1863  ;;  %v1975_v41 = vld [vmem:[#allocation4 + $0x108] sm:$0xff] }
 0x27a   : > { %1946 = vst.msk [vmem:[#allocation4 + $0x150] sm:$0xff] %vm1931_vm11, %v1864_v17 }
 0x27c   : > { %v1862_v24 = vpop.permute.xlu1 %1861  ;;  %v1974_v21 = vld [vmem:[#allocation4 + $0xf0] sm:$0xff] }
 0x27d   : > { %1945 = vst.msk [vmem:[#allocation4 + $0x138] sm:$0xff] %vm1931_vm11, %v1862_v24  ;;  %9109 = vmatprep.mubr.msk.f32.mxu0 %vm2006_vm12, %v1974_v21  ;;  %v1868_v42 = vpop.permute.xlu0 %1867  ;;  %v1976_v48 = vld [vmem:[#allocation4 + $0x120] sm:$0xff] }
 0x27e   : > { %9110 = vmatmul.mubr.msk.f32.gmra.mxu0 %vm2006_vm12, %v1975_v41  ;;  %1948 = vst.msk [vmem:[#allocation4 + $0x180] sm:$0xff] %vm1931_vm11, %v1868_v42 }
 0x27f   : > { %9112 = vmatprep.mubr.msk.f32.mxu0 %vm2006_vm12, %v1976_v48 }
 0x280   : > { %v1866_v43 = vpop.permute.xlu1 %1865 }
 0x281   : > { %1947 = vst.msk [vmem:[#allocation4 + $0x168] sm:$0xff] %vm1931_vm11, %v1866_v43  ;;  %v1872_v28 = vpop.permute.xlu0 %1871  ;;  %v1978_v44 = vld [vmem:[#allocation4 + $0x150] sm:$0xff] }
 0x282   : > { %1950 = vst.msk [vmem:[#allocation4 + $0x1b0] sm:$0xff] %vm1931_vm11, %v1872_v28 }
 0x284   : > { %v1870_v46 = vpop.permute.xlu1 %1869  ;;  %v1977_v51 = vld [vmem:[#allocation4 + $0x138] sm:$0xff] }
 0x285   : > { %1949 = vst.msk [vmem:[#allocation4 + $0x198] sm:$0xff] %vm1931_vm11, %v1870_v46  ;;  %9113 = vmatmul.mubr.msk.f32.gmra.mxu0 %vm2006_vm12, %v1977_v51  ;;  %v1876_v26 = vpop.permute.xlu0 %1875  ;;  %v1980_v35 = vld [vmem:[#allocation4 + $0x180] sm:$0xff] }
 0x286   : > { %9115 = vmatprep.mubr.msk.f32.mxu0 %vm2006_vm12, %v1978_v44  ;;  %1952 = vst.msk [vmem:[#allocation4 + $0x1e0] sm:$0xff] %vm1931_vm11, %v1876_v26 }
 0x288   : > { %v1874_v53 = vpop.permute.xlu1 %1873  ;;  %v1979_v56 = vld [vmem:[#allocation4 + $0x168] sm:$0xff] }
 0x289   : > { %1951 = vst.msk [vmem:[#allocation4 + $0x1c8] sm:$0xff] %vm1931_vm11, %v1874_v53  ;;  %9116 = vmatmul.mubr.msk.f32.gmra.mxu0 %vm2006_vm12, %v1979_v56  ;;  %v1880_v63 = vpop.permute.xlu0 %1879  ;;  %v1982_v11 = vld [vmem:[#allocation4 + $0x1b0] sm:$0xff] }
 0x28a   : > { %9118 = vmatprep.mubr.msk.f32.mxu0 %vm2006_vm12, %v1980_v35  ;;  %1954 = vst.msk [vmem:[#allocation4 + $0x210] sm:$0xff] %vm1931_vm11, %v1880_v63 }
 0x28c   : > { %v1878_v14 = vpop.permute.xlu1 %1877  ;;  %v1981_v15 = vld [vmem:[#allocation4 + $0x198] sm:$0xff] }
 0x28d   : > { %1953 = vst.msk [vmem:[#allocation4 + $0x1f8] sm:$0xff] %vm1931_vm11, %v1878_v14  ;;  %9119 = vmatmul.mubr.msk.f32.gmra.mxu0 %vm2006_vm12, %v1981_v15  ;;  %v1884_v31 = vpop.permute.xlu0 %1883  ;;  %v1984_v18 = vld [vmem:[#allocation4 + $0x1e0] sm:$0xff] }
 0x28e   : > { %9121 = vmatprep.mubr.msk.f32.mxu0 %vm2006_vm12, %v1982_v11  ;;  %1956 = vst.msk [vmem:[#allocation4 + $0x240] sm:$0xff] %vm1931_vm11, %v1884_v31 }
 0x290   : > { %v1882_v19 = vpop.permute.xlu1 %1881  ;;  %v1983_v22 = vld [vmem:[#allocation4 + $0x1c8] sm:$0xff] }
 0x291   : > { %1955 = vst.msk [vmem:[#allocation4 + $0x228] sm:$0xff] %vm1931_vm11, %v1882_v19  ;;  %9122 = vmatmul.mubr.msk.f32.gmra.mxu0 %vm2006_vm12, %v1983_v22  ;;  %v1888_v49 = vpop.permute.xlu0 %1887  ;;  %v1986_v45 = vld [vmem:[#allocation4 + $0x210] sm:$0xff] }
 0x292   : > { %9124 = vmatprep.mubr.msk.f32.mxu0 %vm2006_vm12, %v1984_v18  ;;  %1958 = vst.msk [vmem:[#allocation4 + $0x270] sm:$0xff] %vm1931_vm11, %v1888_v49 }
 0x294   : > { %v1886_v33 = vpop.permute.xlu1 %1885  ;;  %v1985_v25 = vld [vmem:[#allocation4 + $0x1f8] sm:$0xff] }
 0x295   : > { %1957 = vst.msk [vmem:[#allocation4 + $0x258] sm:$0xff] %vm1931_vm11, %v1886_v33  ;;  %9125 = vmatmul.mubr.msk.f32.gmra.mxu0 %vm2006_vm12, %v1985_v25  ;;  %v1892_v47 = vpop.permute.xlu0 %1891  ;;  %v1988_v36 = vld [vmem:[#allocation4 + $0x240] sm:$0xff] }
 0x296   : > { %9127 = vmatprep.mubr.msk.f32.mxu0 %vm2006_vm12, %v1986_v45  ;;  %1960 = vst.msk [vmem:[#allocation4 + $0x2a0] sm:$0xff] %vm1931_vm11, %v1892_v47 }
 0x298   : > { %v1890_v30 = vpop.permute.xlu1 %1889  ;;  %v1987_v29 = vld [vmem:[#allocation4 + $0x228] sm:$0xff] }
 0x299   : > { %1959 = vst.msk [vmem:[#allocation4 + $0x288] sm:$0xff] %vm1931_vm11, %v1890_v30  ;;  %9128 = vmatmul.mubr.msk.f32.gmra.mxu0 %vm2006_vm12, %v1987_v29  ;;  %v1990_v37 = vld [vmem:[#allocation4 + $0x270] sm:$0xff]  ;;  %v1896_v40 = vpop.permute.xlu0 %1895 }
 0x29a   : > { %9130 = vmatprep.mubr.msk.f32.mxu0 %vm2006_vm12, %v1988_v36  ;;  %1962 = vst.msk [vmem:[#allocation4 + $0x2d0] sm:$0xff] %vm1931_vm11, %v1896_v40 }
 0x29c   : > { %v1894_v32 = vpop.permute.xlu1 %1893  ;;  %v1989_v0 = vld [vmem:[#allocation4 + $0x258] sm:$0xff] }
 0x29d   : > { %1961 = vst.msk [vmem:[#allocation4 + $0x2b8] sm:$0xff] %vm1931_vm11, %v1894_v32  ;;  %9131 = vmatmul.mubr.msk.f32.gmra.mxu0 %vm2006_vm12, %v1989_v0  ;;  %v1992_v39 = vld [vmem:[#allocation4 + $0x2a0] sm:$0xff] }
 0x29e   : > { %9133 = vmatprep.mubr.msk.f32.mxu0 %vm2006_vm12, %v1990_v37 }
 0x2a0   : > { %v1991_v38 = vld [vmem:[#allocation4 + $0x288] sm:$0xff]  ;;  %v1898_v54 = vpop.permute.xlu1 %1897 }
 0x2a1   : > { %9134 = vmatmul.mubr.msk.f32.gmra.mxu0 %vm2006_vm12, %v1991_v38  ;;  %1963 = vst.msk [vmem:[#allocation4 + $0x2e8] sm:$0xff] %vm1931_vm11, %v1898_v54  ;;  %v1994_v27 = vld [vmem:[#allocation4 + $0x2d0] sm:$0xff] }
 0x2a2   : > { %9136 = vmatprep.mubr.msk.f32.mxu0 %vm2006_vm12, %v1992_v39 }
 0x2a4   : > { %v1993_v50 = vld [vmem:[#allocation4 + $0x2b8] sm:$0xff] }
 0x2a5   : > { %9137 = vmatmul.mubr.msk.f32.gmra.mxu0 %vm2006_vm12, %v1993_v50 }
 0x2a6   : > { %9139 = vmatprep.mubr.msk.f32.mxu0 %vm2006_vm12, %v1994_v27 }
 0x2a8   : > { %v1995_v57 = vld [vmem:[#allocation4 + $0x2e8] sm:$0xff] }
 0x2a9   : > { %9140 = vmatmul.mubr.msk.f32.gmra.mxu0 %vm2006_vm12, %v1995_v57 }
 0x2b1   : > { %v2526_v58 = vpop.permute.xlu0 %2525 }
 0x2b2   : > { %2622 = vst.msk [vmem:[#allocation4] sm:$0xff] %vm2621_vm14, %v2526_v58 }
 0x2b4   : > { %v2528_v60 = vpop.permute.xlu1 %2527 }
 0x2b5   : > { %2623 = vst.msk [vmem:[#allocation4 + $0x18] sm:$0xff] %vm2621_vm14, %v2528_v60 }
 0x306   : > { %v9096_v1 = vpop.f32.mrf.mxu0 }
 0x307   : > { %v2179_v62 = vadd.f32 %v9096_v1, %v10858_v61 }
 0x308   : > { %v2173_v3 = vpop.f32.mrf.mxu0 }
 0x309   : > { %v2333_v2 = vmax.f32 %v2179_v62, 0.0  ;;  %v2174_v5 = vadd.f32 %v10858_v61, %v2173_v3 }
 0x30a   : > { %v9099_v4 = vpop.f32.mrf.mxu0 }
 0x30b   : > { %2366 = vst.msk [vmem:[#allocation3 + $0x30] sm:$0xff] %vm243_vm10, %v2333_v2  ;;  %v2332_v7 = vmax.f32 %v2174_v5, 0.0  ;;  %v2189_v6 = vadd.f32 %v9099_v4, %v10858_v61 }
 0x30c   : > { %v2183_v9 = vpop.f32.mrf.mxu0 }
 0x30d   : > { %2365 = vst.msk [vmem:[#allocation3 + $0x28] sm:$0xff] %vm243_vm10, %v2332_v7  ;;  %v2335_v8 = vmax.f32 %v2189_v6, 0.0  ;;  %v2184_v12 = vadd.f32 %v10858_v61, %v2183_v9 }
 0x30f   : > { %2368 = vst.msk [vmem:[#allocation3 + $0x50] sm:$0xff] %vm243_vm10, %v2335_v8  ;;  %v2334_v10 = vmax.f32 %v2184_v12, 0.0 }
 0x311   : > { %2367 = vst.msk [vmem:[#allocation3 + $0x48] sm:$0xff] %vm243_vm10, %v2334_v10 }
 0x312   : > { %v9102_v16 = vpop.f32.mrf.mxu0  ;;  %v2464_v13 = vld [vmem:[#allocation3 + $0x30] sm:$0xff] }
 0x313   : > { %v3041_v20 = vld [vmem:[#allocation3 + $0x30] sm:$0xff]  ;;  %v2199_v17 = vadd.f32 %v9102_v16, %v10858_v61  ;;  %2531 = vrot.lane.b32.xlu1 %v2464_v13, %s9519_s6 }
 0x314   : > { %3073 = vst.msk [vmem:[#allocation4 + $0x20] sm:$0xff] %vm243_vm10, %v3041_v20  ;;  %v2193_v41 = vpop.f32.mrf.mxu0  ;;  %v2463_v24 = vld [vmem:[#allocation3 + $0x28] sm:$0xff] }
 0x315   : > { %v10873_v21 = vld [vmem:[#allocation3 + $0x27] sm:$0xff]  ;;  %v2337_v42 = vmax.f32 %v2199_v17, 0.0  ;;  %v2194_v48 = vadd.f32 %v10858_v61, %v2193_v41  ;;  %2529 = vrot.lane.b32.xlu0 %v2463_v24, %s9519_s6  ;;  %v10879_v43 = vld [vmem:[#allocation3 + $0x2f] sm:$0xff] }
 0x316   : > { %2431 = vst.msk [vmem:[#allocation4 + $0x30] sm:$0xff] %vm243_vm10, %v10873_v21  ;;  %v3040_v28 = vld [vmem:[#allocation3 + $0x28] sm:$0xff]  ;;  %v10881_v44 = vld [vmem:[#allocation3 + $0x51] sm:$0xff]  ;;  %2432 = vst.msk [vmem:[#allocation4 + $0x48] sm:$0xff] %vm243_vm10, %v10879_v43 }
 0x317   : > { %v2466_v46 = vld [vmem:[#allocation3 + $0x50] sm:$0xff]  ;;  %3072 = vst.msk [vmem:[#allocation4 + $0x8] sm:$0xff] %vm243_vm10, %v3040_v28  ;;  %3714 = vst.msk [vmem:[#allocation4 + $0x28] sm:$0xff] %vm243_vm10, %v10881_v44  ;;  %v2336_v51 = vmax.f32 %v2194_v48, 0.0 }
 0x318   : > { %2370 = vst.msk [vmem:[#allocation3 + $0x70] sm:$0xff] %vm243_vm10, %v2337_v42  ;;  %2535 = vrot.lane.b32.xlu1 %v2466_v46, %s9519_s6  ;;  %v3043_v26 = vld [vmem:[#allocation3 + $0x50] sm:$0xff]  ;;  %v2465_v53 = vld [vmem:[#allocation3 + $0x48] sm:$0xff] }
 0x319   : > { %v10890_v35 = vld [vmem:[#allocation3 + $0x49] sm:$0xff]  ;;  %3075 = vst.msk [vmem:[#allocation4 + $0x50] sm:$0xff] %vm243_vm10, %v3043_v26  ;;  %2369 = vst.msk [vmem:[#allocation3 + $0x68] sm:$0xff] %vm243_vm10, %v2336_v51  ;;  %2533 = vrot.lane.b32.xlu0 %v2465_v53, %s9519_s6 }
 0x31a   : > { %v10892_v56 = vld [vmem:[#allocation3 + $0x4f] sm:$0xff]  ;;  %3713 = vst.msk [vmem:[#allocation4 + $0x10] sm:$0xff] %vm243_vm10, %v10890_v35  ;;  %v10901_v63 = vld [vmem:[#allocation3 + $0x47] sm:$0xff]  ;;  %v9105_v14 = vpop.f32.mrf.mxu0 }
 0x31b   : > { %2434 = vst.msk [vmem:[#allocation4 + $0x78] sm:$0xff] %vm243_vm10, %v10892_v56  ;;  %v3042_v11 = vld [vmem:[#allocation3 + $0x48] sm:$0xff]  ;;  %2433 = vst.msk [vmem:[#allocation4 + $0x60] sm:$0xff] %vm243_vm10, %v10901_v63  ;;  %v2209_v15 = vadd.f32 %v9105_v14, %v10858_v61 }
 0x31c   : > { %3074 = vst.msk [vmem:[#allocation4 + $0x38] sm:$0xff] %vm243_vm10, %v3042_v11  ;;  %v2203_v31 = vpop.f32.mrf.mxu0 }
 0x31d   : > { %v2339_v18 = vmax.f32 %v2209_v15, 0.0  ;;  %v2204_v19 = vadd.f32 %v10858_v61, %v2203_v31 }
 0x31f   : > { %v10908_v22 = vld [vmem:[#allocation3 + $0x71] sm:$0xff]  ;;  %2372 = vst.msk [vmem:[#allocation3 + $0x90] sm:$0xff] %vm243_vm10, %v2339_v18  ;;  %v2338_v23 = vmax.f32 %v2204_v19, 0.0 }
 0x320   : > { %v2468_v34 = vld [vmem:[#allocation3 + $0x70] sm:$0xff]  ;;  %3716 = vst.msk [vmem:[#allocation4 + $0x58] sm:$0xff] %vm243_vm10, %v10908_v22  ;;  %v2467_v33 = vld [vmem:[#allocation3 + $0x68] sm:$0xff] }
 0x321   : > { %2539 = vrot.lane.b32.xlu1 %v2468_v34, %s9519_s6  ;;  %v3045_v49 = vld [vmem:[#allocation3 + $0x70] sm:$0xff]  ;;  %2371 = vst.msk [vmem:[#allocation3 + $0x88] sm:$0xff] %vm243_vm10, %v2338_v23  ;;  %2537 = vrot.lane.b32.xlu0 %v2467_v33, %s9519_s6  ;;  %v10925_v47 = vld [vmem:[#allocation3 + $0x67] sm:$0xff] }
 0x322   : > { %v10914_v45 = vld [vmem:[#allocation3 + $0x69] sm:$0xff]  ;;  %3077 = vst.msk [vmem:[#allocation4 + $0x80] sm:$0xff] %vm243_vm10, %v3045_v49  ;;  %2435 = vst.msk [vmem:[#allocation4 + $0x90] sm:$0xff] %vm243_vm10, %v10925_v47 }
 0x323   : > { %v10916_v25 = vld [vmem:[#allocation3 + $0x6f] sm:$0xff]  ;;  %3715 = vst.msk [vmem:[#allocation4 + $0x40] sm:$0xff] %vm243_vm10, %v10914_v45 }
 0x324   : > { %2436 = vst.msk [vmem:[#allocation4 + $0xa8] sm:$0xff] %vm243_vm10, %v10916_v25  ;;  %v3044_v36 = vld [vmem:[#allocation3 + $0x68] sm:$0xff] }
 0x325   : > { %3076 = vst.msk [vmem:[#allocation4 + $0x68] sm:$0xff] %vm243_vm10, %v3044_v36 }
 0x326   : > { %v10930_v30 = vld [vmem:[#allocation3 + $0x91] sm:$0xff] }
 0x327   : > { %v2470_v29 = vld [vmem:[#allocation3 + $0x90] sm:$0xff]  ;;  %3718 = vst.msk [vmem:[#allocation4 + $0x88] sm:$0xff] %vm243_vm10, %v10930_v30 }
 0x328   : > { %2543 = vrot.lane.b32.xlu1 %v2470_v29, %s9519_s6  ;;  %v3047_v37 = vld [vmem:[#allocation3 + $0x90] sm:$0xff]  ;;  %v2469_v0 = vld [vmem:[#allocation3 + $0x88] sm:$0xff] }
 0x329   : > { %v10935_v32 = vld [vmem:[#allocation3 + $0x89] sm:$0xff]  ;;  %3079 = vst.msk [vmem:[#allocation4 + $0xb0] sm:$0xff] %vm243_vm10, %v3047_v37  ;;  %2541 = vrot.lane.b32.xlu0 %v2469_v0, %s9519_s6 }
 0x32a   : > { %v10937_v39 = vld [vmem:[#allocation3 + $0x8f] sm:$0xff]  ;;  %3717 = vst.msk [vmem:[#allocation4 + $0x70] sm:$0xff] %vm243_vm10, %v10935_v32  ;;  %v10945_v38 = vld [vmem:[#allocation3 + $0x87] sm:$0xff] }
 0x32b   : > { %2438 = vst.msk [vmem:[#allocation4 + $0xd8] sm:$0xff] %vm243_vm10, %v10937_v39  ;;  %v3046_v50 = vld [vmem:[#allocation3 + $0x88] sm:$0xff]  ;;  %2437 = vst.msk [vmem:[#allocation4 + $0xc0] sm:$0xff] %vm243_vm10, %v10945_v38 }
 0x32c   : > { %3078 = vst.msk [vmem:[#allocation4 + $0x98] sm:$0xff] %vm243_vm10, %v3046_v50 }
 0x336   : > { %v9108_v40 = vpop.f32.mrf.mxu0 }
 0x337   : > { %v2219_v54 = vadd.f32 %v9108_v40, %v10858_v61 }
 0x338   : > { %v2213_v27 = vpop.f32.mrf.mxu0 }
 0x339   : > { %v2341_v57 = vmax.f32 %v2219_v54, 0.0  ;;  %v2214_v55 = vadd.f32 %v10858_v61, %v2213_v27 }
 0x33b   : > { %2374 = vst.msk [vmem:[#allocation3 + $0xb0] sm:$0xff] %vm243_vm10, %v2341_v57  ;;  %v2340_v59 = vmax.f32 %v2214_v55, 0.0 }
 0x33d   : > { %2373 = vst.msk [vmem:[#allocation3 + $0xa8] sm:$0xff] %vm243_vm10, %v2340_v59 }
 0x33e   : > { %v9111_v58 = vpop.f32.mrf.mxu0 }
 0x33f   : > { %v2229_v60 = vadd.f32 %v9111_v58, %v10858_v61 }
 0x340   : > { %v2223_v1 = vpop.f32.mrf.mxu0 }
 0x341   : > { %v2343_v62 = vmax.f32 %v2229_v60, 0.0  ;;  %v2224_v3 = vadd.f32 %v10858_v61, %v2223_v1 }
 0x342   : > { %v10956_v2 = vld [vmem:[#allocation3 + $0xb1] sm:$0xff] }
 0x343   : > { %v2472_v5 = vld [vmem:[#allocation3 + $0xb0] sm:$0xff]  ;;  %3720 = vst.msk [vmem:[#allocation4 + $0xb8] sm:$0xff] %vm243_vm10, %v10956_v2  ;;  %2376 = vst.msk [vmem:[#allocation3 + $0xd0] sm:$0xff] %vm243_vm10, %v2343_v62  ;;  %v2342_v4 = vmax.f32 %v2224_v3, 0.0 }
 0x344   : > { %2547 = vrot.lane.b32.xlu1 %v2472_v5, %s9519_s6  ;;  %v3049_v7 = vld [vmem:[#allocation3 + $0xb0] sm:$0xff]  ;;  %v2471_v9 = vld [vmem:[#allocation3 + $0xa8] sm:$0xff] }
 0x345   : > { %v10962_v6 = vld [vmem:[#allocation3 + $0xa9] sm:$0xff]  ;;  %3081 = vst.msk [vmem:[#allocation4 + $0xe0] sm:$0xff] %vm243_vm10, %v3049_v7  ;;  %2375 = vst.msk [vmem:[#allocation3 + $0xc8] sm:$0xff] %vm243_vm10, %v2342_v4  ;;  %v9114_v12 = vpop.f32.mrf.mxu0  ;;  %2545 = vrot.lane.b32.xlu0 %v2471_v9, %s9519_s6 }
 0x346   : > { %v10964_v8 = vld [vmem:[#allocation3 + $0xaf] sm:$0xff]  ;;  %3719 = vst.msk [vmem:[#allocation4 + $0xa0] sm:$0xff] %vm243_vm10, %v10962_v6  ;;  %v10973_v10 = vld [vmem:[#allocation3 + $0xa7] sm:$0xff]  ;;  %v2239_v13 = vadd.f32 %v9114_v12, %v10858_v61 }
 0x347   : > { %2440 = vst.msk [vmem:[#allocation4 + $0x108] sm:$0xff] %vm243_vm10, %v10964_v8  ;;  %v3048_v16 = vld [vmem:[#allocation3 + $0xa8] sm:$0xff]  ;;  %2439 = vst.msk [vmem:[#allocation4 + $0xf0] sm:$0xff] %vm243_vm10, %v10973_v10  ;;  %v2233_v20 = vpop.f32.mrf.mxu0 }
 0x348   : > { %3080 = vst.msk [vmem:[#allocation4 + $0xc8] sm:$0xff] %vm243_vm10, %v3048_v16  ;;  %v2345_v17 = vmax.f32 %v2239_v13, 0.0  ;;  %v2234_v41 = vadd.f32 %v10858_v61, %v2233_v20 }
 0x349   : > { %v9117_v24 = vpop.f32.mrf.mxu0 }
 0x34a   : > { %v10980_v42 = vld [vmem:[#allocation3 + $0xd1] sm:$0xff]  ;;  %2378 = vst.msk [vmem:[#allocation3 + $0xf0] sm:$0xff] %vm243_vm10, %v2345_v17  ;;  %v2344_v48 = vmax.f32 %v2234_v41, 0.0  ;;  %v2249_v28 = vadd.f32 %v9117_v24, %v10858_v61 }
 0x34b   : > { %v2474_v46 = vld [vmem:[#allocation3 + $0xd0] sm:$0xff]  ;;  %3722 = vst.msk [vmem:[#allocation4 + $0xe8] sm:$0xff] %vm243_vm10, %v10980_v42  ;;  %v2243_v51 = vpop.f32.mrf.mxu0 }
 0x34c   : > { %2551 = vrot.lane.b32.xlu1 %v2474_v46, %s9519_s6  ;;  %v3051_v26 = vld [vmem:[#allocation3 + $0xd0] sm:$0xff]  ;;  %2377 = vst.msk [vmem:[#allocation3 + $0xe8] sm:$0xff] %vm243_vm10, %v2344_v48  ;;  %v2347_v11 = vmax.f32 %v2249_v28, 0.0  ;;  %v2244_v14 = vadd.f32 %v10858_v61, %v2243_v51  ;;  %v2473_v15 = vld [vmem:[#allocation3 + $0xc8] sm:$0xff] }
 0x34d   : > { %v10987_v53 = vld [vmem:[#allocation3 + $0xc9] sm:$0xff]  ;;  %3083 = vst.msk [vmem:[#allocation4 + $0x110] sm:$0xff] %vm243_vm10, %v3051_v26  ;;  %v9120_v18 = vpop.f32.mrf.mxu0  ;;  %2549 = vrot.lane.b32.xlu0 %v2473_v15, %s9519_s6 }
 0x34e   : > { %v10991_v31 = vld [vmem:[#allocation3 + $0xcf] sm:$0xff]  ;;  %3721 = vst.msk [vmem:[#allocation4 + $0xd0] sm:$0xff] %vm243_vm10, %v10987_v53  ;;  %v10999_v19 = vld [vmem:[#allocation3 + $0xc7] sm:$0xff]  ;;  %2380 = vst.msk [vmem:[#allocation3 + $0x110] sm:$0xff] %vm243_vm10, %v2347_v11  ;;  %v2346_v34 = vmax.f32 %v2244_v14, 0.0  ;;  %v2259_v23 = vadd.f32 %v9120_v18, %v10858_v61 }
 0x34f   : > { %2442 = vst.msk [vmem:[#allocation4 + $0x138] sm:$0xff] %vm243_vm10, %v10991_v31  ;;  %2441 = vst.msk [vmem:[#allocation4 + $0x120] sm:$0xff] %vm243_vm10, %v10999_v19  ;;  %v3050_v49 = vld [vmem:[#allocation3 + $0xc8] sm:$0xff]  ;;  %v2253_v33 = vpop.f32.mrf.mxu0 }
 0x350   : > { %3082 = vst.msk [vmem:[#allocation4 + $0xf8] sm:$0xff] %vm243_vm10, %v3050_v49  ;;  %2379 = vst.msk [vmem:[#allocation3 + $0x108] sm:$0xff] %vm243_vm10, %v2346_v34  ;;  %v2349_v36 = vmax.f32 %v2259_v23, 0.0  ;;  %v2254_v29 = vadd.f32 %v10858_v61, %v2253_v33 }
 0x351   : > { %v11008_v37 = vld [vmem:[#allocation3 + $0xf1] sm:$0xff]  ;;  %v9123_v0 = vpop.f32.mrf.mxu0 }
 0x352   : > { %v2476_v50 = vld [vmem:[#allocation3 + $0xf0] sm:$0xff]  ;;  %3724 = vst.msk [vmem:[#allocation4 + $0x118] sm:$0xff] %vm243_vm10, %v11008_v37  ;;  %2382 = vst.msk [vmem:[#allocation3 + $0x130] sm:$0xff] %vm243_vm10, %v2349_v36  ;;  %v2348_v40 = vmax.f32 %v2254_v29, 0.0  ;;  %v2269_v54 = vadd.f32 %v9123_v0, %v10858_v61 }
 0x353   : > { %2555 = vrot.lane.b32.xlu1 %v2476_v50, %s9519_s6  ;;  %v3053_v27 = vld [vmem:[#allocation3 + $0xf0] sm:$0xff]  ;;  %v2263_v55 = vpop.f32.mrf.mxu0  ;;  %v2475_v59 = vld [vmem:[#allocation3 + $0xe8] sm:$0xff] }
 0x354   : > { %v11015_v57 = vld [vmem:[#allocation3 + $0xe9] sm:$0xff]  ;;  %3085 = vst.msk [vmem:[#allocation4 + $0x140] sm:$0xff] %vm243_vm10, %v3053_v27  ;;  %2381 = vst.msk [vmem:[#allocation3 + $0x128] sm:$0xff] %vm243_vm10, %v2348_v40  ;;  %v2351_v60 = vmax.f32 %v2269_v54, 0.0  ;;  %v2264_v1 = vadd.f32 %v10858_v61, %v2263_v55  ;;  %2553 = vrot.lane.b32.xlu0 %v2475_v59, %s9519_s6 }
 0x355   : > { %v11017_v58 = vld [vmem:[#allocation3 + $0xef] sm:$0xff]  ;;  %3723 = vst.msk [vmem:[#allocation4 + $0x100] sm:$0xff] %vm243_vm10, %v11015_v57  ;;  %v11027_v62 = vld [vmem:[#allocation3 + $0xe7] sm:$0xff]  ;;  %v9126_v5 = vpop.f32.mrf.mxu0 }
 0x356   : > { %2444 = vst.msk [vmem:[#allocation4 + $0x168] sm:$0xff] %vm243_vm10, %v11017_v58  ;;  %v11029_v3 = vld [vmem:[#allocation3 + $0x111] sm:$0xff]  ;;  %2443 = vst.msk [vmem:[#allocation4 + $0x150] sm:$0xff] %vm243_vm10, %v11027_v62  ;;  %v2350_v7 = vmax.f32 %v2264_v1, 0.0  ;;  %v2279_v9 = vadd.f32 %v9126_v5, %v10858_v61  ;;  %v3052_v12 = vld [vmem:[#allocation3 + $0xe8] sm:$0xff] }
 0x357   : > { %v2478_v4 = vld [vmem:[#allocation3 + $0x110] sm:$0xff]  ;;  %3726 = vst.msk [vmem:[#allocation4 + $0x148] sm:$0xff] %vm243_vm10, %v11029_v3  ;;  %2384 = vst.msk [vmem:[#allocation3 + $0x150] sm:$0xff] %vm243_vm10, %v2351_v60  ;;  %v2273_v20 = vpop.f32.mrf.mxu0  ;;  %v2477_v17 = vld [vmem:[#allocation3 + $0x108] sm:$0xff] }
 0x358   : > { %2559 = vrot.lane.b32.xlu1 %v2478_v4, %s9519_s6  ;;  %v3055_v16 = vld [vmem:[#allocation3 + $0x110] sm:$0xff]  ;;  %3084 = vst.msk [vmem:[#allocation4 + $0x128] sm:$0xff] %vm243_vm10, %v3052_v12  ;;  %2383 = vst.msk [vmem:[#allocation3 + $0x148] sm:$0xff] %vm243_vm10, %v2350_v7  ;;  %v2353_v24 = vmax.f32 %v2279_v9, 0.0  ;;  %v2274_v48 = vadd.f32 %v10858_v61, %v2273_v20  ;;  %2557 = vrot.lane.b32.xlu0 %v2477_v17, %s9519_s6  ;;  %v11051_v28 = vld [vmem:[#allocation3 + $0x107] sm:$0xff] }
 0x359   : > { %v11038_v13 = vld [vmem:[#allocation3 + $0x109] sm:$0xff]  ;;  %3087 = vst.msk [vmem:[#allocation4 + $0x170] sm:$0xff] %vm243_vm10, %v3055_v16  ;;  %v11053_v46 = vld [vmem:[#allocation3 + $0x131] sm:$0xff]  ;;  %v9129_v51 = vpop.f32.mrf.mxu0  ;;  %2445 = vst.msk [vmem:[#allocation4 + $0x180] sm:$0xff] %vm243_vm10, %v11051_v28 }
 0x35a   : > { %v11040_v41 = vld [vmem:[#allocation3 + $0x10f] sm:$0xff]  ;;  %3725 = vst.msk [vmem:[#allocation4 + $0x130] sm:$0xff] %vm243_vm10, %v11038_v13  ;;  %3728 = vst.msk [vmem:[#allocation4 + $0x178] sm:$0xff] %vm243_vm10, %v11053_v46  ;;  %v2352_v11 = vmax.f32 %v2274_v48, 0.0  ;;  %v2289_v14 = vadd.f32 %v9129_v51, %v10858_v61 }
 0x35b   : > { %2446 = vst.msk [vmem:[#allocation4 + $0x198] sm:$0xff] %vm243_vm10, %v11040_v41  ;;  %v2480_v26 = vld [vmem:[#allocation3 + $0x130] sm:$0xff]  ;;  %2386 = vst.msk [vmem:[#allocation3 + $0x170] sm:$0xff] %vm243_vm10, %v2353_v24  ;;  %v3054_v15 = vld [vmem:[#allocation3 + $0x108] sm:$0xff]  ;;  %v2283_v34 = vpop.f32.mrf.mxu0 }
 0x35c   : > { %2563 = vrot.lane.b32.xlu1 %v2480_v26, %s9519_s6  ;;  %v11062_v18 = vld [vmem:[#allocation3 + $0x129] sm:$0xff]  ;;  %3086 = vst.msk [vmem:[#allocation4 + $0x158] sm:$0xff] %vm243_vm10, %v3054_v15  ;;  %2385 = vst.msk [vmem:[#allocation3 + $0x168] sm:$0xff] %vm243_vm10, %v2352_v11  ;;  %v2355_v33 = vmax.f32 %v2289_v14, 0.0  ;;  %v2284_v36 = vadd.f32 %v10858_v61, %v2283_v34 }
 0x35d   : > { %v2479_v23 = vld [vmem:[#allocation3 + $0x128] sm:$0xff]  ;;  %3727 = vst.msk [vmem:[#allocation4 + $0x160] sm:$0xff] %vm243_vm10, %v11062_v18  ;;  %v9132_v40 = vpop.f32.mrf.mxu0 }
 0x35e   : > { %v11064_v49 = vld [vmem:[#allocation3 + $0x12f] sm:$0xff]  ;;  %2561 = vrot.lane.b32.xlu0 %v2479_v23, %s9519_s6  ;;  %v11074_v29 = vld [vmem:[#allocation3 + $0x127] sm:$0xff]  ;;  %2388 = vst.msk [vmem:[#allocation3 + $0x190] sm:$0xff] %vm243_vm10, %v2355_v33  ;;  %v2354_v55 = vmax.f32 %v2284_v36, 0.0  ;;  %v2299_v59 = vadd.f32 %v9132_v40, %v10858_v61 }
 0x35f   : > { %2448 = vst.msk [vmem:[#allocation4 + $0x1c8] sm:$0xff] %vm243_vm10, %v11064_v49  ;;  %v11076_v0 = vld [vmem:[#allocation3 + $0x128] sm:$0xff]  ;;  %v11078_v50 = vld [vmem:[#allocation3 + $0x151] sm:$0xff]  ;;  %2447 = vst.msk [vmem:[#allocation4 + $0x1b0] sm:$0xff] %vm243_vm10, %v11074_v29  ;;  %v2293_v1 = vpop.f32.mrf.mxu0 }
 0x360   : > { %14434 = vst [vmem:[#allocation8_spill] sm:$0xff] %v11076_v0  ;;  %v2482_v54 = vld [vmem:[#allocation3 + $0x150] sm:$0xff]  ;;  %3088 = vst.msk [vmem:[#allocation4 + $0x188] sm:$0xff] %vm243_vm10, %v11076_v0  ;;  %v2481_v5 = vld [vmem:[#allocation3 + $0x148] sm:$0xff]  ;;  %v2357_v7 = vmax.f32 %v2299_v59, 0.0  ;;  %v2294_v9 = vadd.f32 %v10858_v61, %v2293_v1 }
 0x361   : > { %v11082_v27 = vld [vmem:[#allocation3 + $0x150] sm:$0xff]  ;;  %3730 = vst.msk [vmem:[#allocation4 + $0x1a8] sm:$0xff] %vm243_vm10, %v11078_v50  ;;  %2567 = vrot.lane.b32.xlu1 %v2482_v54, %s9519_s6  ;;  %2387 = vst.msk [vmem:[#allocation3 + $0x188] sm:$0xff] %vm243_vm10, %v2354_v55  ;;  %v11104_v12 = vld [vmem:[#allocation3 + $0x147] sm:$0xff]  ;;  %v9135_v17 = vpop.f32.mrf.mxu0 }
 0x362   : > { %14435 = vst [vmem:[#allocation9_spill] sm:$0xff] %v11082_v27  ;;  %3091 = vst.msk [vmem:[#allocation4 + $0x1d0] sm:$0xff] %vm243_vm10, %v11082_v27  ;;  %v11093_v60 = vld [vmem:[#allocation3 + $0x149] sm:$0xff]  ;;  %2565 = vrot.lane.b32.xlu0 %v2481_v5, %s9519_s6  ;;  %v11108_v20 = vld [vmem:[#allocation3 + $0x171] sm:$0xff]  ;;  %v2356_v51 = vmax.f32 %v2294_v9, 0.0  ;;  %v2309_v26 = vadd.f32 %v9135_v17, %v10858_v61 }
 0x363   : > { %v11095_v4 = vld [vmem:[#allocation3 + $0x14f] sm:$0xff]  ;;  %3729 = vst.msk [vmem:[#allocation4 + $0x190] sm:$0xff] %vm243_vm10, %v11093_v60  ;;  %2449 = vst.msk [vmem:[#allocation4 + $0x1e0] sm:$0xff] %vm243_vm10, %v11104_v12  ;;  %v2303_v14 = vpop.f32.mrf.mxu0  ;;  %v11134_v36 = vld [vmem:[#allocation3 + $0x167] sm:$0xff] }
 0x364   : > { %2450 = vst.msk [vmem:[#allocation4 + $0x1f8] sm:$0xff] %vm243_vm10, %v11095_v4  ;;  %v11106_v16 = vld [vmem:[#allocation3 + $0x148] sm:$0xff]  ;;  %v2484_v24 = vld [vmem:[#allocation3 + $0x170] sm:$0xff]  ;;  %3732 = vst.msk [vmem:[#allocation4 + $0x1d8] sm:$0xff] %vm243_vm10, %v11108_v20  ;;  %v2359_v23 = vmax.f32 %v2309_v26, 0.0  ;;  %v2304_v33 = vadd.f32 %v10858_v61, %v2303_v14 }
 0x365   : > { %14436 = vst [vmem:[#allocation10_spill] sm:$0xff] %v11106_v16  ;;  %v11112_v48 = vld [vmem:[#allocation3 + $0x170] sm:$0xff]  ;;  %3090 = vst.msk [vmem:[#allocation4 + $0x1b8] sm:$0xff] %vm243_vm10, %v11106_v16  ;;  %2571 = vrot.lane.b32.xlu1 %v2484_v24, %s9519_s6  ;;  %v2483_v15 = vld [vmem:[#allocation3 + $0x168] sm:$0xff]  ;;  %v9138_v55 = vpop.f32.mrf.mxu0 }
 0x366   : > { %14437 = vst [vmem:[#allocation11_spill] sm:$0xff] %v11112_v48  ;;  %2390 = vst.msk [vmem:[#allocation3 + $0x1b0] sm:$0xff] %vm243_vm10, %v2357_v7  ;;  %v11123_v11 = vld [vmem:[#allocation3 + $0x169] sm:$0xff]  ;;  %2569 = vrot.lane.b32.xlu0 %v2483_v15, %s9519_s6  ;;  %v11138_v54 = vld [vmem:[#allocation3 + $0x191] sm:$0xff]  ;;  %v2358_v5 = vmax.f32 %v2304_v33, 0.0  ;;  %v2319_v7 = vadd.f32 %v9138_v55, %v10858_v61 }
 0x367   : > { %3093 = vst.msk [vmem:[#allocation4 + $0x200] sm:$0xff] %vm243_vm10, %v11112_v48  ;;  %v11125_v34 = vld [vmem:[#allocation3 + $0x16f] sm:$0xff]  ;;  %3731 = vst.msk [vmem:[#allocation4 + $0x1c0] sm:$0xff] %vm243_vm10, %v11123_v11  ;;  %v2313_v17 = vpop.f32.mrf.mxu0 }
 0x368   : > { %2389 = vst.msk [vmem:[#allocation3 + $0x1a8] sm:$0xff] %vm243_vm10, %v2356_v51  ;;  %2452 = vst.msk [vmem:[#allocation4 + $0x228] sm:$0xff] %vm243_vm10, %v11125_v34  ;;  %v11136_v40 = vld [vmem:[#allocation3 + $0x168] sm:$0xff]  ;;  %v2486_v59 = vld [vmem:[#allocation3 + $0x190] sm:$0xff]  ;;  %v2361_v26 = vmax.f32 %v2319_v7, 0.0  ;;  %v2314_v14 = vadd.f32 %v10858_v61, %v2313_v17 }
 0x369   : > { %14438 = vst [vmem:[#allocation12_spill] sm:$0xff] %v11136_v40  ;;  %2451 = vst.msk [vmem:[#allocation4 + $0x210] sm:$0xff] %vm243_vm10, %v11134_v36  ;;  %v11142_v1 = vld [vmem:[#allocation3 + $0x190] sm:$0xff]  ;;  %2575 = vrot.lane.b32.xlu1 %v2486_v59, %s9519_s6  ;;  %v2485_v24 = vld [vmem:[#allocation3 + $0x188] sm:$0xff] }
 0x36a   : > { %14439 = vst [vmem:[#allocation13_spill] sm:$0xff] %v11142_v1  ;;  %3092 = vst.msk [vmem:[#allocation4 + $0x1e8] sm:$0xff] %vm243_vm10, %v11136_v40  ;;  %v11153_v9 = vld [vmem:[#allocation3 + $0x189] sm:$0xff]  ;;  %2573 = vrot.lane.b32.xlu0 %v2485_v24, %s9519_s6  ;;  %v2360_v61 = vmax.f32 %v2314_v14, 0.0 }
 0x36b   : > { %3734 = vst.msk [vmem:[#allocation4 + $0x208] sm:$0xff] %vm243_vm10, %v11138_v54  ;;  %2392 = vst.msk [vmem:[#allocation3 + $0x1d0] sm:$0xff] %vm243_vm10, %v2359_v23  ;;  %v11155_v51 = vld [vmem:[#allocation3 + $0x18f] sm:$0xff]  ;;  %v11164_v15 = vld [vmem:[#allocation3 + $0x187] sm:$0xff] }
 0x36c   : > { %3095 = vst.msk [vmem:[#allocation4 + $0x230] sm:$0xff] %vm243_vm10, %v11142_v1  ;;  %3733 = vst.msk [vmem:[#allocation4 + $0x1f0] sm:$0xff] %vm243_vm10, %v11153_v9  ;;  %v11166_v23 = vld [vmem:[#allocation3 + $0x188] sm:$0xff] }
 0x36d   : > { %2391 = vst.msk [vmem:[#allocation3 + $0x1c8] sm:$0xff] %vm243_vm10, %v2358_v5  ;;  %2454 = vst.msk [vmem:[#allocation4 + $0x258] sm:$0xff] %vm243_vm10, %v11155_v51  ;;  %v11168_v33 = vld [vmem:[#allocation3 + $0x1b1] sm:$0xff] }
 0x36e   : > { %14440 = vst [vmem:[#allocation14_spill] sm:$0xff] %v11166_v23  ;;  %v2488_v55 = vld [vmem:[#allocation3 + $0x1b0] sm:$0xff]  ;;  %2453 = vst.msk [vmem:[#allocation4 + $0x240] sm:$0xff] %vm243_vm10, %v11164_v15 }
 0x36f   : > { %v11172_v59 = vld [vmem:[#allocation3 + $0x1b0] sm:$0xff]  ;;  %3094 = vst.msk [vmem:[#allocation4 + $0x218] sm:$0xff] %vm243_vm10, %v11166_v23  ;;  %3736 = vst.msk [vmem:[#allocation4 + $0x238] sm:$0xff] %vm243_vm10, %v11168_v33  ;;  %2579 = vrot.lane.b32.xlu1 %v2488_v55, %s9519_s6  ;;  %v2487_v7 = vld [vmem:[#allocation3 + $0x1a8] sm:$0xff] }
 0x370   : > { %14441 = vst [vmem:[#allocation15_spill] sm:$0xff] %v11172_v59  ;;  %2394 = vst.msk [vmem:[#allocation3 + $0x1f0] sm:$0xff] %vm243_vm10, %v2361_v26  ;;  %v11182_v5 = vld [vmem:[#allocation3 + $0x1a9] sm:$0xff]  ;;  %2577 = vrot.lane.b32.xlu0 %v2487_v7, %s9519_s6 }
 0x371   : > { %3097 = vst.msk [vmem:[#allocation4 + $0x260] sm:$0xff] %vm243_vm10, %v11172_v59  ;;  %v11184_v17 = vld [vmem:[#allocation3 + $0x1af] sm:$0xff]  ;;  %3735 = vst.msk [vmem:[#allocation4 + $0x220] sm:$0xff] %vm243_vm10, %v11182_v5  ;;  %v11192_v24 = vld [vmem:[#allocation3 + $0x1a7] sm:$0xff] }
 0x372   : > { %2393 = vst.msk [vmem:[#allocation3 + $0x1e8] sm:$0xff] %vm243_vm10, %v2360_v61  ;;  %2456 = vst.msk [vmem:[#allocation4 + $0x288] sm:$0xff] %vm243_vm10, %v11184_v17  ;;  %v11194_v26 = vld [vmem:[#allocation3 + $0x1a8] sm:$0xff]  ;;  %v11196_v14 = vld [vmem:[#allocation3 + $0x1d1] sm:$0xff] }
 0x373   : > { %14442 = vst [vmem:[#allocation16_spill] sm:$0xff] %v11194_v26  ;;  %v2490_v55 = vld [vmem:[#allocation3 + $0x1d0] sm:$0xff]  ;;  %2455 = vst.msk [vmem:[#allocation4 + $0x270] sm:$0xff] %vm243_vm10, %v11192_v24 }
 0x374   : > { %v11200_v59 = vld [vmem:[#allocation3 + $0x1d0] sm:$0xff]  ;;  %3096 = vst.msk [vmem:[#allocation4 + $0x248] sm:$0xff] %vm243_vm10, %v11194_v26  ;;  %3738 = vst.msk [vmem:[#allocation4 + $0x268] sm:$0xff] %vm243_vm10, %v11196_v14  ;;  %2583 = vrot.lane.b32.xlu1 %v2490_v55, %s9519_s6  ;;  %v2489_v7 = vld [vmem:[#allocation3 + $0x1c8] sm:$0xff] }
 0x375   : > { %14443 = vst [vmem:[#allocation17_spill] sm:$0xff] %v11200_v59  ;;  %3099 = vst.msk [vmem:[#allocation4 + $0x290] sm:$0xff] %vm243_vm10, %v11200_v59  ;;  %v11209_v61 = vld [vmem:[#allocation3 + $0x1c9] sm:$0xff]  ;;  %2581 = vrot.lane.b32.xlu0 %v2489_v7, %s9519_s6  ;;  %v2655_v7 = vld [vmem:[#allocation3 + $0x11] sm:$0xff] }
 0x376   : > { %v11211_v1 = vld [vmem:[#allocation3 + $0x1cf] sm:$0xff]  ;;  %3737 = vst.msk [vmem:[#allocation4 + $0x250] sm:$0xff] %vm243_vm10, %v11209_v61  ;;  %v11218_v26 = vld [vmem:[#allocation3 + $0x1c7] sm:$0xff] }
 0x377   : > { %2458 = vst.msk [vmem:[#allocation4 + $0x2b8] sm:$0xff] %vm243_vm10, %v11211_v1  ;;  %v11220_v23 = vld [vmem:[#allocation3 + $0x1c8] sm:$0xff]  ;;  %v11222_v55 = vld [vmem:[#allocation3 + $0x1f1] sm:$0xff]  ;;  %2457 = vst.msk [vmem:[#allocation4 + $0x2a0] sm:$0xff] %vm243_vm10, %v11218_v26 }
 0x378   : > { %14444 = vst [vmem:[#allocation18_spill] sm:$0xff] %v11220_v23  ;;  %v2492_v59 = vld [vmem:[#allocation3 + $0x1f0] sm:$0xff]  ;;  %3098 = vst.msk [vmem:[#allocation4 + $0x278] sm:$0xff] %vm243_vm10, %v11220_v23 }
 0x379   : > { %3740 = vst.msk [vmem:[#allocation4 + $0x298] sm:$0xff] %vm243_vm10, %v11222_v55  ;;  %2587 = vrot.lane.b32.xlu1 %v2492_v59, %s9519_s6  ;;  %v11231_v48 = vld [vmem:[#allocation3 + $0x1f0] sm:$0xff]  ;;  %v2491_v27 = vld [vmem:[#allocation3 + $0x1e8] sm:$0xff] }
 0x37a   : > { %14445 = vst [vmem:[#allocation19_spill] sm:$0xff] %v11231_v48  ;;  %v11233_v40 = vld [vmem:[#allocation3 + $0x1e9] sm:$0xff]  ;;  %3101 = vst.msk [vmem:[#allocation4 + $0x2c0] sm:$0xff] %vm243_vm10, %v11231_v48  ;;  %2585 = vrot.lane.b32.xlu0 %v2491_v27, %s9519_s6  ;;  %v11249_v27 = vld [vmem:[#allocation3 + $0x31] sm:$0xff] }
 0x37b   : > { %v2428_v16 = vld [vmem:[#allocation3 + $0x1ef] sm:$0xff]  ;;  %3739 = vst.msk [vmem:[#allocation4 + $0x280] sm:$0xff] %vm243_vm10, %v11233_v40  ;;  %v2427_v23 = vld [vmem:[#allocation3 + $0x1e7] sm:$0xff] }
 0x37c   : > { %2460 = vst.msk [vmem:[#allocation4 + $0x2e8] sm:$0xff] %vm243_vm10, %v2428_v16  ;;  %v11241_v0 = vld [vmem:[#allocation3 + $0x1e8] sm:$0xff]  ;;  %2459 = vst.msk [vmem:[#allocation4 + $0x2d0] sm:$0xff] %vm243_vm10, %v2427_v23  ;;  %v3057_v48 = vld [vmem:[#allocation3 + $0x130] sm:$0xff] }
 0x37d   : > { %v2654_v59 = vld [vmem:[#allocation3 + $0x9] sm:$0xff]  ;;  %3100 = vst.msk [vmem:[#allocation4 + $0x2a8] sm:$0xff] %vm243_vm10, %v11241_v0  ;;  %2720 = vrot.lane.b32.xlu1 %v2655_v7, %s9520_s10  ;;  %3089 = vst.msk [vmem:[#allocation4 + $0x1a0] sm:$0xff] %vm243_vm10, %v3057_v48 }
 0x37e   : > { %2718 = vrot.lane.b32.xlu0 %v2654_v59, %s9520_s10  ;;  %v11253_v16 = vld [vmem:[#allocation3 + $0x29] sm:$0xff]  ;;  %v11443_v59 = vld [vmem:[%s14316_s2 + $0xf8] sm:$0xff] }
 0x381   : > { %2724 = vrot.lane.b32.xlu1 %v11249_v27, %s9520_s10 }
 0x382   : > { %2722 = vrot.lane.b32.xlu0 %v11253_v16, %s9520_s10 }
 0x385   : > { %2728 = vrot.lane.b32.xlu1 %v10881_v44, %s9520_s10  ;;  %v2532_v48 = vpop.permute.xlu1 %2531 }
 0x386   : > { %2726 = vrot.lane.b32.xlu0 %v10890_v35, %s9520_s10  ;;  %2625 = vst.msk [vmem:[#allocation4 + $0x48] sm:$0xff] %vm2621_vm14, %v2532_v48 }
 0x387   : > { %v2530_v23 = vpop.permute.xlu0 %2529 }
 0x388   : > { %2624 = vst.msk [vmem:[#allocation4 + $0x30] sm:$0xff] %vm2621_vm14, %v2530_v23  ;;  %v11454_v23 = vld [vmem:[%s14316_s2 + $0xf0] sm:$0xff] }
 0x389   : > { %2732 = vrot.lane.b32.xlu1 %v10908_v22, %s9520_s10 }
 0x38a   : > { %2730 = vrot.lane.b32.xlu0 %v10914_v45, %s9520_s10  ;;  %v2536_v44 = vpop.permute.xlu1 %2535 }
 0x38b   : > { %2627 = vst.msk [vmem:[#allocation4 + $0x78] sm:$0xff] %vm2621_vm14, %v2536_v44  ;;  %v2534_v22 = vpop.permute.xlu0 %2533 }
 0x38c   : > { %2626 = vst.msk [vmem:[#allocation4 + $0x60] sm:$0xff] %vm2621_vm14, %v2534_v22  ;;  %v11464_v22 = vld [vmem:[%s14316_s2 + $0xe8] sm:$0xff] }
 0x38d   : > { %2736 = vrot.lane.b32.xlu1 %v10930_v30, %s9520_s10 }
 0x38e   : > { %2734 = vrot.lane.b32.xlu0 %v10935_v32, %s9520_s10 }
 0x391   : > { %2740 = vrot.lane.b32.xlu1 %v10956_v2, %s9520_s10 }
 0x392   : > { %2738 = vrot.lane.b32.xlu0 %v10962_v6, %s9520_s10 }
 0x393   : > { %v2540_v30 = vpop.permute.xlu1 %2539  ;;  %v2538_v32 = vpop.permute.xlu0 %2537 }
 0x394   : > { %2629 = vst.msk [vmem:[#allocation4 + $0xa8] sm:$0xff] %vm2621_vm14, %v2540_v30  ;;  %2628 = vst.msk [vmem:[#allocation4 + $0x90] sm:$0xff] %vm2621_vm14, %v2538_v32  ;;  %v11475_v32 = vld [vmem:[%s14316_s2 + $0xe0] sm:$0xff] }
 0x395   : > { %2744 = vrot.lane.b32.xlu1 %v10980_v42, %s9520_s10  ;;  %v3856_v42 = vld [vmem:[%s14316_s2 + $0x78] sm:$0xff] }
 0x396   : > { %2742 = vrot.lane.b32.xlu0 %v10987_v53, %s9520_s10  ;;  %3979 = vmatpush1.msra.mxu0 %v3856_v42  ;;  %v3855_v53 = vld [vmem:[%s14316_s2 + $0x70] sm:$0xff] }
 0x397   : > { %3980 = vmatprep.subr.mxu0 %v14433_v52  ;;  %9342 = vmatpush1.msra.mxu1 %v3856_v42 }
 0x398   : > { %3981 = vmatpush1.msra.mxu0 %v3855_v53  ;;  %9311 = vmatprep.subr.mxu1 %v14433_v52 }
 0x399   : > { %2748 = vrot.lane.b32.xlu1 %v11008_v37, %s9520_s10  ;;  %3982 = vmatprep.subr.mxu0 %v14433_v52  ;;  %v3854_v37 = vld [vmem:[%s14316_s2 + $0x68] sm:$0xff] }
 0x39a   : > { %2746 = vrot.lane.b32.xlu0 %v11015_v57, %s9520_s10  ;;  %v2544_v2 = vpop.permute.xlu1 %2543  ;;  %3983 = vmatpush1.msra.mxu0 %v3854_v37  ;;  %v3853_v57 = vld [vmem:[%s14316_s2 + $0x60] sm:$0xff] }
 0x39b   : > { %2631 = vst.msk [vmem:[#allocation4 + $0xd8] sm:$0xff] %vm2621_vm14, %v2544_v2  ;;  %v2542_v6 = vpop.permute.xlu0 %2541  ;;  %3984 = vmatprep.subr.mxu0 %v14433_v52  ;;  %9343 = vmatpush1.msra.mxu1 %v3855_v53  ;;  %v11497_v53 = vld [vmem:[%s14316_s2 + $0xd0] sm:$0xff] }
 0x39c   : > { %2630 = vst.msk [vmem:[#allocation4 + $0xc0] sm:$0xff] %vm2621_vm14, %v2542_v6  ;;  %3985 = vmatpush1.msra.mxu0 %v3853_v57  ;;  %9312 = vmatprep.subr.mxu1 %v14433_v52  ;;  %v11486_v6 = vld [vmem:[%s14316_s2 + $0xd8] sm:$0xff] }
 0x39d   : > { %2752 = vrot.lane.b32.xlu1 %v11029_v3, %s9520_s10  ;;  %3986 = vmatprep.subr.mxu0 %v14433_v52  ;;  %v3852_v3 = vld [vmem:[%s14316_s2 + $0x58] sm:$0xff] }
 0x39e   : > { %2750 = vrot.lane.b32.xlu0 %v11038_v13, %s9520_s10  ;;  %3987 = vmatpush1.msra.mxu0 %v3852_v3  ;;  %v3851_v13 = vld [vmem:[%s14316_s2 + $0x50] sm:$0xff] }
 0x39f   : > { %3988 = vmatprep.subr.mxu0 %v14433_v52  ;;  %9344 = vmatpush1.msra.mxu1 %v3854_v37 }
 0x3a0   : > { %3989 = vmatpush1.msra.mxu0 %v3851_v13  ;;  %9313 = vmatprep.subr.mxu1 %v14433_v52 }
 0x3a1   : > { %2756 = vrot.lane.b32.xlu1 %v11053_v46, %s9520_s10  ;;  %3990 = vmatprep.subr.mxu0 %v14433_v52 }
 0x3a2   : > { %2754 = vrot.lane.b32.xlu0 %v11062_v18, %s9520_s10  ;;  %v3850_v18 = vld [vmem:[%s14316_s2 + $0x48] sm:$0xff]  ;;  %9345 = vmatpush1.msra.mxu1 %v3853_v57 }
 0x3a3   : > { %3991 = vmatpush1.msra.mxu0 %v3850_v18  ;;  %9314 = vmatprep.subr.mxu1 %v14433_v52  ;;  %v11508_v57 = vld [vmem:[%s14316_s2 + $0xc8] sm:$0xff] }
 0x3a4   : > { %3992 = vmatprep.subr.mxu0 %v14433_v52  ;;  %9346 = vmatpush1.msra.mxu1 %v3852_v3 }
 0x3a5   : > { %2760 = vrot.lane.b32.xlu1 %v11078_v50, %s9520_s10  ;;  %9315 = vmatprep.subr.mxu1 %v14433_v52 }
 0x3a6   : > { %2758 = vrot.lane.b32.xlu0 %v11093_v60, %s9520_s10  ;;  %v3849_v60 = vld [vmem:[%s14316_s2 + $0x40] sm:$0xff]  ;;  %9347 = vmatpush1.msra.mxu1 %v3851_v13 }
 0x3a7   : > { %3993 = vmatpush1.msra.mxu0 %v3849_v60  ;;  %9316 = vmatprep.subr.mxu1 %v14433_v52  ;;  %v11519_v13 = vld [vmem:[%s14316_s2 + $0xc0] sm:$0xff] }
 0x3a8   : > { %3994 = vmatprep.subr.mxu0 %v14433_v52  ;;  %9348 = vmatpush1.msra.mxu1 %v3850_v18  ;;  %v11528_v18 = vld [vmem:[%s14316_s2 + $0xb8] sm:$0xff] }
 0x3a9   : > { %2764 = vrot.lane.b32.xlu1 %v11108_v20, %s9520_s10  ;;  %v11372_v20 = vld [vmem:[%s14316_s2 + $0x30] sm:$0xff]  ;;  %9317 = vmatprep.subr.mxu1 %v14433_v52 }
 0x3aa   : > { %2762 = vrot.lane.b32.xlu0 %v11123_v11, %s9520_s10  ;;  %v11381_v11 = vld [vmem:[%s14316_s2 + $0x28] sm:$0xff]  ;;  %9349 = vmatpush1.msra.mxu1 %v3849_v60  ;;  %v11541_v60 = vld [vmem:[%s14316_s2 + $0xb0] sm:$0xff] }
 0x3ab   : > { %9318 = vmatprep.subr.mxu1 %v14433_v52 }
 0x3ad   : > { %2768 = vrot.lane.b32.xlu1 %v11138_v54, %s9520_s10  ;;  %v11392_v54 = vld [vmem:[%s14316_s2 + $0x20] sm:$0xff] }
 0x3ae   : > { %2766 = vrot.lane.b32.xlu0 %v11153_v9, %s9520_s10  ;;  %v11402_v9 = vld [vmem:[%s14316_s2 + $0x18] sm:$0xff] }
 0x3b1   : > { %2772 = vrot.lane.b32.xlu1 %v11168_v33, %s9520_s10  ;;  %v11412_v33 = vld [vmem:[%s14316_s2 + $0x10] sm:$0xff] }
 0x3b2   : > { %2770 = vrot.lane.b32.xlu0 %v11182_v5, %s9520_s10 }
 0x3b5   : > { %2776 = vrot.lane.b32.xlu1 %v11196_v14, %s9520_s10  ;;  %v11422_v14 = vld [vmem:[%s14316_s2 + $0x8] sm:$0xff] }
 0x3b6   : > { %2774 = vrot.lane.b32.xlu0 %v11209_v61, %s9520_s10  ;;  %v2548_v46 = vpop.permute.xlu1 %2547 }
 0x3b7   : > { %2633 = vst.msk [vmem:[#allocation4 + $0x108] sm:$0xff] %vm2621_vm14, %v2548_v46  ;;  %v2546_v50 = vpop.permute.xlu0 %2545 }
 0x3b8   : > { %2632 = vst.msk [vmem:[#allocation4 + $0xf0] sm:$0xff] %vm2621_vm14, %v2546_v50 }
 0x3b9   : > { %2780 = vrot.lane.b32.xlu1 %v11222_v55, %s9520_s10  ;;  %v11433_v55 = vld [vmem:[%s14316_s2] sm:$0xff] }
 0x3ba   : > { %2778 = vrot.lane.b32.xlu0 %v11233_v40, %s9520_s10 }
 0x3bd   : > { %2913 = vrot.lane.b32.xlu1 %v10879_v43, %s9521_s11  ;;  %v3848_v43 = vld [vmem:[%s14316_s2 + $0x38] sm:$0xff] }
 0x3be   : > { %2911 = vrot.lane.b32.xlu0 %v10873_v21, %s9521_s11  ;;  %3995 = vmatpush1.msra.mxu0 %v3848_v43  ;;  %v2552_v21 = vpop.permute.xlu1 %2551 }
 0x3bf   : > { %3996 = vmatprep.subr.mxu0 %v14433_v52  ;;  %2635 = vst.msk [vmem:[#allocation4 + $0x138] sm:$0xff] %vm2621_vm14, %v2552_v21  ;;  %v2550_v40 = vpop.permute.xlu0 %2549  ;;  %9350 = vmatpush1.msra.mxu1 %v3848_v43 }
 0x3c0   : > { %3997 = vmatpush1.msra.mxu0 %v11372_v20  ;;  %2634 = vst.msk [vmem:[#allocation4 + $0x120] sm:$0xff] %vm2621_vm14, %v2550_v40  ;;  %9319 = vmatprep.subr.mxu1 %v14433_v52 }
 0x3c1   : > { %2917 = vrot.lane.b32.xlu1 %v10892_v56, %s9521_s11  ;;  %3998 = vmatprep.subr.mxu0 %v14433_v52 }
 0x3c2   : > { %2915 = vrot.lane.b32.xlu0 %v10901_v63, %s9521_s11  ;;  %3999 = vmatpush1.msra.mxu0 %v11381_v11 }
 0x3c3   : > { %4000 = vmatprep.subr.mxu0 %v14433_v52  ;;  %9351 = vmatpush1.msra.mxu1 %v11372_v20  ;;  %v11552_v20 = vld [vmem:[%s14316_s2 + $0xa8] sm:$0xff] }
 0x3c4   : > { %4001 = vmatpush1.msra.mxu0 %v11392_v54  ;;  %9320 = vmatprep.subr.mxu1 %v14433_v52 }
 0x3c5   : > { %2921 = vrot.lane.b32.xlu1 %v10916_v25, %s9521_s11  ;;  %4002 = vmatprep.subr.mxu0 %v14433_v52  ;;  %v2556_v5 = vpop.permute.xlu1 %2555 }
 0x3c6   : > { %2919 = vrot.lane.b32.xlu0 %v10925_v47, %s9521_s11  ;;  %4003 = vmatpush1.msra.mxu0 %v11402_v9  ;;  %2637 = vst.msk [vmem:[#allocation4 + $0x168] sm:$0xff] %vm2621_vm14, %v2556_v5  ;;  %v2554_v61 = vpop.permute.xlu0 %2553 }
 0x3c7   : > { %4004 = vmatprep.subr.mxu0 %v14433_v52  ;;  %2636 = vst.msk [vmem:[#allocation4 + $0x150] sm:$0xff] %vm2621_vm14, %v2554_v61  ;;  %9352 = vmatpush1.msra.mxu1 %v11381_v11  ;;  %v11563_v11 = vld [vmem:[%s14316_s2 + $0xa0] sm:$0xff]  ;;  %v11594_v61 = vld [vmem:[%s14316_s2 + $0x88] sm:$0xff] }
 0x3c8   : > { %4005 = vmatpush1.msra.mxu0 %v11412_v33  ;;  %9321 = vmatprep.subr.mxu1 %v14433_v52 }
 0x3c9   : > { %2925 = vrot.lane.b32.xlu1 %v10937_v39, %s9521_s11  ;;  %4006 = vmatprep.subr.mxu0 %v14433_v52 }
 0x3ca   : > { %2923 = vrot.lane.b32.xlu0 %v10945_v38, %s9521_s11  ;;  %4007 = vmatpush1.msra.mxu0 %v11422_v14  ;;  %v2560_v7 = vpop.permute.xlu1 %2559  ;;  %v2558_v48 = vpop.permute.xlu0 %2557 }
 0x3cb   : > { %4008 = vmatprep.subr.mxu0 %v14433_v52  ;;  %2639 = vst.msk [vmem:[#allocation4 + $0x198] sm:$0xff] %vm2621_vm14, %v2560_v7  ;;  %2638 = vst.msk [vmem:[#allocation4 + $0x180] sm:$0xff] %vm2621_vm14, %v2558_v48  ;;  %9353 = vmatpush1.msra.mxu1 %v11392_v54  ;;  %v11572_v54 = vld [vmem:[%s14316_s2 + $0x98] sm:$0xff]  ;;  %v11607_v7 = vld [vmem:[%s14316_s2 + $0x80] sm:$0xff] }
 0x3cc   : > { %4009 = vmatpush1.msra.mxu0 %v11433_v55  ;;  %9322 = vmatprep.subr.mxu1 %v14433_v52 }
 0x3cd   : > { %2929 = vrot.lane.b32.xlu1 %v10964_v8, %s9521_s11  ;;  %4010 = vmatprep.subr.mxu0 %v14433_v52 }
 0x3ce   : > { %2927 = vrot.lane.b32.xlu0 %v10973_v10, %s9521_s11  ;;  %4011 = vmatpush2.msra.mxu0 %v11443_v59  ;;  %v2564_v44 = vpop.permute.xlu1 %2563 }
 0x3cf   : > { %4012 = vmatprep.subr.mxu0 %v14433_v52  ;;  %2641 = vst.msk [vmem:[#allocation4 + $0x1c8] sm:$0xff] %vm2621_vm14, %v2564_v44  ;;  %9354 = vmatpush1.msra.mxu1 %v11402_v9  ;;  %v9425_v44 = vld [vmem:[#allocation3 + $0x48] sm:$0xff] }
 0x3d0   : > { %4013 = vmatpush2.msra.mxu0 %v11454_v23  ;;  %v2562_v30 = vpop.permute.xlu0 %2561  ;;  %9323 = vmatprep.subr.mxu1 %v14433_v52 }
 0x3d1   : > { %2933 = vrot.lane.b32.xlu1 %v10991_v31, %s9521_s11  ;;  %4014 = vmatprep.subr.mxu0 %v14433_v52  ;;  %2640 = vst.msk [vmem:[#allocation4 + $0x1b0] sm:$0xff] %vm2621_vm14, %v2562_v30  ;;  %v9426_v30 = vld [vmem:[#allocation3 + $0x50] sm:$0xff] }
 0x3d2   : > { %2931 = vrot.lane.b32.xlu0 %v10999_v19, %s9521_s11  ;;  %4015 = vmatpush2.msra.mxu0 %v11464_v22 }
 0x3d3   : > { %4016 = vmatprep.subr.mxu0 %v14433_v52  ;;  %v2568_v2 = vpop.permute.xlu1 %2567  ;;  %9355 = vmatpush1.msra.mxu1 %v11412_v33  ;;  %v11585_v33 = vld [vmem:[%s14316_s2 + $0x90] sm:$0xff] }
 0x3d4   : > { %4017 = vmatpush2.msra.mxu0 %v11475_v32  ;;  %2643 = vst.msk [vmem:[#allocation4 + $0x1f8] sm:$0xff] %vm2621_vm14, %v2568_v2  ;;  %v2566_v42 = vpop.permute.xlu0 %2565  ;;  %9324 = vmatprep.subr.mxu1 %v14433_v52 }
 0x3d5   : > { %2937 = vrot.lane.b32.xlu1 %v11017_v58, %s9521_s11  ;;  %4018 = vmatprep.subr.mxu0 %v14433_v52  ;;  %2642 = vst.msk [vmem:[#allocation4 + $0x1e0] sm:$0xff] %vm2621_vm14, %v2566_v42 }
 0x3d6   : > { %2935 = vrot.lane.b32.xlu0 %v11027_v62, %s9521_s11  ;;  %4019 = vmatpush2.msra.mxu0 %v11486_v6 }
 0x3d7   : > { %4020 = vmatprep.subr.mxu0 %v14433_v52  ;;  %v2572_v37 = vpop.permute.xlu1 %2571  ;;  %9356 = vmatpush1.msra.mxu1 %v11422_v14 }
 0x3d8   : > { %4021 = vmatpush2.msra.mxu0 %v11497_v53  ;;  %2645 = vst.msk [vmem:[#allocation4 + $0x228] sm:$0xff] %vm2621_vm14, %v2572_v37  ;;  %v2570_v3 = vpop.permute.xlu0 %2569  ;;  %9325 = vmatprep.subr.mxu1 %v14433_v52 }
 0x3d9   : > { %2941 = vrot.lane.b32.xlu1 %v11040_v41, %s9521_s11  ;;  %4022 = vmatprep.subr.mxu0 %v14433_v52  ;;  %2644 = vst.msk [vmem:[#allocation4 + $0x210] sm:$0xff] %vm2621_vm14, %v2570_v3 }
 0x3da   : > { %2939 = vrot.lane.b32.xlu0 %v11051_v28, %s9521_s11  ;;  %4023 = vmatpush2.msra.mxu0 %v11508_v57 }
 0x3db   : > { %4024 = vmatprep.subr.mxu0 %v14433_v52  ;;  %v2576_v46 = vpop.permute.xlu1 %2575  ;;  %9357 = vmatpush1.msra.mxu1 %v11433_v55 }
 0x3dc   : > { %4025 = vmatpush2.msra.mxu0 %v11519_v13  ;;  %2647 = vst.msk [vmem:[#allocation4 + $0x258] sm:$0xff] %vm2621_vm14, %v2576_v46  ;;  %v2574_v50 = vpop.permute.xlu0 %2573  ;;  %9326 = vmatprep.subr.mxu1 %v14433_v52 }
 0x3dd   : > { %2945 = vrot.lane.b32.xlu1 %v11064_v49, %s9521_s11  ;;  %4026 = vmatprep.subr.mxu0 %v14433_v52  ;;  %2646 = vst.msk [vmem:[#allocation4 + $0x240] sm:$0xff] %vm2621_vm14, %v2574_v50  ;;  %v9429_v50 = vld [vmem:[#allocation3 + $0x70] sm:$0xff] }
 0x3de   : > { %2943 = vrot.lane.b32.xlu0 %v11074_v29, %s9521_s11  ;;  %4027 = vmatpush2.msra.mxu0 %v11528_v18 }
 0x3df   : > { %4028 = vmatprep.subr.mxu0 %v14433_v52  ;;  %9358 = vmatpush2.msra.mxu1 %v11443_v59  ;;  %v9427_v59 = vld [vmem:[%s14317_s3] ss:$0 sm:$0xff] }
 0x3e0   : > { %4029 = vmatpush2.msra.mxu0 %v11541_v60  ;;  %9327 = vmatprep.subr.mxu1 %v14433_v52 }
 0x3e1   : > { %2949 = vrot.lane.b32.xlu1 %v11095_v4, %s9521_s11  ;;  %v2580_v43 = vpop.permute.xlu1 %2579  ;;  %4030 = vmatprep.subr.mxu0 %v14433_v52 }
 0x3e2   : > { %2947 = vrot.lane.b32.xlu0 %v11104_v12, %s9521_s11  ;;  %2649 = vst.msk [vmem:[#allocation4 + $0x288] sm:$0xff] %vm2621_vm14, %v2580_v43  ;;  %v2578_v21 = vpop.permute.xlu0 %2577  ;;  %4031 = vmatpush2.msra.mxu0 %v11552_v20 }
 0x3e3   : > { %2648 = vst.msk [vmem:[#allocation4 + $0x270] sm:$0xff] %vm2621_vm14, %v2578_v21  ;;  %4032 = vmatprep.subr.mxu0 %v14433_v52  ;;  %9359 = vmatpush2.msra.mxu1 %v11454_v23 }
 0x3e4   : > { %4033 = vmatpush2.msra.mxu0 %v11563_v11  ;;  %9328 = vmatprep.subr.mxu1 %v14433_v52 }
 0x3e5   : > { %2953 = vrot.lane.b32.xlu1 %v11125_v34, %s9521_s11  ;;  %4034 = vmatprep.subr.mxu0 %v14433_v52 }
 0x3e6   : > { %v2584_v40 = vpop.permute.xlu1 %2583  ;;  %2951 = vrot.lane.b32.xlu0 %v11134_v36, %s9521_s11  ;;  %4035 = vmatpush2.msra.mxu0 %v11572_v54 }
 0x3e7   : > { %2651 = vst.msk [vmem:[#allocation4 + $0x2b8] sm:$0xff] %vm2621_vm14, %v2584_v40  ;;  %v2582_v9 = vpop.permute.xlu0 %2581  ;;  %4036 = vmatprep.subr.mxu0 %v14433_v52  ;;  %9360 = vmatpush2.msra.mxu1 %v11464_v22  ;;  %v9430_v40 = vld [vmem:[#allocation3 + $0x88] sm:$0xff] }
 0x3e8   : > { %2650 = vst.msk [vmem:[#allocation4 + $0x2a0] sm:$0xff] %vm2621_vm14, %v2582_v9  ;;  %4037 = vmatpush2.msra.mxu0 %v11585_v33  ;;  %9329 = vmatprep.subr.mxu1 %v14433_v52  ;;  %v9431_v9 = vld [vmem:[#allocation3 + $0x90] sm:$0xff] }
 0x3e9   : > { %2957 = vrot.lane.b32.xlu1 %v11155_v51, %s9521_s11  ;;  %4038 = vmatprep.subr.mxu0 %v14433_v52 }
 0x3ea   : > { %2955 = vrot.lane.b32.xlu0 %v11164_v15, %s9521_s11  ;;  %4039 = vmatpush2.msra.mxu0 %v11594_v61 }
 0x3eb   : > { %v2588_v5 = vpop.permute.xlu1 %2587  ;;  %4040 = vmatprep.subr.mxu0 %v14433_v52  ;;  %9361 = vmatpush2.msra.mxu1 %v11475_v32  ;;  %v3107_v32 = vld [vmem:[#allocation3 + $0x51] sm:$0xff] }
 0x3ec   : > { %2653 = vst.msk [vmem:[#allocation4 + $0x2e8] sm:$0xff] %vm2621_vm14, %v2588_v5  ;;  %v2586_v14 = vpop.permute.xlu0 %2585  ;;  %4041 = vmatpush2.msra.mxu0 %v11607_v7  ;;  %9330 = vmatprep.subr.mxu1 %v14433_v52 }
 0x3ed   : > { %3361 = vrot.lane.b32.xlu1 %v10901_v63, %s9520_s10  ;;  %2652 = vst.msk [vmem:[#allocation4 + $0x2d0] sm:$0xff] %vm2621_vm14, %v2586_v14  ;;  %9362 = vmatpush2.msra.mxu1 %v11486_v6 }
 0x3ee   : > { %3168 = vrot.lane.b32.xlu0 %v11253_v16, %s9519_s6  ;;  %v9141_v16 = vpop.f32.mrf.mxu0  ;;  %9331 = vmatprep.subr.mxu1 %v14433_v52 }
 0x3ef   : > { %v2721_v48 = vpop.permute.xlu1 %2720  ;;  %v2329_v2 = vadd.f32 %v9427_v59, %v9141_v16  ;;  %9363 = vmatpush2.msra.mxu1 %v11497_v53  ;;  %v9432_v16 = vld [vmem:[#allocation3 + $0xa8] sm:$0xff] }
 0x3f0   : > { %2816 = vst.msk [vmem:[#allocation4 + $0x18] sm:$0xff] %vm2814_vm15, %v2721_v48  ;;  %v2719_v63 = vpop.permute.xlu0 %2718  ;;  %v2323_v37 = vpop.f32.mrf.mxu0  ;;  %9332 = vmatprep.subr.mxu1 %v14433_v52  ;;  %v3110_v48 = vld [vmem:[#allocation3 + $0x89] sm:$0xff] }
 0x3f1   : > { %3170 = vrot.lane.b32.xlu1 %v11249_v27, %s9519_s6  ;;  %2815 = vst.msk [vmem:[#allocation4] sm:$0xff] %vm2814_vm15, %v2719_v63  ;;  %v2363_v42 = vmax.f32 %v2329_v2, 0.0  ;;  %v2324_v3 = vadd.f32 %v9427_v59, %v2323_v37  ;;  %9364 = vmatpush2.msra.mxu1 %v11508_v57  ;;  %v3112_v2 = vld [vmem:[#allocation3 + $0xa9] sm:$0xff] }
 0x3f2   : > { %3553 = vrot.lane.b32.xlu0 %v9425_v44, %s9521_s11  ;;  %9333 = vmatprep.subr.mxu1 %v14433_v52 }
 0x3f3   : > { %v2725_v55 = vpop.permute.xlu1 %2724  ;;  %2396 = vst.msk [vmem:[#allocation3 + $0x210] sm:$0xff] %vm243_vm10, %v2363_v42  ;;  %9365 = vmatpush2.msra.mxu1 %v11519_v13  ;;  %v3113_v42 = vld [vmem:[#allocation3 + $0xb1] sm:$0xff] }
 0x3f4   : > { %2818 = vst.msk [vmem:[#allocation4 + $0x48] sm:$0xff] %vm2814_vm15, %v2725_v55  ;;  %v2723_v27 = vpop.permute.xlu0 %2722  ;;  %9334 = vmatprep.subr.mxu1 %v14433_v52 }
 0x3f5   : > { %3555 = vrot.lane.b32.xlu1 %v9426_v30, %s9521_s11  ;;  %2817 = vst.msk [vmem:[#allocation4 + $0x30] sm:$0xff] %vm2814_vm15, %v2723_v27  ;;  %9366 = vmatpush2.msra.mxu1 %v11528_v18 }
 0x3f6   : > { %3363 = vrot.lane.b32.xlu0 %v10892_v56, %s9520_s10  ;;  %v2362_v56 = vmax.f32 %v2324_v3, 0.0  ;;  %9335 = vmatprep.subr.mxu1 %v14433_v52  ;;  %v9434_v3 = vld [vmem:[#allocation3 + $0xc8] sm:$0xff] }
 0x3f7   : > { %v2729_v23 = vpop.permute.xlu1 %2728  ;;  %9367 = vmatpush2.msra.mxu1 %v11541_v60 }
 0x3f8   : > { %2820 = vst.msk [vmem:[#allocation4 + $0x78] sm:$0xff] %vm2814_vm15, %v2729_v23  ;;  %v2727_v22 = vpop.permute.xlu0 %2726  ;;  %9336 = vmatprep.subr.mxu1 %v14433_v52 }
 0x3f9   : > { %3365 = vrot.lane.b32.xlu1 %v10925_v47, %s9520_s10  ;;  %2819 = vst.msk [vmem:[#allocation4 + $0x60] sm:$0xff] %vm2814_vm15, %v2727_v22  ;;  %9368 = vmatpush2.msra.mxu1 %v11552_v20  ;;  %v11693_v20 = vld [vmem:[%s14316_s2 + $0x118] sm:$0xff] }
 0x3fa   : > { %3172 = vrot.lane.b32.xlu0 %v10890_v35, %s9519_s6  ;;  %2395 = vst.msk [vmem:[#allocation3 + $0x208] sm:$0xff] %vm243_vm10, %v2362_v56  ;;  %v9428_v35 = vld [vmem:[#allocation3 + $0x68] sm:$0xff]  ;;  %v11655_v53 = vld [vmem:[#allocation3 + $0x211] sm:$0xff]  ;;  %9337 = vmatprep.subr.mxu1 %v14433_v52 }
 0x3fb   : > { %v2733_v46 = vpop.permute.xlu1 %2732  ;;  %3742 = vst.msk [vmem:[#allocation4 + $0x2c8] sm:$0xff] %vm243_vm10, %v11655_v53  ;;  %v11680_v60 = vld [vmem:[#allocation3 + $0x210] sm:$0xff]  ;;  %9369 = vmatpush2.msra.mxu1 %v11563_v11  ;;  %9142 = vmatprep.subr.mxu0 %v11693_v20 }
 0x3fc   : > { %2822 = vst.msk [vmem:[#allocation4 + $0xa8] sm:$0xff] %vm2814_vm15, %v2733_v46  ;;  %v2731_v47 = vpop.permute.xlu0 %2730  ;;  %9338 = vmatprep.subr.mxu1 %v14433_v52 }
 0x3fd   : > { %3174 = vrot.lane.b32.xlu1 %v3107_v32, %s9519_s6  ;;  %2821 = vst.msk [vmem:[#allocation4 + $0x90] sm:$0xff] %vm2814_vm15, %v2731_v47  ;;  %9370 = vmatpush2.msra.mxu1 %v11572_v54  ;;  %v3114_v32 = vld [vmem:[#allocation3 + $0xc9] sm:$0xff] }
 0x3fe   : > { %3557 = vrot.lane.b32.xlu0 %v9428_v35, %s9521_s11  ;;  %3103 = vst.msk [vmem:[#allocation4 + $0x2f0] sm:$0xff] %vm243_vm10, %v11680_v60  ;;  %9339 = vmatprep.subr.mxu1 %v14433_v52 }
 0x3ff   : > { %v2737_v6 = vpop.permute.xlu1 %2736  ;;  %9371 = vmatpush2.msra.mxu1 %v11585_v33 }
 0x400   : > { %2824 = vst.msk [vmem:[#allocation4 + $0xd8] sm:$0xff] %vm2814_vm15, %v2737_v6  ;;  %v2735_v57 = vpop.permute.xlu0 %2734  ;;  %9340 = vmatprep.subr.mxu1 %v14433_v52  ;;  %v3115_v6 = vld [vmem:[#allocation3 + $0xd1] sm:$0xff] }
 0x401   : > { %3559 = vrot.lane.b32.xlu1 %v9429_v50, %s9521_s11  ;;  %2823 = vst.msk [vmem:[#allocation4 + $0xc0] sm:$0xff] %vm2814_vm15, %v2735_v57  ;;  %v11666_v43 = vld [vmem:[#allocation3 + $0x209] sm:$0xff]  ;;  %9372 = vmatpush2.msra.mxu1 %v11594_v61 }
 0x402   : > { %3367 = vrot.lane.b32.xlu0 %v10916_v25, %s9520_s10  ;;  %3741 = vst.msk [vmem:[#allocation4 + $0x2b0] sm:$0xff] %vm243_vm10, %v11666_v43  ;;  %v11678_v25 = vld [vmem:[#allocation3 + $0x208] sm:$0xff]  ;;  %9341 = vmatprep.subr.mxu1 %v14433_v52 }
 0x403   : > { %v2741_v13 = vpop.permute.xlu1 %2740  ;;  %3102 = vst.msk [vmem:[#allocation4 + $0x2d8] sm:$0xff] %vm243_vm10, %v11678_v25  ;;  %9373 = vmatpush2.msra.mxu1 %v11607_v7  ;;  %v9436_v50 = vld [vmem:[#allocation3 + $0xe8] sm:$0xff] }
 0x404   : > { %2826 = vst.msk [vmem:[#allocation4 + $0x108] sm:$0xff] %vm2814_vm15, %v2741_v13  ;;  %v2739_v18 = vpop.permute.xlu0 %2738 }
 0x405   : > { %3369 = vrot.lane.b32.xlu1 %v10945_v38, %s9520_s10  ;;  %2825 = vst.msk [vmem:[#allocation4 + $0xf0] sm:$0xff] %vm2814_vm15, %v2739_v18  ;;  %v3109_v38 = vld [vmem:[#allocation3 + $0x71] sm:$0xff] }
 0x406   : > { %3176 = vrot.lane.b32.xlu0 %v10914_v45, %s9519_s6 }
 0x407   : > { %v2745_v21 = vpop.permute.xlu1 %2744 }
 0x408   : > { %2828 = vst.msk [vmem:[#allocation4 + $0x138] sm:$0xff] %vm2814_vm15, %v2745_v21  ;;  %v2743_v45 = vpop.permute.xlu0 %2742  ;;  %v3116_v21 = vld [vmem:[#allocation3 + $0xe9] sm:$0xff] }
 0x409   : > { %3178 = vrot.lane.b32.xlu1 %v3109_v38, %s9519_s6  ;;  %2827 = vst.msk [vmem:[#allocation4 + $0x120] sm:$0xff] %vm2814_vm15, %v2743_v45  ;;  %v3117_v45 = vld [vmem:[#allocation3 + $0xf1] sm:$0xff] }
 0x40a   : > { %3561 = vrot.lane.b32.xlu0 %v9430_v40, %s9521_s11 }
 0x40b   : > { %v2749_v11 = vpop.permute.xlu1 %2748 }
 0x40c   : > { %2830 = vst.msk [vmem:[#allocation4 + $0x168] sm:$0xff] %vm2814_vm15, %v2749_v11  ;;  %v2747_v5 = vpop.permute.xlu0 %2746 }
 0x40d   : > { %3563 = vrot.lane.b32.xlu1 %v9431_v9, %s9521_s11  ;;  %2829 = vst.msk [vmem:[#allocation4 + $0x150] sm:$0xff] %vm2814_vm15, %v2747_v5 }
 0x40e   : > { %3371 = vrot.lane.b32.xlu0 %v10937_v39, %s9520_s10 }
 0x40f   : > { %v2753_v54 = vpop.permute.xlu1 %2752 }
 0x410   : > { %2832 = vst.msk [vmem:[#allocation4 + $0x198] sm:$0xff] %vm2814_vm15, %v2753_v54  ;;  %v2751_v33 = vpop.permute.xlu0 %2750 }
 0x411   : > { %2961 = vrot.lane.b32.xlu1 %v11184_v17, %s9521_s11  ;;  %2831 = vst.msk [vmem:[#allocation4 + $0x180] sm:$0xff] %vm2814_vm15, %v2751_v33  ;;  %v3118_v33 = vld [vmem:[#allocation3 + $0x109] sm:$0xff] }
 0x412   : > { %2959 = vrot.lane.b32.xlu0 %v11192_v24, %s9521_s11 }
 0x413   : > { %v2757_v14 = vpop.permute.xlu1 %2756 }
 0x414   : > { %2834 = vst.msk [vmem:[#allocation4 + $0x1c8] sm:$0xff] %vm2814_vm15, %v2757_v14  ;;  %v2755_v39 = vpop.permute.xlu0 %2754 }
 0x415   : > { %2965 = vrot.lane.b32.xlu1 %v11211_v1, %s9521_s11  ;;  %2833 = vst.msk [vmem:[#allocation4 + $0x1b0] sm:$0xff] %vm2814_vm15, %v2755_v39  ;;  %v3111_v1 = vld [vmem:[#allocation3 + $0x91] sm:$0xff] }
 0x416   : > { %2963 = vrot.lane.b32.xlu0 %v11218_v26, %s9521_s11  ;;  %v3119_v39 = vld [vmem:[#allocation3 + $0x111] sm:$0xff] }
 0x417   : > { %v2761_v61 = vpop.permute.xlu1 %2760 }
 0x418   : > { %2836 = vst.msk [vmem:[#allocation4 + $0x1f8] sm:$0xff] %vm2814_vm15, %v2761_v61  ;;  %v2759_v7 = vpop.permute.xlu0 %2758 }
 0x419   : > { %3373 = vrot.lane.b32.xlu1 %v10973_v10, %s9520_s10  ;;  %2835 = vst.msk [vmem:[#allocation4 + $0x1e0] sm:$0xff] %vm2814_vm15, %v2759_v7  ;;  %v9433_v10 = vld [vmem:[#allocation3 + $0xb0] sm:$0xff]  ;;  %v14446_v7 = vld [vmem:[#allocation8_spill] sm:$0xff] }
 0x41a   : > { %3180 = vrot.lane.b32.xlu0 %v3110_v48, %s9519_s6 }
 0x41b   : > { %v2765_v63 = vpop.permute.xlu1 %2764 }
 0x41c   : > { %2838 = vst.msk [vmem:[#allocation4 + $0x228] sm:$0xff] %vm2814_vm15, %v2765_v63  ;;  %v2763_v55 = vpop.permute.xlu0 %2762 }
 0x41d   : > { %3182 = vrot.lane.b32.xlu1 %v3111_v1, %s9519_s6  ;;  %2837 = vst.msk [vmem:[#allocation4 + $0x210] sm:$0xff] %vm2814_vm15, %v2763_v55  ;;  %v3120_v55 = vld [vmem:[#allocation3 + $0x129] sm:$0xff] }
 0x41e   : > { %3565 = vrot.lane.b32.xlu0 %v9432_v16, %s9521_s11  ;;  %v3121_v16 = vld [vmem:[#allocation3 + $0x131] sm:$0xff] }
 0x41f   : > { %v2769_v44 = vpop.permute.xlu1 %2768 }
 0x420   : > { %2840 = vst.msk [vmem:[#allocation4 + $0x258] sm:$0xff] %vm2814_vm15, %v2769_v44  ;;  %v2767_v30 = vpop.permute.xlu0 %2766 }
 0x421   : > { %3567 = vrot.lane.b32.xlu1 %v9433_v10, %s9521_s11  ;;  %2839 = vst.msk [vmem:[#allocation4 + $0x240] sm:$0xff] %vm2814_vm15, %v2767_v30  ;;  %v14447_v30 = vld [vmem:[#allocation10_spill] sm:$0xff] }
 0x422   : > { %3375 = vrot.lane.b32.xlu0 %v10964_v8, %s9520_s10 }
 0x423   : > { %v2773_v27 = vpop.permute.xlu1 %2772 }
 0x424   : > { %2842 = vst.msk [vmem:[#allocation4 + $0x288] sm:$0xff] %vm2814_vm15, %v2773_v27  ;;  %v2771_v59 = vpop.permute.xlu0 %2770 }
 0x425   : > { %3377 = vrot.lane.b32.xlu1 %v10999_v19, %s9520_s10  ;;  %2841 = vst.msk [vmem:[#allocation4 + $0x270] sm:$0xff] %vm2814_vm15, %v2771_v59  ;;  %v9435_v19 = vld [vmem:[#allocation3 + $0xd0] sm:$0xff] }
 0x426   : > { %3184 = vrot.lane.b32.xlu0 %v3112_v2, %s9519_s6 }
 0x427   : > { %v2777_v23 = vpop.permute.xlu1 %2776 }
 0x428   : > { %2844 = vst.msk [vmem:[#allocation4 + $0x2b8] sm:$0xff] %vm2814_vm15, %v2777_v23  ;;  %v2775_v37 = vpop.permute.xlu0 %2774  ;;  %v3122_v23 = vld [vmem:[#allocation3 + $0x149] sm:$0xff] }
 0x429   : > { %3186 = vrot.lane.b32.xlu1 %v3113_v42, %s9519_s6  ;;  %2843 = vst.msk [vmem:[#allocation4 + $0x2a0] sm:$0xff] %vm2814_vm15, %v2775_v37  ;;  %v3123_v37 = vld [vmem:[#allocation3 + $0x151] sm:$0xff] }
 0x42a   : > { %3569 = vrot.lane.b32.xlu0 %v9434_v3, %s9521_s11  ;;  %v14450_v3 = vld [vmem:[#allocation11_spill] sm:$0xff] }
 0x42b   : > { %v2781_v8 = vpop.permute.xlu1 %2780 }
 0x42c   : > { %2846 = vst.msk [vmem:[#allocation4 + $0x2e8] sm:$0xff] %vm2814_vm15, %v2781_v8  ;;  %v2779_v22 = vpop.permute.xlu0 %2778 }
 0x42d   : > { %3571 = vrot.lane.b32.xlu1 %v9435_v19, %s9521_s11  ;;  %2845 = vst.msk [vmem:[#allocation4 + $0x2d0] sm:$0xff] %vm2814_vm15, %v2779_v22 }
 0x42e   : > { %3379 = vrot.lane.b32.xlu0 %v10991_v31, %s9520_s10 }
 0x42f   : > { %v2914_v56 = vpop.permute.xlu1 %2913 }
 0x430   : > { %3009 = vst.msk [vmem:[#allocation4 + $0x18] sm:$0xff] %vm3007_vm0, %v2914_v56  ;;  %v2912_v46 = vpop.permute.xlu0 %2911 }
 0x431   : > { %3381 = vrot.lane.b32.xlu1 %v11027_v62, %s9520_s10  ;;  %3008 = vst.msk [vmem:[#allocation4] sm:$0xff] %vm3007_vm0, %v2912_v46  ;;  %v3500_v62 = vld [vmem:[#allocation3 + $0xf0] sm:$0xff] }
 0x432   : > { %3188 = vrot.lane.b32.xlu0 %v3114_v32, %s9519_s6  ;;  %v3124_v32 = vld [vmem:[#allocation3 + $0x169] sm:$0xff] }
 0x433   : > { %v2918_v47 = vpop.permute.xlu1 %2917 }
 0x434   : > { %3011 = vst.msk [vmem:[#allocation4 + $0x48] sm:$0xff] %vm3007_vm0, %v2918_v47  ;;  %v2916_v35 = vpop.permute.xlu0 %2915 }
 0x435   : > { %3190 = vrot.lane.b32.xlu1 %v3115_v6, %s9519_s6  ;;  %3010 = vst.msk [vmem:[#allocation4 + $0x30] sm:$0xff] %vm3007_vm0, %v2916_v35  ;;  %v3875_v6 = vld [vmem:[%s14316_s2 + $0x110] sm:$0xff] }
 0x436   : > { %3573 = vrot.lane.b32.xlu0 %v9436_v50, %s9521_s11 }
 0x437   : > { %v2922_v31 = vpop.permute.xlu1 %2921 }
 0x438   : > { %3013 = vst.msk [vmem:[#allocation4 + $0x78] sm:$0xff] %vm3007_vm0, %v2922_v31  ;;  %v2920_v57 = vpop.permute.xlu0 %2919  ;;  %v3745_v47 = vld [vmem:[#allocation4] sm:$0xff]  ;;  %v3874_v31 = vld [vmem:[%s14316_s2 + $0x108] sm:$0xff] }
 0x439   : > { %3575 = vrot.lane.b32.xlu1 %v3500_v62, %s9521_s11  ;;  %3012 = vst.msk [vmem:[#allocation4 + $0x60] sm:$0xff] %vm3007_vm0, %v2920_v57  ;;  %v14451_v57 = vld [vmem:[#allocation14_spill] sm:$0xff] }
 0x43a   : > { %3383 = vrot.lane.b32.xlu0 %v11017_v58, %s9520_s10  ;;  %v3501_v58 = vld [vmem:[#allocation3 + $0x108] sm:$0xff] }
 0x43b   : > { %v2926_v13 = vpop.permute.xlu1 %2925 }
 0x43c   : > { %3015 = vst.msk [vmem:[#allocation4 + $0xa8] sm:$0xff] %vm3007_vm0, %v2926_v13  ;;  %v2924_v18 = vpop.permute.xlu0 %2923  ;;  %v3748_v13 = vld [vmem:[#allocation4 + $0x18] sm:$0xff] }
 0x43d   : > { %3385 = vrot.lane.b32.xlu1 %v11051_v28, %s9520_s10  ;;  %3014 = vst.msk [vmem:[#allocation4 + $0x90] sm:$0xff] %vm3007_vm0, %v2924_v18  ;;  %v3502_v28 = vld [vmem:[#allocation3 + $0x110] sm:$0xff]  ;;  %v14452_v18 = vld [vmem:[#allocation13_spill] sm:$0xff] }
 0x43e   : > { %3192 = vrot.lane.b32.xlu0 %v3116_v21, %s9519_s6 }
 0x43f   : > { %v2930_v38 = vpop.permute.xlu1 %2929 }
 0x440   : > { %3017 = vst.msk [vmem:[#allocation4 + $0xd8] sm:$0xff] %vm3007_vm0, %v2930_v38  ;;  %v2928_v11 = vpop.permute.xlu0 %2927 }
 0x441   : > { %3194 = vrot.lane.b32.xlu1 %v3117_v45, %s9519_s6  ;;  %3016 = vst.msk [vmem:[#allocation4 + $0xc0] sm:$0xff] %vm3007_vm0, %v2928_v11 }
 0x442   : > { %3577 = vrot.lane.b32.xlu0 %v3501_v58, %s9521_s11  ;;  %v3126_v58 = vld [vmem:[#allocation3 + $0x189] sm:$0xff] }
 0x443   : > { %v2934_v40 = vpop.permute.xlu1 %2933 }
 0x444   : > { %3019 = vst.msk [vmem:[#allocation4 + $0x108] sm:$0xff] %vm3007_vm0, %v2934_v40  ;;  %v2932_v9 = vpop.permute.xlu0 %2931  ;;  %v3751_v40 = vld [vmem:[#allocation4 + $0x30] sm:$0xff] }
 0x445   : > { %3579 = vrot.lane.b32.xlu1 %v3502_v28, %s9521_s11  ;;  %3018 = vst.msk [vmem:[#allocation4 + $0xf0] sm:$0xff] %vm3007_vm0, %v2932_v9 }
 0x446   : > { %3387 = vrot.lane.b32.xlu0 %v11040_v41, %s9520_s10 }
 0x447   : > { %v2938_v5 = vpop.permute.xlu1 %2937 }
 0x448   : > { %3021 = vst.msk [vmem:[#allocation4 + $0x138] sm:$0xff] %vm3007_vm0, %v2938_v5  ;;  %v2936_v54 = vpop.permute.xlu0 %2935 }
 0x449   : > { %3389 = vrot.lane.b32.xlu1 %v11074_v29, %s9520_s10  ;;  %3020 = vst.msk [vmem:[#allocation4 + $0x120] sm:$0xff] %vm3007_vm0, %v2936_v54  ;;  %v3504_v29 = vld [vmem:[#allocation3 + $0x130] sm:$0xff]  ;;  %v14453_v54 = vld [vmem:[#allocation16_spill] sm:$0xff] }
 0x44a   : > { %3196 = vrot.lane.b32.xlu0 %v3118_v33, %s9519_s6  ;;  %v3754_v33 = vld [vmem:[#allocation4 + $0x48] sm:$0xff] }
 0x44b   : > { %v2942_v14 = vpop.permute.xlu1 %2941 }
 0x44c   : > { %3023 = vst.msk [vmem:[#allocation4 + $0x168] sm:$0xff] %vm3007_vm0, %v2942_v14  ;;  %v2940_v61 = vpop.permute.xlu0 %2939  ;;  %v14454_v14 = vld [vmem:[#allocation15_spill] sm:$0xff] }
 0x44d   : > { %3198 = vrot.lane.b32.xlu1 %v3119_v39, %s9519_s6  ;;  %3022 = vst.msk [vmem:[#allocation4 + $0x150] sm:$0xff] %vm3007_vm0, %v2940_v61 }
 0x44e   : > { %3581 = vrot.lane.b32.xlu0 %v14446_v7, %s9521_s11 }
 0x44f   : > { %v2946_v41 = vpop.permute.xlu1 %2945 }
 0x450   : > { %3025 = vst.msk [vmem:[#allocation4 + $0x198] sm:$0xff] %vm3007_vm0, %v2946_v41  ;;  %v2944_v48 = vpop.permute.xlu0 %2943 }
 0x451   : > { %3583 = vrot.lane.b32.xlu1 %v3504_v29, %s9521_s11  ;;  %3024 = vst.msk [vmem:[#allocation4 + $0x180] sm:$0xff] %vm3007_vm0, %v2944_v48  ;;  %v3128_v29 = vld [vmem:[#allocation3 + $0x1a9] sm:$0xff]  ;;  %v3757_v48 = vld [vmem:[#allocation4 + $0x60] sm:$0xff] }
 0x452   : > { %3391 = vrot.lane.b32.xlu0 %v11064_v49, %s9520_s10 }
 0x453   : > { %v2950_v63 = vpop.permute.xlu1 %2949 }
 0x454   : > { %3027 = vst.msk [vmem:[#allocation4 + $0x1c8] sm:$0xff] %vm3007_vm0, %v2950_v63  ;;  %v2948_v1 = vpop.permute.xlu0 %2947 }
 0x455   : > { %3393 = vrot.lane.b32.xlu1 %v11104_v12, %s9520_s10  ;;  %3026 = vst.msk [vmem:[#allocation4 + $0x1b0] sm:$0xff] %vm3007_vm0, %v2948_v1  ;;  %v14448_v12 = vld [vmem:[#allocation9_spill] sm:$0xff]  ;;  %v3129_v1 = vld [vmem:[#allocation3 + $0x1b1] sm:$0xff] }
 0x456   : > { %3200 = vrot.lane.b32.xlu0 %v3120_v55, %s9519_s6 }
 0x457   : > { %v2954_v44 = vpop.permute.xlu1 %2953 }
 0x458   : > { %3029 = vst.msk [vmem:[#allocation4 + $0x1f8] sm:$0xff] %vm3007_vm0, %v2954_v44  ;;  %v2952_v10 = vpop.permute.xlu0 %2951  ;;  %v14455_v44 = vld [vmem:[#allocation18_spill] sm:$0xff] }
 0x459   : > { %3202 = vrot.lane.b32.xlu1 %v3121_v16, %s9519_s6  ;;  %3028 = vst.msk [vmem:[#allocation4 + $0x1e0] sm:$0xff] %vm3007_vm0, %v2952_v10  ;;  %v3760_v16 = vld [vmem:[#allocation4 + $0x78] sm:$0xff]  ;;  %v3747_v10 = vld [vmem:[#allocation4 + $0x10] sm:$0xff] }
 0x45a   : > { %3585 = vrot.lane.b32.xlu0 %v14447_v30, %s9521_s11 }
 0x45b   : > { %v2958_v49 = vpop.permute.xlu1 %2957 }
 0x45c   : > { %3031 = vst.msk [vmem:[#allocation4 + $0x228] sm:$0xff] %vm3007_vm0, %v2958_v49  ;;  %v2956_v27 = vpop.permute.xlu0 %2955  ;;  %v14456_v49 = vld [vmem:[#allocation17_spill] sm:$0xff] }
 0x45d   : > { %3587 = vrot.lane.b32.xlu1 %v14448_v12, %s9521_s11  ;;  %3030 = vst.msk [vmem:[#allocation4 + $0x210] sm:$0xff] %vm3007_vm0, %v2956_v27  ;;  %v3322_v12 = vld [vmem:[#allocation3 + $0x1cf] sm:$0xff] }
 0x45e   : > { %3395 = vrot.lane.b32.xlu0 %v11095_v4, %s9520_s10 }
 0x45f   : > { %v3362_v59 = vpop.permute.xlu1 %3361 }
 0x460   : > { %v3169_v2 = vpop.permute.xlu0 %3168 }
 0x461   : > { %3397 = vrot.lane.b32.xlu1 %v11134_v36, %s9520_s10  ;;  %3264 = vst.msk [vmem:[#allocation4 + $0x8] sm:$0xff] %vm2621_vm14, %v3169_v2  ;;  %v14449_v36 = vld [vmem:[#allocation12_spill] sm:$0xff] }
 0x462   : > { %3457 = vst.msk [vmem:[#allocation4 + $0x8] sm:$0xff] %vm2814_vm15, %v3362_v59  ;;  %3204 = vrot.lane.b32.xlu0 %v3122_v23, %s9519_s6  ;;  %v3750_v59 = vld [vmem:[#allocation4 + $0x28] sm:$0xff]  ;;  %v3753_v23 = vld [vmem:[#allocation4 + $0x40] sm:$0xff] }
 0x463   : > { %v3171_v42 = vpop.permute.xlu1 %3170  ;;  %v3323_v2 = vld [vmem:[#allocation3 + $0x1e7] sm:$0xff] }
 0x464   : > { %3265 = vst.msk [vmem:[#allocation4 + $0x20] sm:$0xff] %vm2621_vm14, %v3171_v42  ;;  %v3554_v8 = vpop.permute.xlu0 %3553 }
 0x465   : > { %3206 = vrot.lane.b32.xlu1 %v3123_v37, %s9519_s6  ;;  %3649 = vst.msk [vmem:[#allocation4 + $0x8] sm:$0xff] %vm3007_vm0, %v3554_v8  ;;  %v3130_v37 = vld [vmem:[#allocation3 + $0x1c9] sm:$0xff] }
 0x466   : > { %3589 = vrot.lane.b32.xlu0 %v14449_v36, %s9521_s11  ;;  %v3131_v36 = vld [vmem:[#allocation3 + $0x1d1] sm:$0xff] }
 0x467   : > { %v3556_v4 = vpop.permute.xlu1 %3555 }
 0x468   : > { %v3364_v19 = vpop.permute.xlu0 %3363 }
 0x469   : > { %3591 = vrot.lane.b32.xlu1 %v14450_v3, %s9521_s11  ;;  %3458 = vst.msk [vmem:[#allocation4 + $0x20] sm:$0xff] %vm2814_vm15, %v3364_v19  ;;  %v3759_v3 = vld [vmem:[#allocation4 + $0x70] sm:$0xff] }
 0x46a   : > { %3650 = vst.msk [vmem:[#allocation4 + $0x20] sm:$0xff] %vm3007_vm0, %v3556_v4  ;;  %3399 = vrot.lane.b32.xlu0 %v11125_v34, %s9520_s10  ;;  %v3125_v34 = vld [vmem:[#allocation3 + $0x171] sm:$0xff] }
 0x46b   : > { %v3366_v22 = vpop.permute.xlu1 %3365  ;;  %v3756_v4 = vld [vmem:[#allocation4 + $0x58] sm:$0xff] }
 0x46c   : > { %v3173_v56 = vpop.permute.xlu0 %3172  ;;  %v3746_v46 = vld [vmem:[#allocation4 + $0x8] sm:$0xff] }
 0x46d   : > { %3401 = vrot.lane.b32.xlu1 %v11164_v15, %s9520_s10  ;;  %3266 = vst.msk [vmem:[#allocation4 + $0x38] sm:$0xff] %vm2621_vm14, %v3173_v56  ;;  %4042 = vmatprep.mubr.f32.mxu0 %v3746_v46  ;;  %v3762_v56 = vld [vmem:[#allocation4 + $0x88] sm:$0xff]  ;;  %v3765_v46 = vld [vmem:[#allocation4 + $0xa0] sm:$0xff] }
 0x46e   : > { %3459 = vst.msk [vmem:[#allocation4 + $0x38] sm:$0xff] %vm2814_vm15, %v3366_v22  ;;  %3208 = vrot.lane.b32.xlu0 %v3124_v32, %s9519_s6  ;;  %4043 = vmatmul.mubr.f32.vlgmr.msra.gmra.mxu0 %v3745_v47  ;;  %v14457_v32 = vld [vmem:[#allocation19_spill] sm:$0xff] }
 0x46f   : > { %v3175_v35 = vpop.permute.xlu1 %3174  ;;  %9143 = vmatpush3.msra.mxu0 %v11693_v20  ;;  %v3873_v20 = vld [vmem:[%s14316_s2 + $0x100] sm:$0xff] }
 0x470   : > { %3267 = vst.msk [vmem:[#allocation4 + $0x50] sm:$0xff] %vm2621_vm14, %v3175_v35  ;;  %v3558_v15 = vpop.permute.xlu0 %3557  ;;  %9144 = vmatprep.subr.mxu0 %v3875_v6  ;;  %v3324_v35 = vld [vmem:[#allocation3 + $0x1ef] sm:$0xff] }
 0x471   : > { %3210 = vrot.lane.b32.xlu1 %v3125_v34, %s9519_s6  ;;  %3651 = vst.msk [vmem:[#allocation4 + $0x38] sm:$0xff] %vm3007_vm0, %v3558_v15  ;;  %v3749_v50 = vld [vmem:[#allocation4 + $0x20] sm:$0xff]  ;;  %9145 = vmatpush3.msra.mxu0 %v3875_v6  ;;  %v3763_v34 = vld [vmem:[#allocation4 + $0x90] sm:$0xff] }
 0x472   : > { %3593 = vrot.lane.b32.xlu0 %v14451_v57, %s9521_s11  ;;  %4047 = vmatprep.mubr.f32.mxu0 %v3749_v50  ;;  %v3771_v50 = vld [vmem:[#allocation4 + $0xd0] sm:$0xff] }
 0x473   : > { %v3560_v62 = vpop.permute.xlu1 %3559  ;;  %4048 = vmatmul.mubr.f32.gmra.mxu0 %v3748_v13  ;;  %9146 = vmatprep.subr.mxu0 %v3874_v31  ;;  %v3132_v57 = vld [vmem:[#allocation3 + $0x1e9] sm:$0xff] }
 0x474   : > { %v3368_v21 = vpop.permute.xlu0 %3367  ;;  %9147 = vmatpush3.msra.mxu0 %v3874_v31  ;;  %v11908_v31 = vld [vmem:[#allocation3 + $0x207] sm:$0xff] }
 0x475   : > { %3595 = vrot.lane.b32.xlu1 %v14452_v18, %s9521_s11  ;;  %3460 = vst.msk [vmem:[#allocation4 + $0x50] sm:$0xff] %vm2814_vm15, %v3368_v21  ;;  %9148 = vmatprep.subr.mxu0 %v3873_v20  ;;  %v3766_v18 = vld [vmem:[#allocation4 + $0xa8] sm:$0xff] }
 0x476   : > { %3652 = vst.msk [vmem:[#allocation4 + $0x50] sm:$0xff] %vm3007_vm0, %v3560_v62  ;;  %3403 = vrot.lane.b32.xlu0 %v11155_v51, %s9520_s10  ;;  %9149 = vmatpush3.msra.mxu0 %v3873_v20  ;;  %v3127_v51 = vld [vmem:[#allocation3 + $0x191] sm:$0xff]  ;;  %v3774_v21 = vld [vmem:[#allocation4 + $0xe8] sm:$0xff] }
 0x477   : > { %v3370_v38 = vpop.permute.xlu1 %3369  ;;  %6070 = vmatprep.subr.mxu0 %v14433_v52 }
 0x478   : > { %v3177_v45 = vpop.permute.xlu0 %3176  ;;  %v3752_v11 = vld [vmem:[#allocation4 + $0x38] sm:$0xff] }
 0x479   : > { %3405 = vrot.lane.b32.xlu1 %v11192_v24, %s9520_s10  ;;  %3268 = vst.msk [vmem:[#allocation4 + $0x68] sm:$0xff] %vm2621_vm14, %v3177_v45  ;;  %4052 = vmatprep.mubr.f32.mxu0 %v3752_v11 }
 0x47a   : > { %3461 = vst.msk [vmem:[#allocation4 + $0x68] sm:$0xff] %vm2814_vm15, %v3370_v38  ;;  %3212 = vrot.lane.b32.xlu0 %v3126_v58, %s9519_s6  ;;  %4053 = vmatmul.mubr.f32.gmra.mxu0 %v3751_v40  ;;  %v3777_v38 = vld [vmem:[#allocation4 + $0x100] sm:$0xff]  ;;  %v3780_v58 = vld [vmem:[#allocation4 + $0x118] sm:$0xff]  ;;  %v11923_v40 = vld [vmem:[#allocation3 + $0x20f] sm:$0xff] }
 0x47b   : > { %v3179_v28 = vpop.permute.xlu1 %3178 }
 0x47c   : > { %3269 = vst.msk [vmem:[#allocation4 + $0x80] sm:$0xff] %vm2621_vm14, %v3179_v28  ;;  %v3562_v9 = vpop.permute.xlu0 %3561  ;;  %v3783_v28 = vld [vmem:[#allocation4 + $0x130] sm:$0xff] }
 0x47d   : > { %3214 = vrot.lane.b32.xlu1 %v3127_v51, %s9519_s6  ;;  %3653 = vst.msk [vmem:[#allocation4 + $0x68] sm:$0xff] %vm3007_vm0, %v3562_v9  ;;  %v3755_v24 = vld [vmem:[#allocation4 + $0x50] sm:$0xff] }
 0x47e   : > { %3597 = vrot.lane.b32.xlu0 %v14453_v54, %s9521_s11  ;;  %4057 = vmatprep.mubr.f32.mxu0 %v3755_v24  ;;  %v3133_v24 = vld [vmem:[#allocation3 + $0x1f1] sm:$0xff]  ;;  %v3786_v54 = vld [vmem:[#allocation4 + $0x148] sm:$0xff] }
 0x47f   : > { %v3564_v5 = vpop.permute.xlu1 %3563  ;;  %4058 = vmatmul.mubr.f32.gmra.mxu0 %v3754_v33  ;;  %v3789_v33 = vld [vmem:[#allocation4 + $0x160] sm:$0xff] }
 0x480   : > { %v3372_v39 = vpop.permute.xlu0 %3371 }
 0x481   : > { %3599 = vrot.lane.b32.xlu1 %v14454_v14, %s9521_s11  ;;  %3462 = vst.msk [vmem:[#allocation4 + $0x80] sm:$0xff] %vm2814_vm15, %v3372_v39 }
 0x482   : > { %3654 = vst.msk [vmem:[#allocation4 + $0x80] sm:$0xff] %vm3007_vm0, %v3564_v5  ;;  %3407 = vrot.lane.b32.xlu0 %v11184_v17, %s9520_s10  ;;  %v3769_v5 = vld [vmem:[#allocation4 + $0xc0] sm:$0xff] }
 0x483   : > { %v2962_v61 = vpop.permute.xlu1 %2961 }
 0x484   : > { %3033 = vst.msk [vmem:[#allocation4 + $0x258] sm:$0xff] %vm3007_vm0, %v2962_v61  ;;  %v2960_v41 = vpop.permute.xlu0 %2959  ;;  %v3758_v7 = vld [vmem:[#allocation4 + $0x68] sm:$0xff] }
 0x485   : > { %3409 = vrot.lane.b32.xlu1 %v11218_v26, %s9520_s10  ;;  %3032 = vst.msk [vmem:[#allocation4 + $0x240] sm:$0xff] %vm3007_vm0, %v2960_v41  ;;  %4062 = vmatprep.mubr.f32.mxu0 %v3758_v7  ;;  %v3327_v61 = vld [vmem:[#allocation3 + $0x227] sm:$0xff]  ;;  %v3772_v7 = vld [vmem:[#allocation4 + $0xd8] sm:$0xff] }
 0x486   : > { %3216 = vrot.lane.b32.xlu0 %v3128_v29, %s9519_s6  ;;  %4063 = vmatmul.mubr.f32.gmra.mxu0 %v3757_v48  ;;  %v3792_v29 = vld [vmem:[#allocation4 + $0x178] sm:$0xff]  ;;  %v3795_v48 = vld [vmem:[#allocation4 + $0x190] sm:$0xff] }
 0x487   : > { %v2966_v63 = vpop.permute.xlu1 %2965 }
 0x488   : > { %3035 = vst.msk [vmem:[#allocation4 + $0x288] sm:$0xff] %vm3007_vm0, %v2966_v63  ;;  %v2964_v17 = vpop.permute.xlu0 %2963 }
 0x489   : > { %3218 = vrot.lane.b32.xlu1 %v3129_v1, %s9519_s6  ;;  %3034 = vst.msk [vmem:[#allocation4 + $0x270] sm:$0xff] %vm3007_vm0, %v2964_v17  ;;  %v3761_v26 = vld [vmem:[#allocation4 + $0x80] sm:$0xff]  ;;  %v3711_v1 = vld [vmem:[#allocation3 + $0x229] sm:$0xff] }
 0x48a   : > { %3601 = vrot.lane.b32.xlu0 %v14455_v44, %s9521_s11  ;;  %4067 = vmatprep.mubr.f32.mxu0 %v3761_v26  ;;  %3743 = vst.msk [vmem:[#allocation4 + $0x2e0] sm:$0xff] %vm243_vm10, %v3711_v1  ;;  %v3801_v26 = vld [vmem:[#allocation4 + $0x1c0] sm:$0xff]  ;;  %v3712_v44 = vld [vmem:[#allocation3 + $0x231] sm:$0xff] }
 0x48b   : > { %v3374_v55 = vpop.permute.xlu1 %3373  ;;  %4068 = vmatmul.mubr.f32.gmra.mxu0 %v3760_v16  ;;  %3744 = vst.msk [vmem:[#allocation4 + $0x2f8] sm:$0xff] %vm243_vm10, %v3712_v44 }
 0x48c   : > { %v3181_v30 = vpop.permute.xlu0 %3180  ;;  %9150 = vmatprep.mubr.msk.f32.mxu0 %vm243_vm10, %v3747_v10 }
 0x48d   : > { %3603 = vrot.lane.b32.xlu1 %v14456_v49, %s9521_s11  ;;  %3270 = vst.msk [vmem:[#allocation4 + $0x98] sm:$0xff] %vm2621_vm14, %v3181_v30  ;;  %v3328_v49 = vld [vmem:[#allocation3 + $0x22f] sm:$0xff] }
 0x48e   : > { %3463 = vst.msk [vmem:[#allocation4 + $0x98] sm:$0xff] %vm2814_vm15, %v3374_v55  ;;  %3411 = vrot.lane.b32.xlu0 %v3322_v12, %s9520_s10  ;;  %v3519_v55 = vld [vmem:[#allocation3 + $0x228] sm:$0xff]  ;;  %v3804_v12 = vld [vmem:[#allocation4 + $0x1d8] sm:$0xff] }
 0x48f   : > { %v3183_v27 = vpop.permute.xlu1 %3182  ;;  %9151 = vmatmul.mubr.msk.f32.vlgmr.msra.gmra.mxu0 %vm243_vm10, %v3750_v59 }
 0x490   : > { %3271 = vst.msk [vmem:[#allocation4 + $0xb0] sm:$0xff] %vm2621_vm14, %v3183_v27  ;;  %v3566_v42 = vpop.permute.xlu0 %3565  ;;  %9153 = vmatprep.mubr.msk.f32.mxu0 %vm243_vm10, %v3753_v23  ;;  %v3807_v27 = vld [vmem:[#allocation4 + $0x1f0] sm:$0xff] }
 0x491   : > { %3413 = vrot.lane.b32.xlu1 %v3323_v2, %s9520_s10  ;;  %3655 = vst.msk [vmem:[#allocation4 + $0x98] sm:$0xff] %vm3007_vm0, %v3566_v42  ;;  %v3837_v23 = vld [vmem:[#allocation4 + $0x2e0] sm:$0xff] }
 0x492   : > { %3220 = vrot.lane.b32.xlu0 %v3130_v37, %s9519_s6  ;;  %v3778_v37 = vld [vmem:[#allocation4 + $0x108] sm:$0xff]  ;;  %5834 = vst.msk [vmem:[#allocation4 + $0x2e0] sm:$0xff] %vm243_vm10, %v3711_v1 }
 0x493   : > { %v3568_v8 = vpop.permute.xlu1 %3567  ;;  %9154 = vmatmul.mubr.msk.f32.gmra.mxu0 %vm243_vm10, %v3756_v4  ;;  %v3813_v4 = vld [vmem:[#allocation4 + $0x220] sm:$0xff] }
 0x494   : > { %v3376_v19 = vpop.permute.xlu0 %3375  ;;  %9156 = vmatprep.mubr.msk.f32.mxu0 %vm243_vm10, %v3759_v3  ;;  %v3840_v3 = vld [vmem:[#allocation4 + $0x2f8] sm:$0xff] }
 0x495   : > { %3222 = vrot.lane.b32.xlu1 %v3131_v36, %s9519_s6  ;;  %3464 = vst.msk [vmem:[#allocation4 + $0xb0] sm:$0xff] %vm2814_vm15, %v3376_v19  ;;  %v3520_v36 = vld [vmem:[#allocation3 + $0x230] sm:$0xff] }
 0x496   : > { %3656 = vst.msk [vmem:[#allocation4 + $0xb0] sm:$0xff] %vm3007_vm0, %v3568_v8  ;;  %3605 = vrot.lane.b32.xlu0 %v11241_v0, %s9521_s11  ;;  %v3768_v0 = vld [vmem:[#allocation4 + $0xb8] sm:$0xff]  ;;  %v3810_v8 = vld [vmem:[#allocation4 + $0x208] sm:$0xff] }
 0x497   : > { %v3378_v22 = vpop.permute.xlu1 %3377  ;;  %9157 = vmatmul.mubr.msk.f32.gmra.mxu0 %vm243_vm10, %v3762_v56  ;;  %5835 = vst.msk [vmem:[#allocation4 + $0x2f8] sm:$0xff] %vm243_vm10, %v3712_v44  ;;  %v3819_v56 = vld [vmem:[#allocation4 + $0x250] sm:$0xff] }
 0x498   : > { %v3185_v47 = vpop.permute.xlu0 %3184  ;;  %9159 = vmatprep.mubr.msk.f32.mxu0 %vm243_vm10, %v3765_v46  ;;  %v3764_v6 = vld [vmem:[#allocation4 + $0x98] sm:$0xff] }
 0x499   : > { %3607 = vrot.lane.b32.xlu1 %v14457_v32, %s9521_s11  ;;  %3272 = vst.msk [vmem:[#allocation4 + $0xc8] sm:$0xff] %vm2621_vm14, %v3185_v47  ;;  %4072 = vmatprep.mubr.f32.mxu1 %v3764_v6  ;;  %v3781_v47 = vld [vmem:[#allocation4 + $0x120] sm:$0xff] }
 0x49a   : > { %3465 = vst.msk [vmem:[#allocation4 + $0xc8] sm:$0xff] %vm2814_vm15, %v3378_v22  ;;  %3415 = vrot.lane.b32.xlu0 %v3324_v35, %s9520_s10  ;;  %4073 = vmatmul.mubr.f32.vlgmr.msra.gmra.mxu1 %v3763_v34  ;;  %v3816_v22 = vld [vmem:[#allocation4 + $0x238] sm:$0xff]  ;;  %v3825_v34 = vld [vmem:[#allocation4 + $0x280] sm:$0xff] }
 0x49b   : > { %v3187_v15 = vpop.permute.xlu1 %3186  ;;  %9160 = vmatmul.mubr.msk.f32.gmra.mxu0 %vm243_vm10, %v3768_v0 }
 0x49c   : > { %3273 = vst.msk [vmem:[#allocation4 + $0xe0] sm:$0xff] %vm2621_vm14, %v3187_v15  ;;  %v3570_v62 = vpop.permute.xlu0 %3569  ;;  %9162 = vmatprep.mubr.msk.f32.mxu0 %vm243_vm10, %v3771_v50  ;;  %v3784_v50 = vld [vmem:[#allocation4 + $0x138] sm:$0xff] }
 0x49d   : > { %3417 = vrot.lane.b32.xlu1 %v11908_v31, %s9520_s10  ;;  %3657 = vst.msk [vmem:[#allocation4 + $0xc8] sm:$0xff] %vm3007_vm0, %v3570_v62  ;;  %v3767_v13 = vld [vmem:[#allocation4 + $0xb0] sm:$0xff]  ;;  %v3828_v62 = vld [vmem:[#allocation4 + $0x298] sm:$0xff] }
 0x49e   : > { %3224 = vrot.lane.b32.xlu0 %v3132_v57, %s9519_s6  ;;  %4077 = vmatprep.mubr.f32.mxu1 %v3767_v13  ;;  %v3831_v57 = vld [vmem:[#allocation4 + $0x2b0] sm:$0xff] }
 0x49f   : > { %v3572_v20 = vpop.permute.xlu1 %3571  ;;  %4078 = vmatmul.mubr.f32.gmra.mxu1 %v3766_v18  ;;  %9163 = vmatmul.mubr.msk.f32.gmra.mxu0 %vm243_vm10, %v3774_v21  ;;  %v3834_v18 = vld [vmem:[#allocation4 + $0x2c8] sm:$0xff] }
 0x4a0   : > { %v3380_v45 = vpop.permute.xlu0 %3379  ;;  %9165 = vmatprep.mubr.msk.f32.mxu0 %vm243_vm10, %v3777_v38 }
 0x4a1   : > { %2967 = vrot.lane.b32.xlu1 %v3323_v2, %s9521_s11  ;;  %3466 = vst.msk [vmem:[#allocation4 + $0xe0] sm:$0xff] %vm2814_vm15, %v3380_v45  ;;  %v3787_v45 = vld [vmem:[#allocation4 + $0x150] sm:$0xff] }
 0x4a2   : > { %3658 = vst.msk [vmem:[#allocation4 + $0xe0] sm:$0xff] %vm3007_vm0, %v3572_v20  ;;  %3609 = vrot.lane.b32.xlu0 %v11678_v25, %s9521_s11 }
 0x4a3   : > { %v3382_v11 = vpop.permute.xlu1 %3381  ;;  %9166 = vmatmul.mubr.msk.f32.gmra.mxu0 %vm243_vm10, %v3780_v58 }
 0x4a4   : > { %v3189_v51 = vpop.permute.xlu0 %3188  ;;  %9168 = vmatprep.mubr.msk.f32.mxu0 %vm243_vm10, %v3783_v28  ;;  %v3770_v9 = vld [vmem:[#allocation4 + $0xc8] sm:$0xff] }
 0x4a5   : > { %3419 = vrot.lane.b32.xlu1 %v11923_v40, %s9520_s10  ;;  %3274 = vst.msk [vmem:[#allocation4 + $0xf8] sm:$0xff] %vm2621_vm14, %v3189_v51  ;;  %4082 = vmatprep.mubr.f32.mxu1 %v3770_v9  ;;  %v3790_v51 = vld [vmem:[#allocation4 + $0x168] sm:$0xff] }
 0x4a6   : > { %3467 = vst.msk [vmem:[#allocation4 + $0xf8] sm:$0xff] %vm2814_vm15, %v3382_v11  ;;  %3226 = vrot.lane.b32.xlu0 %v3133_v24, %s9519_s6  ;;  %4083 = vmatmul.mubr.f32.gmra.mxu1 %v3769_v5 }
 0x4a7   : > { %v3191_v25 = vpop.permute.xlu1 %3190  ;;  %9169 = vmatmul.mubr.msk.f32.gmra.mxu0 %vm243_vm10, %v3786_v54  ;;  %v3793_v54 = vld [vmem:[#allocation4 + $0x180] sm:$0xff] }
 0x4a8   : > { %3275 = vst.msk [vmem:[#allocation4 + $0x110] sm:$0xff] %vm2621_vm14, %v3191_v25  ;;  %v3574_v14 = vpop.permute.xlu0 %3573  ;;  %9171 = vmatprep.mubr.msk.f32.mxu0 %vm243_vm10, %v3789_v33 }
 0x4a9   : > { %2969 = vrot.lane.b32.xlu1 %v3324_v35, %s9521_s11  ;;  %3659 = vst.msk [vmem:[#allocation4 + $0xf8] sm:$0xff] %vm3007_vm0, %v3574_v14  ;;  %v3773_v39 = vld [vmem:[#allocation4 + $0xe0] sm:$0xff]  ;;  %v3822_v35 = vld [vmem:[#allocation4 + $0x268] sm:$0xff] }
 0x4aa   : > { %3611 = vrot.lane.b32.xlu0 %v11680_v60, %s9521_s11  ;;  %4087 = vmatprep.mubr.f32.mxu1 %v3773_v39  ;;  %v3798_v60 = vld [vmem:[#allocation4 + $0x1a8] sm:$0xff] }
 0x4ab   : > { %v3576_v41 = vpop.permute.xlu1 %3575  ;;  %4088 = vmatmul.mubr.f32.gmra.mxu1 %v3772_v7  ;;  %9172 = vmatmul.mubr.msk.f32.gmra.mxu0 %vm243_vm10, %v3792_v29  ;;  %v4557_v29 = vld [vmem:[#allocation3 + $0x10] sm:$0xff] }
 0x4ac   : > { %v3384_v63 = vpop.permute.xlu0 %3383  ;;  %9174 = vmatprep.mubr.msk.f32.mxu0 %vm243_vm10, %v3795_v48 }
 0x4ad   : > { %3421 = vrot.lane.b32.xlu1 %v3327_v61, %s9520_s10  ;;  %3468 = vst.msk [vmem:[#allocation4 + $0x110] sm:$0xff] %vm2814_vm15, %v3384_v63  ;;  %v4556_v63 = vld [vmem:[#allocation3 + $0x8] sm:$0xff] }
 0x4ae   : > { %3660 = vst.msk [vmem:[#allocation4 + $0x110] sm:$0xff] %vm3007_vm0, %v3576_v41  ;;  %3228 = vrot.lane.b32.xlu0 %v11666_v43, %s9519_s6  ;;  %v3775_v43 = vld [vmem:[#allocation4 + $0xf0] sm:$0xff]  ;;  %v3796_v41 = vld [vmem:[#allocation4 + $0x198] sm:$0xff] }
 0x4af   : > { %v3386_v17 = vpop.permute.xlu1 %3385  ;;  %9175 = vmatmul.mubr.msk.f32.gmra.mxu0 %vm243_vm10, %v3798_v60  ;;  %v3799_v60 = vld [vmem:[#allocation4 + $0x1b0] sm:$0xff] }
 0x4b0   : > { %v3193_v16 = vpop.permute.xlu0 %3192  ;;  %9177 = vmatprep.mubr.msk.f32.mxu0 %vm243_vm10, %v3801_v26  ;;  %v3776_v10 = vld [vmem:[#allocation4 + $0xf8] sm:$0xff] }
 0x4b1   : > { %2971 = vrot.lane.b32.xlu1 %v11908_v31, %s9521_s11  ;;  %3276 = vst.msk [vmem:[#allocation4 + $0x128] sm:$0xff] %vm2621_vm14, %v3193_v16  ;;  %4092 = vmatprep.mubr.f32.mxu1 %v3776_v10  ;;  %v3802_v10 = vld [vmem:[#allocation4 + $0x1c8] sm:$0xff] }
 0x4b2   : > { %3469 = vst.msk [vmem:[#allocation4 + $0x128] sm:$0xff] %vm2814_vm15, %v3386_v17  ;;  %3613 = vrot.lane.b32.xlu0 %v3519_v55, %s9521_s11  ;;  %4093 = vmatmul.mubr.f32.gmra.mxu1 %v3775_v43  ;;  %v8829_v43 = vld [vmem:[%s14316_s2 + $0x238] sm:$0xff] }
 0x4b3   : > { %v3195_v30 = vpop.permute.xlu1 %3194  ;;  %9178 = vmatmul.mubr.msk.f32.gmra.mxu0 %vm243_vm10, %v3804_v12  ;;  %9198 = vmatprep.subr.mxu1 %v8829_v43 }
 0x4b4   : > { %3277 = vst.msk [vmem:[#allocation4 + $0x140] sm:$0xff] %vm2621_vm14, %v3195_v30  ;;  %v3578_v59 = vpop.permute.xlu0 %3577  ;;  %9180 = vmatprep.mubr.msk.f32.mxu0 %vm243_vm10, %v3807_v27  ;;  %9199 = vmatpush3.msra.mxu1 %v8829_v43 }
 0x4b5   : > { %3423 = vrot.lane.b32.xlu1 %v3328_v49, %s9520_s10  ;;  %3661 = vst.msk [vmem:[#allocation4 + $0x128] sm:$0xff] %vm3007_vm0, %v3578_v59  ;;  %v3779_v2 = vld [vmem:[#allocation4 + $0x110] sm:$0xff] }
 0x4b6   : > { %3230 = vrot.lane.b32.xlu0 %v11655_v53, %s9519_s6  ;;  %4097 = vmatprep.mubr.f32.mxu1 %v3779_v2  ;;  %v8828_v49 = vld [vmem:[%s14316_s2 + $0x230] sm:$0xff]  ;;  %v3805_v2 = vld [vmem:[#allocation4 + $0x1e0] sm:$0xff] }
 0x4b7   : > { %v3580_v42 = vpop.permute.xlu1 %3579  ;;  %4098 = vmatmul.mubr.f32.gmra.mxu1 %v3778_v37  ;;  %9181 = vmatmul.mubr.msk.f32.gmra.mxu0 %vm243_vm10, %v3810_v8 }
 0x4b8   : > { %v3388_v19 = vpop.permute.xlu0 %3387  ;;  %9183 = vmatprep.mubr.msk.f32.mxu0 %vm243_vm10, %v3813_v4  ;;  %9200 = vmatprep.subr.mxu1 %v8828_v49 }
 0x4b9   : > { %2973 = vrot.lane.b32.xlu1 %v11923_v40, %s9521_s11  ;;  %3470 = vst.msk [vmem:[#allocation4 + $0x140] sm:$0xff] %vm2814_vm15, %v3388_v19  ;;  %9201 = vmatpush3.msra.mxu1 %v8828_v49 }
 0x4ba   : > { %3662 = vst.msk [vmem:[#allocation4 + $0x140] sm:$0xff] %vm3007_vm0, %v3580_v42  ;;  %3615 = vrot.lane.b32.xlu0 %v3520_v36, %s9521_s11  ;;  %v8826_v42 = vld [vmem:[%s14316_s2 + $0x220] sm:$0xff] }
 0x4bb   : > { %v3390_v53 = vpop.permute.xlu1 %3389  ;;  %9184 = vmatmul.mubr.msk.f32.gmra.mxu0 %vm243_vm10, %v3816_v22 }
 0x4bc   : > { %v3197_v46 = vpop.permute.xlu0 %3196  ;;  %9186 = vmatprep.mubr.msk.f32.mxu0 %vm243_vm10, %v3819_v56  ;;  %v3782_v32 = vld [vmem:[#allocation4 + $0x128] sm:$0xff] }
 0x4bd   : > { %3278 = vst.msk [vmem:[#allocation4 + $0x158] sm:$0xff] %vm2621_vm14, %v3197_v46  ;;  %4102 = vmatprep.mubr.f32.mxu1 %v3782_v32  ;;  %4622 = vrot.lane.b32.xlu1 %v4557_v29, %s9519_s6  ;;  %v3811_v46 = vld [vmem:[#allocation4 + $0x210] sm:$0xff] }
 0x4be   : > { %3471 = vst.msk [vmem:[#allocation4 + $0x158] sm:$0xff] %vm2814_vm15, %v3390_v53  ;;  %4103 = vmatmul.mubr.f32.gmra.mxu1 %v3781_v47  ;;  %4620 = vrot.lane.b32.xlu0 %v4556_v63, %s9519_s6 }
 0x4bf   : > { %v3199_v6 = vpop.permute.xlu1 %3198  ;;  %9187 = vmatmul.mubr.msk.f32.gmra.mxu0 %vm243_vm10, %v3822_v35 }
 0x4c0   : > { %3279 = vst.msk [vmem:[#allocation4 + $0x170] sm:$0xff] %vm2621_vm14, %v3199_v6  ;;  %v3582_v15 = vpop.permute.xlu0 %3581  ;;  %9189 = vmatprep.mubr.msk.f32.mxu0 %vm243_vm10, %v3825_v34  ;;  %v3814_v34 = vld [vmem:[#allocation4 + $0x228] sm:$0xff] }
 0x4c1   : > { %3663 = vst.msk [vmem:[#allocation4 + $0x158] sm:$0xff] %vm3007_vm0, %v3582_v15  ;;  %v3785_v0 = vld [vmem:[#allocation4 + $0x140] sm:$0xff] }
 0x4c2   : > { %4107 = vmatprep.mubr.f32.mxu1 %v3785_v0 }
 0x4c3   : > { %v3584_v31 = vpop.permute.xlu1 %3583  ;;  %4108 = vmatmul.mubr.f32.gmra.mxu1 %v3784_v50  ;;  %9190 = vmatmul.mubr.msk.f32.gmra.mxu0 %vm243_vm10, %v3828_v62  ;;  %v3817_v62 = vld [vmem:[#allocation4 + $0x240] sm:$0xff] }
 0x4c4   : > { %v3392_v13 = vpop.permute.xlu0 %3391  ;;  %9192 = vmatprep.mubr.msk.f32.mxu0 %vm243_vm10, %v3831_v57 }
 0x4c5   : > { %3472 = vst.msk [vmem:[#allocation4 + $0x170] sm:$0xff] %vm2814_vm15, %v3392_v13 }
 0x4c6   : > { %3664 = vst.msk [vmem:[#allocation4 + $0x170] sm:$0xff] %vm3007_vm0, %v3584_v31 }
 0x4c7   : > { %v3394_v20 = vpop.permute.xlu1 %3393  ;;  %9193 = vmatmul.mubr.msk.f32.gmra.mxu0 %vm243_vm10, %v3834_v18 }
 0x4c8   : > { %v3201_v21 = vpop.permute.xlu0 %3200  ;;  %v3788_v38 = vld [vmem:[#allocation4 + $0x158] sm:$0xff]  ;;  %9195 = vmatprep.mubr.msk.f32.mxu0 %vm243_vm10, %v3837_v23  ;;  %v8827_v23 = vld [vmem:[%s14316_s2 + $0x228] sm:$0xff] }
 0x4c9   : > { %3280 = vst.msk [vmem:[#allocation4 + $0x188] sm:$0xff] %vm2621_vm14, %v3201_v21  ;;  %4112 = vmatprep.mubr.f32.mxu1 %v3788_v38  ;;  %9202 = vmatprep.subr.mxu1 %v8827_v23  ;;  %v3820_v21 = vld [vmem:[#allocation4 + $0x258] sm:$0xff] }
 0x4ca   : > { %3473 = vst.msk [vmem:[#allocation4 + $0x188] sm:$0xff] %vm2814_vm15, %v3394_v20  ;;  %4113 = vmatmul.mubr.f32.gmra.mxu1 %v3787_v45 }
 0x4cb   : > { %v3203_v11 = vpop.permute.xlu1 %3202  ;;  %9196 = vmatmul.mubr.msk.f32.gmra.mxu0 %vm243_vm10, %v3840_v3  ;;  %9203 = vmatpush3.msra.mxu1 %v8827_v23  ;;  %v3808_v3 = vld [vmem:[#allocation4 + $0x1f8] sm:$0xff] }
 0x4cc   : > { %3281 = vst.msk [vmem:[#allocation4 + $0x1a0] sm:$0xff] %vm2621_vm14, %v3203_v11  ;;  %v3586_v58 = vpop.permute.xlu0 %3585  ;;  %9204 = vmatprep.subr.mxu1 %v8826_v42 }
 0x4cd   : > { %3665 = vst.msk [vmem:[#allocation4 + $0x188] sm:$0xff] %vm3007_vm0, %v3586_v58  ;;  %v3791_v40 = vld [vmem:[#allocation4 + $0x170] sm:$0xff]  ;;  %9205 = vmatpush3.msra.mxu1 %v8826_v42 }
 0x4ce   : > { %4117 = vmatprep.mubr.f32.mxu1 %v3791_v40  ;;  %8162 = vmatprep.subr.mxu1 %v14433_v52  ;;  %v3823_v40 = vld [vmem:[#allocation4 + $0x270] sm:$0xff] }
 0x4cf   : > { %v3588_v28 = vpop.permute.xlu1 %3587  ;;  %4118 = vmatmul.mubr.f32.gmra.mxu1 %v3790_v51 }
 0x4d0   : > { %v3396_v9 = vpop.permute.xlu0 %3395 }
 0x4d1   : > { %3474 = vst.msk [vmem:[#allocation4 + $0x1a0] sm:$0xff] %vm2814_vm15, %v3396_v9 }
 0x4d2   : > { %3666 = vst.msk [vmem:[#allocation4 + $0x1a0] sm:$0xff] %vm3007_vm0, %v3588_v28 }
 0x4d3   : > { %v3398_v24 = vpop.permute.xlu1 %3397 }
 0x4d4   : > { %v3205_v5 = vpop.permute.xlu0 %3204  ;;  %v3794_v25 = vld [vmem:[#allocation4 + $0x188] sm:$0xff] }
 0x4d5   : > { %3282 = vst.msk [vmem:[#allocation4 + $0x1b8] sm:$0xff] %vm2621_vm14, %v3205_v5  ;;  %4122 = vmatprep.mubr.f32.mxu1 %v3794_v25  ;;  %v3826_v5 = vld [vmem:[#allocation4 + $0x288] sm:$0xff] }
 0x4d6   : > { %3475 = vst.msk [vmem:[#allocation4 + $0x1b8] sm:$0xff] %vm2814_vm15, %v3398_v24  ;;  %4123 = vmatmul.mubr.f32.gmra.mxu1 %v3793_v54 }
 0x4d7   : > { %v3207_v33 = vpop.permute.xlu1 %3206 }
 0x4d8   : > { %3283 = vst.msk [vmem:[#allocation4 + $0x1d0] sm:$0xff] %vm2621_vm14, %v3207_v33  ;;  %v3590_v14 = vpop.permute.xlu0 %3589 }
 0x4d9   : > { %3667 = vst.msk [vmem:[#allocation4 + $0x1b8] sm:$0xff] %vm3007_vm0, %v3590_v14  ;;  %v3797_v39 = vld [vmem:[#allocation4 + $0x1a0] sm:$0xff] }
 0x4da   : > { %4127 = vmatprep.mubr.f32.mxu1 %v3797_v39 }
 0x4db   : > { %v3592_v61 = vpop.permute.xlu1 %3591  ;;  %4128 = vmatmul.mubr.f32.gmra.mxu1 %v3796_v41 }
 0x4dc   : > { %v3400_v7 = vpop.permute.xlu0 %3399 }
 0x4dd   : > { %3476 = vst.msk [vmem:[#allocation4 + $0x1d0] sm:$0xff] %vm2814_vm15, %v3400_v7 }
 0x4de   : > { %3668 = vst.msk [vmem:[#allocation4 + $0x1d0] sm:$0xff] %vm3007_vm0, %v3592_v61 }
 0x4df   : > { %v3402_v48 = vpop.permute.xlu1 %3401 }
 0x4e0   : > { %v3209_v1 = vpop.permute.xlu0 %3208  ;;  %v3800_v17 = vld [vmem:[#allocation4 + $0x1b8] sm:$0xff] }
 0x4e1   : > { %3284 = vst.msk [vmem:[#allocation4 + $0x1e8] sm:$0xff] %vm2621_vm14, %v3209_v1  ;;  %4132 = vmatprep.mubr.f32.mxu1 %v3800_v17 }
 0x4e2   : > { %3477 = vst.msk [vmem:[#allocation4 + $0x1e8] sm:$0xff] %vm2814_vm15, %v3402_v48  ;;  %4133 = vmatmul.mubr.f32.gmra.mxu1 %v3799_v60 }
 0x4e3   : > { %v3211_v26 = vpop.permute.xlu1 %3210 }
 0x4e4   : > { %3285 = vst.msk [vmem:[#allocation4 + $0x200] sm:$0xff] %vm2621_vm14, %v3211_v26  ;;  %v3594_v55 = vpop.permute.xlu0 %3593 }
 0x4e5   : > { %3669 = vst.msk [vmem:[#allocation4 + $0x1e8] sm:$0xff] %vm3007_vm0, %v3594_v55  ;;  %v3803_v44 = vld [vmem:[#allocation4 + $0x1d0] sm:$0xff] }
 0x4e6   : > { %4137 = vmatprep.mubr.f32.mxu1 %v3803_v44 }
 0x4e7   : > { %v3596_v16 = vpop.permute.xlu1 %3595  ;;  %4138 = vmatmul.mubr.f32.gmra.mxu1 %v3802_v10 }
 0x4e8   : > { %v3404_v30 = vpop.permute.xlu0 %3403 }
 0x4e9   : > { %3478 = vst.msk [vmem:[#allocation4 + $0x200] sm:$0xff] %vm2814_vm15, %v3404_v30 }
 0x4ea   : > { %3670 = vst.msk [vmem:[#allocation4 + $0x200] sm:$0xff] %vm3007_vm0, %v3596_v16 }
 0x4eb   : > { %v3406_v12 = vpop.permute.xlu1 %3405 }
 0x4ec   : > { %v3213_v27 = vpop.permute.xlu0 %3212  ;;  %v3806_v59 = vld [vmem:[#allocation4 + $0x1e8] sm:$0xff] }
 0x4ed   : > { %3286 = vst.msk [vmem:[#allocation4 + $0x218] sm:$0xff] %vm2621_vm14, %v3213_v27  ;;  %4142 = vmatprep.mubr.f32.mxu1 %v3806_v59 }
 0x4ee   : > { %3479 = vst.msk [vmem:[#allocation4 + $0x218] sm:$0xff] %vm2814_vm15, %v3406_v12  ;;  %4143 = vmatmul.mubr.f32.gmra.mxu1 %v3805_v2 }
 0x4ef   : > { %v3215_v37 = vpop.permute.xlu1 %3214 }
 0x4f0   : > { %3287 = vst.msk [vmem:[#allocation4 + $0x230] sm:$0xff] %vm2621_vm14, %v3215_v37  ;;  %v3598_v8 = vpop.permute.xlu0 %3597 }
 0x4f1   : > { %3671 = vst.msk [vmem:[#allocation4 + $0x218] sm:$0xff] %vm3007_vm0, %v3598_v8  ;;  %v3809_v4 = vld [vmem:[#allocation4 + $0x200] sm:$0xff] }
 0x4f2   : > { %4147 = vmatprep.mubr.f32.mxu1 %v3809_v4  ;;  %v12055_v4 = vld [vmem:[%s14317_s3 + $0x1] ss:$0 sm:$0xff] }
 0x4f3   : > { %v3600_v36 = vpop.permute.xlu1 %3599  ;;  %4148 = vmatmul.mubr.f32.gmra.mxu1 %v3808_v3  ;;  %v4493_v3 = vld [vmem:[#allocation3 + $0xf] sm:$0xff] }
 0x4f4   : > { %v3408_v19 = vpop.permute.xlu0 %3407  ;;  %4525 = vst.msk [vmem:[#allocation4 + $0x18] sm:$0xff] %vm243_vm10, %v4493_v3 }
 0x4f5   : > { %3480 = vst.msk [vmem:[#allocation4 + $0x230] sm:$0xff] %vm2814_vm15, %v3408_v19 }
 0x4f6   : > { %3672 = vst.msk [vmem:[#allocation4 + $0x230] sm:$0xff] %vm3007_vm0, %v3600_v36 }
 0x4f7   : > { %v3410_v53 = vpop.permute.xlu1 %3409 }
 0x4f8   : > { %v3217_v22 = vpop.permute.xlu0 %3216  ;;  %v3812_v56 = vld [vmem:[#allocation4 + $0x218] sm:$0xff] }
 0x4f9   : > { %3288 = vst.msk [vmem:[#allocation4 + $0x248] sm:$0xff] %vm2621_vm14, %v3217_v22  ;;  %4152 = vmatprep.mubr.f32.mxu1 %v3812_v56 }
 0x4fa   : > { %3481 = vst.msk [vmem:[#allocation4 + $0x248] sm:$0xff] %vm2814_vm15, %v3410_v53  ;;  %4153 = vmatmul.mubr.f32.gmra.mxu1 %v3811_v46 }
 0x4fb   : > { %v3219_v32 = vpop.permute.xlu1 %3218 }
 0x4fc   : > { %3289 = vst.msk [vmem:[#allocation4 + $0x260] sm:$0xff] %vm2621_vm14, %v3219_v32  ;;  %v3602_v47 = vpop.permute.xlu0 %3601 }
 0x4fd   : > { %3673 = vst.msk [vmem:[#allocation4 + $0x248] sm:$0xff] %vm3007_vm0, %v3602_v47  ;;  %v3815_v6 = vld [vmem:[#allocation4 + $0x230] sm:$0xff] }
 0x4fe   : > { %4157 = vmatprep.mubr.f32.mxu1 %v3815_v6 }
 0x4ff   : > { %v3604_v35 = vpop.permute.xlu1 %3603  ;;  %4158 = vmatmul.mubr.f32.gmra.mxu1 %v3814_v34  ;;  %v4492_v34 = vld [vmem:[#allocation3 + $0x7] sm:$0xff] }
 0x500   : > { %v3412_v15 = vpop.permute.xlu0 %3411  ;;  %4524 = vst.msk [vmem:[#allocation4] sm:$0xff] %vm243_vm10, %v4492_v34 }
 0x501   : > { %3482 = vst.msk [vmem:[#allocation4 + $0x260] sm:$0xff] %vm2814_vm15, %v3412_v15 }
 0x502   : > { %3674 = vst.msk [vmem:[#allocation4 + $0x260] sm:$0xff] %vm3007_vm0, %v3604_v35 }
 0x503   : > { %v3414_v0 = vpop.permute.xlu1 %3413 }
 0x504   : > { %v3221_v31 = vpop.permute.xlu0 %3220  ;;  %v3818_v50 = vld [vmem:[#allocation4 + $0x248] sm:$0xff] }
 0x505   : > { %3290 = vst.msk [vmem:[#allocation4 + $0x278] sm:$0xff] %vm2621_vm14, %v3221_v31  ;;  %4162 = vmatprep.mubr.f32.mxu1 %v3818_v50 }
 0x506   : > { %3483 = vst.msk [vmem:[#allocation4 + $0x278] sm:$0xff] %vm2814_vm15, %v3414_v0  ;;  %4163 = vmatmul.mubr.f32.gmra.mxu1 %v3817_v62 }
 0x507   : > { %v3223_v57 = vpop.permute.xlu1 %3222 }
 0x508   : > { %3291 = vst.msk [vmem:[#allocation4 + $0x290] sm:$0xff] %vm2621_vm14, %v3223_v57  ;;  %v3606_v13 = vpop.permute.xlu0 %3605 }
 0x509   : > { %3675 = vst.msk [vmem:[#allocation4 + $0x278] sm:$0xff] %vm3007_vm0, %v3606_v13  ;;  %v3821_v20 = vld [vmem:[#allocation4 + $0x260] sm:$0xff] }
 0x50a   : > { %4167 = vmatprep.mubr.f32.mxu1 %v3821_v20 }
 0x50b   : > { %v3608_v18 = vpop.permute.xlu1 %3607  ;;  %4168 = vmatmul.mubr.f32.gmra.mxu1 %v3820_v21 }
 0x50c   : > { %v3416_v38 = vpop.permute.xlu0 %3415 }
 0x50d   : > { %3484 = vst.msk [vmem:[#allocation4 + $0x290] sm:$0xff] %vm2814_vm15, %v3416_v38 }
 0x50e   : > { %3676 = vst.msk [vmem:[#allocation4 + $0x290] sm:$0xff] %vm3007_vm0, %v3608_v18 }
 0x50f   : > { %v3418_v45 = vpop.permute.xlu1 %3417 }
 0x510   : > { %v3225_v11 = vpop.permute.xlu0 %3224  ;;  %v3824_v58 = vld [vmem:[#allocation4 + $0x278] sm:$0xff] }
 0x511   : > { %3292 = vst.msk [vmem:[#allocation4 + $0x2a8] sm:$0xff] %vm2621_vm14, %v3225_v11  ;;  %4172 = vmatprep.mubr.f32.mxu1 %v3824_v58 }
 0x512   : > { %3485 = vst.msk [vmem:[#allocation4 + $0x2a8] sm:$0xff] %vm2814_vm15, %v3418_v45  ;;  %4173 = vmatmul.mubr.f32.gmra.mxu1 %v3823_v40 }
 0x513   : > { %v2968_v28 = vpop.permute.xlu1 %2967 }
 0x514   : > { %3036 = vst.msk [vmem:[#allocation4 + $0x2a0] sm:$0xff] %vm3007_vm0, %v2968_v28  ;;  %v3610_v51 = vpop.permute.xlu0 %3609 }
 0x515   : > { %3677 = vst.msk [vmem:[#allocation4 + $0x2a8] sm:$0xff] %vm3007_vm0, %v3610_v51  ;;  %v3827_v9 = vld [vmem:[#allocation4 + $0x290] sm:$0xff] }
 0x516   : > { %4177 = vmatprep.mubr.f32.mxu1 %v3827_v9 }
 0x517   : > { %v3420_v24 = vpop.permute.xlu1 %3419  ;;  %4178 = vmatmul.mubr.f32.gmra.mxu1 %v3826_v5 }
 0x518   : > { %v3227_v25 = vpop.permute.xlu0 %3226 }
 0x519   : > { %3293 = vst.msk [vmem:[#allocation4 + $0x2c0] sm:$0xff] %vm2621_vm14, %v3227_v25 }
 0x51a   : > { %3486 = vst.msk [vmem:[#allocation4 + $0x2c0] sm:$0xff] %vm2814_vm15, %v3420_v24 }
 0x51b   : > { %v2970_v54 = vpop.permute.xlu1 %2969  ;;  %v3829_v39 = vld [vmem:[#allocation4 + $0x2a0] sm:$0xff] }
 0x51c   : > { %3037 = vst.msk [vmem:[#allocation4 + $0x2b8] sm:$0xff] %vm3007_vm0, %v2970_v54  ;;  %v3612_v33 = vpop.permute.xlu0 %3611  ;;  %v3830_v14 = vld [vmem:[#allocation4 + $0x2a8] sm:$0xff] }
 0x51d   : > { %3678 = vst.msk [vmem:[#allocation4 + $0x2c0] sm:$0xff] %vm3007_vm0, %v3612_v33  ;;  %4182 = vmatprep.mubr.f32.mxu1 %v3830_v14 }
 0x51e   : > { %4183 = vmatmul.mubr.f32.gmra.mxu1 %v3829_v39 }
 0x51f   : > { %v3422_v61 = vpop.permute.xlu1 %3421 }
 0x520   : > { %v3229_v41 = vpop.permute.xlu0 %3228 }
 0x521   : > { %3294 = vst.msk [vmem:[#allocation4 + $0x2d8] sm:$0xff] %vm2621_vm14, %v3229_v41 }
 0x522   : > { %3487 = vst.msk [vmem:[#allocation4 + $0x2d8] sm:$0xff] %vm2814_vm15, %v3422_v61 }
 0x523   : > { %v2972_v7 = vpop.permute.xlu1 %2971  ;;  %v3832_v63 = vld [vmem:[#allocation4 + $0x2b8] sm:$0xff] }
 0x524   : > { %3038 = vst.msk [vmem:[#allocation4 + $0x2d0] sm:$0xff] %vm3007_vm0, %v2972_v7  ;;  %v3614_v29 = vpop.permute.xlu0 %3613  ;;  %v3833_v48 = vld [vmem:[#allocation4 + $0x2c0] sm:$0xff] }
 0x525   : > { %3679 = vst.msk [vmem:[#allocation4 + $0x2d8] sm:$0xff] %vm3007_vm0, %v3614_v29  ;;  %4187 = vmatprep.mubr.f32.mxu1 %v3833_v48 }
 0x526   : > { %4188 = vmatmul.mubr.f32.gmra.mxu1 %v3832_v63 }
 0x527   : > { %v3424_v1 = vpop.permute.xlu1 %3423 }
 0x528   : > { %v3231_v17 = vpop.permute.xlu0 %3230 }
 0x529   : > { %3295 = vst.msk [vmem:[#allocation4 + $0x2f0] sm:$0xff] %vm2621_vm14, %v3231_v17 }
 0x52a   : > { %3488 = vst.msk [vmem:[#allocation4 + $0x2f0] sm:$0xff] %vm2814_vm15, %v3424_v1 }
 0x52b   : > { %v2974_v60 = vpop.permute.xlu1 %2973  ;;  %v3835_v44 = vld [vmem:[#allocation4 + $0x2d0] sm:$0xff] }
 0x52c   : > { %3039 = vst.msk [vmem:[#allocation4 + $0x2e8] sm:$0xff] %vm3007_vm0, %v2974_v60  ;;  %v3616_v26 = vpop.permute.xlu0 %3615  ;;  %v3836_v55 = vld [vmem:[#allocation4 + $0x2d8] sm:$0xff] }
 0x52d   : > { %3680 = vst.msk [vmem:[#allocation4 + $0x2f0] sm:$0xff] %vm3007_vm0, %v3616_v26  ;;  %4192 = vmatprep.mubr.f32.mxu1 %v3836_v55 }
 0x52e   : > { %v4044_v16 = vpop.f32.mrf.mxu0  ;;  %4193 = vmatmul.mubr.f32.gmra.mxu1 %v3835_v44 }
 0x52f   : > { %v4623_v22 = vpop.permute.xlu1 %4622  ;;  %v4045_v56 = vadd.f32 %v12055_v4, %v4044_v16 }
 0x530   : > { %v4046_v10 = vpop.f32.mrf.mxu0  ;;  %4717 = vst.msk [vmem:[#allocation4 + $0x18] sm:$0xff] %vm2621_vm14, %v4623_v22  ;;  %v4621_v0 = vpop.permute.xlu0 %4620 }
 0x531   : > { %4716 = vst.msk [vmem:[#allocation4] sm:$0xff] %vm2621_vm14, %v4621_v0 }
 0x533   : > { %v4049_v43 = vpop.f32.mrf.mxu0  ;;  %v3838_v12 = vld [vmem:[#allocation4 + $0x2e8] sm:$0xff] }
 0x534   : > { %v3839_v49 = vld [vmem:[#allocation4 + $0x2f0] sm:$0xff]  ;;  %v4050_v19 = vadd.f32 %v12055_v4, %v4049_v43 }
 0x535   : > { %v4051_v30 = vpop.f32.mrf.mxu0  ;;  %4197 = vmatprep.mubr.f32.mxu1 %v3839_v49 }
 0x536   : > { %4198 = vmatmul.mubr.f32.gmra.mxu1 %v3838_v12 }
 0x53a   : > { %v4054_v27 = vpop.f32.mrf.mxu0 }
 0x53b   : > { %v4055_v31 = vadd.f32 %v12055_v4, %v4054_v27 }
 0x53c   : > { %v4056_v59 = vpop.f32.mrf.mxu0 }
 0x53f   : > { %v4059_v2 = vpop.f32.mrf.mxu0 }
 0x540   : > { %v4060_v47 = vadd.f32 %v12055_v4, %v4059_v2 }
 0x541   : > { %v4061_v23 = vpop.f32.mrf.mxu0 }
 0x546   : > { %v4064_v42 = vpop.f32.mrf.mxu0 }
 0x547   : > { %v4065_v38 = vadd.f32 %v12055_v4, %v4064_v42 }
 0x548   : > { %v4066_v37 = vpop.f32.mrf.mxu0 }
 0x54b   : > { %v4069_v8 = vpop.f32.mrf.mxu0 }
 0x54c   : > { %v4070_v13 = vadd.f32 %v12055_v4, %v4069_v8 }
 0x54d   : > { %v4071_v36 = vpop.f32.mrf.mxu0 }
 0x54f   : > { %v9152_v53 = vpop.f32.mrf.mxu0 }
 0x550   : > { %v4275_v46 = vadd.f32 %v9152_v53, %v4050_v19 }
 0x551   : > { %v4269_v32 = vpop.f32.mrf.mxu0 }
 0x552   : > { %v4429_v6 = vmax.f32 %v4275_v46, 0.0  ;;  %v4270_v35 = vadd.f32 %v4269_v32, %v4045_v56 }
 0x553   : > { %v9155_v15 = vpop.f32.mrf.mxu0 }
 0x554   : > { %4461 = vst.msk [vmem:[#allocation3 + $0x30] sm:$0xff] %vm243_vm10, %v4429_v6  ;;  %v4428_v50 = vmax.f32 %v4270_v35, 0.0  ;;  %v4285_v62 = vadd.f32 %v9155_v15, %v4060_v47 }
 0x555   : > { %v4279_v57 = vpop.f32.mrf.mxu0 }
 0x556   : > { %4460 = vst.msk [vmem:[#allocation3 + $0x28] sm:$0xff] %vm243_vm10, %v4428_v50  ;;  %v4431_v20 = vmax.f32 %v4285_v62, 0.0  ;;  %v4280_v18 = vadd.f32 %v4279_v57, %v4055_v31 }
 0x557   : > { %v9158_v21 = vpop.f32.mrf.mxu0 }
 0x558   : > { %4463 = vst.msk [vmem:[#allocation3 + $0x50] sm:$0xff] %vm243_vm10, %v4431_v20  ;;  %v4430_v45 = vmax.f32 %v4280_v18, 0.0  ;;  %v4295_v11 = vadd.f32 %v9158_v21, %v4070_v13 }
 0x559   : > { %v4289_v58 = vpop.f32.mrf.mxu0 }
 0x55a   : > { %4462 = vst.msk [vmem:[#allocation3 + $0x48] sm:$0xff] %vm243_vm10, %v4430_v45  ;;  %v4433_v40 = vmax.f32 %v4295_v11, 0.0  ;;  %v4290_v28 = vadd.f32 %v4289_v58, %v4065_v38  ;;  %v4074_v51 = vpop.f32.mrf.mxu1 }
 0x55b   : > { %v4075_v9 = vadd.f32 %v12055_v4, %v4074_v51  ;;  %v9161_v24 = vpop.f32.mrf.mxu0  ;;  %v4559_v5 = vld [vmem:[#allocation3 + $0x30] sm:$0xff] }
 0x55c   : > { %v5133_v25 = vld [vmem:[#allocation3 + $0x30] sm:$0xff]  ;;  %4465 = vst.msk [vmem:[#allocation3 + $0x70] sm:$0xff] %vm243_vm10, %v4433_v40  ;;  %v4432_v54 = vmax.f32 %v4290_v28, 0.0  ;;  %v4076_v33 = vpop.f32.mrf.mxu1  ;;  %4626 = vrot.lane.b32.xlu1 %v4559_v5, %s9519_s6 }
 0x55d   : > { %5165 = vst.msk [vmem:[#allocation4 + $0x20] sm:$0xff] %vm243_vm10, %v5133_v25  ;;  %v4299_v14 = vpop.f32.mrf.mxu0  ;;  %v4558_v39 = vld [vmem:[#allocation3 + $0x28] sm:$0xff] }
 0x55e   : > { %v12075_v61 = vld [vmem:[#allocation3 + $0x2f] sm:$0xff]  ;;  %v12077_v41 = vld [vmem:[#allocation3 + $0x27] sm:$0xff]  ;;  %4464 = vst.msk [vmem:[#allocation3 + $0x68] sm:$0xff] %vm243_vm10, %v4432_v54  ;;  %v4300_v7 = vadd.f32 %v4299_v14, %v4075_v9  ;;  %4624 = vrot.lane.b32.xlu0 %v4558_v39, %s9519_s6 }
 0x55f   : > { %4527 = vst.msk [vmem:[#allocation4 + $0x48] sm:$0xff] %vm243_vm10, %v12075_v61  ;;  %4526 = vst.msk [vmem:[#allocation4 + $0x30] sm:$0xff] %vm243_vm10, %v12077_v41  ;;  %v5132_v29 = vld [vmem:[#allocation3 + $0x28] sm:$0xff]  ;;  %v4079_v48 = vpop.f32.mrf.mxu1  ;;  %v4561_v63 = vld [vmem:[#allocation3 + $0x50] sm:$0xff]  ;;  %v9164_v23 = vpop.f32.mrf.mxu0 }
 0x560   : > { %v12085_v1 = vld [vmem:[#allocation3 + $0x51] sm:$0xff]  ;;  %5164 = vst.msk [vmem:[#allocation4 + $0x8] sm:$0xff] %vm243_vm10, %v5132_v29  ;;  %v4434_v60 = vmax.f32 %v4300_v7, 0.0  ;;  %v4080_v26 = vadd.f32 %v12055_v4, %v4079_v48  ;;  %4630 = vrot.lane.b32.xlu1 %v4561_v63, %s9519_s6 }
 0x561   : > { %v5135_v17 = vld [vmem:[#allocation3 + $0x50] sm:$0xff]  ;;  %5805 = vst.msk [vmem:[#allocation4 + $0x28] sm:$0xff] %vm243_vm10, %v12085_v1  ;;  %v4081_v55 = vpop.f32.mrf.mxu1  ;;  %v4560_v44 = vld [vmem:[#allocation3 + $0x48] sm:$0xff]  ;;  %v4309_v22 = vpop.f32.mrf.mxu0 }
 0x562   : > { %5167 = vst.msk [vmem:[#allocation4 + $0x50] sm:$0xff] %vm243_vm10, %v5135_v17  ;;  %v12093_v16 = vld [vmem:[#allocation3 + $0x49] sm:$0xff]  ;;  %4466 = vst.msk [vmem:[#allocation3 + $0x88] sm:$0xff] %vm243_vm10, %v4434_v60  ;;  %v4305_v43 = vadd.f32 %v9161_v24, %v4080_v26  ;;  %4628 = vrot.lane.b32.xlu0 %v4560_v44, %s9519_s6 }
 0x563   : > { %v12095_v10 = vld [vmem:[#allocation3 + $0x4f] sm:$0xff]  ;;  %5804 = vst.msk [vmem:[#allocation4 + $0x10] sm:$0xff] %vm243_vm10, %v12093_v16  ;;  %v12103_v49 = vld [vmem:[#allocation3 + $0x47] sm:$0xff]  ;;  %v9167_v11 = vpop.f32.mrf.mxu0 }
 0x564   : > { %4529 = vst.msk [vmem:[#allocation4 + $0x78] sm:$0xff] %vm243_vm10, %v12095_v10  ;;  %v5134_v30 = vld [vmem:[#allocation3 + $0x48] sm:$0xff]  ;;  %v4563_v12 = vld [vmem:[#allocation3 + $0x70] sm:$0xff]  ;;  %4528 = vst.msk [vmem:[#allocation4 + $0x60] sm:$0xff] %vm243_vm10, %v12103_v49  ;;  %v4435_v2 = vmax.f32 %v4305_v43, 0.0 }
 0x565   : > { %v12105_v27 = vld [vmem:[#allocation3 + $0x71] sm:$0xff]  ;;  %5166 = vst.msk [vmem:[#allocation4 + $0x38] sm:$0xff] %vm243_vm10, %v5134_v30  ;;  %4634 = vrot.lane.b32.xlu1 %v4563_v12, %s9519_s6  ;;  %v4562_v42 = vld [vmem:[#allocation3 + $0x68] sm:$0xff]  ;;  %v4319_v51 = vpop.f32.mrf.mxu0 }
 0x566   : > { %v5137_v59 = vld [vmem:[#allocation3 + $0x70] sm:$0xff]  ;;  %5807 = vst.msk [vmem:[#allocation4 + $0x58] sm:$0xff] %vm243_vm10, %v12105_v27  ;;  %4467 = vst.msk [vmem:[#allocation3 + $0x90] sm:$0xff] %vm243_vm10, %v4435_v2  ;;  %v4084_v36 = vpop.f32.mrf.mxu1  ;;  %4632 = vrot.lane.b32.xlu0 %v4562_v42, %s9519_s6  ;;  %v12124_v3 = vld [vmem:[#allocation3 + $0x67] sm:$0xff] }
 0x567   : > { %5169 = vst.msk [vmem:[#allocation4 + $0x80] sm:$0xff] %vm243_vm10, %v5137_v59  ;;  %v12114_v37 = vld [vmem:[#allocation3 + $0x69] sm:$0xff]  ;;  %v4085_v53 = vadd.f32 %v12055_v4, %v4084_v36  ;;  %4530 = vst.msk [vmem:[#allocation4 + $0x90] sm:$0xff] %vm243_vm10, %v12124_v3  ;;  %v9170_v43 = vpop.f32.mrf.mxu0 }
 0x568   : > { %v12116_v8 = vld [vmem:[#allocation3 + $0x6f] sm:$0xff]  ;;  %5806 = vst.msk [vmem:[#allocation4 + $0x40] sm:$0xff] %vm243_vm10, %v12114_v37  ;;  %v4086_v56 = vpop.f32.mrf.mxu1 }
 0x569   : > { %4531 = vst.msk [vmem:[#allocation4 + $0xa8] sm:$0xff] %vm243_vm10, %v12116_v8  ;;  %v5136_v19 = vld [vmem:[#allocation3 + $0x68] sm:$0xff]  ;;  %v4310_v46 = vadd.f32 %v4309_v22, %v4085_v53  ;;  %v4329_v2 = vpop.f32.mrf.mxu0 }
 0x56a   : > { %5168 = vst.msk [vmem:[#allocation4 + $0x68] sm:$0xff] %vm243_vm10, %v5136_v19  ;;  %v5838_v32 = vld [vmem:[#allocation4 + $0x10] sm:$0xff]  ;;  %v4564_v47 = vld [vmem:[#allocation3 + $0x88] sm:$0xff] }
 0x56b   : > { %v12130_v6 = vld [vmem:[#allocation3 + $0x87] sm:$0xff]  ;;  %9206 = vmatprep.mubr.msk.f32.mxu1 %vm243_vm10, %v5838_v32  ;;  %4636 = vrot.lane.b32.xlu0 %v4564_v47, %s9519_s6  ;;  %v4436_v15 = vmax.f32 %v4310_v46, 0.0  ;;  %v4089_v0 = vpop.f32.mrf.mxu1 }
 0x56c   : > { %v5841_v35 = vld [vmem:[#allocation4 + $0x28] sm:$0xff]  ;;  %4532 = vst.msk [vmem:[#allocation4 + $0xc0] sm:$0xff] %vm243_vm10, %v12130_v6  ;;  %v4090_v31 = vadd.f32 %v12055_v4, %v4089_v0 }
 0x56d   : > { %v5138_v34 = vld [vmem:[#allocation3 + $0x88] sm:$0xff]  ;;  %9207 = vmatmul.mubr.msk.f32.vlgmr.msra.gmra.mxu1 %vm243_vm10, %v5841_v35  ;;  %v5847_v50 = vld [vmem:[#allocation4 + $0x58] sm:$0xff]  ;;  %4468 = vst.msk [vmem:[#allocation3 + $0xa8] sm:$0xff] %vm243_vm10, %v4436_v15  ;;  %v4091_v62 = vpop.f32.mrf.mxu1  ;;  %v4565_v57 = vld [vmem:[#allocation3 + $0x90] sm:$0xff] }
 0x56e   : > { %5170 = vst.msk [vmem:[#allocation4 + $0x98] sm:$0xff] %vm243_vm10, %v5138_v34  ;;  %v12140_v20 = vld [vmem:[#allocation3 + $0x89] sm:$0xff]  ;;  %v4315_v18 = vadd.f32 %v9164_v23, %v4090_v31  ;;  %4638 = vrot.lane.b32.xlu1 %v4565_v57, %s9519_s6  ;;  %v12146_v21 = vld [vmem:[#allocation3 + $0x91] sm:$0xff]  ;;  %v9173_v57 = vpop.f32.mrf.mxu0 }
 0x56f   : > { %v5844_v13 = vld [vmem:[#allocation4 + $0x40] sm:$0xff]  ;;  %5808 = vst.msk [vmem:[#allocation4 + $0x70] sm:$0xff] %vm243_vm10, %v12140_v20  ;;  %v12148_v38 = vld [vmem:[#allocation3 + $0x8f] sm:$0xff]  ;;  %5809 = vst.msk [vmem:[#allocation4 + $0x88] sm:$0xff] %vm243_vm10, %v12146_v21 }
 0x570   : > { %9209 = vmatprep.mubr.msk.f32.mxu1 %vm243_vm10, %v5844_v13  ;;  %v5139_v45 = vld [vmem:[#allocation3 + $0x90] sm:$0xff]  ;;  %4533 = vst.msk [vmem:[#allocation4 + $0xd8] sm:$0xff] %vm243_vm10, %v12148_v38  ;;  %v4437_v58 = vmax.f32 %v4315_v18, 0.0 }
 0x571   : > { %9210 = vmatmul.mubr.msk.f32.gmra.mxu1 %vm243_vm10, %v5847_v50  ;;  %5171 = vst.msk [vmem:[#allocation4 + $0xb0] sm:$0xff] %vm243_vm10, %v5139_v45 }
 0x572   : > { %4469 = vst.msk [vmem:[#allocation3 + $0xb0] sm:$0xff] %vm243_vm10, %v4437_v58  ;;  %v4094_v40 = vpop.f32.mrf.mxu1 }
 0x573   : > { %v4095_v28 = vadd.f32 %v12055_v4, %v4094_v40 }
 0x574   : > { %v4096_v9 = vpop.f32.mrf.mxu1  ;;  %v4566_v24 = vld [vmem:[#allocation3 + $0xa8] sm:$0xff] }
 0x575   : > { %v12158_v5 = vld [vmem:[#allocation3 + $0xa7] sm:$0xff]  ;;  %v4320_v54 = vadd.f32 %v4319_v51, %v4095_v28  ;;  %4640 = vrot.lane.b32.xlu0 %v4566_v24, %s9519_s6 }
 0x576   : > { %v5140_v25 = vld [vmem:[#allocation3 + $0xa8] sm:$0xff]  ;;  %v5850_v33 = vld [vmem:[#allocation4 + $0x70] sm:$0xff]  ;;  %4534 = vst.msk [vmem:[#allocation4 + $0xf0] sm:$0xff] %vm243_vm10, %v12158_v5 }
 0x577   : > { %5172 = vst.msk [vmem:[#allocation4 + $0xc8] sm:$0xff] %vm243_vm10, %v5140_v25  ;;  %9212 = vmatprep.mubr.msk.f32.mxu1 %vm243_vm10, %v5850_v33  ;;  %v5853_v14 = vld [vmem:[#allocation4 + $0x88] sm:$0xff]  ;;  %v4438_v39 = vmax.f32 %v4320_v54, 0.0  ;;  %v4099_v7 = vpop.f32.mrf.mxu1 }
 0x578   : > { %9213 = vmatmul.mubr.msk.f32.gmra.mxu1 %vm243_vm10, %v5853_v14  ;;  %v4100_v29 = vadd.f32 %v12055_v4, %v4099_v7 }
 0x579   : > { %4470 = vst.msk [vmem:[#allocation3 + $0xc8] sm:$0xff] %vm243_vm10, %v4438_v39  ;;  %v4101_v48 = vpop.f32.mrf.mxu1  ;;  %v4567_v63 = vld [vmem:[#allocation3 + $0xb0] sm:$0xff] }
 0x57a   : > { %v12168_v17 = vld [vmem:[#allocation3 + $0xa9] sm:$0xff]  ;;  %v12170_v60 = vld [vmem:[#allocation3 + $0xb1] sm:$0xff]  ;;  %v4325_v26 = vadd.f32 %v9167_v11, %v4100_v29  ;;  %4642 = vrot.lane.b32.xlu1 %v4567_v63, %s9519_s6  ;;  %v4339_v11 = vpop.f32.mrf.mxu0 }
 0x57b   : > { %5810 = vst.msk [vmem:[#allocation4 + $0xa0] sm:$0xff] %vm243_vm10, %v12168_v17  ;;  %5811 = vst.msk [vmem:[#allocation4 + $0xb8] sm:$0xff] %vm243_vm10, %v12170_v60  ;;  %v12177_v55 = vld [vmem:[#allocation3 + $0xaf] sm:$0xff] }
 0x57c   : > { %v5141_v44 = vld [vmem:[#allocation3 + $0xb0] sm:$0xff]  ;;  %4535 = vst.msk [vmem:[#allocation4 + $0x108] sm:$0xff] %vm243_vm10, %v12177_v55  ;;  %v4439_v30 = vmax.f32 %v4325_v26, 0.0 }
 0x57d   : > { %5173 = vst.msk [vmem:[#allocation4 + $0xe0] sm:$0xff] %vm243_vm10, %v5141_v44 }
 0x57e   : > { %4471 = vst.msk [vmem:[#allocation3 + $0xd0] sm:$0xff] %vm243_vm10, %v4439_v30  ;;  %v4104_v12 = vpop.f32.mrf.mxu1 }
 0x57f   : > { %v4105_v59 = vadd.f32 %v12055_v4, %v4104_v12 }
 0x580   : > { %v4106_v23 = vpop.f32.mrf.mxu1  ;;  %v4568_v42 = vld [vmem:[#allocation3 + $0xc8] sm:$0xff] }
 0x581   : > { %v12184_v36 = vld [vmem:[#allocation3 + $0xc7] sm:$0xff]  ;;  %v4330_v53 = vadd.f32 %v4329_v2, %v4105_v59  ;;  %4644 = vrot.lane.b32.xlu0 %v4568_v42, %s9519_s6 }
 0x582   : > { %v5142_v19 = vld [vmem:[#allocation3 + $0xc8] sm:$0xff]  ;;  %v5856_v22 = vld [vmem:[#allocation4 + $0xa0] sm:$0xff]  ;;  %v5859_v56 = vld [vmem:[#allocation4 + $0xb8] sm:$0xff]  ;;  %4536 = vst.msk [vmem:[#allocation4 + $0x120] sm:$0xff] %vm243_vm10, %v12184_v36 }
 0x583   : > { %5174 = vst.msk [vmem:[#allocation4 + $0xf8] sm:$0xff] %vm243_vm10, %v5142_v19  ;;  %9215 = vmatprep.mubr.msk.f32.mxu1 %vm243_vm10, %v5856_v22  ;;  %v4440_v46 = vmax.f32 %v4330_v53, 0.0  ;;  %v4109_v32 = vpop.f32.mrf.mxu1 }
 0x584   : > { %9216 = vmatmul.mubr.msk.f32.gmra.mxu1 %vm243_vm10, %v5859_v56  ;;  %v4110_v47 = vadd.f32 %v12055_v4, %v4109_v32 }
 0x585   : > { %4472 = vst.msk [vmem:[#allocation3 + $0xe8] sm:$0xff] %vm243_vm10, %v4440_v46  ;;  %v4111_v35 = vpop.f32.mrf.mxu1  ;;  %v4569_v34 = vld [vmem:[#allocation3 + $0xd0] sm:$0xff] }
 0x586   : > { %v12194_v15 = vld [vmem:[#allocation3 + $0xc9] sm:$0xff]  ;;  %v12196_v0 = vld [vmem:[#allocation3 + $0xd1] sm:$0xff]  ;;  %v4335_v31 = vadd.f32 %v9170_v43, %v4110_v47  ;;  %4646 = vrot.lane.b32.xlu1 %v4569_v34, %s9519_s6  ;;  %v9176_v43 = vpop.f32.mrf.mxu0 }
 0x587   : > { %5812 = vst.msk [vmem:[#allocation4 + $0xd0] sm:$0xff] %vm243_vm10, %v12194_v15  ;;  %5813 = vst.msk [vmem:[#allocation4 + $0xe8] sm:$0xff] %vm243_vm10, %v12196_v0  ;;  %v12203_v50 = vld [vmem:[#allocation3 + $0xcf] sm:$0xff] }
 0x588   : > { %v5143_v62 = vld [vmem:[#allocation3 + $0xd0] sm:$0xff]  ;;  %4537 = vst.msk [vmem:[#allocation4 + $0x138] sm:$0xff] %vm243_vm10, %v12203_v50  ;;  %v4441_v13 = vmax.f32 %v4335_v31, 0.0  ;;  %v4349_v2 = vpop.f32.mrf.mxu0 }
 0x589   : > { %5175 = vst.msk [vmem:[#allocation4 + $0x110] sm:$0xff] %vm243_vm10, %v5143_v62 }
 0x58a   : > { %4473 = vst.msk [vmem:[#allocation3 + $0xf0] sm:$0xff] %vm243_vm10, %v4441_v13  ;;  %v4114_v18 = vpop.f32.mrf.mxu1 }
 0x58b   : > { %v4115_v45 = vadd.f32 %v12055_v4, %v4114_v18 }
 0x58c   : > { %v4116_v58 = vpop.f32.mrf.mxu1  ;;  %v4570_v40 = vld [vmem:[#allocation3 + $0xe8] sm:$0xff] }
 0x58d   : > { %v12210_v28 = vld [vmem:[#allocation3 + $0xe7] sm:$0xff]  ;;  %v4340_v9 = vadd.f32 %v4339_v11, %v4115_v45  ;;  %4648 = vrot.lane.b32.xlu0 %v4570_v40, %s9519_s6  ;;  %v9179_v11 = vpop.f32.mrf.mxu0 }
 0x58e   : > { %v12212_v51 = vld [vmem:[#allocation3 + $0xe8] sm:$0xff]  ;;  %v5862_v24 = vld [vmem:[#allocation4 + $0xd0] sm:$0xff]  ;;  %4538 = vst.msk [vmem:[#allocation4 + $0x150] sm:$0xff] %vm243_vm10, %v12210_v28 }
 0x58f   : > { %v5865_v25 = vld [vmem:[#allocation4 + $0xe8] sm:$0xff]  ;;  %5176 = vst.msk [vmem:[#allocation4 + $0x128] sm:$0xff] %vm243_vm10, %v12212_v51  ;;  %9218 = vmatprep.mubr.msk.f32.mxu1 %vm243_vm10, %v5862_v24  ;;  %v4442_v54 = vmax.f32 %v4340_v9, 0.0  ;;  %v4119_v33 = vpop.f32.mrf.mxu1  ;;  %v4359_v24 = vpop.f32.mrf.mxu0 }
 0x590   : > { %9219 = vmatmul.mubr.msk.f32.gmra.mxu1 %vm243_vm10, %v5865_v25  ;;  %v4120_v14 = vadd.f32 %v12055_v4, %v4119_v33 }
 0x591   : > { %4474 = vst.msk [vmem:[#allocation3 + $0x108] sm:$0xff] %vm243_vm10, %v4442_v54  ;;  %v4121_v39 = vpop.f32.mrf.mxu1  ;;  %v4571_v7 = vld [vmem:[#allocation3 + $0xf0] sm:$0xff] }
 0x592   : > { %v12223_v29 = vld [vmem:[#allocation3 + $0xe9] sm:$0xff]  ;;  %v5783_v48 = vld [vmem:[#allocation3 + $0xf1] sm:$0xff]  ;;  %v4345_v63 = vadd.f32 %v9173_v57, %v4120_v14  ;;  %4650 = vrot.lane.b32.xlu1 %v4571_v7, %s9519_s6 }
 0x593   : > { %5814 = vst.msk [vmem:[#allocation4 + $0x100] sm:$0xff] %vm243_vm10, %v12223_v29  ;;  %5815 = vst.msk [vmem:[#allocation4 + $0x118] sm:$0xff] %vm243_vm10, %v5783_v48  ;;  %v12229_v26 = vld [vmem:[#allocation3 + $0xef] sm:$0xff] }
 0x594   : > { %v12231_v44 = vld [vmem:[#allocation3 + $0xf0] sm:$0xff]  ;;  %4539 = vst.msk [vmem:[#allocation4 + $0x168] sm:$0xff] %vm243_vm10, %v12229_v26  ;;  %v4443_v30 = vmax.f32 %v4345_v63, 0.0 }
 0x595   : > { %5177 = vst.msk [vmem:[#allocation4 + $0x140] sm:$0xff] %vm243_vm10, %v12231_v44 }
 0x596   : > { %4475 = vst.msk [vmem:[#allocation3 + $0x110] sm:$0xff] %vm243_vm10, %v4443_v30  ;;  %v4124_v12 = vpop.f32.mrf.mxu1 }
 0x597   : > { %v4125_v59 = vadd.f32 %v12055_v4, %v4124_v12 }
 0x598   : > { %v4126_v23 = vpop.f32.mrf.mxu1  ;;  %v4572_v42 = vld [vmem:[#allocation3 + $0x108] sm:$0xff] }
 0x599   : > { %v12239_v19 = vld [vmem:[#allocation3 + $0x107] sm:$0xff]  ;;  %v4350_v22 = vadd.f32 %v4349_v2, %v4125_v59  ;;  %4652 = vrot.lane.b32.xlu0 %v4572_v42, %s9519_s6 }
 0x59a   : > { %v12241_v53 = vld [vmem:[#allocation3 + $0x108] sm:$0xff]  ;;  %v5868_v56 = vld [vmem:[#allocation4 + $0x100] sm:$0xff]  ;;  %v5871_v46 = vld [vmem:[#allocation4 + $0x118] sm:$0xff]  ;;  %4540 = vst.msk [vmem:[#allocation4 + $0x180] sm:$0xff] %vm243_vm10, %v12239_v19 }
 0x59b   : > { %5178 = vst.msk [vmem:[#allocation4 + $0x158] sm:$0xff] %vm243_vm10, %v12241_v53  ;;  %9221 = vmatprep.mubr.msk.f32.mxu1 %vm243_vm10, %v5868_v56  ;;  %v4444_v32 = vmax.f32 %v4350_v22, 0.0  ;;  %v4129_v47 = vpop.f32.mrf.mxu1 }
 0x59c   : > { %9222 = vmatmul.mubr.msk.f32.gmra.mxu1 %vm243_vm10, %v5871_v46  ;;  %v4130_v35 = vadd.f32 %v12055_v4, %v4129_v47  ;;  %v9182_v46 = vpop.f32.mrf.mxu0 }
 0x59d   : > { %4476 = vst.msk [vmem:[#allocation3 + $0x128] sm:$0xff] %vm243_vm10, %v4444_v32  ;;  %v4131_v34 = vpop.f32.mrf.mxu1  ;;  %v4573_v31 = vld [vmem:[#allocation3 + $0x110] sm:$0xff] }
 0x59e   : > { %v5784_v62 = vld [vmem:[#allocation3 + $0x109] sm:$0xff]  ;;  %v5785_v57 = vld [vmem:[#allocation3 + $0x111] sm:$0xff]  ;;  %v4355_v13 = vadd.f32 %v9176_v43, %v4130_v35  ;;  %4654 = vrot.lane.b32.xlu1 %v4573_v31, %s9519_s6  ;;  %v4369_v34 = vpop.f32.mrf.mxu0 }
 0x59f   : > { %5816 = vst.msk [vmem:[#allocation4 + $0x130] sm:$0xff] %vm243_vm10, %v5784_v62  ;;  %5817 = vst.msk [vmem:[#allocation4 + $0x148] sm:$0xff] %vm243_vm10, %v5785_v57  ;;  %v12255_v18 = vld [vmem:[#allocation3 + $0x10f] sm:$0xff] }
 0x5a0   : > { %v12257_v45 = vld [vmem:[#allocation3 + $0x110] sm:$0xff]  ;;  %4541 = vst.msk [vmem:[#allocation4 + $0x198] sm:$0xff] %vm243_vm10, %v12255_v18  ;;  %v4445_v58 = vmax.f32 %v4355_v13, 0.0 }
 0x5a1   : > { %5179 = vst.msk [vmem:[#allocation4 + $0x170] sm:$0xff] %vm243_vm10, %v12257_v45 }
 0x5a2   : > { %4477 = vst.msk [vmem:[#allocation3 + $0x130] sm:$0xff] %vm243_vm10, %v4445_v58  ;;  %v4134_v40 = vpop.f32.mrf.mxu1 }
 0x5a3   : > { %v4135_v9 = vadd.f32 %v12055_v4, %v4134_v40 }
 0x5a4   : > { %v4136_v25 = vpop.f32.mrf.mxu1  ;;  %v4574_v54 = vld [vmem:[#allocation3 + $0x128] sm:$0xff] }
 0x5a5   : > { %v12265_v33 = vld [vmem:[#allocation3 + $0x127] sm:$0xff]  ;;  %v4360_v39 = vadd.f32 %v4359_v24, %v4135_v9  ;;  %4656 = vrot.lane.b32.xlu0 %v4574_v54, %s9519_s6 }
 0x5a6   : > { %v12267_v14 = vld [vmem:[#allocation3 + $0x128] sm:$0xff]  ;;  %v5874_v7 = vld [vmem:[#allocation4 + $0x130] sm:$0xff]  ;;  %4542 = vst.msk [vmem:[#allocation4 + $0x1b0] sm:$0xff] %vm243_vm10, %v12265_v33 }
 0x5a7   : > { %v5877_v48 = vld [vmem:[#allocation4 + $0x148] sm:$0xff]  ;;  %5180 = vst.msk [vmem:[#allocation4 + $0x188] sm:$0xff] %vm243_vm10, %v12267_v14  ;;  %9224 = vmatprep.mubr.msk.f32.mxu1 %vm243_vm10, %v5874_v7  ;;  %v4446_v63 = vmax.f32 %v4360_v39, 0.0  ;;  %v4139_v43 = vpop.f32.mrf.mxu1 }
 0x5a8   : > { %9225 = vmatmul.mubr.msk.f32.gmra.mxu1 %vm243_vm10, %v5877_v48  ;;  %v4140_v30 = vadd.f32 %v12055_v4, %v4139_v43 }
 0x5a9   : > { %4478 = vst.msk [vmem:[#allocation3 + $0x148] sm:$0xff] %vm243_vm10, %v4446_v63  ;;  %v4141_v12 = vpop.f32.mrf.mxu1  ;;  %v4575_v59 = vld [vmem:[#allocation3 + $0x130] sm:$0xff] }
 0x5aa   : > { %v5786_v2 = vld [vmem:[#allocation3 + $0x129] sm:$0xff]  ;;  %v5787_v23 = vld [vmem:[#allocation3 + $0x131] sm:$0xff]  ;;  %v4365_v42 = vadd.f32 %v9179_v11, %v4140_v30  ;;  %4658 = vrot.lane.b32.xlu1 %v4575_v59, %s9519_s6  ;;  %v9185_v12 = vpop.f32.mrf.mxu0 }
 0x5ab   : > { %5818 = vst.msk [vmem:[#allocation4 + $0x160] sm:$0xff] %vm243_vm10, %v5786_v2  ;;  %5819 = vst.msk [vmem:[#allocation4 + $0x178] sm:$0xff] %vm243_vm10, %v5787_v23  ;;  %v12281_v22 = vld [vmem:[#allocation3 + $0x12f] sm:$0xff] }
 0x5ac   : > { %v12283_v56 = vld [vmem:[#allocation3 + $0x130] sm:$0xff]  ;;  %4543 = vst.msk [vmem:[#allocation4 + $0x1c8] sm:$0xff] %vm243_vm10, %v12281_v22  ;;  %v4447_v32 = vmax.f32 %v4365_v42, 0.0  ;;  %v4379_v42 = vpop.f32.mrf.mxu0 }
 0x5ad   : > { %5181 = vst.msk [vmem:[#allocation4 + $0x1a0] sm:$0xff] %vm243_vm10, %v12283_v56 }
 0x5ae   : > { %4479 = vst.msk [vmem:[#allocation3 + $0x150] sm:$0xff] %vm243_vm10, %v4447_v32  ;;  %v4144_v47 = vpop.f32.mrf.mxu1 }
 0x5af   : > { %v4145_v35 = vadd.f32 %v12055_v4, %v4144_v47 }
 0x5b0   : > { %v4146_v31 = vpop.f32.mrf.mxu1  ;;  %v4576_v62 = vld [vmem:[#allocation3 + $0x148] sm:$0xff] }
 0x5b1   : > { %v12291_v57 = vld [vmem:[#allocation3 + $0x147] sm:$0xff]  ;;  %v4370_v11 = vadd.f32 %v4369_v34, %v4145_v35  ;;  %4660 = vrot.lane.b32.xlu0 %v4576_v62, %s9519_s6 }
 0x5b2   : > { %v12293_v13 = vld [vmem:[#allocation3 + $0x148] sm:$0xff]  ;;  %v5880_v58 = vld [vmem:[#allocation4 + $0x160] sm:$0xff]  ;;  %v5883_v40 = vld [vmem:[#allocation4 + $0x178] sm:$0xff]  ;;  %4544 = vst.msk [vmem:[#allocation4 + $0x1e0] sm:$0xff] %vm243_vm10, %v12291_v57 }
 0x5b3   : > { %5182 = vst.msk [vmem:[#allocation4 + $0x1b8] sm:$0xff] %vm243_vm10, %v12293_v13  ;;  %9227 = vmatprep.mubr.msk.f32.mxu1 %vm243_vm10, %v5880_v58  ;;  %v4448_v9 = vmax.f32 %v4370_v11, 0.0  ;;  %v4149_v24 = vpop.f32.mrf.mxu1 }
 0x5b4   : > { %9228 = vmatmul.mubr.msk.f32.gmra.mxu1 %vm243_vm10, %v5883_v40  ;;  %v4150_v25 = vadd.f32 %v12055_v4, %v4149_v24 }
 0x5b5   : > { %4480 = vst.msk [vmem:[#allocation3 + $0x168] sm:$0xff] %vm243_vm10, %v4448_v9  ;;  %v4151_v54 = vpop.f32.mrf.mxu1  ;;  %v4577_v39 = vld [vmem:[#allocation3 + $0x150] sm:$0xff] }
 0x5b6   : > { %v5788_v7 = vld [vmem:[#allocation3 + $0x149] sm:$0xff]  ;;  %v5789_v48 = vld [vmem:[#allocation3 + $0x151] sm:$0xff]  ;;  %v4375_v63 = vadd.f32 %v9182_v46, %v4150_v25  ;;  %4662 = vrot.lane.b32.xlu1 %v4577_v39, %s9519_s6 }
 0x5b7   : > { %5820 = vst.msk [vmem:[#allocation4 + $0x190] sm:$0xff] %vm243_vm10, %v5788_v7  ;;  %5821 = vst.msk [vmem:[#allocation4 + $0x1a8] sm:$0xff] %vm243_vm10, %v5789_v48  ;;  %v12307_v43 = vld [vmem:[#allocation3 + $0x14f] sm:$0xff] }
 0x5b8   : > { %v12309_v30 = vld [vmem:[#allocation3 + $0x150] sm:$0xff]  ;;  %4545 = vst.msk [vmem:[#allocation4 + $0x1f8] sm:$0xff] %vm243_vm10, %v12307_v43  ;;  %v4449_v59 = vmax.f32 %v4375_v63, 0.0  ;;  %v9188_v63 = vpop.f32.mrf.mxu0 }
 0x5b9   : > { %5183 = vst.msk [vmem:[#allocation4 + $0x1d0] sm:$0xff] %vm243_vm10, %v12309_v30 }
 0x5ba   : > { %4481 = vst.msk [vmem:[#allocation3 + $0x170] sm:$0xff] %vm243_vm10, %v4449_v59  ;;  %v4154_v2 = vpop.f32.mrf.mxu1 }
 0x5bb   : > { %v4155_v23 = vadd.f32 %v12055_v4, %v4154_v2 }
 0x5bc   : > { %v4156_v46 = vpop.f32.mrf.mxu1  ;;  %v4578_v32 = vld [vmem:[#allocation3 + $0x168] sm:$0xff] }
 0x5bd   : > { %v12317_v47 = vld [vmem:[#allocation3 + $0x167] sm:$0xff]  ;;  %v4380_v34 = vadd.f32 %v4379_v42, %v4155_v23  ;;  %4664 = vrot.lane.b32.xlu0 %v4578_v32, %s9519_s6  ;;  %v4389_v23 = vpop.f32.mrf.mxu0 }
 0x5be   : > { %v12319_v35 = vld [vmem:[#allocation3 + $0x168] sm:$0xff]  ;;  %v5886_v31 = vld [vmem:[#allocation4 + $0x190] sm:$0xff]  ;;  %4546 = vst.msk [vmem:[#allocation4 + $0x210] sm:$0xff] %vm243_vm10, %v12317_v47 }
 0x5bf   : > { %v5889_v62 = vld [vmem:[#allocation4 + $0x1a8] sm:$0xff]  ;;  %5184 = vst.msk [vmem:[#allocation4 + $0x1e8] sm:$0xff] %vm243_vm10, %v12319_v35  ;;  %9230 = vmatprep.mubr.msk.f32.mxu1 %vm243_vm10, %v5886_v31  ;;  %v4450_v11 = vmax.f32 %v4380_v34, 0.0  ;;  %v4159_v58 = vpop.f32.mrf.mxu1 }
 0x5c0   : > { %9231 = vmatmul.mubr.msk.f32.gmra.mxu1 %vm243_vm10, %v5889_v62  ;;  %v4160_v40 = vadd.f32 %v12055_v4, %v4159_v58 }
 0x5c1   : > { %4482 = vst.msk [vmem:[#allocation3 + $0x188] sm:$0xff] %vm243_vm10, %v4450_v11  ;;  %v4161_v9 = vpop.f32.mrf.mxu1  ;;  %v4579_v24 = vld [vmem:[#allocation3 + $0x170] sm:$0xff] }
 0x5c2   : > { %v5790_v25 = vld [vmem:[#allocation3 + $0x169] sm:$0xff]  ;;  %v5791_v54 = vld [vmem:[#allocation3 + $0x171] sm:$0xff]  ;;  %v4385_v39 = vadd.f32 %v9185_v12, %v4160_v40  ;;  %4666 = vrot.lane.b32.xlu1 %v4579_v24, %s9519_s6 }
 0x5c3   : > { %5822 = vst.msk [vmem:[#allocation4 + $0x1c0] sm:$0xff] %vm243_vm10, %v5790_v25  ;;  %5823 = vst.msk [vmem:[#allocation4 + $0x1d8] sm:$0xff] %vm243_vm10, %v5791_v54  ;;  %v12333_v7 = vld [vmem:[#allocation3 + $0x16f] sm:$0xff] }
 0x5c4   : > { %v12335_v48 = vld [vmem:[#allocation3 + $0x170] sm:$0xff]  ;;  %4547 = vst.msk [vmem:[#allocation4 + $0x228] sm:$0xff] %vm243_vm10, %v12333_v7  ;;  %v4451_v59 = vmax.f32 %v4385_v39, 0.0 }
 0x5c5   : > { %5185 = vst.msk [vmem:[#allocation4 + $0x200] sm:$0xff] %vm243_vm10, %v12335_v48 }
 0x5c6   : > { %4483 = vst.msk [vmem:[#allocation3 + $0x190] sm:$0xff] %vm243_vm10, %v4451_v59  ;;  %v4164_v12 = vpop.f32.mrf.mxu1 }
 0x5c7   : > { %v4165_v2 = vadd.f32 %v12055_v4, %v4164_v12 }
 0x5c8   : > { %v4166_v42 = vpop.f32.mrf.mxu1  ;;  %v4580_v46 = vld [vmem:[#allocation3 + $0x188] sm:$0xff] }
 0x5c9   : > { %v12343_v32 = vld [vmem:[#allocation3 + $0x187] sm:$0xff]  ;;  %v4390_v31 = vadd.f32 %v4389_v23, %v4165_v2  ;;  %4668 = vrot.lane.b32.xlu0 %v4580_v46, %s9519_s6  ;;  %v9191_v42 = vpop.f32.mrf.mxu0 }
 0x5ca   : > { %v12345_v34 = vld [vmem:[#allocation3 + $0x188] sm:$0xff]  ;;  %v5892_v62 = vld [vmem:[#allocation4 + $0x1c0] sm:$0xff]  ;;  %v5895_v11 = vld [vmem:[#allocation4 + $0x1d8] sm:$0xff]  ;;  %4548 = vst.msk [vmem:[#allocation4 + $0x240] sm:$0xff] %vm243_vm10, %v12343_v32 }
 0x5cb   : > { %5186 = vst.msk [vmem:[#allocation4 + $0x218] sm:$0xff] %vm243_vm10, %v12345_v34  ;;  %9233 = vmatprep.mubr.msk.f32.mxu1 %vm243_vm10, %v5892_v62  ;;  %v4452_v58 = vmax.f32 %v4390_v31, 0.0  ;;  %v4169_v40 = vpop.f32.mrf.mxu1 }
 0x5cc   : > { %9234 = vmatmul.mubr.msk.f32.gmra.mxu1 %vm243_vm10, %v5895_v11  ;;  %v4170_v9 = vadd.f32 %v12055_v4, %v4169_v40  ;;  %v4399_v11 = vpop.f32.mrf.mxu0 }
 0x5cd   : > { %4484 = vst.msk [vmem:[#allocation3 + $0x1a8] sm:$0xff] %vm243_vm10, %v4452_v58  ;;  %v4171_v24 = vpop.f32.mrf.mxu1  ;;  %v4581_v25 = vld [vmem:[#allocation3 + $0x190] sm:$0xff] }
 0x5ce   : > { %v5792_v54 = vld [vmem:[#allocation3 + $0x189] sm:$0xff]  ;;  %v5793_v39 = vld [vmem:[#allocation3 + $0x191] sm:$0xff]  ;;  %v4395_v59 = vadd.f32 %v9188_v63, %v4170_v9  ;;  %v4627_v12 = vpop.permute.xlu1 %4626  ;;  %4670 = vrot.lane.b32.xlu1 %v4581_v25, %s9519_s6 }
 0x5cf   : > { %5824 = vst.msk [vmem:[#allocation4 + $0x1f0] sm:$0xff] %vm243_vm10, %v5792_v54  ;;  %5825 = vst.msk [vmem:[#allocation4 + $0x208] sm:$0xff] %vm243_vm10, %v5793_v39  ;;  %v12359_v2 = vld [vmem:[#allocation3 + $0x18f] sm:$0xff] }
 0x5d0   : > { %v12361_v23 = vld [vmem:[#allocation3 + $0x190] sm:$0xff]  ;;  %4719 = vst.msk [vmem:[#allocation4 + $0x48] sm:$0xff] %vm2621_vm14, %v4627_v12  ;;  %v4453_v63 = vmax.f32 %v4395_v59, 0.0  ;;  %v4625_v46 = vpop.permute.xlu0 %4624 }
 0x5d1   : > { %4549 = vst.msk [vmem:[#allocation4 + $0x258] sm:$0xff] %vm243_vm10, %v12359_v2  ;;  %5187 = vst.msk [vmem:[#allocation4 + $0x230] sm:$0xff] %vm243_vm10, %v12361_v23 }
 0x5d2   : > { %4718 = vst.msk [vmem:[#allocation4 + $0x30] sm:$0xff] %vm2621_vm14, %v4625_v46  ;;  %v4174_v31 = vpop.f32.mrf.mxu1  ;;  %v4631_v62 = vpop.permute.xlu1 %4630  ;;  %v8809_v46 = vld [vmem:[%s14316_s2 + $0x198] sm:$0xff] }
 0x5d3   : > { %4485 = vst.msk [vmem:[#allocation3 + $0x1b0] sm:$0xff] %vm243_vm10, %v4453_v63  ;;  %v4175_v58 = vadd.f32 %v12055_v4, %v4174_v31  ;;  %v8808_v31 = vld [vmem:[%s14316_s2 + $0x190] sm:$0xff]  ;;  %6071 = vmatpush1.msra.mxu0 %v8809_v46 }
 0x5d4   : > { %4721 = vst.msk [vmem:[#allocation4 + $0x78] sm:$0xff] %vm2621_vm14, %v4631_v62  ;;  %v4176_v40 = vpop.f32.mrf.mxu1  ;;  %v4629_v9 = vpop.permute.xlu0 %4628  ;;  %v4582_v24 = vld [vmem:[#allocation3 + $0x1a8] sm:$0xff]  ;;  %6072 = vmatprep.subr.mxu0 %v14433_v52 }
 0x5d5   : > { %v12372_v25 = vld [vmem:[#allocation3 + $0x1a7] sm:$0xff]  ;;  %v4400_v39 = vadd.f32 %v4399_v11, %v4175_v58  ;;  %4720 = vst.msk [vmem:[#allocation4 + $0x60] sm:$0xff] %vm2621_vm14, %v4629_v9  ;;  %4672 = vrot.lane.b32.xlu0 %v4582_v24, %s9519_s6  ;;  %6073 = vmatpush1.msra.mxu0 %v8808_v31 }
 0x5d6   : > { %v12374_v54 = vld [vmem:[#allocation3 + $0x1a8] sm:$0xff]  ;;  %v5898_v59 = vld [vmem:[#allocation4 + $0x1f0] sm:$0xff]  ;;  %4550 = vst.msk [vmem:[#allocation4 + $0x270] sm:$0xff] %vm243_vm10, %v12372_v25  ;;  %6074 = vmatprep.subr.mxu0 %v14433_v52 }
 0x5d7   : > { %14458 = vst [vmem:[#allocation20_spill] sm:$0xff] %v12374_v54  ;;  %v5901_v12 = vld [vmem:[#allocation4 + $0x208] sm:$0xff]  ;;  %5188 = vst.msk [vmem:[#allocation4 + $0x248] sm:$0xff] %vm243_vm10, %v12374_v54  ;;  %v4635_v63 = vpop.permute.xlu1 %4634  ;;  %9236 = vmatprep.mubr.msk.f32.mxu1 %vm243_vm10, %v5898_v59  ;;  %v4454_v62 = vmax.f32 %v4400_v39, 0.0  ;;  %v4179_v11 = vpop.f32.mrf.mxu1 }
 0x5d8   : > { %4723 = vst.msk [vmem:[#allocation4 + $0xa8] sm:$0xff] %vm2621_vm14, %v4635_v63  ;;  %9237 = vmatmul.mubr.msk.f32.gmra.mxu1 %vm243_vm10, %v5901_v12  ;;  %v4180_v58 = vadd.f32 %v12055_v4, %v4179_v11  ;;  %v4633_v40 = vpop.permute.xlu0 %4632  ;;  %v8807_v63 = vld [vmem:[%s14316_s2 + $0x188] sm:$0xff] }
 0x5d9   : > { %4486 = vst.msk [vmem:[#allocation3 + $0x1c8] sm:$0xff] %vm243_vm10, %v4454_v62  ;;  %v4181_v9 = vpop.f32.mrf.mxu1  ;;  %v9194_v62 = vpop.f32.mrf.mxu0  ;;  %6075 = vmatpush1.msra.mxu0 %v8807_v63 }
 0x5da   : > { %4722 = vst.msk [vmem:[#allocation4 + $0x90] sm:$0xff] %vm2621_vm14, %v4633_v40  ;;  %v4583_v24 = vld [vmem:[#allocation3 + $0x1b0] sm:$0xff]  ;;  %v4405_v39 = vadd.f32 %v9191_v42, %v4180_v58  ;;  %v8806_v42 = vld [vmem:[%s14316_s2 + $0x180] sm:$0xff]  ;;  %6076 = vmatprep.subr.mxu0 %v14433_v52  ;;  %v8805_v58 = vld [vmem:[%s14316_s2 + $0x178] sm:$0xff] }
 0x5db   : > { %v5794_v59 = vld [vmem:[#allocation3 + $0x1a9] sm:$0xff]  ;;  %v5795_v54 = vld [vmem:[#allocation3 + $0x1b1] sm:$0xff]  ;;  %4674 = vrot.lane.b32.xlu1 %v4583_v24, %s9519_s6  ;;  %6077 = vmatpush1.msra.mxu0 %v8806_v42  ;;  %v4409_v40 = vpop.f32.mrf.mxu0 }
 0x5dc   : > { %5826 = vst.msk [vmem:[#allocation4 + $0x220] sm:$0xff] %vm243_vm10, %v5794_v59  ;;  %5827 = vst.msk [vmem:[#allocation4 + $0x238] sm:$0xff] %vm243_vm10, %v5795_v54  ;;  %v12398_v12 = vld [vmem:[#allocation3 + $0x1af] sm:$0xff]  ;;  %v4455_v54 = vmax.f32 %v4405_v39, 0.0  ;;  %6078 = vmatprep.subr.mxu0 %v14433_v52 }
 0x5dd   : > { %v12404_v46 = vld [vmem:[#allocation3 + $0x1b0] sm:$0xff]  ;;  %4551 = vst.msk [vmem:[#allocation4 + $0x288] sm:$0xff] %vm243_vm10, %v12398_v12  ;;  %v4637_v31 = vpop.permute.xlu0 %4636  ;;  %6079 = vmatpush1.msra.mxu0 %v8805_v58  ;;  %v8803_v58 = vld [vmem:[%s14316_s2 + $0x168] sm:$0xff] }
 0x5de   : > { %14459 = vst [vmem:[#allocation21_spill] sm:$0xff] %v12404_v46  ;;  %5189 = vst.msk [vmem:[#allocation4 + $0x260] sm:$0xff] %vm243_vm10, %v12404_v46  ;;  %v4184_v11 = vpop.f32.mrf.mxu1  ;;  %6080 = vmatprep.subr.mxu0 %v14433_v52  ;;  %v8804_v42 = vld [vmem:[%s14316_s2 + $0x170] sm:$0xff] }
 0x5df   : > { %4724 = vst.msk [vmem:[#allocation4 + $0xc0] sm:$0xff] %vm2621_vm14, %v4637_v31  ;;  %v4185_v9 = vadd.f32 %v12055_v4, %v4184_v11  ;;  %6081 = vmatpush1.msra.mxu0 %v8804_v42 }
 0x5e0   : > { %4487 = vst.msk [vmem:[#allocation3 + $0x1d0] sm:$0xff] %vm243_vm10, %v4455_v54  ;;  %v4186_v24 = vpop.f32.mrf.mxu1  ;;  %v4639_v59 = vpop.permute.xlu1 %4638  ;;  %v4584_v39 = vld [vmem:[#allocation3 + $0x1c8] sm:$0xff]  ;;  %6082 = vmatprep.subr.mxu0 %v14433_v52 }
 0x5e1   : > { %v12421_v63 = vld [vmem:[#allocation3 + $0x1c7] sm:$0xff]  ;;  %v4410_v54 = vadd.f32 %v4409_v40, %v4185_v9  ;;  %4725 = vst.msk [vmem:[#allocation4 + $0xd8] sm:$0xff] %vm2621_vm14, %v4639_v59  ;;  %4676 = vrot.lane.b32.xlu0 %v4584_v39, %s9519_s6  ;;  %6083 = vmatpush1.msra.mxu0 %v8803_v58 }
 0x5e2   : > { %4552 = vst.msk [vmem:[#allocation4 + $0x2a0] sm:$0xff] %vm243_vm10, %v12421_v63  ;;  %v12431_v11 = vld [vmem:[#allocation3 + $0x1c8] sm:$0xff]  ;;  %6084 = vmatprep.subr.mxu0 %v14433_v52  ;;  %v8802_v9 = vld [vmem:[%s14316_s2 + $0x160] sm:$0xff] }
 0x5e3   : > { %v5904_v31 = vld [vmem:[#allocation4 + $0x220] sm:$0xff]  ;;  %v5907_v46 = vld [vmem:[#allocation4 + $0x238] sm:$0xff]  ;;  %14460 = vst [vmem:[#allocation22_spill] sm:$0xff] %v12431_v11  ;;  %5190 = vst.msk [vmem:[#allocation4 + $0x278] sm:$0xff] %vm243_vm10, %v12431_v11  ;;  %v4456_v40 = vmax.f32 %v4410_v54, 0.0  ;;  %6085 = vmatpush1.msra.mxu0 %v8802_v9 }
 0x5e4   : > { %9239 = vmatprep.mubr.msk.f32.mxu1 %vm243_vm10, %v5904_v31  ;;  %6086 = vmatprep.subr.mxu0 %v14433_v52  ;;  %v8801_v54 = vld [vmem:[%s14316_s2 + $0x158] sm:$0xff]  ;;  %v12505_v11 = vld [vmem:[#allocation3 + $0x29] sm:$0xff] }
 0x5e5   : > { %9240 = vmatmul.mubr.msk.f32.gmra.mxu1 %vm243_vm10, %v5907_v46  ;;  %4488 = vst.msk [vmem:[#allocation3 + $0x1e8] sm:$0xff] %vm243_vm10, %v4456_v40  ;;  %6087 = vmatpush1.msra.mxu0 %v8801_v54 }
 0x5e6   : > { %v4189_v42 = vpop.f32.mrf.mxu1  ;;  %6088 = vmatprep.subr.mxu0 %v14433_v52 }
 0x5e7   : > { %v4585_v24 = vld [vmem:[#allocation3 + $0x1d0] sm:$0xff]  ;;  %v4190_v58 = vadd.f32 %v12055_v4, %v4189_v42  ;;  %v4641_v40 = vpop.permute.xlu0 %4640  ;;  %v8799_v4 = vld [vmem:[%s14316_s2 + $0x148] sm:$0xff] }
 0x5e8   : > { %v5796_v59 = vld [vmem:[#allocation3 + $0x1c9] sm:$0xff]  ;;  %v5797_v39 = vld [vmem:[#allocation3 + $0x1d1] sm:$0xff]  ;;  %4678 = vrot.lane.b32.xlu1 %v4585_v24, %s9519_s6  ;;  %4726 = vst.msk [vmem:[#allocation4 + $0xf0] sm:$0xff] %vm2621_vm14, %v4641_v40  ;;  %v4191_v9 = vpop.f32.mrf.mxu1 }
 0x5e9   : > { %5828 = vst.msk [vmem:[#allocation4 + $0x250] sm:$0xff] %vm243_vm10, %v5796_v59  ;;  %5829 = vst.msk [vmem:[#allocation4 + $0x268] sm:$0xff] %vm243_vm10, %v5797_v39  ;;  %v12449_v46 = vld [vmem:[#allocation3 + $0x1cf] sm:$0xff]  ;;  %v4415_v24 = vadd.f32 %v9194_v62, %v4190_v58  ;;  %v12467_v39 = vpop.f32.mrf.mxu0 }
 0x5ea   : > { %14461 = vst [vmem:[#allocation23_spill] sm:$0xff] %v12449_v46  ;;  %v12455_v31 = vld [vmem:[#allocation3 + $0x1d0] sm:$0xff]  ;;  %4553 = vst.msk [vmem:[#allocation4 + $0x2b8] sm:$0xff] %vm243_vm10, %v12449_v46 }
 0x5eb   : > { %14462 = vst [vmem:[#allocation24_spill] sm:$0xff] %v12455_v31  ;;  %5191 = vst.msk [vmem:[#allocation4 + $0x290] sm:$0xff] %vm243_vm10, %v12455_v31  ;;  %v8800_v59 = vld [vmem:[%s14316_s2 + $0x150] sm:$0xff]  ;;  %v4457_v42 = vmax.f32 %v4415_v24, 0.0  ;;  %v8798_v24 = vld [vmem:[%s14316_s2 + $0x140] sm:$0xff] }
 0x5ec   : > { %6089 = vmatpush1.msra.mxu0 %v8800_v59  ;;  %v4643_v54 = vpop.permute.xlu1 %4642  ;;  %v4586_v40 = vld [vmem:[#allocation3 + $0x1e8] sm:$0xff] }
 0x5ed   : > { %6090 = vmatprep.subr.mxu0 %v14433_v52  ;;  %v12473_v9 = vld [vmem:[#allocation3 + $0x1e7] sm:$0xff]  ;;  %4489 = vst.msk [vmem:[#allocation3 + $0x1f0] sm:$0xff] %vm243_vm10, %v4457_v42  ;;  %4680 = vrot.lane.b32.xlu0 %v4586_v40, %s9519_s6  ;;  %v4419_v42 = vpop.f32.mrf.mxu0  ;;  %v8797_v40 = vld [vmem:[%s14316_s2 + $0x138] sm:$0xff] }
 0x5ee   : > { %14463 = vst [vmem:[#allocation25_spill] sm:$0xff] %v12473_v9  ;;  %6091 = vmatpush1.msra.mxu0 %v8799_v4  ;;  %v12475_v62 = vld [vmem:[#allocation3 + $0x1e8] sm:$0xff]  ;;  %4727 = vst.msk [vmem:[#allocation4 + $0x108] sm:$0xff] %vm2621_vm14, %v4643_v54  ;;  %v4194_v4 = vpop.f32.mrf.mxu1 }
 0x5ef   : > { %14464 = vst [vmem:[#allocation26_spill] sm:$0xff] %v12475_v62  ;;  %4554 = vst.msk [vmem:[#allocation4 + $0x2d0] sm:$0xff] %vm243_vm10, %v12473_v9  ;;  %6092 = vmatprep.subr.mxu0 %v14433_v52  ;;  %v4748_v54 = vld [vmem:[#allocation3 + $0x9] sm:$0xff]  ;;  %v9437_v9 = vld [vmem:[%s14317_s3 + $0x1] ss:$0 sm:$0xff] }
 0x5f0   : > { %v5910_v58 = vld [vmem:[#allocation4 + $0x250] sm:$0xff]  ;;  %v5913_v59 = vld [vmem:[#allocation4 + $0x268] sm:$0xff]  ;;  %5192 = vst.msk [vmem:[#allocation4 + $0x2a8] sm:$0xff] %vm243_vm10, %v12475_v62  ;;  %6093 = vmatpush1.msra.mxu0 %v8798_v24  ;;  %v4195_v31 = vadd.f32 %v9437_v9, %v4194_v4  ;;  %v4196_v62 = vpop.f32.mrf.mxu1 }
 0x5f1   : > { %9242 = vmatprep.mubr.msk.f32.mxu1 %vm243_vm10, %v5910_v58  ;;  %6094 = vmatprep.subr.mxu0 %v14433_v52  ;;  %v8796_v58 = vld [vmem:[%s14316_s2 + $0x130] sm:$0xff]  ;;  %v8795_v24 = vld [vmem:[%s14316_s2 + $0x128] sm:$0xff] }
 0x5f2   : > { %9243 = vmatmul.mubr.msk.f32.gmra.mxu1 %vm243_vm10, %v5913_v59  ;;  %6095 = vmatpush1.msra.mxu0 %v8797_v40  ;;  %v4420_v46 = vadd.f32 %v4419_v42, %v4195_v31 }
 0x5f3   : > { %4812 = vrot.lane.b32.xlu0 %v4748_v54, %s9520_s10  ;;  %6096 = vmatprep.subr.mxu0 %v14433_v52  ;;  %v4645_v59 = vpop.permute.xlu0 %4644  ;;  %v8794_v54 = vld [vmem:[%s14316_s2 + $0x120] sm:$0xff] }
 0x5f4   : > { %6097 = vmatpush1.msra.mxu0 %v8796_v58  ;;  %v4458_v4 = vmax.f32 %v4420_v46, 0.0  ;;  %4728 = vst.msk [vmem:[#allocation4 + $0x120] sm:$0xff] %vm2621_vm14, %v4645_v59  ;;  %v4587_v31 = vld [vmem:[#allocation3 + $0x1f0] sm:$0xff]  ;;  %v8825_v59 = vld [vmem:[%s14316_s2 + $0x218] sm:$0xff] }
 0x5f5   : > { %6098 = vmatprep.subr.mxu0 %v14433_v52  ;;  %v5798_v62 = vld [vmem:[#allocation3 + $0x1e9] sm:$0xff]  ;;  %v5799_v42 = vld [vmem:[#allocation3 + $0x1f1] sm:$0xff]  ;;  %4682 = vrot.lane.b32.xlu1 %v4587_v31, %s9519_s6 }
 0x5f6   : > { %6099 = vmatpush1.msra.mxu0 %v8795_v24  ;;  %4490 = vst.msk [vmem:[#allocation3 + $0x208] sm:$0xff] %vm243_vm10, %v4458_v4  ;;  %5830 = vst.msk [vmem:[#allocation4 + $0x280] sm:$0xff] %vm243_vm10, %v5798_v62  ;;  %v12515_v46 = vld [vmem:[#allocation3 + $0x1ef] sm:$0xff]  ;;  %v4199_v58 = vpop.f32.mrf.mxu1 }
 0x5f7   : > { %4816 = vrot.lane.b32.xlu0 %v12505_v11, %s9520_s10  ;;  %5831 = vst.msk [vmem:[#allocation4 + $0x298] sm:$0xff] %vm243_vm10, %v5799_v42  ;;  %v12520_v40 = vld [vmem:[#allocation3 + $0x1f0] sm:$0xff]  ;;  %4555 = vst.msk [vmem:[#allocation4 + $0x2e8] sm:$0xff] %vm243_vm10, %v12515_v46  ;;  %6100 = vmatprep.subr.mxu0 %v14433_v52  ;;  %v4200_v4 = vadd.f32 %v9437_v9, %v4199_v58 }
 0x5f8   : > { %14465 = vst [vmem:[#allocation27_spill] sm:$0xff] %v12520_v40  ;;  %v4749_v24 = vld [vmem:[#allocation3 + $0x11] sm:$0xff]  ;;  %5193 = vst.msk [vmem:[#allocation4 + $0x2c0] sm:$0xff] %vm243_vm10, %v12520_v40  ;;  %6101 = vmatpush1.msra.mxu0 %v8794_v54  ;;  %v4201_v31 = vpop.f32.mrf.mxu1  ;;  %v4647_v62 = vpop.permute.xlu1 %4646 }
 0x5f9   : > { %6102 = vmatprep.subr.mxu0 %v14433_v52  ;;  %v4425_v42 = vadd.f32 %v12467_v39, %v4200_v4  ;;  %4729 = vst.msk [vmem:[#allocation4 + $0x138] sm:$0xff] %vm2621_vm14, %v4647_v62  ;;  %4814 = vrot.lane.b32.xlu1 %v4749_v24, %s9520_s10  ;;  %v8824_v9 = vld [vmem:[%s14316_s2 + $0x210] sm:$0xff]  ;;  %v8823_v39 = vld [vmem:[%s14316_s2 + $0x208] sm:$0xff] }
 0x5fa   : > { %6103 = vmatpush2.msra.mxu0 %v8825_v59  ;;  %v12540_v58 = vld [vmem:[#allocation3 + $0x31] sm:$0xff]  ;;  %v8822_v59 = vld [vmem:[%s14316_s2 + $0x200] sm:$0xff] }
 0x5fb   : > { %4820 = vrot.lane.b32.xlu0 %v12093_v16, %s9520_s10  ;;  %v4459_v54 = vmax.f32 %v4425_v42, 0.0  ;;  %6104 = vmatprep.subr.mxu0 %v14433_v52  ;;  %v8820_v62 = vld [vmem:[%s14316_s2 + $0x1f0] sm:$0xff] }
 0x5fc   : > { %6105 = vmatpush2.msra.mxu0 %v8824_v9 }
 0x5fd   : > { %v5916_v31 = vld [vmem:[#allocation4 + $0x280] sm:$0xff]  ;;  %4491 = vst.msk [vmem:[#allocation3 + $0x210] sm:$0xff] %vm243_vm10, %v4459_v54  ;;  %4818 = vrot.lane.b32.xlu1 %v12540_v58, %s9520_s10  ;;  %v12549_v24 = vld [vmem:[#allocation3 + $0x208] sm:$0xff]  ;;  %6106 = vmatprep.subr.mxu0 %v14433_v52 }
 0x5fe   : > { %v5919_v40 = vld [vmem:[#allocation4 + $0x298] sm:$0xff]  ;;  %9245 = vmatprep.mubr.msk.f32.mxu1 %vm243_vm10, %v5916_v31  ;;  %5194 = vst.msk [vmem:[#allocation4 + $0x2d8] sm:$0xff] %vm243_vm10, %v12549_v24  ;;  %6107 = vmatpush2.msra.mxu0 %v8823_v39  ;;  %v8819_v31 = vld [vmem:[%s14316_s2 + $0x1e8] sm:$0xff] }
 0x5ff   : > { %4824 = vrot.lane.b32.xlu0 %v12114_v37, %s9520_s10  ;;  %9246 = vmatmul.mubr.msk.f32.gmra.mxu1 %vm243_vm10, %v5919_v40  ;;  %v4649_v4 = vpop.permute.xlu0 %4648  ;;  %v8821_v40 = vld [vmem:[%s14316_s2 + $0x1f8] sm:$0xff] }
 0x600   : > { %4730 = vst.msk [vmem:[#allocation4 + $0x150] sm:$0xff] %vm2621_vm14, %v4649_v4  ;;  %6108 = vmatprep.subr.mxu0 %v14433_v52  ;;  %v8818_v4 = vld [vmem:[%s14316_s2 + $0x1e0] sm:$0xff] }
 0x601   : > { %4822 = vrot.lane.b32.xlu1 %v12085_v1, %s9520_s10  ;;  %6109 = vmatpush2.msra.mxu0 %v8822_v59  ;;  %v8817_v59 = vld [vmem:[%s14316_s2 + $0x1d8] sm:$0xff] }
 0x602   : > { %6110 = vmatprep.subr.mxu0 %v14433_v52 }
 0x603   : > { %4828 = vrot.lane.b32.xlu0 %v12140_v20, %s9520_s10  ;;  %6111 = vmatpush2.msra.mxu0 %v8821_v40 }
 0x604   : > { %v4651_v42 = vpop.permute.xlu1 %4650  ;;  %v5800_v9 = vld [vmem:[#allocation3 + $0x209] sm:$0xff]  ;;  %v5801_v54 = vld [vmem:[#allocation3 + $0x211] sm:$0xff]  ;;  %6112 = vmatprep.subr.mxu0 %v14433_v52 }
 0x605   : > { %4731 = vst.msk [vmem:[#allocation4 + $0x168] sm:$0xff] %vm2621_vm14, %v4651_v42  ;;  %4826 = vrot.lane.b32.xlu1 %v12105_v27, %s9520_s10  ;;  %v12582_v39 = vld [vmem:[#allocation3 + $0x210] sm:$0xff]  ;;  %6113 = vmatpush2.msra.mxu0 %v8820_v62 }
 0x606   : > { %5832 = vst.msk [vmem:[#allocation4 + $0x2b0] sm:$0xff] %vm243_vm10, %v5800_v9  ;;  %5833 = vst.msk [vmem:[#allocation4 + $0x2c8] sm:$0xff] %vm243_vm10, %v5801_v54  ;;  %6114 = vmatprep.subr.mxu0 %v14433_v52  ;;  %v8816_v9 = vld [vmem:[%s14316_s2 + $0x1d0] sm:$0xff]  ;;  %v8815_v54 = vld [vmem:[%s14316_s2 + $0x1c8] sm:$0xff] }
 0x607   : > { %4832 = vrot.lane.b32.xlu0 %v12168_v17, %s9520_s10  ;;  %5195 = vst.msk [vmem:[#allocation4 + $0x2f0] sm:$0xff] %vm243_vm10, %v12582_v39  ;;  %6115 = vmatpush2.msra.mxu0 %v8819_v31 }
 0x608   : > { %6116 = vmatprep.subr.mxu0 %v14433_v52 }
 0x609   : > { %4830 = vrot.lane.b32.xlu1 %v12146_v21, %s9520_s10  ;;  %6117 = vmatpush2.msra.mxu0 %v8818_v4  ;;  %v8813_v4 = vld [vmem:[%s14316_s2 + $0x1b8] sm:$0xff] }
 0x60a   : > { %6118 = vmatprep.subr.mxu0 %v14433_v52 }
 0x60b   : > { %4836 = vrot.lane.b32.xlu0 %v12194_v15, %s9520_s10  ;;  %v4653_v40 = vpop.permute.xlu0 %4652  ;;  %6119 = vmatpush2.msra.mxu0 %v8817_v59 }
 0x60c   : > { %4732 = vst.msk [vmem:[#allocation4 + $0x180] sm:$0xff] %vm2621_vm14, %v4653_v40  ;;  %6120 = vmatprep.subr.mxu0 %v14433_v52  ;;  %v8811_v40 = vld [vmem:[%s14316_s2 + $0x1a8] sm:$0xff] }
 0x60d   : > { %v5922_v62 = vld [vmem:[#allocation4 + $0x2b0] sm:$0xff]  ;;  %v5925_v42 = vld [vmem:[#allocation4 + $0x2c8] sm:$0xff]  ;;  %4834 = vrot.lane.b32.xlu1 %v12170_v60, %s9520_s10  ;;  %6121 = vmatpush2.msra.mxu0 %v8816_v9 }
 0x60e   : > { %9248 = vmatprep.mubr.msk.f32.mxu1 %vm243_vm10, %v5922_v62  ;;  %6122 = vmatprep.subr.mxu0 %v14433_v52 }
 0x60f   : > { %4840 = vrot.lane.b32.xlu0 %v12223_v29, %s9520_s10  ;;  %9249 = vmatmul.mubr.msk.f32.gmra.mxu1 %vm243_vm10, %v5925_v42  ;;  %v8814_v29 = vld [vmem:[%s14316_s2 + $0x1c0] sm:$0xff]  ;;  %v9439_v42 = vld [vmem:[#allocation3 + $0x50] sm:$0xff] }
 0x610   : > { %v4655_v31 = vpop.permute.xlu1 %4654  ;;  %6123 = vmatpush2.msra.mxu0 %v8815_v54 }
 0x611   : > { %4733 = vst.msk [vmem:[#allocation4 + $0x198] sm:$0xff] %vm2621_vm14, %v4655_v31  ;;  %4838 = vrot.lane.b32.xlu1 %v12196_v0, %s9520_s10  ;;  %6124 = vmatprep.subr.mxu0 %v14433_v52  ;;  %v8812_v0 = vld [vmem:[%s14316_s2 + $0x1b0] sm:$0xff] }
 0x612   : > { %6125 = vmatpush2.msra.mxu0 %v8814_v29 }
 0x613   : > { %5452 = vrot.lane.b32.xlu0 %v12103_v49, %s9520_s10  ;;  %6126 = vmatprep.subr.mxu0 %v14433_v52 }
 0x614   : > { %6127 = vmatpush2.msra.mxu0 %v8813_v4 }
 0x615   : > { %5260 = vrot.lane.b32.xlu1 %v12505_v11, %s9519_s6  ;;  %6128 = vmatprep.subr.mxu0 %v14433_v52  ;;  %v9438_v11 = vld [vmem:[#allocation3 + $0x48] sm:$0xff] }
 0x616   : > { %6129 = vmatpush2.msra.mxu0 %v8812_v0 }
 0x617   : > { %5004 = vrot.lane.b32.xlu0 %v12077_v41, %s9521_s11  ;;  %v4657_v59 = vpop.permute.xlu0 %4656  ;;  %6130 = vmatprep.subr.mxu0 %v14433_v52  ;;  %v8810_v41 = vld [vmem:[%s14316_s2 + $0x1a0] sm:$0xff] }
 0x618   : > { %4734 = vst.msk [vmem:[#allocation4 + $0x1b0] sm:$0xff] %vm2621_vm14, %v4657_v59  ;;  %6131 = vmatpush2.msra.mxu0 %v8811_v40 }
 0x619   : > { %5644 = vrot.lane.b32.xlu1 %v9438_v11, %s9521_s11  ;;  %6132 = vmatprep.subr.mxu0 %v14433_v52  ;;  %v5208_v11 = vld [vmem:[#allocation3 + $0xe9] sm:$0xff] }
 0x61a   : > { %6133 = vmatpush2.msra.mxu0 %v8810_v41 }
 0x61b   : > { %5454 = vrot.lane.b32.xlu0 %v12095_v10, %s9520_s10 }
 0x61c   : > { %v4659_v62 = vpop.permute.xlu1 %4658 }
 0x61d   : > { %4735 = vst.msk [vmem:[#allocation4 + $0x1c8] sm:$0xff] %vm2621_vm14, %v4659_v62  ;;  %5262 = vrot.lane.b32.xlu1 %v12540_v58, %s9519_s6  ;;  %v9440_v58 = vld [vmem:[#allocation3 + $0x68] sm:$0xff] }
 0x61f   : > { %5006 = vrot.lane.b32.xlu0 %v12075_v61, %s9521_s11 }
 0x621   : > { %5646 = vrot.lane.b32.xlu1 %v9439_v42, %s9521_s11  ;;  %v5209_v42 = vld [vmem:[#allocation3 + $0xf1] sm:$0xff] }
 0x623   : > { %5456 = vrot.lane.b32.xlu0 %v12124_v3, %s9520_s10  ;;  %v4661_v9 = vpop.permute.xlu0 %4660 }
 0x624   : > { %4736 = vst.msk [vmem:[#allocation4 + $0x1e0] sm:$0xff] %vm2621_vm14, %v4661_v9 }
 0x625   : > { %5264 = vrot.lane.b32.xlu1 %v12093_v16, %s9519_s6  ;;  %v9441_v16 = vld [vmem:[#allocation3 + $0x70] sm:$0xff] }
 0x627   : > { %5008 = vrot.lane.b32.xlu0 %v12103_v49, %s9521_s11 }
 0x628   : > { %v4663_v54 = vpop.permute.xlu1 %4662 }
 0x629   : > { %4737 = vst.msk [vmem:[#allocation4 + $0x1f8] sm:$0xff] %vm2621_vm14, %v4663_v54  ;;  %5648 = vrot.lane.b32.xlu1 %v9440_v58, %s9521_s11  ;;  %v5210_v58 = vld [vmem:[#allocation3 + $0x109] sm:$0xff] }
 0x62b   : > { %5458 = vrot.lane.b32.xlu0 %v12116_v8, %s9520_s10 }
 0x62d   : > { %5266 = vrot.lane.b32.xlu1 %v12085_v1, %s9519_s6  ;;  %v9442_v1 = vld [vmem:[#allocation3 + $0x88] sm:$0xff] }
 0x62f   : > { %5010 = vrot.lane.b32.xlu0 %v12095_v10, %s9521_s11  ;;  %v4665_v61 = vpop.permute.xlu0 %4664 }
 0x630   : > { %4738 = vst.msk [vmem:[#allocation4 + $0x210] sm:$0xff] %vm2621_vm14, %v4665_v61 }
 0x631   : > { %5650 = vrot.lane.b32.xlu1 %v9441_v16, %s9521_s11 }
 0x633   : > { %5460 = vrot.lane.b32.xlu0 %v12130_v6, %s9520_s10 }
 0x634   : > { %v4667_v49 = vpop.permute.xlu1 %4666 }
 0x635   : > { %4739 = vst.msk [vmem:[#allocation4 + $0x228] sm:$0xff] %vm2621_vm14, %v4667_v49  ;;  %5268 = vrot.lane.b32.xlu1 %v12114_v37, %s9519_s6  ;;  %v9443_v37 = vld [vmem:[#allocation3 + $0x90] sm:$0xff] }
 0x636   : > { %v5211_v49 = vld [vmem:[#allocation3 + $0x111] sm:$0xff] }
 0x637   : > { %5012 = vrot.lane.b32.xlu0 %v12124_v3, %s9521_s11 }
 0x639   : > { %5652 = vrot.lane.b32.xlu1 %v9442_v1, %s9521_s11 }
 0x63b   : > { %5462 = vrot.lane.b32.xlu0 %v12148_v38, %s9520_s10  ;;  %v4669_v10 = vpop.permute.xlu0 %4668 }
 0x63c   : > { %4740 = vst.msk [vmem:[#allocation4 + $0x240] sm:$0xff] %vm2621_vm14, %v4669_v10 }
 0x63d   : > { %5270 = vrot.lane.b32.xlu1 %v12105_v27, %s9519_s6  ;;  %v9444_v27 = vld [vmem:[#allocation3 + $0xa8] sm:$0xff] }
 0x63f   : > { %5014 = vrot.lane.b32.xlu0 %v12116_v8, %s9521_s11 }
 0x640   : > { %v4671_v31 = vpop.permute.xlu1 %4670 }
 0x641   : > { %4741 = vst.msk [vmem:[#allocation4 + $0x258] sm:$0xff] %vm2621_vm14, %v4671_v31  ;;  %5654 = vrot.lane.b32.xlu1 %v9443_v37, %s9521_s11 }
 0x643   : > { %5464 = vrot.lane.b32.xlu0 %v12158_v5, %s9520_s10 }
 0x645   : > { %5272 = vrot.lane.b32.xlu1 %v12140_v20, %s9519_s6  ;;  %v9445_v20 = vld [vmem:[#allocation3 + $0xb0] sm:$0xff] }
 0x647   : > { %5016 = vrot.lane.b32.xlu0 %v12130_v6, %s9521_s11  ;;  %v4673_v3 = vpop.permute.xlu0 %4672 }
 0x648   : > { %4742 = vst.msk [vmem:[#allocation4 + $0x270] sm:$0xff] %vm2621_vm14, %v4673_v3 }
 0x649   : > { %5656 = vrot.lane.b32.xlu1 %v9444_v27, %s9521_s11 }
 0x64b   : > { %5466 = vrot.lane.b32.xlu0 %v12177_v55, %s9520_s10 }
 0x64d   : > { %v4675_v8 = vpop.permute.xlu1 %4674  ;;  %5274 = vrot.lane.b32.xlu1 %v12146_v21, %s9519_s6  ;;  %v9446_v21 = vld [vmem:[#allocation3 + $0xc8] sm:$0xff] }
 0x64e   : > { %4743 = vst.msk [vmem:[#allocation4 + $0x288] sm:$0xff] %vm2621_vm14, %v4675_v8 }
 0x64f   : > { %5018 = vrot.lane.b32.xlu0 %v12148_v38, %s9521_s11 }
 0x651   : > { %5658 = vrot.lane.b32.xlu1 %v9445_v20, %s9521_s11 }
 0x653   : > { %5468 = vrot.lane.b32.xlu0 %v12184_v36, %s9520_s10  ;;  %v4677_v6 = vpop.permute.xlu0 %4676 }
 0x654   : > { %4744 = vst.msk [vmem:[#allocation4 + $0x2a0] sm:$0xff] %vm2621_vm14, %v4677_v6 }
 0x655   : > { %5276 = vrot.lane.b32.xlu1 %v12168_v17, %s9519_s6  ;;  %v9447_v17 = vld [vmem:[#allocation3 + $0xd0] sm:$0xff] }
 0x657   : > { %5020 = vrot.lane.b32.xlu0 %v12158_v5, %s9521_s11 }
 0x659   : > { %5660 = vrot.lane.b32.xlu1 %v9446_v21, %s9521_s11 }
 0x65a   : > { %v4679_v29 = vpop.permute.xlu1 %4678 }
 0x65b   : > { %4745 = vst.msk [vmem:[#allocation4 + $0x2b8] sm:$0xff] %vm2621_vm14, %v4679_v29  ;;  %5470 = vrot.lane.b32.xlu0 %v12203_v50, %s9520_s10 }
 0x65d   : > { %5278 = vrot.lane.b32.xlu1 %v12170_v60, %s9519_s6 }
 0x65f   : > { %5022 = vrot.lane.b32.xlu0 %v12177_v55, %s9521_s11  ;;  %v4681_v38 = vpop.permute.xlu0 %4680 }
 0x660   : > { %4746 = vst.msk [vmem:[#allocation4 + $0x2d0] sm:$0xff] %vm2621_vm14, %v4681_v38  ;;  %v5213_v38 = vld [vmem:[#allocation3 + $0x131] sm:$0xff] }
 0x661   : > { %5662 = vrot.lane.b32.xlu1 %v9447_v17, %s9521_s11 }
 0x663   : > { %5472 = vrot.lane.b32.xlu0 %v12210_v28, %s9520_s10 }
 0x665   : > { %v4813_v5 = vpop.permute.xlu0 %4812  ;;  %5280 = vrot.lane.b32.xlu1 %v12194_v15, %s9519_s6  ;;  %v5207_v15 = vld [vmem:[#allocation3 + $0xd1] sm:$0xff] }
 0x666   : > { %4908 = vst.msk [vmem:[#allocation4] sm:$0xff] %vm2814_vm15, %v4813_v5 }
 0x667   : > { %5024 = vrot.lane.b32.xlu0 %v12184_v36, %s9521_s11  ;;  %v4683_v60 = vpop.permute.xlu1 %4682 }
 0x668   : > { %4747 = vst.msk [vmem:[#allocation4 + $0x2e8] sm:$0xff] %vm2621_vm14, %v4683_v60  ;;  %v5214_v60 = vld [vmem:[#allocation3 + $0x149] sm:$0xff] }
 0x669   : > { %v4817_v55 = vpop.permute.xlu0 %4816  ;;  %5664 = vrot.lane.b32.xlu1 %v12212_v51, %s9521_s11 }
 0x66a   : > { %4910 = vst.msk [vmem:[#allocation4 + $0x30] sm:$0xff] %vm2814_vm15, %v4817_v55 }
 0x66b   : > { %5474 = vrot.lane.b32.xlu0 %v12229_v26, %s9520_s10  ;;  %v4815_v4 = vpop.permute.xlu1 %4814 }
 0x66c   : > { %4909 = vst.msk [vmem:[#allocation4 + $0x18] sm:$0xff] %vm2814_vm15, %v4815_v4 }
 0x66d   : > { %v4821_v0 = vpop.permute.xlu0 %4820  ;;  %5282 = vrot.lane.b32.xlu1 %v5207_v15, %s9519_s6 }
 0x66e   : > { %4912 = vst.msk [vmem:[#allocation4 + $0x60] sm:$0xff] %vm2814_vm15, %v4821_v0 }
 0x66f   : > { %5026 = vrot.lane.b32.xlu0 %v12203_v50, %s9521_s11  ;;  %v4819_v36 = vpop.permute.xlu1 %4818 }
 0x670   : > { %4911 = vst.msk [vmem:[#allocation4 + $0x48] sm:$0xff] %vm2814_vm15, %v4819_v36 }
 0x671   : > { %v4825_v59 = vpop.permute.xlu0 %4824  ;;  %5666 = vrot.lane.b32.xlu1 %v12231_v44, %s9521_s11 }
 0x672   : > { %4914 = vst.msk [vmem:[#allocation4 + $0x90] sm:$0xff] %vm2814_vm15, %v4825_v59 }
 0x673   : > { %5476 = vrot.lane.b32.xlu0 %v12239_v19, %s9520_s10  ;;  %v4823_v51 = vpop.permute.xlu1 %4822 }
 0x674   : > { %4913 = vst.msk [vmem:[#allocation4 + $0x78] sm:$0xff] %vm2814_vm15, %v4823_v51 }
 0x675   : > { %v4829_v40 = vpop.permute.xlu0 %4828  ;;  %5284 = vrot.lane.b32.xlu1 %v5208_v11, %s9519_s6 }
 0x676   : > { %4916 = vst.msk [vmem:[#allocation4 + $0xc0] sm:$0xff] %vm2814_vm15, %v4829_v40 }
 0x677   : > { %5028 = vrot.lane.b32.xlu0 %v12210_v28, %s9521_s11  ;;  %v4827_v50 = vpop.permute.xlu1 %4826 }
 0x678   : > { %4915 = vst.msk [vmem:[#allocation4 + $0xa8] sm:$0xff] %vm2814_vm15, %v4827_v50 }
 0x679   : > { %v4833_v41 = vpop.permute.xlu0 %4832  ;;  %5668 = vrot.lane.b32.xlu1 %v12241_v53, %s9521_s11 }
 0x67a   : > { %4918 = vst.msk [vmem:[#allocation4 + $0xf0] sm:$0xff] %vm2814_vm15, %v4833_v41 }
 0x67b   : > { %5478 = vrot.lane.b32.xlu0 %v12255_v18, %s9520_s10  ;;  %v4831_v44 = vpop.permute.xlu1 %4830 }
 0x67c   : > { %4917 = vst.msk [vmem:[#allocation4 + $0xd8] sm:$0xff] %vm2814_vm15, %v4831_v44  ;;  %v5216_v44 = vld [vmem:[#allocation3 + $0x169] sm:$0xff] }
 0x67d   : > { %v4837_v62 = vpop.permute.xlu0 %4836  ;;  %5286 = vrot.lane.b32.xlu1 %v5209_v42, %s9519_s6 }
 0x67e   : > { %4920 = vst.msk [vmem:[#allocation4 + $0x120] sm:$0xff] %vm2814_vm15, %v4837_v62 }
 0x67f   : > { %5030 = vrot.lane.b32.xlu0 %v12229_v26, %s9521_s11  ;;  %v4835_v28 = vpop.permute.xlu1 %4834 }
 0x680   : > { %4919 = vst.msk [vmem:[#allocation4 + $0x108] sm:$0xff] %vm2814_vm15, %v4835_v28 }
 0x681   : > { %v4841_v9 = vpop.permute.xlu0 %4840  ;;  %5670 = vrot.lane.b32.xlu1 %v12257_v45, %s9521_s11 }
 0x682   : > { %4922 = vst.msk [vmem:[#allocation4 + $0x150] sm:$0xff] %vm2814_vm15, %v4841_v9 }
 0x683   : > { %5480 = vrot.lane.b32.xlu0 %v12265_v33, %s9520_s10  ;;  %v4839_v53 = vpop.permute.xlu1 %4838 }
 0x684   : > { %4921 = vst.msk [vmem:[#allocation4 + $0x138] sm:$0xff] %vm2814_vm15, %v4839_v53 }
 0x685   : > { %v5453_v54 = vpop.permute.xlu0 %5452  ;;  %5288 = vrot.lane.b32.xlu1 %v5210_v58, %s9519_s6 }
 0x687   : > { %5032 = vrot.lane.b32.xlu0 %v12239_v19, %s9521_s11  ;;  %v5261_v26 = vpop.permute.xlu1 %5260 }
 0x688   : > { %5356 = vst.msk [vmem:[#allocation4 + $0x8] sm:$0xff] %vm2621_vm14, %v5261_v26 }
 0x689   : > { %v5005_v61 = vpop.permute.xlu0 %5004  ;;  %5548 = vst.msk [vmem:[#allocation4 + $0x8] sm:$0xff] %vm2814_vm15, %v5453_v54  ;;  %5672 = vrot.lane.b32.xlu1 %v12267_v14, %s9521_s11  ;;  %v5212_v14 = vld [vmem:[#allocation3 + $0x129] sm:$0xff] }
 0x68a   : > { %5100 = vst.msk [vmem:[#allocation4] sm:$0xff] %vm3007_vm0, %v5005_v61 }
 0x68b   : > { %5482 = vrot.lane.b32.xlu0 %v12281_v22, %s9520_s10  ;;  %v5645_v45 = vpop.permute.xlu1 %5644 }
 0x68c   : > { %5740 = vst.msk [vmem:[#allocation4 + $0x8] sm:$0xff] %vm3007_vm0, %v5645_v45 }
 0x68d   : > { %v5455_v16 = vpop.permute.xlu0 %5454  ;;  %5290 = vrot.lane.b32.xlu1 %v5211_v49, %s9519_s6 }
 0x68f   : > { %5674 = vrot.lane.b32.xlu0 %v12283_v56, %s9521_s11  ;;  %v5263_v19 = vpop.permute.xlu1 %5262 }
 0x690   : > { %5357 = vst.msk [vmem:[#allocation4 + $0x20] sm:$0xff] %vm2621_vm14, %v5263_v19 }
 0x691   : > { %v5007_v1 = vpop.permute.xlu0 %5006  ;;  %5549 = vst.msk [vmem:[#allocation4 + $0x20] sm:$0xff] %vm2814_vm15, %v5455_v16  ;;  %4842 = vrot.lane.b32.xlu1 %v5209_v42, %s9520_s10  ;;  %v5836_v56 = vld [vmem:[#allocation4] sm:$0xff]  ;;  %v5217_v16 = vld [vmem:[#allocation3 + $0x171] sm:$0xff] }
 0x692   : > { %5101 = vst.msk [vmem:[#allocation4 + $0x18] sm:$0xff] %vm3007_vm0, %v5007_v1  ;;  %v5218_v1 = vld [vmem:[#allocation3 + $0x189] sm:$0xff] }
 0x693   : > { %5292 = vrot.lane.b32.xlu0 %v5212_v14, %s9519_s6  ;;  %v5647_v10 = vpop.permute.xlu1 %5646  ;;  %v5837_v31 = vld [vmem:[#allocation4 + $0x8] sm:$0xff] }
 0x694   : > { %5741 = vst.msk [vmem:[#allocation4 + $0x20] sm:$0xff] %vm3007_vm0, %v5647_v10  ;;  %6134 = vmatprep.mubr.f32.mxu0 %v5837_v31 }
 0x695   : > { %v5457_v37 = vpop.permute.xlu0 %5456  ;;  %5034 = vrot.lane.b32.xlu1 %v12255_v18, %s9521_s11  ;;  %6135 = vmatmul.mubr.f32.vlgmr.msra.gmra.mxu0 %v5836_v56 }
 0x697   : > { %4844 = vrot.lane.b32.xlu0 %v5210_v58, %s9520_s10  ;;  %v5265_v3 = vpop.permute.xlu1 %5264 }
 0x698   : > { %5358 = vst.msk [vmem:[#allocation4 + $0x38] sm:$0xff] %vm2621_vm14, %v5265_v3 }
 0x699   : > { %v5009_v27 = vpop.permute.xlu0 %5008  ;;  %5550 = vst.msk [vmem:[#allocation4 + $0x38] sm:$0xff] %vm2814_vm15, %v5457_v37  ;;  %5484 = vrot.lane.b32.xlu1 %v12291_v57, %s9520_s10  ;;  %v5839_v6 = vld [vmem:[#allocation4 + $0x18] sm:$0xff] }
 0x69a   : > { %5102 = vst.msk [vmem:[#allocation4 + $0x30] sm:$0xff] %vm3007_vm0, %v5009_v27  ;;  %v14466_v27 = vld [vmem:[#allocation20_spill] sm:$0xff] }
 0x69b   : > { %5036 = vrot.lane.b32.xlu0 %v12265_v33, %s9521_s11  ;;  %v5649_v8 = vpop.permute.xlu1 %5648  ;;  %v5840_v20 = vld [vmem:[#allocation4 + $0x20] sm:$0xff] }
 0x69c   : > { %5742 = vst.msk [vmem:[#allocation4 + $0x38] sm:$0xff] %vm3007_vm0, %v5649_v8  ;;  %6139 = vmatprep.mubr.f32.mxu0 %v5840_v20 }
 0x69d   : > { %v5459_v18 = vpop.permute.xlu0 %5458  ;;  %5676 = vrot.lane.b32.xlu1 %v12293_v13, %s9521_s11  ;;  %6140 = vmatmul.mubr.f32.gmra.mxu0 %v5839_v6 }
 0x69f   : > { %5486 = vrot.lane.b32.xlu0 %v12307_v43, %s9520_s10  ;;  %v5267_v29 = vpop.permute.xlu1 %5266 }
 0x6a0   : > { %5359 = vst.msk [vmem:[#allocation4 + $0x50] sm:$0xff] %vm2621_vm14, %v5267_v29  ;;  %v14467_v29 = vld [vmem:[#allocation21_spill] sm:$0xff] }
 0x6a1   : > { %v5011_v21 = vpop.permute.xlu0 %5010  ;;  %5551 = vst.msk [vmem:[#allocation4 + $0x50] sm:$0xff] %vm2814_vm15, %v5459_v18  ;;  %5294 = vrot.lane.b32.xlu1 %v5213_v38, %s9519_s6  ;;  %v5842_v5 = vld [vmem:[#allocation4 + $0x30] sm:$0xff] }
 0x6a2   : > { %5103 = vst.msk [vmem:[#allocation4 + $0x48] sm:$0xff] %vm3007_vm0, %v5011_v21 }
 0x6a3   : > { %5678 = vrot.lane.b32.xlu0 %v12309_v30, %s9521_s11  ;;  %v5651_v33 = vpop.permute.xlu1 %5650  ;;  %v5843_v13 = vld [vmem:[#allocation4 + $0x38] sm:$0xff] }
 0x6a4   : > { %5743 = vst.msk [vmem:[#allocation4 + $0x50] sm:$0xff] %vm3007_vm0, %v5651_v33  ;;  %6144 = vmatprep.mubr.f32.mxu0 %v5843_v13 }
 0x6a5   : > { %v5461_v17 = vpop.permute.xlu0 %5460  ;;  %4846 = vrot.lane.b32.xlu1 %v5211_v49, %s9520_s10  ;;  %6145 = vmatmul.mubr.f32.gmra.mxu0 %v5842_v5 }
 0x6a7   : > { %5296 = vrot.lane.b32.xlu0 %v5214_v60, %s9519_s6  ;;  %v5269_v55 = vpop.permute.xlu1 %5268 }
 0x6a8   : > { %5360 = vst.msk [vmem:[#allocation4 + $0x68] sm:$0xff] %vm2621_vm14, %v5269_v55 }
 0x6a9   : > { %v5013_v4 = vpop.permute.xlu0 %5012  ;;  %5552 = vst.msk [vmem:[#allocation4 + $0x68] sm:$0xff] %vm2814_vm15, %v5461_v17  ;;  %5038 = vrot.lane.b32.xlu1 %v12281_v22, %s9521_s11  ;;  %v5845_v36 = vld [vmem:[#allocation4 + $0x48] sm:$0xff] }
 0x6aa   : > { %5104 = vst.msk [vmem:[#allocation4 + $0x60] sm:$0xff] %vm3007_vm0, %v5013_v4 }
 0x6ab   : > { %4848 = vrot.lane.b32.xlu0 %v5212_v14, %s9520_s10  ;;  %v5653_v30 = vpop.permute.xlu1 %5652  ;;  %v5846_v0 = vld [vmem:[#allocation4 + $0x50] sm:$0xff] }
 0x6ac   : > { %5744 = vst.msk [vmem:[#allocation4 + $0x68] sm:$0xff] %vm3007_vm0, %v5653_v30  ;;  %6149 = vmatprep.mubr.f32.mxu0 %v5846_v0 }
 0x6ad   : > { %v5463_v15 = vpop.permute.xlu0 %5462  ;;  %5488 = vrot.lane.b32.xlu1 %v12317_v47, %s9520_s10  ;;  %6150 = vmatmul.mubr.f32.gmra.mxu0 %v5845_v36  ;;  %v14469_v36 = vld [vmem:[#allocation23_spill] sm:$0xff] }
 0x6af   : > { %5040 = vrot.lane.b32.xlu0 %v12291_v57, %s9521_s11  ;;  %v5271_v59 = vpop.permute.xlu1 %5270  ;;  %v5215_v57 = vld [vmem:[#allocation3 + $0x151] sm:$0xff] }
 0x6b0   : > { %5361 = vst.msk [vmem:[#allocation4 + $0x80] sm:$0xff] %vm2621_vm14, %v5271_v59 }
 0x6b1   : > { %v5015_v22 = vpop.permute.xlu0 %5014  ;;  %5553 = vst.msk [vmem:[#allocation4 + $0x80] sm:$0xff] %vm2814_vm15, %v5463_v15  ;;  %5680 = vrot.lane.b32.xlu1 %v12319_v35, %s9521_s11  ;;  %v5848_v50 = vld [vmem:[#allocation4 + $0x60] sm:$0xff]  ;;  %v14468_v15 = vld [vmem:[#allocation22_spill] sm:$0xff] }
 0x6b2   : > { %5105 = vst.msk [vmem:[#allocation4 + $0x78] sm:$0xff] %vm3007_vm0, %v5015_v22  ;;  %v5221_v22 = vld [vmem:[#allocation3 + $0x1b1] sm:$0xff] }
 0x6b3   : > { %5490 = vrot.lane.b32.xlu0 %v12333_v7, %s9520_s10  ;;  %v5655_v51 = vpop.permute.xlu1 %5654  ;;  %v5849_v40 = vld [vmem:[#allocation4 + $0x68] sm:$0xff] }
 0x6b4   : > { %5745 = vst.msk [vmem:[#allocation4 + $0x80] sm:$0xff] %vm3007_vm0, %v5655_v51  ;;  %6154 = vmatprep.mubr.f32.mxu0 %v5849_v40 }
 0x6b5   : > { %v5465_v11 = vpop.permute.xlu0 %5464  ;;  %5298 = vrot.lane.b32.xlu1 %v5215_v57, %s9519_s6  ;;  %6155 = vmatmul.mubr.f32.gmra.mxu0 %v5848_v50  ;;  %v5222_v50 = vld [vmem:[#allocation3 + $0x1c9] sm:$0xff] }
 0x6b7   : > { %5682 = vrot.lane.b32.xlu0 %v12335_v48, %s9521_s11  ;;  %v5273_v41 = vpop.permute.xlu1 %5272 }
 0x6b8   : > { %5362 = vst.msk [vmem:[#allocation4 + $0x98] sm:$0xff] %vm2621_vm14, %v5273_v41 }
 0x6b9   : > { %v5017_v35 = vpop.permute.xlu0 %5016  ;;  %5554 = vst.msk [vmem:[#allocation4 + $0x98] sm:$0xff] %vm2814_vm15, %v5465_v11  ;;  %4850 = vrot.lane.b32.xlu1 %v5213_v38, %s9520_s10  ;;  %v5851_v48 = vld [vmem:[#allocation4 + $0x78] sm:$0xff] }
 0x6ba   : > { %5106 = vst.msk [vmem:[#allocation4 + $0x90] sm:$0xff] %vm3007_vm0, %v5017_v35 }
 0x6bb   : > { %5300 = vrot.lane.b32.xlu0 %v5216_v44, %s9519_s6  ;;  %v5657_v62 = vpop.permute.xlu1 %5656  ;;  %v5852_v42 = vld [vmem:[#allocation4 + $0x80] sm:$0xff] }
 0x6bc   : > { %5746 = vst.msk [vmem:[#allocation4 + $0x98] sm:$0xff] %vm3007_vm0, %v5657_v62  ;;  %6159 = vmatprep.mubr.f32.mxu0 %v5852_v42 }
 0x6bd   : > { %v5467_v28 = vpop.permute.xlu0 %5466  ;;  %5042 = vrot.lane.b32.xlu1 %v12307_v43, %s9521_s11  ;;  %6160 = vmatmul.mubr.f32.gmra.mxu0 %v5851_v48 }
 0x6bf   : > { %4852 = vrot.lane.b32.xlu0 %v5214_v60, %s9520_s10  ;;  %v5275_v9 = vpop.permute.xlu1 %5274 }
 0x6c0   : > { %5363 = vst.msk [vmem:[#allocation4 + $0xb0] sm:$0xff] %vm2621_vm14, %v5275_v9  ;;  %v14471_v9 = vld [vmem:[#allocation25_spill] sm:$0xff] }
 0x6c1   : > { %v5019_v53 = vpop.permute.xlu0 %5018  ;;  %5555 = vst.msk [vmem:[#allocation4 + $0xb0] sm:$0xff] %vm2814_vm15, %v5467_v28  ;;  %5492 = vrot.lane.b32.xlu1 %v12343_v32, %s9520_s10  ;;  %v5854_v26 = vld [vmem:[#allocation4 + $0x90] sm:$0xff] }
 0x6c2   : > { %5107 = vst.msk [vmem:[#allocation4 + $0xa8] sm:$0xff] %vm3007_vm0, %v5019_v53  ;;  %v4966_v53 = vld [vmem:[#allocation3 + $0x1c7] sm:$0xff] }
 0x6c3   : > { %5044 = vrot.lane.b32.xlu0 %v12317_v47, %s9521_s11  ;;  %v5659_v54 = vpop.permute.xlu1 %5658  ;;  %v5855_v58 = vld [vmem:[#allocation4 + $0x98] sm:$0xff] }
 0x6c4   : > { %5747 = vst.msk [vmem:[#allocation4 + $0xb0] sm:$0xff] %vm3007_vm0, %v5659_v54  ;;  %6164 = vmatprep.mubr.f32.mxu0 %v5855_v58 }
 0x6c5   : > { %v5469_v43 = vpop.permute.xlu0 %5468  ;;  %5684 = vrot.lane.b32.xlu1 %v12345_v34, %s9521_s11  ;;  %6165 = vmatmul.mubr.f32.gmra.mxu0 %v5854_v26 }
 0x6c7   : > { %5494 = vrot.lane.b32.xlu0 %v12359_v2, %s9520_s10  ;;  %v5277_v61 = vpop.permute.xlu1 %5276 }
 0x6c8   : > { %5364 = vst.msk [vmem:[#allocation4 + $0xc8] sm:$0xff] %vm2621_vm14, %v5277_v61 }
 0x6c9   : > { %v5021_v45 = vpop.permute.xlu0 %5020  ;;  %5556 = vst.msk [vmem:[#allocation4 + $0xc8] sm:$0xff] %vm2814_vm15, %v5469_v43  ;;  %5302 = vrot.lane.b32.xlu1 %v5217_v16, %s9519_s6  ;;  %v5857_v19 = vld [vmem:[#allocation4 + $0xa8] sm:$0xff]  ;;  %v14472_v43 = vld [vmem:[#allocation26_spill] sm:$0xff] }
 0x6ca   : > { %5108 = vst.msk [vmem:[#allocation4 + $0xc0] sm:$0xff] %vm3007_vm0, %v5021_v45 }
 0x6cb   : > { %5686 = vrot.lane.b32.xlu0 %v12361_v23, %s9521_s11  ;;  %v5661_v47 = vpop.permute.xlu1 %5660  ;;  %v5858_v34 = vld [vmem:[#allocation4 + $0xb0] sm:$0xff] }
 0x6cc   : > { %5748 = vst.msk [vmem:[#allocation4 + $0xc8] sm:$0xff] %vm3007_vm0, %v5661_v47  ;;  %6169 = vmatprep.mubr.f32.mxu0 %v5858_v34  ;;  %v14473_v34 = vld [vmem:[#allocation27_spill] sm:$0xff] }
 0x6cd   : > { %v5471_v49 = vpop.permute.xlu0 %5470  ;;  %4854 = vrot.lane.b32.xlu1 %v5215_v57, %s9520_s10  ;;  %6170 = vmatmul.mubr.f32.gmra.mxu0 %v5857_v19  ;;  %v5224_v19 = vld [vmem:[#allocation3 + $0x1e9] sm:$0xff] }
 0x6cf   : > { %5304 = vrot.lane.b32.xlu0 %v5218_v1, %s9519_s6  ;;  %v5279_v14 = vpop.permute.xlu1 %5278 }
 0x6d0   : > { %5365 = vst.msk [vmem:[#allocation4 + $0xe0] sm:$0xff] %vm2621_vm14, %v5279_v14 }
 0x6d1   : > { %v5023_v10 = vpop.permute.xlu0 %5022  ;;  %5557 = vst.msk [vmem:[#allocation4 + $0xe0] sm:$0xff] %vm2814_vm15, %v5471_v49  ;;  %5046 = vrot.lane.b32.xlu1 %v12333_v7, %s9521_s11  ;;  %v5860_v56 = vld [vmem:[#allocation4 + $0xc0] sm:$0xff] }
 0x6d2   : > { %5109 = vst.msk [vmem:[#allocation4 + $0xd8] sm:$0xff] %vm3007_vm0, %v5023_v10 }
 0x6d3   : > { %4856 = vrot.lane.b32.xlu0 %v5216_v44, %s9520_s10  ;;  %v5663_v23 = vpop.permute.xlu1 %5662  ;;  %v5861_v31 = vld [vmem:[#allocation4 + $0xc8] sm:$0xff] }
 0x6d4   : > { %5749 = vst.msk [vmem:[#allocation4 + $0xe0] sm:$0xff] %vm3007_vm0, %v5663_v23  ;;  %6174 = vmatprep.mubr.f32.mxu0 %v5861_v31  ;;  %v4965_v44 = vld [vmem:[#allocation3 + $0x1af] sm:$0xff] }
 0x6d5   : > { %v5473_v37 = vpop.permute.xlu0 %5472  ;;  %5496 = vrot.lane.b32.xlu1 %v12372_v25, %s9520_s10  ;;  %6175 = vmatmul.mubr.f32.gmra.mxu0 %v5860_v56  ;;  %v4967_v23 = vld [vmem:[#allocation3 + $0x1cf] sm:$0xff] }
 0x6d7   : > { %5048 = vrot.lane.b32.xlu0 %v12343_v32, %s9521_s11  ;;  %v5281_v3 = vpop.permute.xlu1 %5280  ;;  %v5219_v32 = vld [vmem:[#allocation3 + $0x191] sm:$0xff] }
 0x6d8   : > { %5366 = vst.msk [vmem:[#allocation4 + $0xf8] sm:$0xff] %vm2621_vm14, %v5281_v3  ;;  %v5416_v3 = vld [vmem:[#allocation3 + $0x207] sm:$0xff] }
 0x6d9   : > { %v5025_v7 = vpop.permute.xlu0 %5024  ;;  %5558 = vst.msk [vmem:[#allocation4 + $0xf8] sm:$0xff] %vm2814_vm15, %v5473_v37  ;;  %5688 = vrot.lane.b32.xlu1 %v14466_v27, %s9521_s11  ;;  %v5863_v6 = vld [vmem:[#allocation4 + $0xd8] sm:$0xff] }
 0x6da   : > { %5110 = vst.msk [vmem:[#allocation4 + $0xf0] sm:$0xff] %vm3007_vm0, %v5025_v7  ;;  %v4968_v7 = vld [vmem:[#allocation3 + $0x1e7] sm:$0xff] }
 0x6db   : > { %5498 = vrot.lane.b32.xlu0 %v12398_v12, %s9520_s10  ;;  %v5665_v8 = vpop.permute.xlu1 %5664  ;;  %v5864_v20 = vld [vmem:[#allocation4 + $0xe0] sm:$0xff]  ;;  %v5220_v12 = vld [vmem:[#allocation3 + $0x1a9] sm:$0xff] }
 0x6dc   : > { %5750 = vst.msk [vmem:[#allocation4 + $0xf8] sm:$0xff] %vm3007_vm0, %v5665_v8  ;;  %6179 = vmatprep.mubr.f32.mxu0 %v5864_v20  ;;  %v12953_v20 = vld [vmem:[#allocation3 + $0x20f] sm:$0xff] }
 0x6dd   : > { %v5475_v18 = vpop.permute.xlu0 %5474  ;;  %5306 = vrot.lane.b32.xlu1 %v5219_v32, %s9519_s6  ;;  %6180 = vmatmul.mubr.f32.gmra.mxu0 %v5863_v6 }
 0x6df   : > { %5690 = vrot.lane.b32.xlu0 %v14467_v29, %s9521_s11  ;;  %v5283_v21 = vpop.permute.xlu1 %5282  ;;  %v12959_v29 = vld [vmem:[#allocation3 + $0x1f1] sm:$0xff] }
 0x6e0   : > { %5367 = vst.msk [vmem:[#allocation4 + $0x110] sm:$0xff] %vm2621_vm14, %v5283_v21 }
 0x6e1   : > { %v5027_v38 = vpop.permute.xlu0 %5026  ;;  %5559 = vst.msk [vmem:[#allocation4 + $0x110] sm:$0xff] %vm2814_vm15, %v5475_v18  ;;  %4858 = vrot.lane.b32.xlu1 %v5217_v16, %s9520_s10  ;;  %v5866_v5 = vld [vmem:[#allocation4 + $0xf0] sm:$0xff] }
 0x6e2   : > { %5111 = vst.msk [vmem:[#allocation4 + $0x108] sm:$0xff] %vm3007_vm0, %v5027_v38  ;;  %v5223_v16 = vld [vmem:[#allocation3 + $0x1d1] sm:$0xff] }
 0x6e3   : > { %5308 = vrot.lane.b32.xlu0 %v5220_v12, %s9519_s6  ;;  %v5667_v33 = vpop.permute.xlu1 %5666  ;;  %v5867_v13 = vld [vmem:[#allocation4 + $0xf8] sm:$0xff] }
 0x6e4   : > { %5751 = vst.msk [vmem:[#allocation4 + $0x110] sm:$0xff] %vm3007_vm0, %v5667_v33  ;;  %6184 = vmatprep.mubr.f32.mxu0 %v5867_v13 }
 0x6e5   : > { %v5477_v17 = vpop.permute.xlu0 %5476  ;;  %5050 = vrot.lane.b32.xlu1 %v12359_v2, %s9521_s11  ;;  %6185 = vmatmul.mubr.f32.gmra.mxu0 %v5866_v5  ;;  %v4969_v5 = vld [vmem:[#allocation3 + $0x1ef] sm:$0xff] }
 0x6e7   : > { %4860 = vrot.lane.b32.xlu0 %v5218_v1, %s9520_s10  ;;  %v5285_v60 = vpop.permute.xlu1 %5284 }
 0x6e8   : > { %5368 = vst.msk [vmem:[#allocation4 + $0x128] sm:$0xff] %vm2621_vm14, %v5285_v60 }
 0x6e9   : > { %v5029_v55 = vpop.permute.xlu0 %5028  ;;  %5560 = vst.msk [vmem:[#allocation4 + $0x128] sm:$0xff] %vm2814_vm15, %v5477_v17  ;;  %5500 = vrot.lane.b32.xlu1 %v12421_v63, %s9520_s10  ;;  %v5869_v0 = vld [vmem:[#allocation4 + $0x108] sm:$0xff] }
 0x6ea   : > { %5112 = vst.msk [vmem:[#allocation4 + $0x120] sm:$0xff] %vm3007_vm0, %v5029_v55 }
 0x6eb   : > { %5052 = vrot.lane.b32.xlu0 %v12372_v25, %s9521_s11  ;;  %v5669_v4 = vpop.permute.xlu1 %5668  ;;  %v5870_v30 = vld [vmem:[#allocation4 + $0x110] sm:$0xff]  ;;  %v14470_v25 = vld [vmem:[#allocation24_spill] sm:$0xff] }
 0x6ec   : > { %5752 = vst.msk [vmem:[#allocation4 + $0x128] sm:$0xff] %vm3007_vm0, %v5669_v4  ;;  %6189 = vmatprep.mubr.f32.mxu0 %v5870_v30  ;;  %v5928_v30 = vld [vmem:[#allocation4 + $0x2e0] sm:$0xff] }
 0x6ed   : > { %v5479_v2 = vpop.permute.xlu0 %5478  ;;  %5692 = vrot.lane.b32.xlu1 %v14468_v15, %s9521_s11  ;;  %6190 = vmatmul.mubr.f32.gmra.mxu0 %v5869_v0  ;;  %v5610_v0 = vld [vmem:[#allocation3 + $0x228] sm:$0xff] }
 0x6ee   : > { %9251 = vmatprep.mubr.msk.f32.mxu1 %vm243_vm10, %v5928_v30 }
 0x6ef   : > { %5502 = vrot.lane.b32.xlu0 %v14469_v36, %s9520_s10  ;;  %v5287_v59 = vpop.permute.xlu1 %5286  ;;  %v5419_v36 = vld [vmem:[#allocation3 + $0x22f] sm:$0xff] }
 0x6f0   : > { %5369 = vst.msk [vmem:[#allocation4 + $0x140] sm:$0xff] %vm2621_vm14, %v5287_v59 }
 0x6f1   : > { %v5031_v63 = vpop.permute.xlu0 %5030  ;;  %5561 = vst.msk [vmem:[#allocation4 + $0x140] sm:$0xff] %vm2814_vm15, %v5479_v2  ;;  %5310 = vrot.lane.b32.xlu1 %v5221_v22, %s9519_s6  ;;  %v5872_v57 = vld [vmem:[#allocation4 + $0x120] sm:$0xff]  ;;  %v7894_v2 = vld [vmem:[#allocation3 + $0x229] sm:$0xff] }
 0x6f2   : > { %5113 = vst.msk [vmem:[#allocation4 + $0x138] sm:$0xff] %vm3007_vm0, %v5031_v63  ;;  %v5227_v63 = vld [vmem:[#allocation3 + $0x211] sm:$0xff] }
 0x6f3   : > { %5694 = vrot.lane.b32.xlu0 %v14470_v25, %s9521_s11  ;;  %v5671_v51 = vpop.permute.xlu1 %5670  ;;  %v5873_v40 = vld [vmem:[#allocation4 + $0x128] sm:$0xff]  ;;  %7926 = vst.msk [vmem:[#allocation4 + $0x2e0] sm:$0xff] %vm243_vm10, %v7894_v2  ;;  %v8865_v2 = vld [vmem:[%s14316_s2 + $0x250] sm:$0xff] }
 0x6f4   : > { %5753 = vst.msk [vmem:[#allocation4 + $0x140] sm:$0xff] %vm3007_vm0, %v5671_v51  ;;  %6194 = vmatprep.mubr.f32.mxu0 %v5873_v40  ;;  %v5611_v40 = vld [vmem:[#allocation3 + $0x230] sm:$0xff] }
 0x6f5   : > { %v5481_v11 = vpop.permute.xlu0 %5480  ;;  %4862 = vrot.lane.b32.xlu1 %v5219_v32, %s9520_s10  ;;  %6195 = vmatmul.mubr.f32.gmra.mxu0 %v5872_v57  ;;  %v5931_v57 = vld [vmem:[#allocation4 + $0x2f8] sm:$0xff] }
 0x6f6   : > { %9252 = vmatmul.mubr.msk.f32.gmra.mxu1 %vm243_vm10, %v5931_v57 }
 0x6f7   : > { %5312 = vrot.lane.b32.xlu0 %v5222_v50, %s9519_s6  ;;  %v5289_v41 = vpop.permute.xlu1 %5288 }
 0x6f8   : > { %5370 = vst.msk [vmem:[#allocation4 + $0x158] sm:$0xff] %vm2621_vm14, %v5289_v41  ;;  %v8898_v41 = vld [vmem:[%s14316_s2 + $0x358] sm:$0xff] }
 0x6f9   : > { %v5033_v35 = vpop.permute.xlu0 %5032  ;;  %5562 = vst.msk [vmem:[#allocation4 + $0x158] sm:$0xff] %vm2814_vm15, %v5481_v11  ;;  %5054 = vrot.lane.b32.xlu1 %v4965_v44, %s9521_s11  ;;  %v5875_v48 = vld [vmem:[#allocation4 + $0x138] sm:$0xff]  ;;  %9254 = vmatprep.subr.mxu0 %v8898_v41 }
 0x6fa   : > { %5114 = vst.msk [vmem:[#allocation4 + $0x150] sm:$0xff] %vm3007_vm0, %v5033_v35  ;;  %9255 = vmatpush3.msra.mxu0 %v8898_v41 }
 0x6fb   : > { %4864 = vrot.lane.b32.xlu0 %v5220_v12, %s9520_s10  ;;  %v5673_v62 = vpop.permute.xlu1 %5672  ;;  %v5876_v42 = vld [vmem:[#allocation4 + $0x140] sm:$0xff]  ;;  %v5226_v12 = vld [vmem:[#allocation3 + $0x209] sm:$0xff] }
 0x6fc   : > { %5754 = vst.msk [vmem:[#allocation4 + $0x158] sm:$0xff] %vm3007_vm0, %v5673_v62  ;;  %6199 = vmatprep.mubr.f32.mxu0 %v5876_v42 }
 0x6fd   : > { %v5483_v28 = vpop.permute.xlu0 %5482  ;;  %5504 = vrot.lane.b32.xlu1 %v14471_v9, %s9520_s10  ;;  %6200 = vmatmul.mubr.f32.gmra.mxu0 %v5875_v48  ;;  %v8897_v48 = vld [vmem:[%s14316_s2 + $0x350] sm:$0xff]  ;;  %v8896_v9 = vld [vmem:[%s14316_s2 + $0x348] sm:$0xff] }
 0x6fe   : > { %9256 = vmatprep.subr.mxu0 %v8897_v48 }
 0x6ff   : > { %5056 = vrot.lane.b32.xlu0 %v4966_v53, %s9521_s11  ;;  %v5291_v54 = vpop.permute.xlu1 %5290  ;;  %v6648_v53 = vld [vmem:[#allocation3 + $0x8] sm:$0xff]  ;;  %9257 = vmatpush3.msra.mxu0 %v8897_v48 }
 0x700   : > { %5371 = vst.msk [vmem:[#allocation4 + $0x170] sm:$0xff] %vm2621_vm14, %v5291_v54  ;;  %9258 = vmatprep.subr.mxu0 %v8896_v9 }
 0x701   : > { %v5675_v58 = vpop.permute.xlu0 %5674  ;;  %5563 = vst.msk [vmem:[#allocation4 + $0x170] sm:$0xff] %vm2814_vm15, %v5483_v28  ;;  %5696 = vrot.lane.b32.xlu1 %v14472_v43, %s9521_s11  ;;  %v5878_v47 = vld [vmem:[#allocation4 + $0x150] sm:$0xff]  ;;  %v8895_v43 = vld [vmem:[%s14316_s2 + $0x340] sm:$0xff]  ;;  %9259 = vmatpush3.msra.mxu0 %v8896_v9 }
 0x702   : > { %5755 = vst.msk [vmem:[#allocation4 + $0x170] sm:$0xff] %vm3007_vm0, %v5675_v58  ;;  %9260 = vmatprep.subr.mxu0 %v8895_v43 }
 0x703   : > { %5506 = vrot.lane.b32.xlu0 %v12515_v46, %s9520_s10  ;;  %v4843_v26 = vpop.permute.xlu1 %4842  ;;  %v5879_v61 = vld [vmem:[#allocation4 + $0x158] sm:$0xff]  ;;  %9261 = vmatpush3.msra.mxu0 %v8895_v43  ;;  %v6585_v43 = vld [vmem:[#allocation3 + $0xf] sm:$0xff] }
 0x704   : > { %4923 = vst.msk [vmem:[#allocation4 + $0x168] sm:$0xff] %vm2814_vm15, %v4843_v26  ;;  %6204 = vmatprep.mubr.f32.mxu0 %v5879_v61  ;;  %v6840_v61 = vld [vmem:[#allocation3 + $0x9] sm:$0xff] }
 0x705   : > { %v5293_v45 = vpop.permute.xlu0 %5292  ;;  %5314 = vrot.lane.b32.xlu1 %v5223_v16, %s9519_s6  ;;  %6205 = vmatmul.mubr.f32.gmra.mxu0 %v5878_v47  ;;  %v8878_v47 = vld [vmem:[%s14316_s2 + $0x2b8] sm:$0xff]  ;;  %6617 = vst.msk [vmem:[#allocation4 + $0x18] sm:$0xff] %vm243_vm10, %v6585_v43 }
 0x706   : > { %5372 = vst.msk [vmem:[#allocation4 + $0x188] sm:$0xff] %vm2621_vm14, %v5293_v45  ;;  %8163 = vmatpush1.msra.mxu1 %v8878_v47 }
 0x707   : > { %5698 = vrot.lane.b32.xlu0 %v14473_v34, %s9521_s11  ;;  %v5035_v49 = vpop.permute.xlu1 %5034  ;;  %v8877_v34 = vld [vmem:[%s14316_s2 + $0x2b0] sm:$0xff]  ;;  %8164 = vmatprep.subr.mxu1 %v14433_v52 }
 0x708   : > { %5115 = vst.msk [vmem:[#allocation4 + $0x168] sm:$0xff] %vm3007_vm0, %v5035_v49  ;;  %v8876_v49 = vld [vmem:[%s14316_s2 + $0x2a8] sm:$0xff]  ;;  %8165 = vmatpush1.msra.mxu1 %v8877_v34 }
 0x709   : > { %v4845_v46 = vpop.permute.xlu0 %4844  ;;  %4866 = vrot.lane.b32.xlu1 %v5221_v22, %s9520_s10  ;;  %v5882_v1 = vld [vmem:[#allocation4 + $0x170] sm:$0xff]  ;;  %8166 = vmatprep.subr.mxu1 %v14433_v52 }
 0x70a   : > { %4924 = vst.msk [vmem:[#allocation4 + $0x180] sm:$0xff] %vm2814_vm15, %v4845_v46  ;;  %6209 = vmatprep.mubr.f32.mxu0 %v5882_v1  ;;  %8167 = vmatpush1.msra.mxu1 %v8876_v49 }
 0x70b   : > { %5316 = vrot.lane.b32.xlu0 %v5224_v19, %s9519_s6  ;;  %v5485_v14 = vpop.permute.xlu1 %5484  ;;  %8168 = vmatprep.subr.mxu1 %v14433_v52 }
 0x70c   : > { %5564 = vst.msk [vmem:[#allocation4 + $0x188] sm:$0xff] %vm2814_vm15, %v5485_v14 }
 0x70d   : > { %v5037_v10 = vpop.permute.xlu0 %5036  ;;  %5058 = vrot.lane.b32.xlu1 %v4967_v23, %s9521_s11 }
 0x70e   : > { %5116 = vst.msk [vmem:[#allocation4 + $0x180] sm:$0xff] %vm3007_vm0, %v5037_v10  ;;  %v8875_v10 = vld [vmem:[%s14316_s2 + $0x2a0] sm:$0xff] }
 0x70f   : > { %4868 = vrot.lane.b32.xlu0 %v5222_v50, %s9520_s10  ;;  %v5677_v31 = vpop.permute.xlu1 %5676  ;;  %v5881_v37 = vld [vmem:[#allocation4 + $0x168] sm:$0xff]  ;;  %v7895_v50 = vld [vmem:[#allocation3 + $0x231] sm:$0xff]  ;;  %8169 = vmatpush1.msra.mxu1 %v8875_v10 }
 0x710   : > { %5756 = vst.msk [vmem:[#allocation4 + $0x188] sm:$0xff] %vm3007_vm0, %v5677_v31  ;;  %6210 = vmatmul.mubr.f32.gmra.mxu0 %v5881_v37  ;;  %8170 = vmatprep.subr.mxu1 %v14433_v52  ;;  %v8874_v37 = vld [vmem:[%s14316_s2 + $0x298] sm:$0xff] }
 0x711   : > { %v5487_v56 = vpop.permute.xlu0 %5486  ;;  %5508 = vrot.lane.b32.xlu1 %v5416_v3, %s9520_s10  ;;  %7927 = vst.msk [vmem:[#allocation4 + $0x2f8] sm:$0xff] %vm243_vm10, %v7895_v50  ;;  %8171 = vmatpush1.msra.mxu1 %v8874_v37  ;;  %v8894_v50 = vld [vmem:[%s14316_s2 + $0x338] sm:$0xff] }
 0x712   : > { %8172 = vmatprep.subr.mxu1 %v14433_v52 }
 0x713   : > { %5060 = vrot.lane.b32.xlu0 %v4968_v7, %s9521_s11  ;;  %v5295_v27 = vpop.permute.xlu1 %5294  ;;  %v8872_v7 = vld [vmem:[%s14316_s2 + $0x288] sm:$0xff] }
 0x714   : > { %5373 = vst.msk [vmem:[#allocation4 + $0x1a0] sm:$0xff] %vm2621_vm14, %v5295_v27 }
 0x715   : > { %v5679_v8 = vpop.permute.xlu0 %5678  ;;  %5565 = vst.msk [vmem:[#allocation4 + $0x1a0] sm:$0xff] %vm2814_vm15, %v5487_v56  ;;  %5700 = vrot.lane.b32.xlu1 %v12549_v24, %s9521_s11  ;;  %v5884_v21 = vld [vmem:[#allocation4 + $0x180] sm:$0xff]  ;;  %v8873_v56 = vld [vmem:[%s14316_s2 + $0x290] sm:$0xff] }
 0x716   : > { %5757 = vst.msk [vmem:[#allocation4 + $0x1a0] sm:$0xff] %vm3007_vm0, %v5679_v8  ;;  %8173 = vmatpush1.msra.mxu1 %v8873_v56 }
 0x717   : > { %5510 = vrot.lane.b32.xlu0 %v12953_v20, %s9520_s10  ;;  %v4847_v18 = vpop.permute.xlu1 %4846  ;;  %v5885_v32 = vld [vmem:[#allocation4 + $0x188] sm:$0xff]  ;;  %8174 = vmatprep.subr.mxu1 %v14433_v52 }
 0x718   : > { %4925 = vst.msk [vmem:[#allocation4 + $0x198] sm:$0xff] %vm2814_vm15, %v4847_v18  ;;  %6214 = vmatprep.mubr.f32.mxu0 %v5885_v32  ;;  %8175 = vmatpush1.msra.mxu1 %v8872_v7 }
 0x719   : > { %v5297_v6 = vpop.permute.xlu0 %5296  ;;  %5318 = vrot.lane.b32.xlu1 %v12959_v29, %s9519_s6  ;;  %6215 = vmatmul.mubr.f32.gmra.mxu0 %v5884_v21  ;;  %v8869_v21 = vld [vmem:[%s14316_s2 + $0x270] sm:$0xff] }
 0x71a   : > { %5374 = vst.msk [vmem:[#allocation4 + $0x1b8] sm:$0xff] %vm2621_vm14, %v5297_v6  ;;  %8176 = vmatprep.subr.mxu1 %v14433_v52 }
 0x71b   : > { %5702 = vrot.lane.b32.xlu0 %v12582_v39, %s9521_s11  ;;  %v5039_v24 = vpop.permute.xlu1 %5038  ;;  %v5418_v39 = vld [vmem:[#allocation3 + $0x227] sm:$0xff] }
 0x71c   : > { %5117 = vst.msk [vmem:[#allocation4 + $0x198] sm:$0xff] %vm3007_vm0, %v5039_v24  ;;  %v6584_v24 = vld [vmem:[#allocation3 + $0x7] sm:$0xff] }
 0x71d   : > { %v4849_v38 = vpop.permute.xlu0 %4848  ;;  %4870 = vrot.lane.b32.xlu1 %v5223_v16, %s9520_s10  ;;  %v5888_v33 = vld [vmem:[#allocation4 + $0x1a0] sm:$0xff]  ;;  %6616 = vst.msk [vmem:[#allocation4] sm:$0xff] %vm243_vm10, %v6584_v24 }
 0x71e   : > { %4926 = vst.msk [vmem:[#allocation4 + $0x1b0] sm:$0xff] %vm2814_vm15, %v4849_v38  ;;  %6219 = vmatprep.mubr.f32.mxu0 %v5888_v33  ;;  %v8868_v38 = vld [vmem:[%s14316_s2 + $0x268] sm:$0xff] }
 0x71f   : > { %5320 = vrot.lane.b32.xlu0 %v5226_v12, %s9519_s6  ;;  %v5489_v13 = vpop.permute.xlu1 %5488 }
 0x720   : > { %5566 = vst.msk [vmem:[#allocation4 + $0x1b8] sm:$0xff] %vm2814_vm15, %v5489_v13  ;;  %v8867_v13 = vld [vmem:[%s14316_s2 + $0x260] sm:$0xff] }
 0x721   : > { %v5041_v17 = vpop.permute.xlu0 %5040  ;;  %5062 = vrot.lane.b32.xlu1 %v4969_v5, %s9521_s11  ;;  %v8866_v5 = vld [vmem:[%s14316_s2 + $0x258] sm:$0xff] }
 0x722   : > { %5118 = vst.msk [vmem:[#allocation4 + $0x1b0] sm:$0xff] %vm3007_vm0, %v5041_v17  ;;  %v9208_v17 = vpop.f32.mrf.mxu1 }
 0x723   : > { %4872 = vrot.lane.b32.xlu0 %v5224_v19, %s9520_s10  ;;  %v5681_v60 = vpop.permute.xlu1 %5680  ;;  %v5887_v55 = vld [vmem:[#allocation4 + $0x198] sm:$0xff] }
 0x724   : > { %5758 = vst.msk [vmem:[#allocation4 + $0x1b8] sm:$0xff] %vm3007_vm0, %v5681_v60  ;;  %6220 = vmatmul.mubr.f32.gmra.mxu0 %v5887_v55  ;;  %v13080_v55 = vld [vmem:[%s14317_s3 + $0x2] ss:$0 sm:$0xff] }
 0x725   : > { %v5491_v4 = vpop.permute.xlu0 %5490  ;;  %5512 = vrot.lane.b32.xlu1 %v5418_v39, %s9520_s10 }
 0x727   : > { %5064 = vrot.lane.b32.xlu0 %v5416_v3, %s9521_s11  ;;  %v5299_v15 = vpop.permute.xlu1 %5298 }
 0x728   : > { %5375 = vst.msk [vmem:[#allocation4 + $0x1d0] sm:$0xff] %vm2621_vm14, %v5299_v15  ;;  %v6361_v15 = vpop.f32.mrf.mxu1 }
 0x729   : > { %v5683_v59 = vpop.permute.xlu0 %5682  ;;  %5567 = vst.msk [vmem:[#allocation4 + $0x1d0] sm:$0xff] %vm2814_vm15, %v5491_v4  ;;  %5704 = vrot.lane.b32.xlu1 %v5610_v0, %s9521_s11  ;;  %v5890_v51 = vld [vmem:[#allocation4 + $0x1b0] sm:$0xff] }
 0x72a   : > { %5759 = vst.msk [vmem:[#allocation4 + $0x1d0] sm:$0xff] %vm3007_vm0, %v5683_v59 }
 0x72b   : > { %5514 = vrot.lane.b32.xlu0 %v5419_v36, %s9520_s10  ;;  %v4851_v22 = vpop.permute.xlu1 %4850  ;;  %v5891_v25 = vld [vmem:[#allocation4 + $0x1b8] sm:$0xff] }
 0x72c   : > { %4927 = vst.msk [vmem:[#allocation4 + $0x1c8] sm:$0xff] %vm2814_vm15, %v4851_v22  ;;  %6224 = vmatprep.mubr.f32.mxu0 %v5891_v25  ;;  %v8864_v22 = vld [vmem:[%s14316_s2 + $0x248] sm:$0xff] }
 0x72d   : > { %v5301_v11 = vpop.permute.xlu0 %5300  ;;  %5322 = vrot.lane.b32.xlu1 %v5227_v63, %s9519_s6  ;;  %6225 = vmatmul.mubr.f32.gmra.mxu0 %v5890_v51 }
 0x72e   : > { %5376 = vst.msk [vmem:[#allocation4 + $0x1e8] sm:$0xff] %vm2621_vm14, %v5301_v11 }
 0x72f   : > { %5706 = vrot.lane.b32.xlu0 %v5611_v40, %s9521_s11  ;;  %v5043_v35 = vpop.permute.xlu1 %5042  ;;  %v8863_v40 = vld [vmem:[%s14316_s2 + $0x240] sm:$0xff] }
 0x730   : > { %5119 = vst.msk [vmem:[#allocation4 + $0x1c8] sm:$0xff] %vm3007_vm0, %v5043_v35 }
 0x731   : > { %v4853_v44 = vpop.permute.xlu0 %4852  ;;  %4874 = vrot.lane.b32.xlu1 %v12959_v29, %s9520_s10  ;;  %v5894_v62 = vld [vmem:[#allocation4 + $0x1d0] sm:$0xff]  ;;  %v8870_v29 = vld [vmem:[%s14316_s2 + $0x278] sm:$0xff] }
 0x732   : > { %4928 = vst.msk [vmem:[#allocation4 + $0x1e0] sm:$0xff] %vm2814_vm15, %v4853_v44  ;;  %6229 = vmatprep.mubr.f32.mxu0 %v5894_v62  ;;  %v8893_v44 = vld [vmem:[%s14316_s2 + $0x330] sm:$0xff] }
 0x733   : > { %v5493_v42 = vpop.permute.xlu1 %5492 }
 0x734   : > { %5568 = vst.msk [vmem:[#allocation4 + $0x1e8] sm:$0xff] %vm2814_vm15, %v5493_v42 }
 0x735   : > { %v5045_v28 = vpop.permute.xlu0 %5044  ;;  %5066 = vrot.lane.b32.xlu1 %v12953_v20, %s9521_s11  ;;  %v8871_v20 = vld [vmem:[%s14316_s2 + $0x280] sm:$0xff] }
 0x736   : > { %5120 = vst.msk [vmem:[#allocation4 + $0x1e0] sm:$0xff] %vm3007_vm0, %v5045_v28  ;;  %8177 = vmatpush1.msra.mxu1 %v8871_v20  ;;  %v6841_v20 = vld [vmem:[#allocation3 + $0x11] sm:$0xff] }
 0x737   : > { %v5685_v54 = vpop.permute.xlu1 %5684  ;;  %v5893_v58 = vld [vmem:[#allocation4 + $0x1c8] sm:$0xff]  ;;  %8178 = vmatprep.subr.mxu1 %v14433_v52 }
 0x738   : > { %5760 = vst.msk [vmem:[#allocation4 + $0x1e8] sm:$0xff] %vm3007_vm0, %v5685_v54  ;;  %6230 = vmatmul.mubr.f32.gmra.mxu0 %v5893_v58  ;;  %8179 = vmatpush1.msra.mxu1 %v8870_v29  ;;  %v8892_v58 = vld [vmem:[%s14316_s2 + $0x328] sm:$0xff] }
 0x739   : > { %v5495_v26 = vpop.permute.xlu0 %5494  ;;  %6712 = vrot.lane.b32.xlu1 %v6648_v53, %s9519_s6  ;;  %8180 = vmatprep.subr.mxu1 %v14433_v52 }
 0x73a   : > { %8181 = vmatpush1.msra.mxu1 %v8869_v21 }
 0x73b   : > { %v5303_v45 = vpop.permute.xlu1 %5302  ;;  %8182 = vmatprep.subr.mxu1 %v14433_v52 }
 0x73c   : > { %5377 = vst.msk [vmem:[#allocation4 + $0x200] sm:$0xff] %vm2621_vm14, %v5303_v45  ;;  %8183 = vmatpush1.msra.mxu1 %v8868_v38  ;;  %v8886_v38 = vld [vmem:[%s14316_s2 + $0x2f8] sm:$0xff] }
 0x73d   : > { %v5687_v16 = vpop.permute.xlu0 %5686  ;;  %5569 = vst.msk [vmem:[#allocation4 + $0x200] sm:$0xff] %vm2814_vm15, %v5495_v26  ;;  %6904 = vrot.lane.b32.xlu1 %v6840_v61, %s9520_s10  ;;  %v5896_v14 = vld [vmem:[#allocation4 + $0x1e0] sm:$0xff]  ;;  %8184 = vmatprep.subr.mxu1 %v14433_v52  ;;  %v13121_v61 = vpop.f32.mrf.mxu1 }
 0x73e   : > { %5761 = vst.msk [vmem:[#allocation4 + $0x200] sm:$0xff] %vm3007_vm0, %v5687_v16  ;;  %8185 = vmatpush1.msra.mxu1 %v8867_v13  ;;  %v8891_v26 = vld [vmem:[%s14316_s2 + $0x320] sm:$0xff]  ;;  %v8890_v16 = vld [vmem:[%s14316_s2 + $0x318] sm:$0xff] }
 0x73f   : > { %v4855_v46 = vpop.permute.xlu1 %4854  ;;  %v5897_v19 = vld [vmem:[#allocation4 + $0x1e8] sm:$0xff]  ;;  %8186 = vmatprep.subr.mxu1 %v14433_v52  ;;  %v6371_v10 = vpop.f32.mrf.mxu1 }
 0x740   : > { %4929 = vst.msk [vmem:[#allocation4 + $0x1f8] sm:$0xff] %vm2814_vm15, %v4855_v46  ;;  %6234 = vmatprep.mubr.f32.mxu0 %v5897_v19  ;;  %8187 = vmatpush1.msra.mxu1 %v8866_v5  ;;  %v8889_v19 = vld [vmem:[%s14316_s2 + $0x310] sm:$0xff] }
 0x741   : > { %v5305_v1 = vpop.permute.xlu0 %5304  ;;  %6235 = vmatmul.mubr.f32.gmra.mxu0 %v5896_v14  ;;  %8188 = vmatprep.subr.mxu1 %v14433_v52  ;;  %v6649_v14 = vld [vmem:[#allocation3 + $0x10] sm:$0xff] }
 0x742   : > { %5378 = vst.msk [vmem:[#allocation4 + $0x218] sm:$0xff] %vm2621_vm14, %v5305_v1  ;;  %8189 = vmatpush1.msra.mxu1 %v8865_v2 }
 0x743   : > { %v5047_v23 = vpop.permute.xlu1 %5046  ;;  %8190 = vmatprep.subr.mxu1 %v14433_v52 }
 0x744   : > { %5121 = vst.msk [vmem:[#allocation4 + $0x1f8] sm:$0xff] %vm3007_vm0, %v5047_v23  ;;  %8191 = vmatpush1.msra.mxu1 %v8864_v22 }
 0x745   : > { %v4857_v31 = vpop.permute.xlu0 %4856  ;;  %v5900_v3 = vld [vmem:[#allocation4 + $0x200] sm:$0xff]  ;;  %8192 = vmatprep.subr.mxu1 %v14433_v52 }
 0x746   : > { %4930 = vst.msk [vmem:[#allocation4 + $0x210] sm:$0xff] %vm2814_vm15, %v4857_v31  ;;  %6239 = vmatprep.mubr.f32.mxu0 %v5900_v3  ;;  %8193 = vmatpush1.msra.mxu1 %v8863_v40  ;;  %v8888_v3 = vld [vmem:[%s14316_s2 + $0x308] sm:$0xff] }
 0x747   : > { %v5497_v27 = vpop.permute.xlu1 %5496  ;;  %8194 = vmatprep.subr.mxu1 %v14433_v52 }
 0x748   : > { %5570 = vst.msk [vmem:[#allocation4 + $0x218] sm:$0xff] %vm2814_vm15, %v5497_v27  ;;  %8195 = vmatpush2.msra.mxu1 %v8894_v50 }
 0x749   : > { %v5049_v8 = vpop.permute.xlu0 %5048  ;;  %8196 = vmatprep.subr.mxu1 %v14433_v52 }
 0x74a   : > { %5122 = vst.msk [vmem:[#allocation4 + $0x210] sm:$0xff] %vm3007_vm0, %v5049_v8  ;;  %8197 = vmatpush2.msra.mxu1 %v8893_v44 }
 0x74b   : > { %v5689_v18 = vpop.permute.xlu1 %5688  ;;  %v5899_v32 = vld [vmem:[#allocation4 + $0x1f8] sm:$0xff]  ;;  %8198 = vmatprep.subr.mxu1 %v14433_v52 }
 0x74c   : > { %5762 = vst.msk [vmem:[#allocation4 + $0x218] sm:$0xff] %vm3007_vm0, %v5689_v18  ;;  %6240 = vmatmul.mubr.f32.gmra.mxu0 %v5899_v32  ;;  %8199 = vmatpush2.msra.mxu1 %v8892_v58  ;;  %v8887_v32 = vld [vmem:[%s14316_s2 + $0x300] sm:$0xff] }
 0x74d   : > { %v5499_v6 = vpop.permute.xlu0 %5498  ;;  %8200 = vmatprep.subr.mxu1 %v14433_v52 }
 0x74e   : > { %8201 = vmatpush2.msra.mxu1 %v8891_v26  ;;  %v8880_v26 = vld [vmem:[%s14316_s2 + $0x2c8] sm:$0xff] }
 0x74f   : > { %v5307_v12 = vpop.permute.xlu1 %5306  ;;  %8202 = vmatprep.subr.mxu1 %v14433_v52 }
 0x750   : > { %5379 = vst.msk [vmem:[#allocation4 + $0x230] sm:$0xff] %vm2621_vm14, %v5307_v12  ;;  %8203 = vmatpush2.msra.mxu1 %v8890_v16 }
 0x751   : > { %v5691_v33 = vpop.permute.xlu0 %5690  ;;  %5571 = vst.msk [vmem:[#allocation4 + $0x230] sm:$0xff] %vm2814_vm15, %v5499_v6  ;;  %v5902_v30 = vld [vmem:[#allocation4 + $0x210] sm:$0xff]  ;;  %8204 = vmatprep.subr.mxu1 %v14433_v52 }
 0x752   : > { %5763 = vst.msk [vmem:[#allocation4 + $0x230] sm:$0xff] %vm3007_vm0, %v5691_v33  ;;  %8205 = vmatpush2.msra.mxu1 %v8889_v19 }
 0x753   : > { %v4859_v39 = vpop.permute.xlu1 %4858  ;;  %v5903_v60 = vld [vmem:[#allocation4 + $0x218] sm:$0xff]  ;;  %8206 = vmatprep.subr.mxu1 %v14433_v52 }
 0x754   : > { %4931 = vst.msk [vmem:[#allocation4 + $0x228] sm:$0xff] %vm2814_vm15, %v4859_v39  ;;  %6244 = vmatprep.mubr.f32.mxu0 %v5903_v60  ;;  %8207 = vmatpush2.msra.mxu1 %v8888_v3 }
 0x755   : > { %v5309_v4 = vpop.permute.xlu0 %5308  ;;  %v6136_v0 = vpop.f32.mrf.mxu0  ;;  %6245 = vmatmul.mubr.f32.gmra.mxu0 %v5902_v30  ;;  %8208 = vmatprep.subr.mxu1 %v14433_v52 }
 0x756   : > { %5380 = vst.msk [vmem:[#allocation4 + $0x248] sm:$0xff] %vm2621_vm14, %v5309_v4  ;;  %v6137_v36 = vadd.f32 %v13080_v55, %v6136_v0  ;;  %8209 = vmatpush2.msra.mxu1 %v8887_v32  ;;  %v8884_v0 = vld [vmem:[%s14316_s2 + $0x2e8] sm:$0xff] }
 0x757   : > { %v5051_v59 = vpop.permute.xlu1 %5050  ;;  %v6138_v63 = vpop.f32.mrf.mxu0  ;;  %8210 = vmatprep.subr.mxu1 %v14433_v52 }
 0x758   : > { %v6362_v25 = vadd.f32 %v6361_v15, %v6137_v36  ;;  %5123 = vst.msk [vmem:[#allocation4 + $0x228] sm:$0xff] %vm3007_vm0, %v5051_v59  ;;  %8211 = vmatpush2.msra.mxu1 %v8886_v38  ;;  %v13180_v15 = vpop.f32.mrf.mxu1 }
 0x759   : > { %v4861_v51 = vpop.permute.xlu0 %4860  ;;  %v5906_v11 = vld [vmem:[#allocation4 + $0x230] sm:$0xff]  ;;  %8212 = vmatprep.subr.mxu1 %v14433_v52 }
 0x75a   : > { %4932 = vst.msk [vmem:[#allocation4 + $0x240] sm:$0xff] %vm2814_vm15, %v4861_v51  ;;  %v6520_v57 = vmax.f32 %v6362_v25, 0.0  ;;  %6249 = vmatprep.mubr.f32.mxu0 %v5906_v11  ;;  %v8883_v25 = vld [vmem:[%s14316_s2 + $0x2e0] sm:$0xff]  ;;  %v6381_v50 = vpop.f32.mrf.mxu1 }
 0x75b   : > { %v5501_v41 = vpop.permute.xlu1 %5500 }
 0x75c   : > { %6552 = vst.msk [vmem:[#allocation3 + $0x28] sm:$0xff] %vm243_vm10, %v6520_v57  ;;  %v9217_v3 = vpop.f32.mrf.mxu1 }
 0x75d   : > { %5572 = vst.msk [vmem:[#allocation4 + $0x248] sm:$0xff] %vm2814_vm15, %v5501_v41  ;;  %v5053_v35 = vpop.permute.xlu0 %5052  ;;  %v6141_v62 = vpop.f32.mrf.mxu0 }
 0x75e   : > { %5124 = vst.msk [vmem:[#allocation4 + $0x240] sm:$0xff] %vm3007_vm0, %v5053_v35  ;;  %v6142_v42 = vadd.f32 %v13080_v55, %v6141_v62  ;;  %v8882_v35 = vld [vmem:[%s14316_s2 + $0x2d8] sm:$0xff] }
 0x75f   : > { %v5693_v28 = vpop.permute.xlu1 %5692  ;;  %v6143_v48 = vpop.f32.mrf.mxu0  ;;  %v5905_v9 = vld [vmem:[#allocation4 + $0x228] sm:$0xff] }
 0x760   : > { %v6367_v53 = vadd.f32 %v9208_v17, %v6142_v42  ;;  %5764 = vst.msk [vmem:[#allocation4 + $0x248] sm:$0xff] %vm3007_vm0, %v5693_v28  ;;  %6250 = vmatmul.mubr.f32.gmra.mxu0 %v5905_v9  ;;  %v8885_v17 = vld [vmem:[%s14316_s2 + $0x2f0] sm:$0xff] }
 0x761   : > { %v5503_v54 = vpop.permute.xlu0 %5502  ;;  %8213 = vmatpush2.msra.mxu1 %v8885_v17  ;;  %v8881_v9 = vld [vmem:[%s14316_s2 + $0x2d0] sm:$0xff] }
 0x762   : > { %v6521_v45 = vmax.f32 %v6367_v53, 0.0  ;;  %8214 = vmatprep.subr.mxu1 %v14433_v52 }
 0x763   : > { %v5311_v47 = vpop.permute.xlu1 %5310  ;;  %v7032_v34 = vld [vmem:[#allocation3 + $0x27] sm:$0xff]  ;;  %8215 = vmatpush2.msra.mxu1 %v8884_v0 }
 0x764   : > { %v13127_v49 = vld [vmem:[#allocation3 + $0x28] sm:$0xff]  ;;  %6553 = vst.msk [vmem:[#allocation3 + $0x30] sm:$0xff] %vm243_vm10, %v6521_v45  ;;  %7096 = vrot.lane.b32.xlu1 %v7032_v34, %s9521_s11  ;;  %6618 = vst.msk [vmem:[#allocation4 + $0x30] sm:$0xff] %vm243_vm10, %v7032_v34  ;;  %8216 = vmatprep.subr.mxu1 %v14433_v52 }
 0x765   : > { %5381 = vst.msk [vmem:[#allocation4 + $0x260] sm:$0xff] %vm2621_vm14, %v5311_v47  ;;  %v5695_v46 = vpop.permute.xlu0 %5694  ;;  %v6146_v1 = vpop.f32.mrf.mxu0  ;;  %v5908_v8 = vld [vmem:[#allocation4 + $0x240] sm:$0xff]  ;;  %8217 = vmatpush2.msra.mxu1 %v8883_v25 }
 0x766   : > { %7256 = vst.msk [vmem:[#allocation4 + $0x8] sm:$0xff] %vm243_vm10, %v13127_v49  ;;  %v6147_v23 = vadd.f32 %v13080_v55, %v6146_v1  ;;  %8218 = vmatprep.subr.mxu1 %v14433_v52  ;;  %v8879_v1 = vld [vmem:[%s14316_s2 + $0x2c0] sm:$0xff] }
 0x767   : > { %5573 = vst.msk [vmem:[#allocation4 + $0x260] sm:$0xff] %vm2814_vm15, %v5503_v54  ;;  %v4863_v31 = vpop.permute.xlu1 %4862  ;;  %v6148_v37 = vpop.f32.mrf.mxu0  ;;  %v5909_v56 = vld [vmem:[#allocation4 + $0x248] sm:$0xff]  ;;  %8219 = vmatpush2.msra.mxu1 %v8882_v35 }
 0x768   : > { %5765 = vst.msk [vmem:[#allocation4 + $0x260] sm:$0xff] %vm3007_vm0, %v5695_v46  ;;  %v6372_v7 = vadd.f32 %v6371_v10, %v6147_v23  ;;  %6714 = vrot.lane.b32.xlu1 %v6649_v14, %s9519_s6  ;;  %6254 = vmatprep.mubr.f32.mxu0 %v5909_v56 }
 0x769   : > { %4933 = vst.msk [vmem:[#allocation4 + $0x258] sm:$0xff] %vm2814_vm15, %v4863_v31  ;;  %v5313_v27 = vpop.permute.xlu0 %5312  ;;  %6255 = vmatmul.mubr.f32.gmra.mxu0 %v5908_v8  ;;  %8220 = vmatprep.subr.mxu1 %v14433_v52 }
 0x76a   : > { %5382 = vst.msk [vmem:[#allocation4 + $0x278] sm:$0xff] %vm2621_vm14, %v5313_v27  ;;  %v6522_v18 = vmax.f32 %v6372_v7, 0.0  ;;  %8221 = vmatpush2.msra.mxu1 %v8881_v9 }
 0x76b   : > { %v5055_v6 = vpop.permute.xlu1 %5054  ;;  %v7288_v29 = vld [vmem:[#allocation3 + $0x29] sm:$0xff]  ;;  %v7289_v58 = vld [vmem:[#allocation3 + $0x31] sm:$0xff]  ;;  %8222 = vmatprep.subr.mxu1 %v14433_v52 }
 0x76c   : > { %6554 = vst.msk [vmem:[#allocation3 + $0x48] sm:$0xff] %vm243_vm10, %v6522_v18  ;;  %6906 = vrot.lane.b32.xlu1 %v6841_v20, %s9520_s10  ;;  %7352 = vrot.lane.b32.xlu0 %v7288_v29, %s9519_s6  ;;  %v13158_v24 = vld [vmem:[#allocation3 + $0x30] sm:$0xff] }
 0x76d   : > { %5125 = vst.msk [vmem:[#allocation4 + $0x258] sm:$0xff] %vm3007_vm0, %v5055_v6  ;;  %v4865_v21 = vpop.permute.xlu0 %4864  ;;  %v6151_v12 = vpop.f32.mrf.mxu0  ;;  %v6587_v5 = vld [vmem:[#allocation3 + $0x2f] sm:$0xff]  ;;  %8223 = vmatpush2.msra.mxu1 %v8880_v26 }
 0x76e   : > { %4934 = vst.msk [vmem:[#allocation4 + $0x270] sm:$0xff] %vm2814_vm15, %v4865_v21  ;;  %v6152_v13 = vadd.f32 %v13080_v55, %v6151_v12  ;;  %v7033_v4 = vld [vmem:[#allocation3 + $0x2f] sm:$0xff]  ;;  %8224 = vmatprep.subr.mxu1 %v14433_v52  ;;  %v6391_v6 = vpop.f32.mrf.mxu1 }
 0x76f   : > { %v5912_v33 = vld [vmem:[#allocation4 + $0x260] sm:$0xff]  ;;  %7257 = vst.msk [vmem:[#allocation4 + $0x20] sm:$0xff] %vm243_vm10, %v13158_v24  ;;  %v5505_v39 = vpop.permute.xlu1 %5504  ;;  %v6153_v60 = vpop.f32.mrf.mxu0  ;;  %6619 = vst.msk [vmem:[#allocation4 + $0x48] sm:$0xff] %vm243_vm10, %v6587_v5  ;;  %8225 = vmatpush2.msra.mxu1 %v8879_v1 }
 0x770   : > { %6259 = vmatprep.mubr.f32.mxu0 %v5912_v33  ;;  %v6377_v30 = vadd.f32 %v13121_v61, %v6152_v13  ;;  %5574 = vst.msk [vmem:[#allocation4 + $0x278] sm:$0xff] %vm2814_vm15, %v5505_v39  ;;  %7098 = vrot.lane.b32.xlu1 %v7033_v4, %s9521_s11 }
 0x771   : > { %v5057_v2 = vpop.permute.xlu0 %5056 }
 0x772   : > { %5126 = vst.msk [vmem:[#allocation4 + $0x270] sm:$0xff] %vm3007_vm0, %v5057_v2  ;;  %v6523_v36 = vmax.f32 %v6377_v30, 0.0 }
 0x773   : > { %v5697_v59 = vpop.permute.xlu1 %5696  ;;  %v7480_v63 = vld [vmem:[#allocation3 + $0x47] sm:$0xff] }
 0x774   : > { %v5911_v22 = vld [vmem:[#allocation4 + $0x258] sm:$0xff]  ;;  %6555 = vst.msk [vmem:[#allocation3 + $0x50] sm:$0xff] %vm243_vm10, %v6523_v36  ;;  %6716 = vrot.lane.b32.xlu1 %v13127_v49, %s9519_s6  ;;  %7544 = vrot.lane.b32.xlu0 %v7480_v63, %s9520_s10  ;;  %v7226_v40 = vld [vmem:[#allocation3 + $0x48] sm:$0xff] }
 0x775   : > { %5766 = vst.msk [vmem:[#allocation4 + $0x278] sm:$0xff] %vm3007_vm0, %v5697_v59  ;;  %v5507_v51 = vpop.permute.xlu0 %5506  ;;  %6260 = vmatmul.mubr.f32.gmra.mxu0 %v5911_v22  ;;  %v6156_v11 = vpop.f32.mrf.mxu0  ;;  %v6588_v57 = vld [vmem:[#allocation3 + $0x47] sm:$0xff] }
 0x776   : > { %7258 = vst.msk [vmem:[#allocation4 + $0x38] sm:$0xff] %vm243_vm10, %v7226_v40  ;;  %v6157_v41 = vadd.f32 %v13080_v55, %v6156_v11  ;;  %6620 = vst.msk [vmem:[#allocation4 + $0x60] sm:$0xff] %vm243_vm10, %v6588_v57  ;;  %v13198_v42 = vld [vmem:[#allocation3 + $0x48] sm:$0xff]  ;;  %v9220_v11 = vpop.f32.mrf.mxu1 }
 0x777   : > { %v5315_v44 = vpop.permute.xlu1 %5314  ;;  %v6158_v62 = vpop.f32.mrf.mxu0 }
 0x778   : > { %v6382_v28 = vadd.f32 %v6381_v50, %v6157_v41  ;;  %5383 = vst.msk [vmem:[#allocation4 + $0x290] sm:$0xff] %vm2621_vm14, %v5315_v44  ;;  %6908 = vrot.lane.b32.xlu1 %v7288_v29, %s9520_s10  ;;  %7736 = vrot.lane.b32.xlu0 %v13198_v42, %s9521_s11 }
 0x779   : > { %v5699_v48 = vpop.permute.xlu0 %5698  ;;  %5575 = vst.msk [vmem:[#allocation4 + $0x290] sm:$0xff] %vm2814_vm15, %v5507_v51  ;;  %v5914_v49 = vld [vmem:[#allocation4 + $0x270] sm:$0xff] }
 0x77a   : > { %v6524_v53 = vmax.f32 %v6382_v28, 0.0  ;;  %5767 = vst.msk [vmem:[#allocation4 + $0x290] sm:$0xff] %vm3007_vm0, %v5699_v48  ;;  %v6401_v28 = vpop.f32.mrf.mxu1 }
 0x77b   : > { %v4867_v54 = vpop.permute.xlu1 %4866  ;;  %v13218_v45 = vld [vmem:[#allocation3 + $0x49] sm:$0xff]  ;;  %v13220_v16 = vld [vmem:[#allocation3 + $0x51] sm:$0xff] }
 0x77c   : > { %v5915_v43 = vld [vmem:[#allocation4 + $0x278] sm:$0xff]  ;;  %6556 = vst.msk [vmem:[#allocation3 + $0x68] sm:$0xff] %vm243_vm10, %v6524_v53  ;;  %7100 = vrot.lane.b32.xlu1 %v7480_v63, %s9521_s11  ;;  %7354 = vrot.lane.b32.xlu0 %v7289_v58, %s9519_s6  ;;  %v7227_v47 = vld [vmem:[#allocation3 + $0x50] sm:$0xff]  ;;  %7896 = vst.msk [vmem:[#allocation4 + $0x10] sm:$0xff] %vm243_vm10, %v13218_v45 }
 0x77d   : > { %4935 = vst.msk [vmem:[#allocation4 + $0x288] sm:$0xff] %vm2814_vm15, %v4867_v54  ;;  %v5317_v61 = vpop.permute.xlu0 %5316  ;;  %6264 = vmatprep.mubr.f32.mxu0 %v5915_v43  ;;  %v6161_v34 = vpop.f32.mrf.mxu0  ;;  %v6589_v46 = vld [vmem:[#allocation3 + $0x4f] sm:$0xff] }
 0x77e   : > { %5384 = vst.msk [vmem:[#allocation4 + $0x2a8] sm:$0xff] %vm2621_vm14, %v5317_v61  ;;  %v6162_v19 = vadd.f32 %v13080_v55, %v6161_v34  ;;  %6265 = vmatmul.mubr.f32.gmra.mxu0 %v5914_v49  ;;  %v7481_v23 = vld [vmem:[#allocation3 + $0x4f] sm:$0xff] }
 0x77f   : > { %7897 = vst.msk [vmem:[#allocation4 + $0x28] sm:$0xff] %vm243_vm10, %v13220_v16  ;;  %7259 = vst.msk [vmem:[#allocation4 + $0x50] sm:$0xff] %vm243_vm10, %v7227_v47  ;;  %v5059_v14 = vpop.permute.xlu1 %5058  ;;  %v6163_v10 = vpop.f32.mrf.mxu0  ;;  %v13241_v8 = vld [vmem:[#allocation3 + $0x50] sm:$0xff] }
 0x780   : > { %6621 = vst.msk [vmem:[#allocation4 + $0x78] sm:$0xff] %vm243_vm10, %v6589_v46  ;;  %v6387_v31 = vadd.f32 %v13180_v15, %v6162_v19  ;;  %6718 = vrot.lane.b32.xlu1 %v13158_v24, %s9519_s6  ;;  %7546 = vrot.lane.b32.xlu0 %v7481_v23, %s9520_s10 }
 0x781   : > { %5127 = vst.msk [vmem:[#allocation4 + $0x288] sm:$0xff] %vm3007_vm0, %v5059_v14  ;;  %v4869_v37 = vpop.permute.xlu0 %4868  ;;  %v5918_v56 = vld [vmem:[#allocation4 + $0x290] sm:$0xff] }
 0x782   : > { %4936 = vst.msk [vmem:[#allocation4 + $0x2a0] sm:$0xff] %vm2814_vm15, %v4869_v37  ;;  %v6525_v7 = vmax.f32 %v6387_v31, 0.0  ;;  %6269 = vmatprep.mubr.f32.mxu0 %v5918_v56  ;;  %v9223_v56 = vpop.f32.mrf.mxu1 }
 0x783   : > { %v5509_v27 = vpop.permute.xlu1 %5508  ;;  %v7228_v52 = vld [vmem:[#allocation3 + $0x68] sm:$0xff] }
 0x784   : > { %6557 = vst.msk [vmem:[#allocation3 + $0x70] sm:$0xff] %vm243_vm10, %v6525_v7  ;;  %6910 = vrot.lane.b32.xlu1 %v7289_v58, %s9520_s10  ;;  %7738 = vrot.lane.b32.xlu0 %v13241_v8, %s9521_s11  ;;  %7260 = vst.msk [vmem:[#allocation4 + $0x68] sm:$0xff] %vm243_vm10, %v7228_v52  ;;  %v6590_v18 = vld [vmem:[#allocation3 + $0x67] sm:$0xff] }
 0x785   : > { %5576 = vst.msk [vmem:[#allocation4 + $0x2a8] sm:$0xff] %vm2814_vm15, %v5509_v27  ;;  %v5061_v20 = vpop.permute.xlu0 %5060  ;;  %v6166_v32 = vpop.f32.mrf.mxu0  ;;  %v7482_v5 = vld [vmem:[#allocation3 + $0x67] sm:$0xff] }
 0x786   : > { %5128 = vst.msk [vmem:[#allocation4 + $0x2a0] sm:$0xff] %vm3007_vm0, %v5061_v20  ;;  %v6167_v29 = vadd.f32 %v13080_v55, %v6166_v32  ;;  %v13274_v63 = vld [vmem:[#allocation3 + $0x68] sm:$0xff] }
 0x787   : > { %6622 = vst.msk [vmem:[#allocation4 + $0x90] sm:$0xff] %vm243_vm10, %v6590_v18  ;;  %v5701_v21 = vpop.permute.xlu1 %5700  ;;  %v6168_v24 = vpop.f32.mrf.mxu0 }
 0x788   : > { %v5917_v38 = vld [vmem:[#allocation4 + $0x288] sm:$0xff]  ;;  %v6392_v12 = vadd.f32 %v6391_v6, %v6167_v29  ;;  %5768 = vst.msk [vmem:[#allocation4 + $0x2a8] sm:$0xff] %vm3007_vm0, %v5701_v21  ;;  %7102 = vrot.lane.b32.xlu1 %v7481_v23, %s9521_s11  ;;  %7356 = vrot.lane.b32.xlu0 %v13218_v45, %s9519_s6  ;;  %v6411_v6 = vpop.f32.mrf.mxu1 }
 0x789   : > { %v5511_v33 = vpop.permute.xlu0 %5510  ;;  %6270 = vmatmul.mubr.f32.gmra.mxu0 %v5917_v38 }
 0x78a   : > { %v6526_v13 = vmax.f32 %v6392_v12, 0.0 }
 0x78b   : > { %v5319_v17 = vpop.permute.xlu1 %5318  ;;  %v13256_v39 = vld [vmem:[#allocation3 + $0x69] sm:$0xff]  ;;  %v13263_v4 = vld [vmem:[#allocation3 + $0x71] sm:$0xff] }
 0x78c   : > { %6558 = vst.msk [vmem:[#allocation3 + $0x88] sm:$0xff] %vm243_vm10, %v6526_v13  ;;  %6720 = vrot.lane.b32.xlu1 %v13198_v42, %s9519_s6  ;;  %7548 = vrot.lane.b32.xlu0 %v7482_v5, %s9520_s10  ;;  %7898 = vst.msk [vmem:[#allocation4 + $0x40] sm:$0xff] %vm243_vm10, %v13256_v39  ;;  %v7229_v30 = vld [vmem:[#allocation3 + $0x70] sm:$0xff] }
 0x78d   : > { %5385 = vst.msk [vmem:[#allocation4 + $0x2c0] sm:$0xff] %vm2621_vm14, %v5319_v17  ;;  %v5703_v60 = vpop.permute.xlu0 %5702  ;;  %v6171_v2 = vpop.f32.mrf.mxu0  ;;  %v6591_v0 = vld [vmem:[#allocation3 + $0x6f] sm:$0xff]  ;;  %v5920_v40 = vld [vmem:[#allocation4 + $0x2a0] sm:$0xff] }
 0x78e   : > { %5577 = vst.msk [vmem:[#allocation4 + $0x2c0] sm:$0xff] %vm2814_vm15, %v5511_v33  ;;  %v6172_v15 = vadd.f32 %v13080_v55, %v6171_v2  ;;  %v7483_v54 = vld [vmem:[#allocation3 + $0x6f] sm:$0xff] }
 0x78f   : > { %7899 = vst.msk [vmem:[#allocation4 + $0x58] sm:$0xff] %vm243_vm10, %v13263_v4  ;;  %7261 = vst.msk [vmem:[#allocation4 + $0x80] sm:$0xff] %vm243_vm10, %v7229_v30  ;;  %v4871_v36 = vpop.permute.xlu1 %4870  ;;  %v6173_v59 = vpop.f32.mrf.mxu0  ;;  %v5921_v22 = vld [vmem:[#allocation4 + $0x2a8] sm:$0xff] }
 0x790   : > { %5769 = vst.msk [vmem:[#allocation4 + $0x2c0] sm:$0xff] %vm3007_vm0, %v5703_v60  ;;  %v6397_v25 = vadd.f32 %v9217_v3, %v6172_v15  ;;  %6912 = vrot.lane.b32.xlu1 %v13218_v45, %s9520_s10  ;;  %7740 = vrot.lane.b32.xlu0 %v13274_v63, %s9521_s11  ;;  %v13296_v45 = vld [vmem:[#allocation3 + $0x70] sm:$0xff] }
 0x791   : > { %6623 = vst.msk [vmem:[#allocation4 + $0xa8] sm:$0xff] %vm243_vm10, %v6591_v0  ;;  %v5321_v51 = vpop.permute.xlu0 %5320  ;;  %6274 = vmatprep.mubr.f32.mxu0 %v5921_v22 }
 0x792   : > { %4937 = vst.msk [vmem:[#allocation4 + $0x2b8] sm:$0xff] %vm2814_vm15, %v4871_v36  ;;  %v6527_v57 = vmax.f32 %v6397_v25, 0.0  ;;  %6275 = vmatmul.mubr.f32.gmra.mxu0 %v5920_v40  ;;  %v7930_v25 = vld [vmem:[#allocation4 + $0x10] sm:$0xff]  ;;  %v9226_v40 = vpop.f32.mrf.mxu1 }
 0x793   : > { %5386 = vst.msk [vmem:[#allocation4 + $0x2d8] sm:$0xff] %vm2621_vm14, %v5321_v51  ;;  %v5063_v50 = vpop.permute.xlu1 %5062  ;;  %v7230_v35 = vld [vmem:[#allocation3 + $0x88] sm:$0xff] }
 0x794   : > { %6559 = vst.msk [vmem:[#allocation3 + $0x90] sm:$0xff] %vm243_vm10, %v6527_v57  ;;  %7358 = vrot.lane.b32.xlu0 %v13220_v16, %s9519_s6  ;;  %7104 = vrot.lane.b32.xlu1 %v7482_v5, %s9521_s11  ;;  %v6592_v44 = vld [vmem:[#allocation3 + $0x87] sm:$0xff]  ;;  %7262 = vst.msk [vmem:[#allocation4 + $0x98] sm:$0xff] %vm243_vm10, %v7230_v35 }
 0x795   : > { %5129 = vst.msk [vmem:[#allocation4 + $0x2b8] sm:$0xff] %vm3007_vm0, %v5063_v50  ;;  %v4873_v41 = vpop.permute.xlu0 %4872  ;;  %v6176_v62 = vpop.f32.mrf.mxu0  ;;  %v13332_v12 = vld [vmem:[#allocation3 + $0x88] sm:$0xff]  ;;  %v7936_v57 = vld [vmem:[#allocation4 + $0x40] sm:$0xff] }
 0x796   : > { %4938 = vst.msk [vmem:[#allocation4 + $0x2d0] sm:$0xff] %vm2814_vm15, %v4873_v41  ;;  %v6177_v48 = vadd.f32 %v13080_v55, %v6176_v62 }
 0x797   : > { %v5924_v42 = vld [vmem:[#allocation4 + $0x2c0] sm:$0xff]  ;;  %6624 = vst.msk [vmem:[#allocation4 + $0xc0] sm:$0xff] %vm243_vm10, %v6592_v44  ;;  %v5513_v9 = vpop.permute.xlu1 %5512  ;;  %v6178_v53 = vpop.f32.mrf.mxu0 }
 0x798   : > { %6279 = vmatprep.mubr.f32.mxu0 %v5924_v42  ;;  %v6402_v58 = vadd.f32 %v6401_v28, %v6177_v48  ;;  %5578 = vst.msk [vmem:[#allocation4 + $0x2d8] sm:$0xff] %vm2814_vm15, %v5513_v9  ;;  %7550 = vrot.lane.b32.xlu0 %v7483_v54, %s9520_s10  ;;  %v6421_v42 = vpop.f32.mrf.mxu1  ;;  %v7939_v48 = vld [vmem:[#allocation4 + $0x58] sm:$0xff] }
 0x799   : > { %v5065_v43 = vpop.permute.xlu0 %5064  ;;  %6722 = vrot.lane.b32.xlu1 %v13241_v8, %s9519_s6  ;;  %v7484_v8 = vld [vmem:[#allocation3 + $0x87] sm:$0xff] }
 0x79a   : > { %5130 = vst.msk [vmem:[#allocation4 + $0x2d0] sm:$0xff] %vm3007_vm0, %v5065_v43  ;;  %v6528_v26 = vmax.f32 %v6402_v58, 0.0 }
 0x79b   : > { %v5705_v61 = vpop.permute.xlu1 %5704  ;;  %v13304_v49 = vld [vmem:[#allocation3 + $0x89] sm:$0xff]  ;;  %v13306_v46 = vld [vmem:[#allocation3 + $0x91] sm:$0xff] }
 0x79c   : > { %v5923_v47 = vld [vmem:[#allocation4 + $0x2b8] sm:$0xff]  ;;  %6560 = vst.msk [vmem:[#allocation3 + $0xa8] sm:$0xff] %vm243_vm10, %v6528_v26  ;;  %7742 = vrot.lane.b32.xlu0 %v13296_v45, %s9521_s11  ;;  %v7231_v19 = vld [vmem:[#allocation3 + $0x90] sm:$0xff]  ;;  %7900 = vst.msk [vmem:[#allocation4 + $0x70] sm:$0xff] %vm243_vm10, %v13304_v49 }
 0x79d   : > { %5770 = vst.msk [vmem:[#allocation4 + $0x2d8] sm:$0xff] %vm3007_vm0, %v5705_v61  ;;  %6914 = vrot.lane.b32.xlu1 %v13220_v16, %s9520_s10  ;;  %v5515_v34 = vpop.permute.xlu0 %5514  ;;  %6280 = vmatmul.mubr.f32.gmra.mxu0 %v5923_v47  ;;  %v6181_v1 = vpop.f32.mrf.mxu0  ;;  %v6593_v14 = vld [vmem:[#allocation3 + $0x8f] sm:$0xff] }
 0x79e   : > { %7901 = vst.msk [vmem:[#allocation4 + $0x88] sm:$0xff] %vm243_vm10, %v13306_v46  ;;  %7263 = vst.msk [vmem:[#allocation4 + $0xb0] sm:$0xff] %vm243_vm10, %v7231_v19  ;;  %v6182_v10 = vadd.f32 %v13080_v55, %v6181_v1  ;;  %v7485_v22 = vld [vmem:[#allocation3 + $0x8f] sm:$0xff] }
 0x79f   : > { %6625 = vst.msk [vmem:[#allocation4 + $0xd8] sm:$0xff] %vm243_vm10, %v6593_v14  ;;  %v5323_v16 = vpop.permute.xlu1 %5322  ;;  %v6183_v23 = vpop.f32.mrf.mxu0  ;;  %v13359_v50 = vld [vmem:[#allocation3 + $0x90] sm:$0xff] }
 0x7a0   : > { %v6407_v31 = vadd.f32 %v9220_v11, %v6182_v10  ;;  %5387 = vst.msk [vmem:[#allocation4 + $0x2f0] sm:$0xff] %vm2621_vm14, %v5323_v16  ;;  %7360 = vrot.lane.b32.xlu0 %v13256_v39, %s9519_s6  ;;  %v7933_v11 = vld [vmem:[#allocation4 + $0x28] sm:$0xff] }
 0x7a1   : > { %7106 = vrot.lane.b32.xlu1 %v7483_v54, %s9521_s11  ;;  %v5707_v37 = vpop.permute.xlu0 %5706  ;;  %5579 = vst.msk [vmem:[#allocation4 + $0x2f0] sm:$0xff] %vm2814_vm15, %v5515_v34  ;;  %v5926_v52 = vld [vmem:[#allocation4 + $0x2d0] sm:$0xff] }
 0x7a2   : > { %v6529_v3 = vmax.f32 %v6407_v31, 0.0  ;;  %5771 = vst.msk [vmem:[#allocation4 + $0x2f0] sm:$0xff] %vm3007_vm0, %v5707_v37  ;;  %v9229_v31 = vpop.f32.mrf.mxu1 }
 0x7a3   : > { %v4875_v7 = vpop.permute.xlu1 %4874  ;;  %v7232_v20 = vld [vmem:[#allocation3 + $0xa8] sm:$0xff]  ;;  %v7942_v9 = vld [vmem:[#allocation4 + $0x70] sm:$0xff] }
 0x7a4   : > { %v5927_v27 = vld [vmem:[#allocation4 + $0x2d8] sm:$0xff]  ;;  %6561 = vst.msk [vmem:[#allocation3 + $0xb0] sm:$0xff] %vm243_vm10, %v6529_v3  ;;  %7552 = vrot.lane.b32.xlu0 %v7484_v8, %s9520_s10  ;;  %7264 = vst.msk [vmem:[#allocation4 + $0xc8] sm:$0xff] %vm243_vm10, %v7232_v20  ;;  %v6594_v32 = vld [vmem:[#allocation3 + $0xa7] sm:$0xff] }
 0x7a5   : > { %4939 = vst.msk [vmem:[#allocation4 + $0x2e8] sm:$0xff] %vm2814_vm15, %v4875_v7  ;;  %6724 = vrot.lane.b32.xlu1 %v13274_v63, %s9519_s6  ;;  %6284 = vmatprep.mubr.f32.mxu0 %v5927_v27  ;;  %v6186_v18 = vpop.f32.mrf.mxu0  ;;  %v7486_v54 = vld [vmem:[#allocation3 + $0xa7] sm:$0xff] }
 0x7a6   : > { %6285 = vmatmul.mubr.f32.gmra.mxu0 %v5926_v52  ;;  %v6187_v29 = vadd.f32 %v13080_v55, %v6186_v18  ;;  %6626 = vst.msk [vmem:[#allocation4 + $0xf0] sm:$0xff] %vm243_vm10, %v6594_v32  ;;  %v7945_v58 = vld [vmem:[#allocation4 + $0x88] sm:$0xff] }
 0x7a7   : > { %v5067_v21 = vpop.permute.xlu1 %5066  ;;  %v6188_v24 = vpop.f32.mrf.mxu0  ;;  %v7678_v16 = vld [vmem:[#allocation3 + $0xa8] sm:$0xff] }
 0x7a8   : > { %v6412_v38 = vadd.f32 %v6411_v6, %v6187_v29  ;;  %5131 = vst.msk [vmem:[#allocation4 + $0x2e8] sm:$0xff] %vm3007_vm0, %v5067_v21  ;;  %7744 = vrot.lane.b32.xlu0 %v13332_v12, %s9521_s11 }
 0x7a9   : > { %6916 = vrot.lane.b32.xlu1 %v13256_v39, %s9520_s10  ;;  %v5930_v33 = vld [vmem:[#allocation4 + $0x2f0] sm:$0xff] }
 0x7aa   : > { %v6530_v13 = vmax.f32 %v6412_v38, 0.0  ;;  %6289 = vmatprep.mubr.f32.mxu0 %v5930_v33 }
 0x7ab   : > { %v13336_v17 = vld [vmem:[#allocation3 + $0xa9] sm:$0xff]  ;;  %v13338_v5 = vld [vmem:[#allocation3 + $0xb1] sm:$0xff]  ;;  %v6713_v60 = vpop.permute.xlu1 %6712 }
 0x7ac   : > { %6562 = vst.msk [vmem:[#allocation3 + $0xc8] sm:$0xff] %vm243_vm10, %v6530_v13  ;;  %7902 = vst.msk [vmem:[#allocation4 + $0xa0] sm:$0xff] %vm243_vm10, %v13336_v17  ;;  %v7233_v39 = vld [vmem:[#allocation3 + $0xb0] sm:$0xff]  ;;  %7362 = vrot.lane.b32.xlu0 %v13263_v4, %s9519_s6 }
 0x7ad   : > { %7108 = vrot.lane.b32.xlu1 %v7484_v8, %s9521_s11  ;;  %7903 = vst.msk [vmem:[#allocation4 + $0xb8] sm:$0xff] %vm243_vm10, %v13338_v5  ;;  %v6595_v30 = vld [vmem:[#allocation3 + $0xaf] sm:$0xff]  ;;  %v6191_v2 = vpop.f32.mrf.mxu0  ;;  %7265 = vst.msk [vmem:[#allocation4 + $0xe0] sm:$0xff] %vm243_vm10, %v7233_v39  ;;  %v6431_v8 = vpop.f32.mrf.mxu1 }
 0x7ae   : > { %6808 = vst.msk [vmem:[#allocation4] sm:$0xff] %vm2621_vm14, %v6713_v60  ;;  %v6192_v0 = vadd.f32 %v13080_v55, %v6191_v2  ;;  %v7487_v18 = vld [vmem:[#allocation3 + $0xaf] sm:$0xff] }
 0x7af   : > { %6627 = vst.msk [vmem:[#allocation4 + $0x108] sm:$0xff] %vm243_vm10, %v6595_v30  ;;  %v6193_v15 = vpop.f32.mrf.mxu0  ;;  %v5929_v36 = vld [vmem:[#allocation4 + $0x2e8] sm:$0xff]  ;;  %v6905_v59 = vpop.permute.xlu1 %6904  ;;  %v7679_v24 = vld [vmem:[#allocation3 + $0xb0] sm:$0xff] }
 0x7b0   : > { %v6417_v63 = vadd.f32 %v9223_v56, %v6192_v0  ;;  %6290 = vmatmul.mubr.f32.gmra.mxu0 %v5929_v36  ;;  %7000 = vst.msk [vmem:[#allocation4] sm:$0xff] %vm2814_vm15, %v6905_v59  ;;  %7554 = vrot.lane.b32.xlu0 %v7485_v22, %s9520_s10  ;;  %v9232_v59 = vpop.f32.mrf.mxu1 }
 0x7b1   : > { %6726 = vrot.lane.b32.xlu1 %v13296_v45, %s9519_s6  ;;  %9262 = vmatprep.mubr.msk.f32.mxu0 %vm243_vm10, %v7930_v25 }
 0x7b2   : > { %v6531_v51 = vmax.f32 %v6417_v63, 0.0 }
 0x7b3   : > { %v13363_v41 = vld [vmem:[#allocation3 + $0xc8] sm:$0xff]  ;;  %v7948_v61 = vld [vmem:[#allocation4 + $0xa0] sm:$0xff] }
 0x7b4   : > { %6563 = vst.msk [vmem:[#allocation3 + $0xd0] sm:$0xff] %vm243_vm10, %v6531_v51  ;;  %9263 = vmatmul.mubr.msk.f32.vlgmr.msra.gmra.mxu0 %vm243_vm10, %v7933_v11  ;;  %v6596_v35 = vld [vmem:[#allocation3 + $0xc7] sm:$0xff]  ;;  %7746 = vrot.lane.b32.xlu0 %v13359_v50, %s9521_s11  ;;  %7266 = vst.msk [vmem:[#allocation4 + $0xf8] sm:$0xff] %vm243_vm10, %v13363_v41  ;;  %v7951_v14 = vld [vmem:[#allocation4 + $0xb8] sm:$0xff]  ;;  %v6441_v51 = vpop.f32.mrf.mxu1 }
 0x7b5   : > { %6918 = vrot.lane.b32.xlu1 %v13263_v4, %s9520_s10  ;;  %v6196_v44 = vpop.f32.mrf.mxu0  ;;  %9265 = vmatprep.mubr.msk.f32.mxu0 %vm243_vm10, %v7936_v57  ;;  %6628 = vst.msk [vmem:[#allocation4 + $0x120] sm:$0xff] %vm243_vm10, %v6596_v35  ;;  %v7488_v2 = vld [vmem:[#allocation3 + $0xc7] sm:$0xff] }
 0x7b6   : > { %v6197_v62 = vadd.f32 %v13080_v55, %v6196_v44 }
 0x7b7   : > { %v6198_v28 = vpop.f32.mrf.mxu0 }
 0x7b8   : > { %v6422_v4 = vadd.f32 %v6421_v42, %v6197_v62  ;;  %9266 = vmatmul.mubr.msk.f32.gmra.mxu0 %vm243_vm10, %v7939_v48  ;;  %7364 = vrot.lane.b32.xlu0 %v13304_v49, %s9519_s6 }
 0x7b9   : > { %7110 = vrot.lane.b32.xlu1 %v7485_v22, %s9521_s11  ;;  %9268 = vmatprep.mubr.msk.f32.mxu0 %vm243_vm10, %v7942_v9 }
 0x7ba   : > { %v6532_v53 = vmax.f32 %v6422_v4, 0.0  ;;  %v13490_v4 = vld [vmem:[%s14317_s3 + $0x2] ss:$0 sm:$0xff] }
 0x7bb   : > { %v13377_v43 = vld [vmem:[#allocation3 + $0xc9] sm:$0xff]  ;;  %v13379_v26 = vld [vmem:[#allocation3 + $0xd1] sm:$0xff] }
 0x7bc   : > { %6564 = vst.msk [vmem:[#allocation3 + $0xe8] sm:$0xff] %vm243_vm10, %v6532_v53  ;;  %9269 = vmatmul.mubr.msk.f32.gmra.mxu0 %vm243_vm10, %v7945_v58  ;;  %7904 = vst.msk [vmem:[#allocation4 + $0xd0] sm:$0xff] %vm243_vm10, %v13377_v43  ;;  %v13389_v45 = vld [vmem:[#allocation3 + $0xd0] sm:$0xff]  ;;  %7556 = vrot.lane.b32.xlu0 %v7486_v54, %s9520_s10 }
 0x7bd   : > { %6728 = vrot.lane.b32.xlu1 %v13332_v12, %s9519_s6  ;;  %7905 = vst.msk [vmem:[#allocation4 + $0xe8] sm:$0xff] %vm243_vm10, %v13379_v26  ;;  %v6597_v47 = vld [vmem:[#allocation3 + $0xcf] sm:$0xff]  ;;  %v6201_v34 = vpop.f32.mrf.mxu0  ;;  %9271 = vmatprep.mubr.msk.f32.mxu0 %vm243_vm10, %v7948_v61  ;;  %7267 = vst.msk [vmem:[#allocation4 + $0x110] sm:$0xff] %vm243_vm10, %v13389_v45 }
 0x7be   : > { %6629 = vst.msk [vmem:[#allocation4 + $0x138] sm:$0xff] %vm243_vm10, %v6597_v47  ;;  %v6202_v19 = vadd.f32 %v13080_v55, %v6201_v34  ;;  %v7489_v42 = vld [vmem:[#allocation3 + $0xcf] sm:$0xff] }
 0x7bf   : > { %v6203_v1 = vpop.f32.mrf.mxu0 }
 0x7c0   : > { %v6427_v10 = vadd.f32 %v9226_v40, %v6202_v19  ;;  %9272 = vmatmul.mubr.msk.f32.gmra.mxu0 %vm243_vm10, %v7951_v14  ;;  %7748 = vrot.lane.b32.xlu0 %v7678_v16, %s9521_s11 }
 0x7c1   : > { %6920 = vrot.lane.b32.xlu1 %v13304_v49, %s9520_s10 }
 0x7c2   : > { %v6533_v23 = vmax.f32 %v6427_v10, 0.0 }
 0x7c3   : > { %v7954_v37 = vld [vmem:[#allocation4 + $0xd0] sm:$0xff]  ;;  %v13404_v3 = vld [vmem:[#allocation3 + $0xe8] sm:$0xff] }
 0x7c4   : > { %v7957_v56 = vld [vmem:[#allocation4 + $0xe8] sm:$0xff]  ;;  %6565 = vst.msk [vmem:[#allocation3 + $0xf0] sm:$0xff] %vm243_vm10, %v6533_v23  ;;  %9274 = vmatprep.mubr.msk.f32.mxu0 %vm243_vm10, %v7954_v37  ;;  %7366 = vrot.lane.b32.xlu0 %v13306_v46, %s9519_s6  ;;  %7268 = vst.msk [vmem:[#allocation4 + $0x128] sm:$0xff] %vm243_vm10, %v13404_v3 }
 0x7c5   : > { %7112 = vrot.lane.b32.xlu1 %v7486_v54, %s9521_s11  ;;  %v6598_v7 = vld [vmem:[#allocation3 + $0xe7] sm:$0xff]  ;;  %v6206_v27 = vpop.f32.mrf.mxu0  ;;  %9275 = vmatmul.mubr.msk.f32.gmra.mxu0 %vm243_vm10, %v7957_v56 }
 0x7c6   : > { %6630 = vst.msk [vmem:[#allocation4 + $0x150] sm:$0xff] %vm243_vm10, %v6598_v7  ;;  %v6207_v49 = vadd.f32 %v13080_v55, %v6206_v27  ;;  %v7490_v23 = vld [vmem:[#allocation3 + $0xe7] sm:$0xff] }
 0x7c7   : > { %v6208_v52 = vpop.f32.mrf.mxu0 }
 0x7c8   : > { %v6432_v20 = vadd.f32 %v6431_v8, %v6207_v49  ;;  %7558 = vrot.lane.b32.xlu0 %v7487_v18, %s9520_s10 }
 0x7c9   : > { %6730 = vrot.lane.b32.xlu1 %v13359_v50, %s9519_s6 }
 0x7ca   : > { %v6534_v32 = vmax.f32 %v6432_v20, 0.0 }
 0x7cb   : > { %v13416_v6 = vld [vmem:[#allocation3 + $0xe9] sm:$0xff]  ;;  %v13418_v29 = vld [vmem:[#allocation3 + $0xf1] sm:$0xff] }
 0x7cc   : > { %v13420_v21 = vld [vmem:[#allocation3 + $0xef] sm:$0xff]  ;;  %6566 = vst.msk [vmem:[#allocation3 + $0x108] sm:$0xff] %vm243_vm10, %v6534_v32  ;;  %7906 = vst.msk [vmem:[#allocation4 + $0x100] sm:$0xff] %vm243_vm10, %v13416_v6  ;;  %7750 = vrot.lane.b32.xlu0 %v7679_v24, %s9521_s11 }
 0x7cd   : > { %6922 = vrot.lane.b32.xlu1 %v13306_v46, %s9520_s10  ;;  %7907 = vst.msk [vmem:[#allocation4 + $0x118] sm:$0xff] %vm243_vm10, %v13418_v29  ;;  %v13429_v38 = vld [vmem:[#allocation3 + $0xf0] sm:$0xff]  ;;  %6631 = vst.msk [vmem:[#allocation4 + $0x168] sm:$0xff] %vm243_vm10, %v13420_v21 }
 0x7ce   : > { %7269 = vst.msk [vmem:[#allocation4 + $0x140] sm:$0xff] %vm243_vm10, %v13429_v38 }
 0x7d0   : > { %v6211_v12 = vpop.f32.mrf.mxu0  ;;  %7368 = vrot.lane.b32.xlu0 %v13336_v17, %s9519_s6 }
 0x7d1   : > { %7114 = vrot.lane.b32.xlu1 %v7487_v18, %s9521_s11  ;;  %v6212_v46 = vadd.f32 %v13080_v55, %v6211_v12 }
 0x7d2   : > { %v6213_v33 = vpop.f32.mrf.mxu0 }
 0x7d3   : > { %v6437_v13 = vadd.f32 %v9229_v31, %v6212_v46  ;;  %v7960_v60 = vld [vmem:[#allocation4 + $0x100] sm:$0xff]  ;;  %v13444_v0 = vld [vmem:[#allocation3 + $0x108] sm:$0xff] }
 0x7d4   : > { %v7963_v39 = vld [vmem:[#allocation4 + $0x118] sm:$0xff]  ;;  %v13440_v30 = vld [vmem:[#allocation3 + $0x107] sm:$0xff]  ;;  %9277 = vmatprep.mubr.msk.f32.mxu0 %vm243_vm10, %v7960_v60  ;;  %7560 = vrot.lane.b32.xlu0 %v7488_v2, %s9520_s10  ;;  %7270 = vst.msk [vmem:[#allocation4 + $0x158] sm:$0xff] %vm243_vm10, %v13444_v0 }
 0x7d5   : > { %6732 = vrot.lane.b32.xlu1 %v7678_v16, %s9519_s6  ;;  %6632 = vst.msk [vmem:[#allocation4 + $0x180] sm:$0xff] %vm243_vm10, %v13440_v30  ;;  %v6535_v15 = vmax.f32 %v6437_v13, 0.0  ;;  %9278 = vmatmul.mubr.msk.f32.gmra.mxu0 %vm243_vm10, %v7963_v39  ;;  %v9235_v16 = vpop.f32.mrf.mxu1 }
 0x7d6   : > { %v7097_v36 = vpop.permute.xlu1 %7096 }
 0x7d7   : > { %6567 = vst.msk [vmem:[#allocation3 + $0x110] sm:$0xff] %vm243_vm10, %v6535_v15  ;;  %v6451_v27 = vpop.f32.mrf.mxu1 }
 0x7d8   : > { %7192 = vst.msk [vmem:[#allocation4] sm:$0xff] %vm3007_vm0, %v7097_v36  ;;  %7752 = vrot.lane.b32.xlu0 %v13363_v41, %s9521_s11 }
 0x7d9   : > { %6924 = vrot.lane.b32.xlu1 %v13336_v17, %s9520_s10  ;;  %v6216_v63 = vpop.f32.mrf.mxu0 }
 0x7da   : > { %v6217_v22 = vadd.f32 %v13080_v55, %v6216_v63  ;;  %v6715_v25 = vpop.permute.xlu1 %6714 }
 0x7db   : > { %6809 = vst.msk [vmem:[#allocation4 + $0x18] sm:$0xff] %vm2621_vm14, %v6715_v25  ;;  %v6218_v40 = vpop.f32.mrf.mxu0 }
 0x7dc   : > { %v6442_v11 = vadd.f32 %v6441_v51, %v6217_v22  ;;  %7370 = vrot.lane.b32.xlu0 %v13338_v5, %s9519_s6 }
 0x7dd   : > { %7116 = vrot.lane.b32.xlu1 %v7488_v2, %s9521_s11 }
 0x7de   : > { %v6536_v57 = vmax.f32 %v6442_v11, 0.0  ;;  %v6907_v50 = vpop.permute.xlu1 %6906  ;;  %v7353_v17 = vpop.permute.xlu0 %7352  ;;  %v13463_v35 = vld [vmem:[#allocation3 + $0x109] sm:$0xff]  ;;  %v13465_v44 = vld [vmem:[#allocation3 + $0x111] sm:$0xff] }
 0x7df   : > { %7001 = vst.msk [vmem:[#allocation4 + $0x18] sm:$0xff] %vm2814_vm15, %v6907_v50  ;;  %v13473_v55 = vld [vmem:[#allocation3 + $0x10f] sm:$0xff]  ;;  %v7928_v12 = vld [vmem:[#allocation4] sm:$0xff]  ;;  %v9238_v50 = vpop.f32.mrf.mxu1 }
 0x7e0   : > { %7448 = vst.msk [vmem:[#allocation4 + $0x8] sm:$0xff] %vm2621_vm14, %v7353_v17  ;;  %v13475_v62 = vld [vmem:[#allocation3 + $0x110] sm:$0xff]  ;;  %7562 = vrot.lane.b32.xlu0 %v7489_v42, %s9520_s10 }
 0x7e1   : > { %7908 = vst.msk [vmem:[#allocation4 + $0x130] sm:$0xff] %vm243_vm10, %v13463_v35  ;;  %7909 = vst.msk [vmem:[#allocation4 + $0x148] sm:$0xff] %vm243_vm10, %v13465_v44  ;;  %6734 = vrot.lane.b32.xlu1 %v7679_v24, %s9519_s6 }
 0x7e2   : > { %6568 = vst.msk [vmem:[#allocation3 + $0x128] sm:$0xff] %vm243_vm10, %v6536_v57  ;;  %7271 = vst.msk [vmem:[#allocation4 + $0x170] sm:$0xff] %vm243_vm10, %v13475_v62  ;;  %v7099_v28 = vpop.permute.xlu1 %7098 }
 0x7e3   : > { %6633 = vst.msk [vmem:[#allocation4 + $0x198] sm:$0xff] %vm243_vm10, %v13473_v55 }
 0x7e4   : > { %7193 = vst.msk [vmem:[#allocation4 + $0x18] sm:$0xff] %vm3007_vm0, %v7099_v28  ;;  %v6221_v48 = vpop.f32.mrf.mxu0  ;;  %7754 = vrot.lane.b32.xlu0 %v13389_v45, %s9521_s11 }
 0x7e5   : > { %6926 = vrot.lane.b32.xlu1 %v13338_v5, %s9520_s10  ;;  %v6222_v9 = vadd.f32 %v13490_v4, %v6221_v48 }
 0x7e6   : > { %v6717_v53 = vpop.permute.xlu1 %6716  ;;  %v7545_v54 = vpop.permute.xlu0 %7544 }
 0x7e7   : > { %v6447_v47 = vadd.f32 %v9232_v59, %v6222_v9  ;;  %6810 = vst.msk [vmem:[#allocation4 + $0x30] sm:$0xff] %vm2621_vm14, %v6717_v53  ;;  %v6223_v5 = vpop.f32.mrf.mxu0  ;;  %v6461_v9 = vpop.f32.mrf.mxu1 }
 0x7e8   : > { %v7966_v58 = vld [vmem:[#allocation4 + $0x130] sm:$0xff]  ;;  %v7969_v61 = vld [vmem:[#allocation4 + $0x148] sm:$0xff]  ;;  %7640 = vst.msk [vmem:[#allocation4 + $0x8] sm:$0xff] %vm2814_vm15, %v7545_v54  ;;  %7372 = vrot.lane.b32.xlu0 %v13377_v43, %s9519_s6 }
 0x7e9   : > { %9280 = vmatprep.mubr.msk.f32.mxu0 %vm243_vm10, %v7966_v58  ;;  %v13498_v34 = vld [vmem:[#allocation3 + $0x127] sm:$0xff]  ;;  %7118 = vrot.lane.b32.xlu1 %v7489_v42, %s9521_s11  ;;  %v6537_v1 = vmax.f32 %v6447_v47, 0.0 }
 0x7ea   : > { %v13500_v19 = vld [vmem:[#allocation3 + $0x128] sm:$0xff]  ;;  %9281 = vmatmul.mubr.msk.f32.gmra.mxu0 %vm243_vm10, %v7969_v61  ;;  %6634 = vst.msk [vmem:[#allocation4 + $0x1b0] sm:$0xff] %vm243_vm10, %v13498_v34  ;;  %v6909_v14 = vpop.permute.xlu1 %6908  ;;  %v7737_v10 = vpop.permute.xlu0 %7736 }
 0x7eb   : > { %7272 = vst.msk [vmem:[#allocation4 + $0x188] sm:$0xff] %vm243_vm10, %v13500_v19  ;;  %6569 = vst.msk [vmem:[#allocation3 + $0x130] sm:$0xff] %vm243_vm10, %v6537_v1 }
 0x7ec   : > { %7002 = vst.msk [vmem:[#allocation4 + $0x30] sm:$0xff] %vm2814_vm15, %v6909_v14  ;;  %7564 = vrot.lane.b32.xlu0 %v7490_v23, %s9520_s10 }
 0x7ed   : > { %7832 = vst.msk [vmem:[#allocation4 + $0x8] sm:$0xff] %vm3007_vm0, %v7737_v10  ;;  %6736 = vrot.lane.b32.xlu1 %v13363_v41, %s9519_s6  ;;  %v6226_v31 = vpop.f32.mrf.mxu0 }
 0x7ee   : > { %v6227_v37 = vadd.f32 %v13490_v4, %v6226_v31  ;;  %v7101_v56 = vpop.permute.xlu1 %7100  ;;  %v7355_v7 = vpop.permute.xlu0 %7354 }
 0x7ef   : > { %7194 = vst.msk [vmem:[#allocation4 + $0x30] sm:$0xff] %vm3007_vm0, %v7101_v56  ;;  %v6228_v49 = vpop.f32.mrf.mxu0 }
 0x7f0   : > { %7449 = vst.msk [vmem:[#allocation4 + $0x20] sm:$0xff] %vm2621_vm14, %v7355_v7  ;;  %v6452_v8 = vadd.f32 %v6451_v27, %v6227_v37  ;;  %7756 = vrot.lane.b32.xlu0 %v13404_v3, %s9521_s11 }
 0x7f1   : > { %6928 = vrot.lane.b32.xlu1 %v13377_v43, %s9520_s10 }
 0x7f2   : > { %v6538_v41 = vmax.f32 %v6452_v8, 0.0  ;;  %v6719_v52 = vpop.permute.xlu1 %6718  ;;  %v7547_v20 = vpop.permute.xlu0 %7546  ;;  %v13523_v32 = vld [vmem:[#allocation3 + $0x129] sm:$0xff]  ;;  %v13525_v24 = vld [vmem:[#allocation3 + $0x131] sm:$0xff] }
 0x7f3   : > { %6811 = vst.msk [vmem:[#allocation4 + $0x48] sm:$0xff] %vm2621_vm14, %v6719_v52  ;;  %v13533_v43 = vld [vmem:[#allocation3 + $0x12f] sm:$0xff]  ;;  %v9241_v52 = vpop.f32.mrf.mxu1 }
 0x7f4   : > { %v7929_v18 = vld [vmem:[#allocation4 + $0x8] sm:$0xff]  ;;  %7641 = vst.msk [vmem:[#allocation4 + $0x20] sm:$0xff] %vm2814_vm15, %v7547_v20  ;;  %v13535_v46 = vld [vmem:[#allocation3 + $0x130] sm:$0xff]  ;;  %7374 = vrot.lane.b32.xlu0 %v13379_v26, %s9519_s6 }
 0x7f5   : > { %8226 = vmatprep.mubr.f32.mxu1 %v7929_v18  ;;  %7910 = vst.msk [vmem:[#allocation4 + $0x160] sm:$0xff] %vm243_vm10, %v13523_v32  ;;  %7911 = vst.msk [vmem:[#allocation4 + $0x178] sm:$0xff] %vm243_vm10, %v13525_v24  ;;  %7120 = vrot.lane.b32.xlu1 %v7490_v23, %s9521_s11 }
 0x7f6   : > { %6570 = vst.msk [vmem:[#allocation3 + $0x148] sm:$0xff] %vm243_vm10, %v6538_v41  ;;  %8227 = vmatmul.mubr.f32.vlgmr.msra.gmra.mxu1 %v7928_v12  ;;  %7273 = vst.msk [vmem:[#allocation4 + $0x1a0] sm:$0xff] %vm243_vm10, %v13535_v46  ;;  %v6911_v33 = vpop.permute.xlu1 %6910  ;;  %v7739_v13 = vpop.permute.xlu0 %7738  ;;  %v7934_v23 = vld [vmem:[#allocation4 + $0x30] sm:$0xff] }
 0x7f7   : > { %6635 = vst.msk [vmem:[#allocation4 + $0x1c8] sm:$0xff] %vm243_vm10, %v13533_v43 }
 0x7f8   : > { %7003 = vst.msk [vmem:[#allocation4 + $0x48] sm:$0xff] %vm2814_vm15, %v6911_v33  ;;  %v6231_v60 = vpop.f32.mrf.mxu0  ;;  %7566 = vrot.lane.b32.xlu0 %v13420_v21, %s9520_s10  ;;  %v6471_v33 = vpop.f32.mrf.mxu1 }
 0x7f9   : > { %7833 = vst.msk [vmem:[#allocation4 + $0x20] sm:$0xff] %vm3007_vm0, %v7739_v13  ;;  %6738 = vrot.lane.b32.xlu1 %v13389_v45, %s9519_s6  ;;  %v6232_v39 = vadd.f32 %v13490_v4, %v6231_v60 }
 0x7fa   : > { %v7103_v2 = vpop.permute.xlu1 %7102  ;;  %v7357_v15 = vpop.permute.xlu0 %7356 }
 0x7fb   : > { %v6457_v63 = vadd.f32 %v9235_v16, %v6232_v39  ;;  %7195 = vst.msk [vmem:[#allocation4 + $0x48] sm:$0xff] %vm3007_vm0, %v7103_v2  ;;  %v6233_v22 = vpop.f32.mrf.mxu0 }
 0x7fc   : > { %v7972_v36 = vld [vmem:[#allocation4 + $0x160] sm:$0xff]  ;;  %v7975_v59 = vld [vmem:[#allocation4 + $0x178] sm:$0xff]  ;;  %7450 = vst.msk [vmem:[#allocation4 + $0x38] sm:$0xff] %vm2621_vm14, %v7357_v15  ;;  %7758 = vrot.lane.b32.xlu0 %v13429_v38, %s9521_s11 }
 0x7fd   : > { %9283 = vmatprep.mubr.msk.f32.mxu0 %vm243_vm10, %v7972_v36  ;;  %v13555_v25 = vld [vmem:[#allocation3 + $0x147] sm:$0xff]  ;;  %6930 = vrot.lane.b32.xlu1 %v13379_v26, %s9520_s10  ;;  %v6539_v51 = vmax.f32 %v6457_v63, 0.0  ;;  %v7931_v26 = vld [vmem:[#allocation4 + $0x18] sm:$0xff] }
 0x7fe   : > { %v13557_v45 = vld [vmem:[#allocation3 + $0x148] sm:$0xff]  ;;  %9284 = vmatmul.mubr.msk.f32.gmra.mxu0 %vm243_vm10, %v7975_v59  ;;  %6636 = vst.msk [vmem:[#allocation4 + $0x1e0] sm:$0xff] %vm243_vm10, %v13555_v25  ;;  %v6721_v40 = vpop.permute.xlu1 %6720  ;;  %v7549_v11 = vpop.permute.xlu0 %7548 }
 0x7ff   : > { %7274 = vst.msk [vmem:[#allocation4 + $0x1b8] sm:$0xff] %vm243_vm10, %v13557_v45  ;;  %6571 = vst.msk [vmem:[#allocation3 + $0x150] sm:$0xff] %vm243_vm10, %v6539_v51 }
 0x800   : > { %v7932_v57 = vld [vmem:[#allocation4 + $0x20] sm:$0xff]  ;;  %6812 = vst.msk [vmem:[#allocation4 + $0x60] sm:$0xff] %vm2621_vm14, %v6721_v40  ;;  %7376 = vrot.lane.b32.xlu0 %v13416_v6, %s9519_s6 }
 0x801   : > { %7642 = vst.msk [vmem:[#allocation4 + $0x38] sm:$0xff] %vm2814_vm15, %v7549_v11  ;;  %8231 = vmatprep.mubr.f32.mxu1 %v7932_v57  ;;  %7122 = vrot.lane.b32.xlu1 %v13420_v21, %s9521_s11  ;;  %v6236_v17 = vpop.f32.mrf.mxu0 }
 0x802   : > { %8232 = vmatmul.mubr.f32.gmra.mxu1 %v7931_v26  ;;  %v6237_v42 = vadd.f32 %v13490_v4, %v6236_v17  ;;  %v6913_v28 = vpop.permute.xlu1 %6912  ;;  %v7741_v48 = vpop.permute.xlu0 %7740  ;;  %v7937_v36 = vld [vmem:[#allocation4 + $0x48] sm:$0xff] }
 0x803   : > { %7004 = vst.msk [vmem:[#allocation4 + $0x60] sm:$0xff] %vm2814_vm15, %v6913_v28  ;;  %v6238_v53 = vpop.f32.mrf.mxu0 }
 0x804   : > { %7834 = vst.msk [vmem:[#allocation4 + $0x38] sm:$0xff] %vm3007_vm0, %v7741_v48  ;;  %v6462_v54 = vadd.f32 %v6461_v9, %v6237_v42  ;;  %7568 = vrot.lane.b32.xlu0 %v13440_v30, %s9520_s10 }
 0x805   : > { %6740 = vrot.lane.b32.xlu1 %v13404_v3, %s9519_s6 }
 0x806   : > { %v6540_v21 = vmax.f32 %v6462_v54, 0.0  ;;  %v7359_v58 = vpop.permute.xlu0 %7358  ;;  %v7105_v61 = vpop.permute.xlu1 %7104  ;;  %v13582_v47 = vld [vmem:[#allocation3 + $0x149] sm:$0xff]  ;;  %v13584_v5 = vld [vmem:[#allocation3 + $0x151] sm:$0xff] }
 0x807   : > { %v13586_v1 = vld [vmem:[#allocation3 + $0x14f] sm:$0xff]  ;;  %7451 = vst.msk [vmem:[#allocation4 + $0x50] sm:$0xff] %vm2621_vm14, %v7359_v58 }
 0x808   : > { %7196 = vst.msk [vmem:[#allocation4 + $0x60] sm:$0xff] %vm3007_vm0, %v7105_v61  ;;  %v13594_v3 = vld [vmem:[#allocation3 + $0x150] sm:$0xff]  ;;  %7760 = vrot.lane.b32.xlu0 %v13444_v0, %s9521_s11 }
 0x809   : > { %7912 = vst.msk [vmem:[#allocation4 + $0x190] sm:$0xff] %vm243_vm10, %v13582_v47  ;;  %7913 = vst.msk [vmem:[#allocation4 + $0x1a8] sm:$0xff] %vm243_vm10, %v13584_v5  ;;  %6932 = vrot.lane.b32.xlu1 %v13416_v6, %s9520_s10 }
 0x80a   : > { %6637 = vst.msk [vmem:[#allocation4 + $0x1f8] sm:$0xff] %vm243_vm10, %v13586_v1  ;;  %6572 = vst.msk [vmem:[#allocation3 + $0x168] sm:$0xff] %vm243_vm10, %v6540_v21  ;;  %v7551_v14 = vpop.permute.xlu0 %7550 }
 0x80b   : > { %7275 = vst.msk [vmem:[#allocation4 + $0x1d0] sm:$0xff] %vm243_vm10, %v13594_v3  ;;  %v6723_v10 = vpop.permute.xlu1 %6722  ;;  %v7935_v16 = vld [vmem:[#allocation4 + $0x38] sm:$0xff] }
 0x80c   : > { %7643 = vst.msk [vmem:[#allocation4 + $0x50] sm:$0xff] %vm2814_vm15, %v7551_v14  ;;  %8236 = vmatprep.mubr.f32.mxu1 %v7935_v16  ;;  %v6241_v31 = vpop.f32.mrf.mxu0  ;;  %7378 = vrot.lane.b32.xlu0 %v13418_v29, %s9519_s6  ;;  %v9244_v14 = vpop.f32.mrf.mxu1 }
 0x80d   : > { %6813 = vst.msk [vmem:[#allocation4 + $0x78] sm:$0xff] %vm2621_vm14, %v6723_v10  ;;  %8237 = vmatmul.mubr.f32.gmra.mxu1 %v7934_v23  ;;  %7124 = vrot.lane.b32.xlu1 %v13440_v30, %s9521_s11  ;;  %v6242_v6 = vadd.f32 %v13490_v4, %v6241_v31 }
 0x80e   : > { %v7743_v37 = vpop.permute.xlu0 %7742  ;;  %v6243_v8 = vpop.f32.mrf.mxu0 }
 0x80f   : > { %v6915_v56 = vpop.permute.xlu1 %6914  ;;  %v6467_v49 = vadd.f32 %v9238_v50, %v6242_v6  ;;  %7835 = vst.msk [vmem:[#allocation4 + $0x50] sm:$0xff] %vm3007_vm0, %v7743_v37  ;;  %v6481_v31 = vpop.f32.mrf.mxu1 }
 0x810   : > { %v7978_v7 = vld [vmem:[#allocation4 + $0x190] sm:$0xff]  ;;  %v7981_v27 = vld [vmem:[#allocation4 + $0x1a8] sm:$0xff]  ;;  %7005 = vst.msk [vmem:[#allocation4 + $0x78] sm:$0xff] %vm2814_vm15, %v6915_v56  ;;  %7570 = vrot.lane.b32.xlu0 %v13473_v55, %s9520_s10 }
 0x811   : > { %9286 = vmatprep.mubr.msk.f32.mxu0 %vm243_vm10, %v7978_v7  ;;  %v13615_v41 = vld [vmem:[#allocation3 + $0x167] sm:$0xff]  ;;  %6742 = vrot.lane.b32.xlu1 %v13429_v38, %s9519_s6  ;;  %v6541_v20 = vmax.f32 %v6467_v49, 0.0 }
 0x812   : > { %v13617_v30 = vld [vmem:[#allocation3 + $0x168] sm:$0xff]  ;;  %9287 = vmatmul.mubr.msk.f32.gmra.mxu0 %vm243_vm10, %v7981_v27  ;;  %6638 = vst.msk [vmem:[#allocation4 + $0x210] sm:$0xff] %vm243_vm10, %v13615_v41  ;;  %v7361_v18 = vpop.permute.xlu0 %7360 }
 0x813   : > { %7276 = vst.msk [vmem:[#allocation4 + $0x1e8] sm:$0xff] %vm243_vm10, %v13617_v30  ;;  %v7107_v12 = vpop.permute.xlu1 %7106  ;;  %6573 = vst.msk [vmem:[#allocation3 + $0x170] sm:$0xff] %vm243_vm10, %v6541_v20 }
 0x814   : > { %7452 = vst.msk [vmem:[#allocation4 + $0x68] sm:$0xff] %vm2621_vm14, %v7361_v18  ;;  %7762 = vrot.lane.b32.xlu0 %v13475_v62, %s9521_s11 }
 0x815   : > { %7197 = vst.msk [vmem:[#allocation4 + $0x78] sm:$0xff] %vm3007_vm0, %v7107_v12  ;;  %6934 = vrot.lane.b32.xlu1 %v13418_v29, %s9520_s10  ;;  %v6246_v38 = vpop.f32.mrf.mxu0 }
 0x816   : > { %v6247_v13 = vadd.f32 %v13490_v4, %v6246_v38  ;;  %v7938_v39 = vld [vmem:[#allocation4 + $0x50] sm:$0xff]  ;;  %v7553_v2 = vpop.permute.xlu0 %7552 }
 0x817   : > { %v6725_v60 = vpop.permute.xlu1 %6724  ;;  %v6248_v15 = vpop.f32.mrf.mxu0  ;;  %8241 = vmatprep.mubr.f32.mxu1 %v7938_v39  ;;  %7644 = vst.msk [vmem:[#allocation4 + $0x68] sm:$0xff] %vm2814_vm15, %v7553_v2 }
 0x818   : > { %6814 = vst.msk [vmem:[#allocation4 + $0x90] sm:$0xff] %vm2621_vm14, %v6725_v60  ;;  %v6472_v59 = vadd.f32 %v6471_v33, %v6247_v13  ;;  %8242 = vmatmul.mubr.f32.gmra.mxu1 %v7937_v36  ;;  %7380 = vrot.lane.b32.xlu0 %v13463_v35, %s9519_s6 }
 0x819   : > { %7126 = vrot.lane.b32.xlu1 %v13473_v55, %s9521_s11 }
 0x81a   : > { %v6542_v29 = vmax.f32 %v6472_v59, 0.0  ;;  %v13642_v22 = vld [vmem:[#allocation3 + $0x169] sm:$0xff]  ;;  %v13644_v51 = vld [vmem:[#allocation3 + $0x171] sm:$0xff]  ;;  %v7745_v40 = vpop.permute.xlu0 %7744 }
 0x81b   : > { %v6917_v63 = vpop.permute.xlu1 %6916  ;;  %7914 = vst.msk [vmem:[#allocation4 + $0x1c0] sm:$0xff] %vm243_vm10, %v13642_v22  ;;  %7915 = vst.msk [vmem:[#allocation4 + $0x1d8] sm:$0xff] %vm243_vm10, %v13644_v51  ;;  %v13651_v11 = vld [vmem:[#allocation3 + $0x16f] sm:$0xff] }
 0x81c   : > { %7006 = vst.msk [vmem:[#allocation4 + $0x90] sm:$0xff] %vm2814_vm15, %v6917_v63  ;;  %v13653_v55 = vld [vmem:[#allocation3 + $0x170] sm:$0xff]  ;;  %7572 = vrot.lane.b32.xlu0 %v13498_v34, %s9520_s10 }
 0x81d   : > { %6574 = vst.msk [vmem:[#allocation3 + $0x188] sm:$0xff] %vm243_vm10, %v6542_v29  ;;  %6744 = vrot.lane.b32.xlu1 %v13444_v0, %s9519_s6  ;;  %7277 = vst.msk [vmem:[#allocation4 + $0x200] sm:$0xff] %vm243_vm10, %v13653_v55 }
 0x81e   : > { %7836 = vst.msk [vmem:[#allocation4 + $0x68] sm:$0xff] %vm3007_vm0, %v7745_v40  ;;  %v7363_v50 = vpop.permute.xlu0 %7362 }
 0x81f   : > { %6639 = vst.msk [vmem:[#allocation4 + $0x228] sm:$0xff] %vm243_vm10, %v13651_v11  ;;  %v7109_v57 = vpop.permute.xlu1 %7108 }
 0x820   : > { %7198 = vst.msk [vmem:[#allocation4 + $0x90] sm:$0xff] %vm3007_vm0, %v7109_v57  ;;  %v6251_v26 = vpop.f32.mrf.mxu0  ;;  %7764 = vrot.lane.b32.xlu0 %v13500_v19, %s9521_s11 }
 0x821   : > { %7453 = vst.msk [vmem:[#allocation4 + $0x80] sm:$0xff] %vm2621_vm14, %v7363_v50  ;;  %6936 = vrot.lane.b32.xlu1 %v13463_v35, %s9520_s10  ;;  %v6252_v0 = vadd.f32 %v13490_v4, %v6251_v26  ;;  %v7940_v35 = vld [vmem:[#allocation4 + $0x60] sm:$0xff]  ;;  %v9247_v26 = vpop.f32.mrf.mxu1 }
 0x822   : > { %v6253_v17 = vpop.f32.mrf.mxu0  ;;  %v7984_v28 = vld [vmem:[#allocation4 + $0x1c0] sm:$0xff]  ;;  %v7987_v48 = vld [vmem:[#allocation4 + $0x1d8] sm:$0xff]  ;;  %v7555_v53 = vpop.permute.xlu0 %7554 }
 0x823   : > { %v6727_v42 = vpop.permute.xlu1 %6726  ;;  %v6477_v9 = vadd.f32 %v9241_v52, %v6252_v0  ;;  %9289 = vmatprep.mubr.msk.f32.mxu0 %vm243_vm10, %v7984_v28  ;;  %7645 = vst.msk [vmem:[#allocation4 + $0x80] sm:$0xff] %vm2814_vm15, %v7555_v53 }
 0x824   : > { %6815 = vst.msk [vmem:[#allocation4 + $0xa8] sm:$0xff] %vm2621_vm14, %v6727_v42  ;;  %v13674_v21 = vld [vmem:[#allocation3 + $0x187] sm:$0xff]  ;;  %9290 = vmatmul.mubr.msk.f32.gmra.mxu0 %vm243_vm10, %v7987_v48  ;;  %7382 = vrot.lane.b32.xlu0 %v13465_v44, %s9519_s6  ;;  %v6491_v48 = vpop.f32.mrf.mxu1 }
 0x825   : > { %v7941_v54 = vld [vmem:[#allocation4 + $0x68] sm:$0xff]  ;;  %6640 = vst.msk [vmem:[#allocation4 + $0x240] sm:$0xff] %vm243_vm10, %v13674_v21  ;;  %v6543_v61 = vmax.f32 %v6477_v9, 0.0  ;;  %7128 = vrot.lane.b32.xlu1 %v13498_v34, %s9521_s11 }
 0x826   : > { %v13676_v58 = vld [vmem:[#allocation3 + $0x188] sm:$0xff]  ;;  %8246 = vmatprep.mubr.f32.mxu1 %v7941_v54  ;;  %v7747_v16 = vpop.permute.xlu0 %7746 }
 0x827   : > { %7278 = vst.msk [vmem:[#allocation4 + $0x218] sm:$0xff] %vm243_vm10, %v13676_v58  ;;  %8247 = vmatmul.mubr.f32.gmra.mxu1 %v7940_v35  ;;  %v6919_v10 = vpop.permute.xlu1 %6918  ;;  %6575 = vst.msk [vmem:[#allocation3 + $0x190] sm:$0xff] %vm243_vm10, %v6543_v61  ;;  %v7946_v0 = vld [vmem:[#allocation4 + $0x90] sm:$0xff] }
 0x828   : > { %7007 = vst.msk [vmem:[#allocation4 + $0xa8] sm:$0xff] %vm2814_vm15, %v6919_v10  ;;  %7574 = vrot.lane.b32.xlu0 %v13533_v43, %s9520_s10 }
 0x829   : > { %7837 = vst.msk [vmem:[#allocation4 + $0x80] sm:$0xff] %vm3007_vm0, %v7747_v16  ;;  %v6256_v23 = vpop.f32.mrf.mxu0  ;;  %6746 = vrot.lane.b32.xlu1 %v13475_v62, %s9519_s6 }
 0x82a   : > { %v6257_v6 = vadd.f32 %v13490_v4, %v6256_v23  ;;  %v7365_v34 = vpop.permute.xlu0 %7364 }
 0x82b   : > { %v7111_v37 = vpop.permute.xlu1 %7110  ;;  %v6258_v56 = vpop.f32.mrf.mxu0  ;;  %7454 = vst.msk [vmem:[#allocation4 + $0x98] sm:$0xff] %vm2621_vm14, %v7365_v34 }
 0x82c   : > { %7199 = vst.msk [vmem:[#allocation4 + $0xa8] sm:$0xff] %vm3007_vm0, %v7111_v37  ;;  %v6482_v7 = vadd.f32 %v6481_v31, %v6257_v6  ;;  %7766 = vrot.lane.b32.xlu0 %v13535_v46, %s9521_s11 }
 0x82d   : > { %6938 = vrot.lane.b32.xlu1 %v13465_v44, %s9520_s10  ;;  %v7943_v44 = vld [vmem:[#allocation4 + $0x78] sm:$0xff] }
 0x82e   : > { %v6544_v27 = vmax.f32 %v6482_v7, 0.0  ;;  %v13702_v8 = vld [vmem:[#allocation3 + $0x189] sm:$0xff]  ;;  %v13704_v62 = vld [vmem:[#allocation3 + $0x191] sm:$0xff]  ;;  %v7557_v20 = vpop.permute.xlu0 %7556 }
 0x82f   : > { %v6729_v49 = vpop.permute.xlu1 %6728  ;;  %v13706_v52 = vld [vmem:[#allocation3 + $0x18f] sm:$0xff]  ;;  %7916 = vst.msk [vmem:[#allocation4 + $0x1f0] sm:$0xff] %vm243_vm10, %v13702_v8  ;;  %7917 = vst.msk [vmem:[#allocation4 + $0x208] sm:$0xff] %vm243_vm10, %v13704_v62 }
 0x830   : > { %6816 = vst.msk [vmem:[#allocation4 + $0xc0] sm:$0xff] %vm2621_vm14, %v6729_v49  ;;  %v7944_v18 = vld [vmem:[#allocation4 + $0x80] sm:$0xff]  ;;  %v13713_v12 = vld [vmem:[#allocation3 + $0x190] sm:$0xff]  ;;  %7384 = vrot.lane.b32.xlu0 %v13523_v32, %s9519_s6 }
 0x831   : > { %6641 = vst.msk [vmem:[#allocation4 + $0x258] sm:$0xff] %vm243_vm10, %v13706_v52  ;;  %6576 = vst.msk [vmem:[#allocation3 + $0x1a8] sm:$0xff] %vm243_vm10, %v6544_v27  ;;  %8251 = vmatprep.mubr.f32.mxu1 %v7944_v18  ;;  %7130 = vrot.lane.b32.xlu1 %v13533_v43, %s9521_s11 }
 0x832   : > { %7646 = vst.msk [vmem:[#allocation4 + $0x98] sm:$0xff] %vm2814_vm15, %v7557_v20  ;;  %8252 = vmatmul.mubr.f32.gmra.mxu1 %v7943_v44  ;;  %v7749_v33 = vpop.permute.xlu0 %7748 }
 0x833   : > { %7279 = vst.msk [vmem:[#allocation4 + $0x230] sm:$0xff] %vm243_vm10, %v13713_v12  ;;  %v6921_v38 = vpop.permute.xlu1 %6920  ;;  %v7949_v6 = vld [vmem:[#allocation4 + $0xa8] sm:$0xff] }
 0x834   : > { %7008 = vst.msk [vmem:[#allocation4 + $0xc0] sm:$0xff] %vm2814_vm15, %v6921_v38  ;;  %7576 = vrot.lane.b32.xlu0 %v13555_v25, %s9520_s10 }
 0x835   : > { %7838 = vst.msk [vmem:[#allocation4 + $0x98] sm:$0xff] %vm3007_vm0, %v7749_v33  ;;  %v6261_v13 = vpop.f32.mrf.mxu0  ;;  %6748 = vrot.lane.b32.xlu1 %v13500_v19, %s9519_s6 }
 0x836   : > { %v6262_v60 = vadd.f32 %v13490_v4, %v6261_v13  ;;  %v7990_v2 = vld [vmem:[#allocation4 + $0x1f0] sm:$0xff]  ;;  %v7993_v15 = vld [vmem:[#allocation4 + $0x208] sm:$0xff]  ;;  %v7367_v43 = vpop.permute.xlu0 %7366  ;;  %v9250_v13 = vpop.f32.mrf.mxu1 }
 0x837   : > { %v7113_v39 = vpop.permute.xlu1 %7112  ;;  %v6263_v36 = vpop.f32.mrf.mxu0  ;;  %9292 = vmatprep.mubr.msk.f32.mxu0 %vm243_vm10, %v7990_v2  ;;  %7455 = vst.msk [vmem:[#allocation4 + $0xb0] sm:$0xff] %vm2621_vm14, %v7367_v43 }
 0x838   : > { %7200 = vst.msk [vmem:[#allocation4 + $0xc0] sm:$0xff] %vm3007_vm0, %v7113_v39  ;;  %v13734_v59 = vld [vmem:[#allocation3 + $0x1a7] sm:$0xff]  ;;  %v6487_v63 = vadd.f32 %v9244_v14, %v6262_v60  ;;  %9293 = vmatmul.mubr.msk.f32.gmra.mxu0 %vm243_vm10, %v7993_v15  ;;  %7768 = vrot.lane.b32.xlu0 %v13557_v45, %s9521_s11  ;;  %v6501_v36 = vpop.f32.mrf.mxu1 }
 0x839   : > { %v13736_v29 = vld [vmem:[#allocation3 + $0x1a8] sm:$0xff]  ;;  %6642 = vst.msk [vmem:[#allocation4 + $0x270] sm:$0xff] %vm243_vm10, %v13734_v59  ;;  %6940 = vrot.lane.b32.xlu1 %v13523_v32, %s9520_s10 }
 0x83a   : > { %7280 = vst.msk [vmem:[#allocation4 + $0x248] sm:$0xff] %vm243_vm10, %v13736_v29  ;;  %v6545_v19 = vmax.f32 %v6487_v63, 0.0  ;;  %v7559_v57 = vpop.permute.xlu0 %7558 }
 0x83b   : > { %v6731_v40 = vpop.permute.xlu1 %6730  ;;  %7647 = vst.msk [vmem:[#allocation4 + $0xb0] sm:$0xff] %vm2814_vm15, %v7559_v57 }
 0x83c   : > { %6817 = vst.msk [vmem:[#allocation4 + $0xd8] sm:$0xff] %vm2621_vm14, %v6731_v40  ;;  %v7947_v50 = vld [vmem:[#allocation4 + $0x98] sm:$0xff]  ;;  %7386 = vrot.lane.b32.xlu0 %v13525_v24, %s9519_s6 }
 0x83d   : > { %6577 = vst.msk [vmem:[#allocation3 + $0x1b0] sm:$0xff] %vm243_vm10, %v6545_v19  ;;  %8256 = vmatprep.mubr.f32.mxu1 %v7947_v50  ;;  %7132 = vrot.lane.b32.xlu1 %v13555_v25, %s9521_s11 }
 0x83e   : > { %8257 = vmatmul.mubr.f32.gmra.mxu1 %v7946_v0  ;;  %v6266_v32 = vpop.f32.mrf.mxu0  ;;  %v7751_v28 = vpop.permute.xlu0 %7750 }
 0x83f   : > { %v6923_v17 = vpop.permute.xlu1 %6922  ;;  %v6267_v42 = vadd.f32 %v13490_v4, %v6266_v32  ;;  %7839 = vst.msk [vmem:[#allocation4 + $0xb0] sm:$0xff] %vm3007_vm0, %v7751_v28  ;;  %v7952_v63 = vld [vmem:[#allocation4 + $0xc0] sm:$0xff] }
 0x840   : > { %7009 = vst.msk [vmem:[#allocation4 + $0xd8] sm:$0xff] %vm2814_vm15, %v6923_v17  ;;  %v6268_v9 = vpop.f32.mrf.mxu0  ;;  %7578 = vrot.lane.b32.xlu0 %v13586_v1, %s9520_s10 }
 0x841   : > { %v6492_v53 = vadd.f32 %v6491_v48, %v6267_v42  ;;  %6750 = vrot.lane.b32.xlu1 %v13535_v46, %s9519_s6 }
 0x842   : > { %v7369_v35 = vpop.permute.xlu0 %7368 }
 0x843   : > { %v7115_v54 = vpop.permute.xlu1 %7114  ;;  %v6546_v25 = vmax.f32 %v6492_v53, 0.0  ;;  %7456 = vst.msk [vmem:[#allocation4 + $0xc8] sm:$0xff] %vm2621_vm14, %v7369_v35 }
 0x844   : > { %7201 = vst.msk [vmem:[#allocation4 + $0xd8] sm:$0xff] %vm3007_vm0, %v7115_v54  ;;  %v13763_v61 = vld [vmem:[#allocation3 + $0x1a9] sm:$0xff]  ;;  %v13765_v14 = vld [vmem:[#allocation3 + $0x1b1] sm:$0xff]  ;;  %7770 = vrot.lane.b32.xlu0 %v13594_v3, %s9521_s11 }
 0x845   : > { %v13767_v10 = vld [vmem:[#allocation3 + $0x1af] sm:$0xff]  ;;  %7918 = vst.msk [vmem:[#allocation4 + $0x220] sm:$0xff] %vm243_vm10, %v13763_v61  ;;  %7919 = vst.msk [vmem:[#allocation4 + $0x238] sm:$0xff] %vm243_vm10, %v13765_v14  ;;  %6942 = vrot.lane.b32.xlu1 %v13525_v24, %s9520_s10 }
 0x846   : > { %v13774_v46 = vld [vmem:[#allocation3 + $0x1b0] sm:$0xff]  ;;  %6643 = vst.msk [vmem:[#allocation4 + $0x288] sm:$0xff] %vm243_vm10, %v13767_v10  ;;  %6578 = vst.msk [vmem:[#allocation3 + $0x1c8] sm:$0xff] %vm243_vm10, %v6546_v25  ;;  %v7561_v23 = vpop.permute.xlu0 %7560 }
 0x847   : > { %7281 = vst.msk [vmem:[#allocation4 + $0x260] sm:$0xff] %vm243_vm10, %v13774_v46  ;;  %v6733_v16 = vpop.permute.xlu1 %6732  ;;  %v7950_v31 = vld [vmem:[#allocation4 + $0xb0] sm:$0xff] }
 0x848   : > { %6818 = vst.msk [vmem:[#allocation4 + $0xf0] sm:$0xff] %vm2621_vm14, %v6733_v16  ;;  %8261 = vmatprep.mubr.f32.mxu1 %v7950_v31  ;;  %7388 = vrot.lane.b32.xlu0 %v13582_v47, %s9519_s6  ;;  %v9253_v31 = vpop.f32.mrf.mxu1 }
 0x849   : > { %7648 = vst.msk [vmem:[#allocation4 + $0xc8] sm:$0xff] %vm2814_vm15, %v7561_v23  ;;  %v6271_v37 = vpop.f32.mrf.mxu0  ;;  %8262 = vmatmul.mubr.f32.gmra.mxu1 %v7949_v6  ;;  %7134 = vrot.lane.b32.xlu1 %v13586_v1, %s9521_s11 }
 0x84a   : > { %v6272_v34 = vadd.f32 %v13490_v4, %v6271_v37  ;;  %v7753_v7 = vpop.permute.xlu0 %7752 }
 0x84b   : > { %v6925_v24 = vpop.permute.xlu1 %6924  ;;  %v6273_v56 = vpop.f32.mrf.mxu0  ;;  %7840 = vst.msk [vmem:[#allocation4 + $0xc8] sm:$0xff] %vm3007_vm0, %v7753_v7 }
 0x84c   : > { %7010 = vst.msk [vmem:[#allocation4 + $0xf0] sm:$0xff] %vm2814_vm15, %v6925_v24  ;;  %v7996_v27 = vld [vmem:[#allocation4 + $0x220] sm:$0xff]  ;;  %v7999_v49 = vld [vmem:[#allocation4 + $0x238] sm:$0xff]  ;;  %v6497_v20 = vadd.f32 %v9247_v26, %v6272_v34  ;;  %7580 = vrot.lane.b32.xlu0 %v13615_v41, %s9520_s10  ;;  %v6511_v56 = vpop.f32.mrf.mxu1 }
 0x84d   : > { %9295 = vmatprep.mubr.msk.f32.mxu0 %vm243_vm10, %v7996_v27  ;;  %v13795_v18 = vld [vmem:[#allocation3 + $0x1c7] sm:$0xff]  ;;  %6752 = vrot.lane.b32.xlu1 %v13557_v45, %s9519_s6 }
 0x84e   : > { %v13797_v44 = vld [vmem:[#allocation3 + $0x1c8] sm:$0xff]  ;;  %9296 = vmatmul.mubr.msk.f32.gmra.mxu0 %vm243_vm10, %v7999_v49  ;;  %6644 = vst.msk [vmem:[#allocation4 + $0x2a0] sm:$0xff] %vm243_vm10, %v13795_v18  ;;  %v6547_v1 = vmax.f32 %v6497_v20, 0.0  ;;  %v7371_v33 = vpop.permute.xlu0 %7370 }
 0x84f   : > { %7282 = vst.msk [vmem:[#allocation4 + $0x278] sm:$0xff] %vm243_vm10, %v13797_v44  ;;  %v7117_v38 = vpop.permute.xlu1 %7116 }
 0x850   : > { %7202 = vst.msk [vmem:[#allocation4 + $0xf0] sm:$0xff] %vm3007_vm0, %v7117_v38  ;;  %7772 = vrot.lane.b32.xlu0 %v13617_v30, %s9521_s11 }
 0x851   : > { %6579 = vst.msk [vmem:[#allocation3 + $0x1d0] sm:$0xff] %vm243_vm10, %v6547_v1  ;;  %6944 = vrot.lane.b32.xlu1 %v13582_v47, %s9520_s10 }
 0x852   : > { %7457 = vst.msk [vmem:[#allocation4 + $0xe0] sm:$0xff] %vm2621_vm14, %v7371_v33  ;;  %v6276_v60 = vpop.f32.mrf.mxu0  ;;  %v7563_v45 = vpop.permute.xlu0 %7562  ;;  %v7953_v15 = vld [vmem:[#allocation4 + $0xc8] sm:$0xff] }
 0x853   : > { %v6735_v39 = vpop.permute.xlu1 %6734  ;;  %v6277_v2 = vadd.f32 %v13490_v4, %v6276_v60  ;;  %7649 = vst.msk [vmem:[#allocation4 + $0xe0] sm:$0xff] %vm2814_vm15, %v7563_v45  ;;  %8266 = vmatprep.mubr.f32.mxu1 %v7953_v15 }
 0x854   : > { %6819 = vst.msk [vmem:[#allocation4 + $0x108] sm:$0xff] %vm2621_vm14, %v6735_v39  ;;  %v6278_v43 = vpop.f32.mrf.mxu0  ;;  %7390 = vrot.lane.b32.xlu0 %v13584_v5, %s9519_s6  ;;  %8267 = vmatmul.mubr.f32.gmra.mxu1 %v7952_v63 }
 0x855   : > { %v6502_v19 = vadd.f32 %v6501_v36, %v6277_v2  ;;  %7136 = vrot.lane.b32.xlu1 %v13615_v41, %s9521_s11 }
 0x856   : > { %v7755_v57 = vpop.permute.xlu0 %7754 }
 0x857   : > { %v6927_v47 = vpop.permute.xlu1 %6926  ;;  %v6548_v40 = vmax.f32 %v6502_v19, 0.0  ;;  %7841 = vst.msk [vmem:[#allocation4 + $0xe0] sm:$0xff] %vm3007_vm0, %v7755_v57  ;;  %v7958_v39 = vld [vmem:[#allocation4 + $0xf0] sm:$0xff] }
 0x858   : > { %7011 = vst.msk [vmem:[#allocation4 + $0x108] sm:$0xff] %vm2814_vm15, %v6927_v47  ;;  %v13823_v50 = vld [vmem:[#allocation3 + $0x1c9] sm:$0xff]  ;;  %v13825_v26 = vld [vmem:[#allocation3 + $0x1d1] sm:$0xff]  ;;  %7582 = vrot.lane.b32.xlu0 %v13651_v11, %s9520_s10 }
 0x859   : > { %v13827_v0 = vld [vmem:[#allocation3 + $0x1cf] sm:$0xff]  ;;  %7920 = vst.msk [vmem:[#allocation4 + $0x250] sm:$0xff] %vm243_vm10, %v13823_v50  ;;  %7921 = vst.msk [vmem:[#allocation4 + $0x268] sm:$0xff] %vm243_vm10, %v13825_v26  ;;  %6754 = vrot.lane.b32.xlu1 %v13594_v3, %s9519_s6 }
 0x85a   : > { %v13834_v41 = vld [vmem:[#allocation3 + $0x1d0] sm:$0xff]  ;;  %6645 = vst.msk [vmem:[#allocation4 + $0x2b8] sm:$0xff] %vm243_vm10, %v13827_v0  ;;  %6580 = vst.msk [vmem:[#allocation3 + $0x1e8] sm:$0xff] %vm243_vm10, %v6548_v40  ;;  %v7373_v17 = vpop.permute.xlu0 %7372 }
 0x85b   : > { %7283 = vst.msk [vmem:[#allocation4 + $0x290] sm:$0xff] %vm243_vm10, %v13834_v41  ;;  %v7119_v32 = vpop.permute.xlu1 %7118 }
 0x85c   : > { %7203 = vst.msk [vmem:[#allocation4 + $0x108] sm:$0xff] %vm3007_vm0, %v7119_v32  ;;  %7774 = vrot.lane.b32.xlu0 %v13653_v55, %s9521_s11 }
 0x85d   : > { %7458 = vst.msk [vmem:[#allocation4 + $0xf8] sm:$0xff] %vm2621_vm14, %v7373_v17  ;;  %v6281_v42 = vpop.f32.mrf.mxu0  ;;  %6946 = vrot.lane.b32.xlu1 %v13584_v5, %s9520_s10  ;;  %v7955_v5 = vld [vmem:[#allocation4 + $0xd8] sm:$0xff] }
 0x85e   : > { %v6282_v28 = vadd.f32 %v13490_v4, %v6281_v42  ;;  %v7565_v53 = vpop.permute.xlu0 %7564  ;;  %v7956_v3 = vld [vmem:[#allocation4 + $0xe0] sm:$0xff] }
 0x85f   : > { %v6737_v48 = vpop.permute.xlu1 %6736  ;;  %v6283_v9 = vpop.f32.mrf.mxu0  ;;  %7650 = vst.msk [vmem:[#allocation4 + $0xf8] sm:$0xff] %vm2814_vm15, %v7565_v53  ;;  %8271 = vmatprep.mubr.f32.mxu1 %v7956_v3 }
 0x860   : > { %6820 = vst.msk [vmem:[#allocation4 + $0x120] sm:$0xff] %vm2621_vm14, %v6737_v48  ;;  %v8002_v54 = vld [vmem:[#allocation4 + $0x250] sm:$0xff]  ;;  %v8005_v25 = vld [vmem:[#allocation4 + $0x268] sm:$0xff]  ;;  %v6507_v35 = vadd.f32 %v9250_v13, %v6282_v28  ;;  %7392 = vrot.lane.b32.xlu0 %v13642_v22, %s9519_s6  ;;  %8272 = vmatmul.mubr.f32.gmra.mxu1 %v7955_v5 }
 0x861   : > { %9298 = vmatprep.mubr.msk.f32.mxu0 %vm243_vm10, %v8002_v54  ;;  %v13855_v16 = vld [vmem:[#allocation3 + $0x1e7] sm:$0xff]  ;;  %7138 = vrot.lane.b32.xlu1 %v13651_v11, %s9521_s11 }
 0x862   : > { %v13857_v23 = vld [vmem:[#allocation3 + $0x1e8] sm:$0xff]  ;;  %9299 = vmatmul.mubr.msk.f32.gmra.mxu0 %vm243_vm10, %v8005_v25  ;;  %6646 = vst.msk [vmem:[#allocation4 + $0x2d0] sm:$0xff] %vm243_vm10, %v13855_v16  ;;  %v6549_v6 = vmax.f32 %v6507_v35, 0.0  ;;  %v7757_v34 = vpop.permute.xlu0 %7756 }
 0x863   : > { %7284 = vst.msk [vmem:[#allocation4 + $0x2a8] sm:$0xff] %vm243_vm10, %v13857_v23  ;;  %v6929_v37 = vpop.permute.xlu1 %6928  ;;  %v7961_v28 = vld [vmem:[#allocation4 + $0x108] sm:$0xff] }
 0x864   : > { %7012 = vst.msk [vmem:[#allocation4 + $0x120] sm:$0xff] %vm2814_vm15, %v6929_v37  ;;  %7584 = vrot.lane.b32.xlu0 %v13674_v21, %s9520_s10 }
 0x865   : > { %6581 = vst.msk [vmem:[#allocation3 + $0x1f0] sm:$0xff] %vm243_vm10, %v6549_v6  ;;  %6756 = vrot.lane.b32.xlu1 %v13617_v30, %s9519_s6 }
 0x866   : > { %7842 = vst.msk [vmem:[#allocation4 + $0xf8] sm:$0xff] %vm3007_vm0, %v7757_v34  ;;  %v6286_v24 = vpop.f32.mrf.mxu0  ;;  %v7375_v27 = vpop.permute.xlu0 %7374 }
 0x867   : > { %v6287_v7 = vadd.f32 %v13490_v4, %v6286_v24  ;;  %v7121_v11 = vpop.permute.xlu1 %7120  ;;  %7459 = vst.msk [vmem:[#allocation4 + $0x110] sm:$0xff] %vm2621_vm14, %v7375_v27 }
 0x868   : > { %7204 = vst.msk [vmem:[#allocation4 + $0x120] sm:$0xff] %vm3007_vm0, %v7121_v11  ;;  %v6288_v49 = vpop.f32.mrf.mxu0  ;;  %7776 = vrot.lane.b32.xlu0 %v13676_v58, %s9521_s11 }
 0x869   : > { %v6512_v20 = vadd.f32 %v6511_v56, %v6287_v7  ;;  %6948 = vrot.lane.b32.xlu1 %v13642_v22, %s9520_s10 }
 0x86a   : > { %v7567_v33 = vpop.permute.xlu0 %7566 }
 0x86b   : > { %v6550_v1 = vmax.f32 %v6512_v20, 0.0  ;;  %v6739_v38 = vpop.permute.xlu1 %6738  ;;  %7651 = vst.msk [vmem:[#allocation4 + $0x110] sm:$0xff] %vm2814_vm15, %v7567_v33 }
 0x86c   : > { %6821 = vst.msk [vmem:[#allocation4 + $0x138] sm:$0xff] %vm2621_vm14, %v6739_v38  ;;  %v13883_v13 = vld [vmem:[#allocation3 + $0x1e9] sm:$0xff]  ;;  %v13885_v60 = vld [vmem:[#allocation3 + $0x1f1] sm:$0xff]  ;;  %7394 = vrot.lane.b32.xlu0 %v13644_v51, %s9519_s6 }
 0x86d   : > { %v7959_v30 = vld [vmem:[#allocation4 + $0xf8] sm:$0xff]  ;;  %6582 = vst.msk [vmem:[#allocation3 + $0x208] sm:$0xff] %vm243_vm10, %v6550_v1  ;;  %7922 = vst.msk [vmem:[#allocation4 + $0x280] sm:$0xff] %vm243_vm10, %v13883_v13  ;;  %v13893_v22 = vld [vmem:[#allocation3 + $0x1ef] sm:$0xff]  ;;  %7140 = vrot.lane.b32.xlu1 %v13674_v21, %s9521_s11 }
 0x86e   : > { %8276 = vmatprep.mubr.f32.mxu1 %v7959_v30  ;;  %7923 = vst.msk [vmem:[#allocation4 + $0x298] sm:$0xff] %vm243_vm10, %v13885_v60  ;;  %v13895_v2 = vld [vmem:[#allocation3 + $0x1f0] sm:$0xff]  ;;  %6647 = vst.msk [vmem:[#allocation4 + $0x2e8] sm:$0xff] %vm243_vm10, %v13893_v22  ;;  %v7759_v15 = vpop.permute.xlu0 %7758 }
 0x86f   : > { %8277 = vmatmul.mubr.f32.gmra.mxu1 %v7958_v39  ;;  %7285 = vst.msk [vmem:[#allocation4 + $0x2c0] sm:$0xff] %vm243_vm10, %v13895_v2  ;;  %v6931_v45 = vpop.permute.xlu1 %6930  ;;  %v7964_v5 = vld [vmem:[#allocation4 + $0x120] sm:$0xff] }
 0x870   : > { %7013 = vst.msk [vmem:[#allocation4 + $0x138] sm:$0xff] %vm2814_vm15, %v6931_v45  ;;  %v6291_v36 = vpop.f32.mrf.mxu0  ;;  %7586 = vrot.lane.b32.xlu0 %v13706_v52, %s9520_s10 }
 0x871   : > { %7843 = vst.msk [vmem:[#allocation4 + $0x110] sm:$0xff] %vm3007_vm0, %v7759_v15  ;;  %v6292_v43 = vadd.f32 %v13490_v4, %v6291_v36  ;;  %6758 = vrot.lane.b32.xlu1 %v13653_v55, %s9519_s6 }
 0x872   : > { %v6293_v63 = vpop.f32.mrf.mxu0  ;;  %v7377_v40 = vpop.permute.xlu0 %7376 }
 0x873   : > { %v7123_v19 = vpop.permute.xlu1 %7122  ;;  %v6517_v47 = vadd.f32 %v9253_v31, %v6292_v43  ;;  %7460 = vst.msk [vmem:[#allocation4 + $0x128] sm:$0xff] %vm2621_vm14, %v7377_v40  ;;  %v14033_v63 = vld [vmem:[%s14317_s3 + $0x3] ss:$0 sm:$0xff] }
 0x874   : > { %7205 = vst.msk [vmem:[#allocation4 + $0x138] sm:$0xff] %vm3007_vm0, %v7123_v19  ;;  %v8008_v21 = vld [vmem:[#allocation4 + $0x280] sm:$0xff]  ;;  %v13915_v32 = vld [vmem:[#allocation3 + $0x208] sm:$0xff]  ;;  %7778 = vrot.lane.b32.xlu0 %v13713_v12, %s9521_s11 }
 0x875   : > { %v8011_v57 = vld [vmem:[#allocation4 + $0x298] sm:$0xff]  ;;  %9301 = vmatprep.mubr.msk.f32.mxu0 %vm243_vm10, %v8008_v21  ;;  %v6551_v4 = vmax.f32 %v6517_v47, 0.0  ;;  %7286 = vst.msk [vmem:[#allocation4 + $0x2d8] sm:$0xff] %vm243_vm10, %v13915_v32  ;;  %6950 = vrot.lane.b32.xlu1 %v13644_v51, %s9520_s10 }
 0x876   : > { %9302 = vmatmul.mubr.msk.f32.gmra.mxu0 %vm243_vm10, %v8011_v57  ;;  %v7569_v17 = vpop.permute.xlu0 %7568 }
 0x877   : > { %v6741_v55 = vpop.permute.xlu1 %6740  ;;  %6583 = vst.msk [vmem:[#allocation3 + $0x210] sm:$0xff] %vm243_vm10, %v6551_v4 }
 0x878   : > { %6822 = vst.msk [vmem:[#allocation4 + $0x150] sm:$0xff] %vm2621_vm14, %v6741_v55  ;;  %v7962_v42 = vld [vmem:[#allocation4 + $0x110] sm:$0xff]  ;;  %7396 = vrot.lane.b32.xlu0 %v13702_v8, %s9519_s6 }
 0x879   : > { %7652 = vst.msk [vmem:[#allocation4 + $0x128] sm:$0xff] %vm2814_vm15, %v7569_v17  ;;  %8281 = vmatprep.mubr.f32.mxu1 %v7962_v42  ;;  %7142 = vrot.lane.b32.xlu1 %v13706_v52, %s9521_s11 }
 0x87a   : > { %8282 = vmatmul.mubr.f32.gmra.mxu1 %v7961_v28  ;;  %v7761_v51 = vpop.permute.xlu0 %7760 }
 0x87b   : > { %v6933_v48 = vpop.permute.xlu1 %6932  ;;  %7844 = vst.msk [vmem:[#allocation4 + $0x128] sm:$0xff] %vm3007_vm0, %v7761_v51 }
 0x87c   : > { %7014 = vst.msk [vmem:[#allocation4 + $0x150] sm:$0xff] %vm2814_vm15, %v6933_v48  ;;  %7588 = vrot.lane.b32.xlu0 %v13734_v59, %s9520_s10 }
 0x87d   : > { %6760 = vrot.lane.b32.xlu1 %v13676_v58, %s9519_s6 }
 0x87e   : > { %v13937_v53 = vld [vmem:[#allocation3 + $0x209] sm:$0xff]  ;;  %v13939_v3 = vld [vmem:[#allocation3 + $0x211] sm:$0xff]  ;;  %v7379_v54 = vpop.permute.xlu0 %7378 }
 0x87f   : > { %v7125_v9 = vpop.permute.xlu1 %7124  ;;  %7924 = vst.msk [vmem:[#allocation4 + $0x2b0] sm:$0xff] %vm243_vm10, %v13937_v53  ;;  %7925 = vst.msk [vmem:[#allocation4 + $0x2c8] sm:$0xff] %vm243_vm10, %v13939_v3  ;;  %v13946_v52 = vld [vmem:[#allocation3 + $0x210] sm:$0xff] }
 0x880   : > { %7206 = vst.msk [vmem:[#allocation4 + $0x150] sm:$0xff] %vm3007_vm0, %v7125_v9  ;;  %7780 = vrot.lane.b32.xlu0 %v13736_v29, %s9521_s11 }
 0x881   : > { %7461 = vst.msk [vmem:[#allocation4 + $0x140] sm:$0xff] %vm2621_vm14, %v7379_v54  ;;  %6952 = vrot.lane.b32.xlu1 %v13702_v8, %s9520_s10 }
 0x882   : > { %7287 = vst.msk [vmem:[#allocation4 + $0x2f0] sm:$0xff] %vm243_vm10, %v13946_v52  ;;  %v7571_v25 = vpop.permute.xlu0 %7570  ;;  %v7965_v35 = vld [vmem:[#allocation4 + $0x128] sm:$0xff] }
 0x883   : > { %v6743_v58 = vpop.permute.xlu1 %6742  ;;  %7653 = vst.msk [vmem:[#allocation4 + $0x140] sm:$0xff] %vm2814_vm15, %v7571_v25  ;;  %8286 = vmatprep.mubr.f32.mxu1 %v7965_v35 }
 0x884   : > { %6823 = vst.msk [vmem:[#allocation4 + $0x168] sm:$0xff] %vm2621_vm14, %v6743_v58  ;;  %7398 = vrot.lane.b32.xlu0 %v13704_v62, %s9519_s6  ;;  %8287 = vmatmul.mubr.f32.gmra.mxu1 %v7964_v5 }
 0x885   : > { %7144 = vrot.lane.b32.xlu1 %v13734_v59, %s9521_s11 }
 0x886   : > { %v8014_v6 = vld [vmem:[#allocation4 + $0x2b0] sm:$0xff]  ;;  %v8017_v37 = vld [vmem:[#allocation4 + $0x2c8] sm:$0xff]  ;;  %v7763_v8 = vpop.permute.xlu0 %7762 }
 0x887   : > { %v6935_v31 = vpop.permute.xlu1 %6934  ;;  %9304 = vmatprep.mubr.msk.f32.mxu0 %vm243_vm10, %v8014_v6  ;;  %7845 = vst.msk [vmem:[#allocation4 + $0x140] sm:$0xff] %vm3007_vm0, %v7763_v8  ;;  %v7970_v38 = vld [vmem:[#allocation4 + $0x150] sm:$0xff] }
 0x888   : > { %7015 = vst.msk [vmem:[#allocation4 + $0x168] sm:$0xff] %vm2814_vm15, %v6935_v31  ;;  %9305 = vmatmul.mubr.msk.f32.gmra.mxu0 %vm243_vm10, %v8017_v37  ;;  %7590 = vrot.lane.b32.xlu0 %v13767_v10, %s9520_s10  ;;  %v7508_v31 = vld [vmem:[#allocation3 + $0x207] sm:$0xff] }
 0x889   : > { %6762 = vrot.lane.b32.xlu1 %v13713_v12, %s9519_s6  ;;  %v7967_v12 = vld [vmem:[#allocation4 + $0x138] sm:$0xff] }
 0x88a   : > { %v7381_v59 = vpop.permute.xlu0 %7380 }
 0x88b   : > { %v7127_v34 = vpop.permute.xlu1 %7126  ;;  %7462 = vst.msk [vmem:[#allocation4 + $0x158] sm:$0xff] %vm2621_vm14, %v7381_v59 }
 0x88c   : > { %7207 = vst.msk [vmem:[#allocation4 + $0x168] sm:$0xff] %vm3007_vm0, %v7127_v34  ;;  %7782 = vrot.lane.b32.xlu0 %v13774_v46, %s9521_s11 }
 0x88d   : > { %6954 = vrot.lane.b32.xlu1 %v13704_v62, %s9520_s10 }
 0x88e   : > { %v7573_v56 = vpop.permute.xlu0 %7572  ;;  %v7968_v7 = vld [vmem:[#allocation4 + $0x140] sm:$0xff] }
 0x88f   : > { %v6745_v24 = vpop.permute.xlu1 %6744  ;;  %7654 = vst.msk [vmem:[#allocation4 + $0x158] sm:$0xff] %vm2814_vm15, %v7573_v56  ;;  %8291 = vmatprep.mubr.f32.mxu1 %v7968_v7 }
 0x890   : > { %6824 = vst.msk [vmem:[#allocation4 + $0x180] sm:$0xff] %vm2621_vm14, %v6745_v24  ;;  %7400 = vrot.lane.b32.xlu0 %v13763_v61, %s9519_s6  ;;  %8292 = vmatmul.mubr.f32.gmra.mxu1 %v7967_v12 }
 0x891   : > { %7146 = vrot.lane.b32.xlu1 %v13767_v10, %s9521_s11 }
 0x892   : > { %v7765_v27 = vpop.permute.xlu0 %7764 }
 0x893   : > { %v6937_v11 = vpop.permute.xlu1 %6936  ;;  %7846 = vst.msk [vmem:[#allocation4 + $0x158] sm:$0xff] %vm3007_vm0, %v7765_v27  ;;  %v7509_v27 = vld [vmem:[#allocation3 + $0x20f] sm:$0xff] }
 0x894   : > { %7016 = vst.msk [vmem:[#allocation4 + $0x180] sm:$0xff] %vm2814_vm15, %v6937_v11  ;;  %7592 = vrot.lane.b32.xlu0 %v13795_v18, %s9520_s10 }
 0x895   : > { %6764 = vrot.lane.b32.xlu1 %v13736_v29, %s9519_s6 }
 0x896   : > { %v7383_v62 = vpop.permute.xlu0 %7382 }
 0x897   : > { %7463 = vst.msk [vmem:[#allocation4 + $0x170] sm:$0xff] %vm2621_vm14, %v7383_v62  ;;  %v7129_v49 = vpop.permute.xlu1 %7128 }
 0x898   : > { %7208 = vst.msk [vmem:[#allocation4 + $0x180] sm:$0xff] %vm3007_vm0, %v7129_v49  ;;  %7784 = vrot.lane.b32.xlu0 %v13797_v44, %s9521_s11 }
 0x899   : > { %6956 = vrot.lane.b32.xlu1 %v13763_v61, %s9520_s10 }
 0x89a   : > { %v7575_v10 = vpop.permute.xlu0 %7574  ;;  %v7971_v20 = vld [vmem:[#allocation4 + $0x158] sm:$0xff] }
 0x89b   : > { %7655 = vst.msk [vmem:[#allocation4 + $0x170] sm:$0xff] %vm2814_vm15, %v7575_v10  ;;  %v6747_v1 = vpop.permute.xlu1 %6746  ;;  %8296 = vmatprep.mubr.f32.mxu1 %v7971_v20 }
 0x89c   : > { %6825 = vst.msk [vmem:[#allocation4 + $0x198] sm:$0xff] %vm2621_vm14, %v6747_v1  ;;  %7402 = vrot.lane.b32.xlu0 %v13765_v14, %s9519_s6  ;;  %8297 = vmatmul.mubr.f32.gmra.mxu1 %v7970_v38 }
 0x89d   : > { %7148 = vrot.lane.b32.xlu1 %v13795_v18, %s9521_s11 }
 0x89e   : > { %v7767_v29 = vpop.permute.xlu0 %7766 }
 0x89f   : > { %7847 = vst.msk [vmem:[#allocation4 + $0x170] sm:$0xff] %vm3007_vm0, %v7767_v29  ;;  %v6939_v61 = vpop.permute.xlu1 %6938  ;;  %v7976_v21 = vld [vmem:[#allocation4 + $0x180] sm:$0xff] }
 0x8a0   : > { %7017 = vst.msk [vmem:[#allocation4 + $0x198] sm:$0xff] %vm2814_vm15, %v6939_v61  ;;  %7594 = vrot.lane.b32.xlu0 %v13827_v0, %s9520_s10 }
 0x8a1   : > { %6766 = vrot.lane.b32.xlu1 %v13774_v46, %s9519_s6  ;;  %v7973_v46 = vld [vmem:[#allocation4 + $0x168] sm:$0xff] }
 0x8a2   : > { %v7385_v33 = vpop.permute.xlu0 %7384 }
 0x8a3   : > { %7464 = vst.msk [vmem:[#allocation4 + $0x188] sm:$0xff] %vm2621_vm14, %v7385_v33  ;;  %v7131_v30 = vpop.permute.xlu1 %7130 }
 0x8a4   : > { %7209 = vst.msk [vmem:[#allocation4 + $0x198] sm:$0xff] %vm3007_vm0, %v7131_v30  ;;  %7786 = vrot.lane.b32.xlu0 %v13834_v41, %s9521_s11 }
 0x8a5   : > { %6958 = vrot.lane.b32.xlu1 %v13765_v14, %s9520_s10 }
 0x8a6   : > { %v7577_v18 = vpop.permute.xlu0 %7576  ;;  %v7974_v39 = vld [vmem:[#allocation4 + $0x170] sm:$0xff] }
 0x8a7   : > { %7656 = vst.msk [vmem:[#allocation4 + $0x188] sm:$0xff] %vm2814_vm15, %v7577_v18  ;;  %v6749_v45 = vpop.permute.xlu1 %6748  ;;  %8301 = vmatprep.mubr.f32.mxu1 %v7974_v39  ;;  %v8020_v18 = vld [vmem:[#allocation4 + $0x2e0] sm:$0xff] }
 0x8a8   : > { %6826 = vst.msk [vmem:[#allocation4 + $0x1b0] sm:$0xff] %vm2621_vm14, %v6749_v45  ;;  %7404 = vrot.lane.b32.xlu0 %v13823_v50, %s9519_s6  ;;  %8302 = vmatmul.mubr.f32.gmra.mxu1 %v7973_v46 }
 0x8a9   : > { %7150 = vrot.lane.b32.xlu1 %v13827_v0, %s9521_s11  ;;  %v9264_v0 = vpop.f32.mrf.mxu0  ;;  %9307 = vmatprep.mubr.msk.f32.mxu0 %vm243_vm10, %v8020_v18 }
 0x8aa   : > { %v7769_v15 = vpop.permute.xlu0 %7768 }
 0x8ab   : > { %7848 = vst.msk [vmem:[#allocation4 + $0x188] sm:$0xff] %vm3007_vm0, %v7769_v15  ;;  %v6941_v14 = vpop.permute.xlu1 %6940  ;;  %v7979_v54 = vld [vmem:[#allocation4 + $0x198] sm:$0xff] }
 0x8ac   : > { %7018 = vst.msk [vmem:[#allocation4 + $0x1b0] sm:$0xff] %vm2814_vm15, %v6941_v14  ;;  %7596 = vrot.lane.b32.xlu0 %v13855_v16, %s9520_s10  ;;  %v8023_v15 = vld [vmem:[#allocation4 + $0x2f8] sm:$0xff] }
 0x8ad   : > { %6768 = vrot.lane.b32.xlu1 %v13797_v44, %s9519_s6  ;;  %9308 = vmatmul.mubr.msk.f32.gmra.mxu0 %vm243_vm10, %v8023_v15 }
 0x8ae   : > { %v7387_v36 = vpop.permute.xlu0 %7386 }
 0x8af   : > { %7465 = vst.msk [vmem:[#allocation4 + $0x1a0] sm:$0xff] %vm2621_vm14, %v7387_v36  ;;  %v7133_v43 = vpop.permute.xlu1 %7132 }
 0x8b0   : > { %7210 = vst.msk [vmem:[#allocation4 + $0x1b0] sm:$0xff] %vm3007_vm0, %v7133_v43  ;;  %7788 = vrot.lane.b32.xlu0 %v13857_v23, %s9521_s11 }
 0x8b1   : > { %6960 = vrot.lane.b32.xlu1 %v13823_v50, %s9520_s10  ;;  %v8453_v50 = vpop.f32.mrf.mxu0 }
 0x8b2   : > { %v7579_v44 = vpop.permute.xlu0 %7578  ;;  %v7977_v19 = vld [vmem:[#allocation4 + $0x188] sm:$0xff] }
 0x8b3   : > { %7657 = vst.msk [vmem:[#allocation4 + $0x1a0] sm:$0xff] %vm2814_vm15, %v7579_v44  ;;  %v6751_v47 = vpop.permute.xlu1 %6750  ;;  %8306 = vmatprep.mubr.f32.mxu1 %v7977_v19  ;;  %v9267_v37 = vpop.f32.mrf.mxu0 }
 0x8b4   : > { %6827 = vst.msk [vmem:[#allocation4 + $0x1c8] sm:$0xff] %vm2621_vm14, %v6751_v47  ;;  %7406 = vrot.lane.b32.xlu0 %v13825_v26, %s9519_s6  ;;  %8307 = vmatmul.mubr.f32.gmra.mxu1 %v7976_v21 }
 0x8b5   : > { %7152 = vrot.lane.b32.xlu1 %v13855_v16, %s9521_s11 }
 0x8b6   : > { %v8228_v40 = vpop.f32.mrf.mxu1  ;;  %v7771_v17 = vpop.permute.xlu0 %7770 }
 0x8b7   : > { %v8229_v57 = vadd.f32 %v14033_v63, %v8228_v40  ;;  %7849 = vst.msk [vmem:[#allocation4 + $0x1a0] sm:$0xff] %vm3007_vm0, %v7771_v17  ;;  %v6943_v42 = vpop.permute.xlu1 %6942  ;;  %v7982_v24 = vld [vmem:[#allocation4 + $0x1b0] sm:$0xff] }
 0x8b8   : > { %v8230_v4 = vpop.f32.mrf.mxu1  ;;  %7019 = vst.msk [vmem:[#allocation4 + $0x1c8] sm:$0xff] %vm2814_vm15, %v6943_v42  ;;  %7598 = vrot.lane.b32.xlu0 %v13893_v22, %s9520_s10  ;;  %v7511_v40 = vld [vmem:[#allocation3 + $0x22f] sm:$0xff] }
 0x8b9   : > { %v8454_v55 = vadd.f32 %v8453_v50, %v8229_v57  ;;  %6770 = vrot.lane.b32.xlu1 %v13834_v41, %s9519_s6 }
 0x8ba   : > { %v7389_v16 = vpop.permute.xlu0 %7388 }
 0x8bb   : > { %8612 = vst.msk [vmem:[%s14045_s29] sm:$0xff] %vm243_vm10, %v8454_v55  ;;  %v7135_v28 = vpop.permute.xlu1 %7134  ;;  %v7703_v55 = vld [vmem:[#allocation3 + $0x230] sm:$0xff] }
 0x8bc   : > { %7466 = vst.msk [vmem:[#allocation4 + $0x1b8] sm:$0xff] %vm2621_vm14, %v7389_v16  ;;  %7790 = vrot.lane.b32.xlu0 %v13895_v2, %s9521_s11 }
 0x8bd   : > { %7211 = vst.msk [vmem:[#allocation4 + $0x1c8] sm:$0xff] %vm3007_vm0, %v7135_v28  ;;  %6962 = vrot.lane.b32.xlu1 %v13825_v26, %s9520_s10 }
 0x8be   : > { %v7581_v48 = vpop.permute.xlu0 %7580  ;;  %v7980_v51 = vld [vmem:[#allocation4 + $0x1a0] sm:$0xff] }
 0x8bf   : > { %7658 = vst.msk [vmem:[#allocation4 + $0x1b8] sm:$0xff] %vm2814_vm15, %v7581_v48  ;;  %v6753_v9 = vpop.permute.xlu1 %6752  ;;  %8311 = vmatprep.mubr.f32.mxu1 %v7980_v51 }
 0x8c0   : > { %6828 = vst.msk [vmem:[#allocation4 + $0x1e0] sm:$0xff] %vm2621_vm14, %v6753_v9  ;;  %7408 = vrot.lane.b32.xlu0 %v13883_v13, %s9519_s6  ;;  %8312 = vmatmul.mubr.f32.gmra.mxu1 %v7979_v54 }
 0x8c1   : > { %7154 = vrot.lane.b32.xlu1 %v13893_v22, %s9521_s11 }
 0x8c2   : > { %v8233_v41 = vpop.f32.mrf.mxu1  ;;  %v7773_v35 = vpop.permute.xlu0 %7772 }
 0x8c3   : > { %v8234_v58 = vadd.f32 %v14033_v63, %v8233_v41  ;;  %7850 = vst.msk [vmem:[#allocation4 + $0x1b8] sm:$0xff] %vm3007_vm0, %v7773_v35  ;;  %v6945_v5 = vpop.permute.xlu1 %6944 }
 0x8c4   : > { %v8235_v26 = vpop.f32.mrf.mxu1  ;;  %7020 = vst.msk [vmem:[#allocation4 + $0x1e0] sm:$0xff] %vm2814_vm15, %v6945_v5  ;;  %7600 = vrot.lane.b32.xlu0 %v7508_v31, %s9520_s10  ;;  %v7985_v38 = vld [vmem:[#allocation4 + $0x1c8] sm:$0xff] }
 0x8c5   : > { %v8459_v25 = vadd.f32 %v9264_v0, %v8234_v58  ;;  %6772 = vrot.lane.b32.xlu1 %v13857_v23, %s9519_s6 }
 0x8c6   : > { %v7391_v6 = vpop.permute.xlu0 %7390 }
 0x8c7   : > { %8613 = vst.msk [vmem:[%s14045_s29 + $0x8] sm:$0xff] %vm243_vm10, %v8459_v25  ;;  %v7137_v22 = vpop.permute.xlu1 %7136 }
 0x8c8   : > { %7467 = vst.msk [vmem:[#allocation4 + $0x1d0] sm:$0xff] %vm2621_vm14, %v7391_v6  ;;  %7792 = vrot.lane.b32.xlu0 %v13915_v32, %s9521_s11  ;;  %v8463_v32 = vpop.f32.mrf.mxu0 }
 0x8c9   : > { %7212 = vst.msk [vmem:[#allocation4 + $0x1e0] sm:$0xff] %vm3007_vm0, %v7137_v22  ;;  %6964 = vrot.lane.b32.xlu1 %v13883_v13, %s9520_s10 }
 0x8ca   : > { %v7583_v8 = vpop.permute.xlu0 %7582  ;;  %v7983_v34 = vld [vmem:[#allocation4 + $0x1b8] sm:$0xff]  ;;  %v9270_v46 = vpop.f32.mrf.mxu0 }
 0x8cb   : > { %7659 = vst.msk [vmem:[#allocation4 + $0x1d0] sm:$0xff] %vm2814_vm15, %v7583_v8  ;;  %v6755_v59 = vpop.permute.xlu1 %6754  ;;  %8316 = vmatprep.mubr.f32.mxu1 %v7983_v34 }
 0x8cc   : > { %6829 = vst.msk [vmem:[#allocation4 + $0x1f8] sm:$0xff] %vm2621_vm14, %v6755_v59  ;;  %7410 = vrot.lane.b32.xlu0 %v13885_v60, %s9519_s6  ;;  %8317 = vmatmul.mubr.f32.gmra.mxu1 %v7982_v24  ;;  %v8473_v19 = vpop.f32.mrf.mxu0 }
 0x8cd   : > { %v8238_v23 = vpop.f32.mrf.mxu1  ;;  %7156 = vrot.lane.b32.xlu1 %v7508_v31, %s9521_s11 }
 0x8ce   : > { %v8239_v56 = vadd.f32 %v14033_v63, %v8238_v23  ;;  %v7775_v12 = vpop.permute.xlu0 %7774  ;;  %v9273_v5 = vpop.f32.mrf.mxu0 }
 0x8cf   : > { %v8240_v13 = vpop.f32.mrf.mxu1  ;;  %7851 = vst.msk [vmem:[#allocation4 + $0x1d0] sm:$0xff] %vm3007_vm0, %v7775_v12  ;;  %v6947_v11 = vpop.permute.xlu1 %6946 }
 0x8d0   : > { %v8464_v7 = vadd.f32 %v8463_v32, %v8239_v56  ;;  %7021 = vst.msk [vmem:[#allocation4 + $0x1f8] sm:$0xff] %vm2814_vm15, %v6947_v11  ;;  %7602 = vrot.lane.b32.xlu0 %v7509_v27, %s9520_s10  ;;  %v7988_v0 = vld [vmem:[#allocation4 + $0x1e0] sm:$0xff]  ;;  %v8483_v34 = vpop.f32.mrf.mxu0 }
 0x8d1   : > { %6774 = vrot.lane.b32.xlu1 %v13895_v2, %s9519_s6 }
 0x8d2   : > { %8614 = vst.msk [vmem:[%s14045_s29 + $0x10] sm:$0xff] %vm243_vm10, %v8464_v7  ;;  %v7393_v62 = vpop.permute.xlu0 %7392 }
 0x8d3   : > { %7468 = vst.msk [vmem:[#allocation4 + $0x1e8] sm:$0xff] %vm2621_vm14, %v7393_v62  ;;  %v7139_v49 = vpop.permute.xlu1 %7138 }
 0x8d4   : > { %7213 = vst.msk [vmem:[#allocation4 + $0x1f8] sm:$0xff] %vm3007_vm0, %v7139_v49  ;;  %7794 = vrot.lane.b32.xlu0 %v13946_v52, %s9521_s11  ;;  %v7510_v52 = vld [vmem:[#allocation3 + $0x227] sm:$0xff] }
 0x8d5   : > { %6966 = vrot.lane.b32.xlu1 %v13885_v60, %s9520_s10 }
 0x8d6   : > { %v7585_v10 = vpop.permute.xlu0 %7584  ;;  %v7986_v20 = vld [vmem:[#allocation4 + $0x1d0] sm:$0xff] }
 0x8d7   : > { %7660 = vst.msk [vmem:[#allocation4 + $0x1e8] sm:$0xff] %vm2814_vm15, %v7585_v10  ;;  %v6757_v1 = vpop.permute.xlu1 %6756  ;;  %8321 = vmatprep.mubr.f32.mxu1 %v7986_v20 }
 0x8d8   : > { %v8243_v2 = vpop.f32.mrf.mxu1  ;;  %6830 = vst.msk [vmem:[#allocation4 + $0x210] sm:$0xff] %vm2621_vm14, %v6757_v1  ;;  %7412 = vrot.lane.b32.xlu0 %v13937_v53, %s9519_s6  ;;  %8322 = vmatmul.mubr.f32.gmra.mxu1 %v7985_v38  ;;  %v7702_v53 = vld [vmem:[#allocation3 + $0x228] sm:$0xff] }
 0x8d9   : > { %v8244_v29 = vadd.f32 %v14033_v63, %v8243_v2  ;;  %7158 = vrot.lane.b32.xlu1 %v7509_v27, %s9521_s11 }
 0x8da   : > { %v8245_v60 = vpop.f32.mrf.mxu1  ;;  %v7777_v33 = vpop.permute.xlu0 %7776 }
 0x8db   : > { %v8469_v61 = vadd.f32 %v9267_v37, %v8244_v29  ;;  %7852 = vst.msk [vmem:[#allocation4 + $0x1e8] sm:$0xff] %vm3007_vm0, %v7777_v33  ;;  %v6949_v30 = vpop.permute.xlu1 %6948  ;;  %v7991_v48 = vld [vmem:[#allocation4 + $0x1f8] sm:$0xff] }
 0x8dc   : > { %7022 = vst.msk [vmem:[#allocation4 + $0x210] sm:$0xff] %vm2814_vm15, %v6949_v30  ;;  %7604 = vrot.lane.b32.xlu0 %v7510_v52, %s9520_s10  ;;  %v9276_v52 = vpop.f32.mrf.mxu0 }
 0x8dd   : > { %8615 = vst.msk [vmem:[%s14045_s29 + $0x18] sm:$0xff] %vm243_vm10, %v8469_v61 }
 0x8de   : > { %v7395_v39 = vpop.permute.xlu0 %7394 }
 0x8df   : > { %7469 = vst.msk [vmem:[#allocation4 + $0x200] sm:$0xff] %vm2621_vm14, %v7395_v39  ;;  %v7141_v45 = vpop.permute.xlu1 %7140  ;;  %v8493_v39 = vpop.f32.mrf.mxu0 }
 0x8e0   : > { %7214 = vst.msk [vmem:[#allocation4 + $0x210] sm:$0xff] %vm3007_vm0, %v7141_v45  ;;  %7796 = vrot.lane.b32.xlu0 %v7702_v53, %s9521_s11 }
 0x8e2   : > { %v7587_v14 = vpop.permute.xlu0 %7586  ;;  %v7989_v36 = vld [vmem:[#allocation4 + $0x1e8] sm:$0xff] }
 0x8e3   : > { %7661 = vst.msk [vmem:[#allocation4 + $0x200] sm:$0xff] %vm2814_vm15, %v7587_v14  ;;  %v6759_v43 = vpop.permute.xlu1 %6758  ;;  %8326 = vmatprep.mubr.f32.mxu1 %v7989_v36 }
 0x8e4   : > { %6831 = vst.msk [vmem:[#allocation4 + $0x228] sm:$0xff] %vm2621_vm14, %v6759_v43  ;;  %7414 = vrot.lane.b32.xlu0 %v13939_v3, %s9519_s6  ;;  %8327 = vmatmul.mubr.f32.gmra.mxu1 %v7988_v0  ;;  %s8938_s6 = sshll.u32 %s9570_s19, 12  ;;  %s14273_s19 = scalar_lea.sflag [#allocation6], %s188_s22 }
 0x8e5   : > { %s14265_s5 = scalar_lea.hbm %s14318_s4, %s8938_s6 }
 0x8e6   : > { %v7779_v57 = vpop.permute.xlu0 %7778 }
 0x8e7   : > { %v8248_v44 = vpop.f32.mrf.mxu1  ;;  %7853 = vst.msk [vmem:[#allocation4 + $0x200] sm:$0xff] %vm3007_vm0, %v7779_v57  ;;  %v6951_v4 = vpop.permute.xlu1 %6950  ;;  %v7994_v37 = vld [vmem:[#allocation4 + $0x210] sm:$0xff] }
 0x8e8   : > { %v8249_v47 = vadd.f32 %v14033_v63, %v8248_v44  ;;  %7023 = vst.msk [vmem:[#allocation4 + $0x228] sm:$0xff] %vm2814_vm15, %v6951_v4  ;;  %7606 = vrot.lane.b32.xlu0 %v7511_v40, %s9520_s10  ;;  %s8658_s10 = sshll.u32 %s14045_s29, 4  ;;  %s14267_s10 = int_to_ptr.vmem [resolvable:$true] %s8658_s10 }
 0x8e9   : > { %v8250_v21 = vpop.f32.mrf.mxu1  ;;  %s9449_s8 = scalar_lea.vmem %s14267_s10, 4096  ;;  %p9456_p0 = scmp.lt.s32.totalorder %s14267_s10, %s9454_s12 }
 0x8ea   : > { %v8474_v50 = vadd.f32 %v8473_v19, %v8249_v47  ;;  %v7397_v17 = vpop.permute.xlu0 %7396  ;;  %p9450_p11 = scmp.ne.s32.totalorder %s14267_s10, %s9449_s8  ;;  %p9457_p1 = scmp.lt.s32.totalorder %s9455_s13, %s9449_s8 }
 0x8eb   : > { %7470 = vst.msk [vmem:[#allocation4 + $0x218] sm:$0xff] %vm2621_vm14, %v7397_v17  ;;  %v7143_v3 = vpop.permute.xlu1 %7142 }
 0x8ec   : > { %8616 = vst.msk [vmem:[%s14045_s29 + $0x20] sm:$0xff] %vm243_vm10, %v8474_v50  ;;  %7798 = vrot.lane.b32.xlu0 %v7703_v55, %s9521_s11  ;;  %p9451_p12 = pnand %p9450_p11, %p9587_p5  ;;  %p9458_p2 = por %p9457_p1, %p9456_p0 }
 0x8ed   : > { %7215 = vst.msk [vmem:[#allocation4 + $0x228] sm:$0xff] %vm3007_vm0, %v7143_v3 }
 0x8ee   : > { %v7589_v42 = vpop.permute.xlu0 %7588  ;;  %v7992_v16 = vld [vmem:[#allocation4 + $0x200] sm:$0xff]  ;;  %p9452_p13 = pneg %p9451_p12 }
 0x8ef   : > { %7662 = vst.msk [vmem:[#allocation4 + $0x218] sm:$0xff] %vm2814_vm15, %v7589_v42  ;;  %v6761_v28 = vpop.permute.xlu1 %6760  ;;  %8331 = vmatprep.mubr.f32.mxu1 %v7992_v16  ;;  %v9279_v16 = vpop.f32.mrf.mxu0 }
 0x8f0   : > { %6832 = vst.msk [vmem:[#allocation4 + $0x240] sm:$0xff] %vm2621_vm14, %v6761_v28  ;;  %8332 = vmatmul.mubr.f32.gmra.mxu1 %v7991_v48  ;;  %p9459_p3 = pnand %p9458_p2, %p9452_p13 }
 0x8f2   : > { %v8253_v51 = vpop.f32.mrf.mxu1  ;;  %v7781_v54 = vpop.permute.xlu0 %7780 }
 0x8f3   : > { %v8254_v9 = vadd.f32 %v14033_v63, %v8253_v51  ;;  %7854 = vst.msk [vmem:[#allocation4 + $0x218] sm:$0xff] %vm3007_vm0, %v7781_v54  ;;  %v6953_v26 = vpop.permute.xlu1 %6952  ;;  %v8503_v54 = vpop.f32.mrf.mxu0 }
 0x8f4   : > { %v8255_v41 = vpop.f32.mrf.mxu1  ;;  %7024 = vst.msk [vmem:[#allocation4 + $0x240] sm:$0xff] %vm2814_vm15, %v6953_v26  ;;  %v7997_v62 = vld [vmem:[#allocation4 + $0x228] sm:$0xff] }
 0x8f5   : > { %v8479_v58 = vadd.f32 %v9270_v46, %v8254_v9 }
 0x8f6   : > { %v7399_v25 = vpop.permute.xlu0 %7398 }
 0x8f7   : > { %8617 = vst.msk [vmem:[%s14045_s29 + $0x28] sm:$0xff] %vm243_vm10, %v8479_v58  ;;  %v7145_v35 = vpop.permute.xlu1 %7144 }
 0x8f8   : > { %7471 = vst.msk [vmem:[#allocation4 + $0x230] sm:$0xff] %vm2621_vm14, %v7399_v25 }
 0x8f9   : > { %7216 = vst.msk [vmem:[#allocation4 + $0x240] sm:$0xff] %vm3007_vm0, %v7145_v35 }
 0x8fa   : > { %v7591_v31 = vpop.permute.xlu0 %7590  ;;  %v7995_v6 = vld [vmem:[#allocation4 + $0x218] sm:$0xff] }
 0x8fb   : > { %7663 = vst.msk [vmem:[#allocation4 + $0x230] sm:$0xff] %vm2814_vm15, %v7591_v31  ;;  %v6763_v22 = vpop.permute.xlu1 %6762  ;;  %8336 = vmatprep.mubr.f32.mxu1 %v7995_v6 }
 0x8fc   : > { %6833 = vst.msk [vmem:[#allocation4 + $0x258] sm:$0xff] %vm2621_vm14, %v6763_v22  ;;  %8337 = vmatmul.mubr.f32.gmra.mxu1 %v7994_v37 }
 0x8fe   : > { %v8258_v8 = vpop.f32.mrf.mxu1  ;;  %v7783_v23 = vpop.permute.xlu0 %7782 }
 0x8ff   : > { %v8259_v59 = vadd.f32 %v14033_v63, %v8258_v8  ;;  %7855 = vst.msk [vmem:[#allocation4 + $0x230] sm:$0xff] %vm3007_vm0, %v7783_v23  ;;  %v6955_v32 = vpop.permute.xlu1 %6954 }
 0x900   : > { %v8260_v24 = vpop.f32.mrf.mxu1  ;;  %7025 = vst.msk [vmem:[#allocation4 + $0x258] sm:$0xff] %vm2814_vm15, %v6955_v32  ;;  %v8000_v18 = vld [vmem:[#allocation4 + $0x240] sm:$0xff] }
 0x901   : > { %v8484_v56 = vadd.f32 %v8483_v34, %v8259_v59 }
 0x902   : > { %v7401_v13 = vpop.permute.xlu0 %7400 }
 0x903   : > { %8618 = vst.msk [vmem:[%s14045_s29 + $0x30] sm:$0xff] %vm243_vm10, %v8484_v56  ;;  %v7147_v7 = vpop.permute.xlu1 %7146 }
 0x904   : > { %7472 = vst.msk [vmem:[#allocation4 + $0x248] sm:$0xff] %vm2621_vm14, %v7401_v13 }
 0x905   : > { %7217 = vst.msk [vmem:[#allocation4 + $0x258] sm:$0xff] %vm3007_vm0, %v7147_v7 }
 0x906   : > { %v7593_v12 = vpop.permute.xlu0 %7592  ;;  %v7998_v11 = vld [vmem:[#allocation4 + $0x230] sm:$0xff] }
 0x907   : > { %7664 = vst.msk [vmem:[#allocation4 + $0x248] sm:$0xff] %vm2814_vm15, %v7593_v12  ;;  %v6765_v27 = vpop.permute.xlu1 %6764  ;;  %8341 = vmatprep.mubr.f32.mxu1 %v7998_v11  ;;  %v9282_v11 = vpop.f32.mrf.mxu0 }
 0x908   : > { %6834 = vst.msk [vmem:[#allocation4 + $0x270] sm:$0xff] %vm2621_vm14, %v6765_v27  ;;  %8342 = vmatmul.mubr.f32.gmra.mxu1 %v7997_v62 }
 0x909   : > { %v8263_v49 = vpop.f32.mrf.mxu1 }
 0x90a   : > { %v8264_v10 = vadd.f32 %v14033_v63, %v8263_v49  ;;  %v7785_v20 = vpop.permute.xlu0 %7784 }
 0x90b   : > { %v8265_v1 = vpop.f32.mrf.mxu1  ;;  %7856 = vst.msk [vmem:[#allocation4 + $0x248] sm:$0xff] %vm3007_vm0, %v7785_v20  ;;  %v6957_v38 = vpop.permute.xlu1 %6956 }
 0x90c   : > { %v8489_v2 = vadd.f32 %v9273_v5, %v8264_v10  ;;  %7026 = vst.msk [vmem:[#allocation4 + $0x270] sm:$0xff] %vm2814_vm15, %v6957_v38  ;;  %v8003_v40 = vld [vmem:[#allocation4 + $0x258] sm:$0xff]  ;;  %v8513_v1 = vpop.f32.mrf.mxu0 }
 0x90e   : > { %8619 = vst.msk [vmem:[%s14045_s29 + $0x38] sm:$0xff] %vm243_vm10, %v8489_v2  ;;  %v7403_v29 = vpop.permute.xlu0 %7402 }
 0x90f   : > { %7473 = vst.msk [vmem:[#allocation4 + $0x260] sm:$0xff] %vm2621_vm14, %v7403_v29  ;;  %v7149_v60 = vpop.permute.xlu1 %7148 }
 0x910   : > { %7218 = vst.msk [vmem:[#allocation4 + $0x270] sm:$0xff] %vm3007_vm0, %v7149_v60 }
 0x912   : > { %v7595_v61 = vpop.permute.xlu0 %7594  ;;  %v8001_v33 = vld [vmem:[#allocation4 + $0x248] sm:$0xff] }
 0x913   : > { %7665 = vst.msk [vmem:[#allocation4 + $0x260] sm:$0xff] %vm2814_vm15, %v7595_v61  ;;  %v6767_v30 = vpop.permute.xlu1 %6766  ;;  %8346 = vmatprep.mubr.f32.mxu1 %v8001_v33 }
 0x914   : > { %6835 = vst.msk [vmem:[#allocation4 + $0x288] sm:$0xff] %vm2621_vm14, %v6767_v30  ;;  %v8268_v53 = vpop.f32.mrf.mxu1  ;;  %8347 = vmatmul.mubr.f32.gmra.mxu1 %v8000_v18 }
 0x915   : > { %v8269_v45 = vadd.f32 %v14033_v63, %v8268_v53 }
 0x916   : > { %v7787_v46 = vpop.permute.xlu0 %7786  ;;  %v8270_v15 = vpop.f32.mrf.mxu1 }
 0x917   : > { %v8494_v14 = vadd.f32 %v8493_v39, %v8269_v45  ;;  %7857 = vst.msk [vmem:[#allocation4 + $0x260] sm:$0xff] %vm3007_vm0, %v7787_v46  ;;  %v6959_v36 = vpop.permute.xlu1 %6958  ;;  %v8006_v9 = vld [vmem:[#allocation4 + $0x270] sm:$0xff] }
 0x918   : > { %7027 = vst.msk [vmem:[#allocation4 + $0x288] sm:$0xff] %vm2814_vm15, %v6959_v36 }
 0x919   : > { %8620 = vst.msk [vmem:[%s14045_s29 + $0x40] sm:$0xff] %vm243_vm10, %v8494_v14 }
 0x91a   : > { %v7405_v43 = vpop.permute.xlu0 %7404 }
 0x91b   : > { %7474 = vst.msk [vmem:[#allocation4 + $0x278] sm:$0xff] %vm2621_vm14, %v7405_v43  ;;  %v7151_v0 = vpop.permute.xlu1 %7150  ;;  %v9285_v43 = vpop.f32.mrf.mxu0 }
 0x91c   : > { %7219 = vst.msk [vmem:[#allocation4 + $0x288] sm:$0xff] %vm3007_vm0, %v7151_v0 }
 0x91e   : > { %v7597_v44 = vpop.permute.xlu0 %7596  ;;  %v8004_v19 = vld [vmem:[#allocation4 + $0x260] sm:$0xff] }
 0x91f   : > { %7666 = vst.msk [vmem:[#allocation4 + $0x278] sm:$0xff] %vm2814_vm15, %v7597_v44  ;;  %v6769_v47 = vpop.permute.xlu1 %6768  ;;  %8351 = vmatprep.mubr.f32.mxu1 %v8004_v19 }
 0x920   : > { %6836 = vst.msk [vmem:[#allocation4 + $0x2a0] sm:$0xff] %vm2621_vm14, %v6769_v47  ;;  %8352 = vmatmul.mubr.f32.gmra.mxu1 %v8003_v40  ;;  %v8273_v21 = vpop.f32.mrf.mxu1  ;;  %v8523_v40 = vpop.f32.mrf.mxu0 }
 0x921   : > { %v8274_v57 = vadd.f32 %v14033_v63, %v8273_v21 }
 0x922   : > { %v7789_v50 = vpop.permute.xlu0 %7788  ;;  %v8275_v55 = vpop.f32.mrf.mxu1 }
 0x923   : > { %7858 = vst.msk [vmem:[#allocation4 + $0x278] sm:$0xff] %vm3007_vm0, %v7789_v50  ;;  %v6961_v4 = vpop.permute.xlu1 %6960  ;;  %v8499_v17 = vadd.f32 %v9276_v52, %v8274_v57  ;;  %v8009_v34 = vld [vmem:[#allocation4 + $0x288] sm:$0xff] }
 0x924   : > { %7028 = vst.msk [vmem:[#allocation4 + $0x2a0] sm:$0xff] %vm2814_vm15, %v6961_v4 }
 0x925   : > { %8621 = vst.msk [vmem:[%s14045_s29 + $0x48] sm:$0xff] %vm243_vm10, %v8499_v17 }
 0x926   : > { %v7407_v3 = vpop.permute.xlu0 %7406 }
 0x927   : > { %7475 = vst.msk [vmem:[#allocation4 + $0x290] sm:$0xff] %vm2621_vm14, %v7407_v3  ;;  %v7153_v42 = vpop.permute.xlu1 %7152 }
 0x928   : > { %7220 = vst.msk [vmem:[#allocation4 + $0x2a0] sm:$0xff] %vm3007_vm0, %v7153_v42 }
 0x92a   : > { %v7599_v28 = vpop.permute.xlu0 %7598  ;;  %v8007_v48 = vld [vmem:[#allocation4 + $0x278] sm:$0xff] }
 0x92b   : > { %7667 = vst.msk [vmem:[#allocation4 + $0x290] sm:$0xff] %vm2814_vm15, %v7599_v28  ;;  %v6771_v51 = vpop.permute.xlu1 %6770  ;;  %8356 = vmatprep.mubr.f32.mxu1 %v8007_v48  ;;  %v9288_v48 = vpop.f32.mrf.mxu0 }
 0x92c   : > { %6837 = vst.msk [vmem:[#allocation4 + $0x2b8] sm:$0xff] %vm2621_vm14, %v6771_v51  ;;  %8357 = vmatmul.mubr.f32.gmra.mxu1 %v8006_v9 }
 0x92e   : > { %v7791_v26 = vpop.permute.xlu0 %7790 }
 0x92f   : > { %v8278_v41 = vpop.f32.mrf.mxu1  ;;  %7859 = vst.msk [vmem:[#allocation4 + $0x290] sm:$0xff] %vm3007_vm0, %v7791_v26  ;;  %v6963_v5 = vpop.permute.xlu1 %6962  ;;  %v8012_v10 = vld [vmem:[#allocation4 + $0x2a0] sm:$0xff] }
 0x930   : > { %v8279_v58 = vadd.f32 %v14033_v63, %v8278_v41  ;;  %7029 = vst.msk [vmem:[#allocation4 + $0x2b8] sm:$0xff] %vm2814_vm15, %v6963_v5  ;;  %v8533_v41 = vpop.f32.mrf.mxu0 }
 0x931   : > { %v8280_v25 = vpop.f32.mrf.mxu1 }
 0x932   : > { %v8504_v35 = vadd.f32 %v8503_v54, %v8279_v58  ;;  %v7409_v31 = vpop.permute.xlu0 %7408 }
 0x933   : > { %7476 = vst.msk [vmem:[#allocation4 + $0x2a8] sm:$0xff] %vm2621_vm14, %v7409_v31  ;;  %v7155_v6 = vpop.permute.xlu1 %7154  ;;  %v9291_v31 = vpop.f32.mrf.mxu0 }
 0x934   : > { %8622 = vst.msk [vmem:[%s14045_s29 + $0x50] sm:$0xff] %vm243_vm10, %v8504_v35 }
 0x935   : > { %7221 = vst.msk [vmem:[#allocation4 + $0x2b8] sm:$0xff] %vm3007_vm0, %v7155_v6 }
 0x936   : > { %v7601_v22 = vpop.permute.xlu0 %7600  ;;  %v8010_v37 = vld [vmem:[#allocation4 + $0x290] sm:$0xff] }
 0x937   : > { %7668 = vst.msk [vmem:[#allocation4 + $0x2a8] sm:$0xff] %vm2814_vm15, %v7601_v22  ;;  %v6773_v8 = vpop.permute.xlu1 %6772  ;;  %8361 = vmatprep.mubr.f32.mxu1 %v8010_v37  ;;  %v8543_v37 = vpop.f32.mrf.mxu0 }
 0x938   : > { %6838 = vst.msk [vmem:[#allocation4 + $0x2d0] sm:$0xff] %vm2621_vm14, %v6773_v8  ;;  %8362 = vmatmul.mubr.f32.gmra.mxu1 %v8009_v34 }
 0x93a   : > { %v8283_v59 = vpop.f32.mrf.mxu1  ;;  %v7793_v24 = vpop.permute.xlu0 %7792 }
 0x93b   : > { %v8284_v23 = vadd.f32 %v14033_v63, %v8283_v59  ;;  %7860 = vst.msk [vmem:[#allocation4 + $0x2a8] sm:$0xff] %vm3007_vm0, %v7793_v24  ;;  %v6965_v13 = vpop.permute.xlu1 %6964 }
 0x93c   : > { %v8285_v56 = vpop.f32.mrf.mxu1  ;;  %7030 = vst.msk [vmem:[#allocation4 + $0x2d0] sm:$0xff] %vm2814_vm15, %v6965_v13  ;;  %v8015_v53 = vld [vmem:[#allocation4 + $0x2b8] sm:$0xff] }
 0x93d   : > { %v8509_v32 = vadd.f32 %v9279_v16, %v8284_v23 }
 0x93e   : > { %v7411_v7 = vpop.permute.xlu0 %7410 }
 0x93f   : > { %8623 = vst.msk [vmem:[%s14045_s29 + $0x58] sm:$0xff] %vm243_vm10, %v8509_v32  ;;  %v7157_v12 = vpop.permute.xlu1 %7156  ;;  %v9294_v32 = vpop.f32.mrf.mxu0 }
 0x940   : > { %7477 = vst.msk [vmem:[#allocation4 + $0x2c0] sm:$0xff] %vm2621_vm14, %v7411_v7 }
 0x941   : > { %7222 = vst.msk [vmem:[#allocation4 + $0x2d0] sm:$0xff] %vm3007_vm0, %v7157_v12  ;;  %v8553_v12 = vpop.f32.mrf.mxu0 }
 0x942   : > { %v7603_v27 = vpop.permute.xlu0 %7602  ;;  %v8013_v62 = vld [vmem:[#allocation4 + $0x2a8] sm:$0xff] }
 0x943   : > { %7669 = vst.msk [vmem:[#allocation4 + $0x2c0] sm:$0xff] %vm2814_vm15, %v7603_v27  ;;  %v6775_v49 = vpop.permute.xlu1 %6774  ;;  %8366 = vmatprep.mubr.f32.mxu1 %v8013_v62 }
 0x944   : > { %6839 = vst.msk [vmem:[#allocation4 + $0x2e8] sm:$0xff] %vm2621_vm14, %v6775_v49  ;;  %v8288_v20 = vpop.f32.mrf.mxu1  ;;  %8367 = vmatmul.mubr.f32.gmra.mxu1 %v8012_v10 }
 0x945   : > { %v8289_v2 = vadd.f32 %v14033_v63, %v8288_v20 }
 0x946   : > { %v7795_v38 = vpop.permute.xlu0 %7794  ;;  %v8290_v29 = vpop.f32.mrf.mxu1 }
 0x947   : > { %v8514_v60 = vadd.f32 %v8513_v1, %v8289_v2  ;;  %7861 = vst.msk [vmem:[#allocation4 + $0x2c0] sm:$0xff] %vm3007_vm0, %v7795_v38  ;;  %v6967_v52 = vpop.permute.xlu1 %6966  ;;  %v9297_v1 = vpop.f32.mrf.mxu0 }
 0x948   : > { %7031 = vst.msk [vmem:[#allocation4 + $0x2e8] sm:$0xff] %vm2814_vm15, %v6967_v52  ;;  %v8018_v19 = vld [vmem:[#allocation4 + $0x2d0] sm:$0xff] }
 0x949   : > { %8624 = vst.msk [vmem:[%s14045_s29 + $0x60] sm:$0xff] %vm243_vm10, %v8514_v60  ;;  %v8563_v29 = vpop.f32.mrf.mxu0 }
 0x94a   : > { %v7413_v61 = vpop.permute.xlu0 %7412 }
 0x94b   : > { %7478 = vst.msk [vmem:[#allocation4 + $0x2d8] sm:$0xff] %vm2621_vm14, %v7413_v61  ;;  %v7159_v33 = vpop.permute.xlu1 %7158 }
 0x94c   : > { %7223 = vst.msk [vmem:[#allocation4 + $0x2e8] sm:$0xff] %vm3007_vm0, %v7159_v33 }
 0x94e   : > { %v7605_v30 = vpop.permute.xlu0 %7604  ;;  %v8016_v18 = vld [vmem:[#allocation4 + $0x2c0] sm:$0xff] }
 0x94f   : > { %7670 = vst.msk [vmem:[#allocation4 + $0x2d8] sm:$0xff] %vm2814_vm15, %v7605_v30  ;;  %8371 = vmatprep.mubr.f32.mxu1 %v8016_v18 }
 0x950   : > { %v8293_v39 = vpop.f32.mrf.mxu1  ;;  %8372 = vmatmul.mubr.f32.gmra.mxu1 %v8015_v53  ;;  %v9300_v53 = vpop.f32.mrf.mxu0 }
 0x951   : > { %v8294_v45 = vadd.f32 %v14033_v63, %v8293_v39 }
 0x952   : > { %v7797_v46 = vpop.permute.xlu0 %7796  ;;  %v8295_v15 = vpop.f32.mrf.mxu1 }
 0x953   : > { %v8519_v14 = vadd.f32 %v9282_v11, %v8294_v45  ;;  %7862 = vst.msk [vmem:[#allocation4 + $0x2d8] sm:$0xff] %vm3007_vm0, %v7797_v46  ;;  %v8021_v17 = vld [vmem:[#allocation4 + $0x2e8] sm:$0xff]  ;;  %v8573_v46 = vpop.f32.mrf.mxu0 }
 0x955   : > { %8625 = vst.msk [vmem:[%s14045_s29 + $0x68] sm:$0xff] %vm243_vm10, %v8519_v14 }
 0x956   : > { %v7415_v36 = vpop.permute.xlu0 %7414 }
 0x957   : > { %7479 = vst.msk [vmem:[#allocation4 + $0x2f0] sm:$0xff] %vm2621_vm14, %v7415_v36 }
 0x95a   : > { %v7607_v0 = vpop.permute.xlu0 %7606  ;;  %v8019_v44 = vld [vmem:[#allocation4 + $0x2d8] sm:$0xff] }
 0x95b   : > { %7671 = vst.msk [vmem:[#allocation4 + $0x2f0] sm:$0xff] %vm2814_vm15, %v7607_v0  ;;  %8376 = vmatprep.mubr.f32.mxu1 %v8019_v44 }
 0x95c   : > { %v8298_v47 = vpop.f32.mrf.mxu1  ;;  %8377 = vmatmul.mubr.f32.gmra.mxu1 %v8018_v19  ;;  %v9303_v19 = vpop.f32.mrf.mxu0 }
 0x95d   : > { %v8299_v21 = vadd.f32 %v14033_v63, %v8298_v47 }
 0x95e   : > { %v7799_v57 = vpop.permute.xlu0 %7798  ;;  %v8300_v50 = vpop.f32.mrf.mxu1 }
 0x95f   : > { %v8524_v4 = vadd.f32 %v8523_v40, %v8299_v21  ;;  %7863 = vst.msk [vmem:[#allocation4 + $0x2f0] sm:$0xff] %vm3007_vm0, %v7799_v57  ;;  %v8583_v21 = vpop.f32.mrf.mxu0 }
 0x961   : > { %8626 = vst.msk [vmem:[%s14045_s29 + $0x70] sm:$0xff] %vm243_vm10, %v8524_v4 }
 0x966   : > { %v8022_v55 = vld [vmem:[#allocation4 + $0x2f0] sm:$0xff] }
 0x967   : > { %8381 = vmatprep.mubr.f32.mxu1 %v8022_v55 }
 0x968   : > { %v8303_v3 = vpop.f32.mrf.mxu1  ;;  %8382 = vmatmul.mubr.f32.gmra.mxu1 %v8021_v17 }
 0x969   : > { %v8304_v42 = vadd.f32 %v14033_v63, %v8303_v3 }
 0x96a   : > { %v8305_v16 = vpop.f32.mrf.mxu1 }
 0x96b   : > { %v8529_v28 = vadd.f32 %v9285_v43, %v8304_v42  ;;  %v9306_v42 = vpop.f32.mrf.mxu0 }
 0x96d   : > { %8627 = vst.msk [vmem:[%s14045_s29 + $0x78] sm:$0xff] %vm243_vm10, %v8529_v28 }
 0x974   : > { %v8308_v51 = vpop.f32.mrf.mxu1 }
 0x975   : > { %v8309_v9 = vadd.f32 %v14033_v63, %v8308_v51 }
 0x976   : > { %v8310_v54 = vpop.f32.mrf.mxu1 }
 0x977   : > { %v8534_v58 = vadd.f32 %v8533_v41, %v8309_v9 }
 0x979   : > { %8628 = vst.msk [vmem:[%s14045_s29 + $0x80] sm:$0xff] %vm243_vm10, %v8534_v58 }
 0x980   : > { %v8313_v26 = vpop.f32.mrf.mxu1 }
 0x981   : > { %v8314_v25 = vadd.f32 %v14033_v63, %v8313_v26 }
 0x982   : > { %v8315_v35 = vpop.f32.mrf.mxu1 }
 0x983   : > { %v8539_v5 = vadd.f32 %v9288_v48, %v8314_v25  ;;  %v8593_v48 = vpop.f32.mrf.mxu0 }
 0x985   : > { %8629 = vst.msk [vmem:[%s14045_s29 + $0x88] sm:$0xff] %vm243_vm10, %v8539_v5  ;;  %v9309_v25 = vpop.f32.mrf.mxu0 }
 0x987   : > { %v8603_v5 = vpop.f32.mrf.mxu0 }
 0x98c   : > { %v8318_v6 = vpop.f32.mrf.mxu1 }
 0x98d   : > { %v8319_v22 = vadd.f32 %v14033_v63, %v8318_v6 }
 0x98e   : > { %v8320_v8 = vpop.f32.mrf.mxu1 }
 0x98f   : > { %v8544_v34 = vadd.f32 %v8543_v37, %v8319_v22 }
 0x991   : > { %8630 = vst.msk [vmem:[%s14045_s29 + $0x90] sm:$0xff] %vm243_vm10, %v8544_v34 }
 0x998   : > { %v8323_v59 = vpop.f32.mrf.mxu1 }
 0x999   : > { %v8324_v23 = vadd.f32 %v14033_v63, %v8323_v59 }
 0x99a   : > { %v8325_v24 = vpop.f32.mrf.mxu1 }
 0x99b   : > { %v8549_v56 = vadd.f32 %v9291_v31, %v8324_v23 }
 0x99d   : > { %8631 = vst.msk [vmem:[%s14045_s29 + $0x98] sm:$0xff] %vm243_vm10, %v8549_v56 }
 0x9a4   : > { %v8328_v13 = vpop.f32.mrf.mxu1 }
 0x9a5   : > { %v8329_v7 = vadd.f32 %v14033_v63, %v8328_v13 }
 0x9a6   : > { %v8330_v11 = vpop.f32.mrf.mxu1 }
 0x9a7   : > { %v8554_v27 = vadd.f32 %v8553_v12, %v8329_v7 }
 0x9a9   : > { %8632 = vst.msk [vmem:[%s14045_s29 + $0xa0] sm:$0xff] %vm243_vm10, %v8554_v27 }
 0x9b0   : > { %v8333_v62 = vpop.f32.mrf.mxu1 }
 0x9b1   : > { %v8334_v49 = vadd.f32 %v14033_v63, %v8333_v62 }
 0x9b2   : > { %v8335_v10 = vpop.f32.mrf.mxu1 }
 0x9b3   : > { %v8559_v20 = vadd.f32 %v9294_v32, %v8334_v49 }
 0x9b5   : > { %8633 = vst.msk [vmem:[%s14045_s29 + $0xa8] sm:$0xff] %vm243_vm10, %v8559_v20 }
 0x9bc   : > { %v8338_v2 = vpop.f32.mrf.mxu1 }
 0x9bd   : > { %v8339_v38 = vadd.f32 %v14033_v63, %v8338_v2 }
 0x9be   : > { %v8340_v60 = vpop.f32.mrf.mxu1 }
 0x9bf   : > { %v8564_v52 = vadd.f32 %v8563_v29, %v8339_v38 }
 0x9c1   : > { %8634 = vst.msk [vmem:[%s14045_s29 + $0xb0] sm:$0xff] %vm243_vm10, %v8564_v52 }
 0x9c8   : > { %v8343_v61 = vpop.f32.mrf.mxu1 }
 0x9c9   : > { %v8344_v33 = vadd.f32 %v14033_v63, %v8343_v61 }
 0x9ca   : > { %v8345_v30 = vpop.f32.mrf.mxu1 }
 0x9cb   : > { %v8569_v18 = vadd.f32 %v9297_v1, %v8344_v33 }
 0x9cd   : > { %8635 = vst.msk [vmem:[%s14045_s29 + $0xb8] sm:$0xff] %vm243_vm10, %v8569_v18 }
 0x9d4   : > { %v8348_v39 = vpop.f32.mrf.mxu1 }
 0x9d5   : > { %v8349_v45 = vadd.f32 %v14033_v63, %v8348_v39 }
 0x9d6   : > { %v8350_v15 = vpop.f32.mrf.mxu1 }
 0x9d7   : > { %v8574_v14 = vadd.f32 %v8573_v46, %v8349_v45 }
 0x9d9   : > { %8636 = vst.msk [vmem:[%s14045_s29 + $0xc0] sm:$0xff] %vm243_vm10, %v8574_v14 }
 0x9e0   : > { %v8353_v36 = vpop.f32.mrf.mxu1 }
 0x9e1   : > { %v8354_v43 = vadd.f32 %v14033_v63, %v8353_v36 }
 0x9e2   : > { %v8355_v0 = vpop.f32.mrf.mxu1 }
 0x9e3   : > { %v8579_v44 = vadd.f32 %v9300_v53, %v8354_v43 }
 0x9e5   : > { %8637 = vst.msk [vmem:[%s14045_s29 + $0xc8] sm:$0xff] %vm243_vm10, %v8579_v44 }
 0x9ec   : > { %v8358_v47 = vpop.f32.mrf.mxu1 }
 0x9ed   : > { %v8359_v40 = vadd.f32 %v14033_v63, %v8358_v47 }
 0x9ee   : > { %v8360_v57 = vpop.f32.mrf.mxu1 }
 0x9ef   : > { %v8584_v50 = vadd.f32 %v8583_v21, %v8359_v40 }
 0x9f1   : > { %8638 = vst.msk [vmem:[%s14045_s29 + $0xd0] sm:$0xff] %vm243_vm10, %v8584_v50 }
 0x9f8   : > { %v8363_v4 = vpop.f32.mrf.mxu1 }
 0x9f9   : > { %v8364_v55 = vadd.f32 %v14033_v63, %v8363_v4 }
 0x9fa   : > { %v8365_v17 = vpop.f32.mrf.mxu1 }
 0x9fb   : > { %v8589_v3 = vadd.f32 %v9303_v19, %v8364_v55 }
 0x9fd   : > { %8639 = vst.msk [vmem:[%s14045_s29 + $0xd8] sm:$0xff] %vm243_vm10, %v8589_v3 }
 0xa04   : > { %v8368_v16 = vpop.f32.mrf.mxu1 }
 0xa05   : > { %v8369_v28 = vadd.f32 %v14033_v63, %v8368_v16 }
 0xa06   : > { %v8370_v51 = vpop.f32.mrf.mxu1 }
 0xa07   : > { %v8594_v9 = vadd.f32 %v8593_v48, %v8369_v28 }
 0xa09   : > { %8640 = vst.msk [vmem:[%s14045_s29 + $0xe0] sm:$0xff] %vm243_vm10, %v8594_v9 }
 0xa10   : > { %v8373_v41 = vpop.f32.mrf.mxu1 }
 0xa11   : > { %v8374_v54 = vadd.f32 %v14033_v63, %v8373_v41 }
 0xa12   : > { %v8375_v58 = vpop.f32.mrf.mxu1 }
 0xa13   : > { %v8599_v26 = vadd.f32 %v9306_v42, %v8374_v54 }
 0xa15   : > { %8641 = vst.msk [vmem:[%s14045_s29 + $0xe8] sm:$0xff] %vm243_vm10, %v8599_v26 }
 0xa1c   : > { %v8378_v35 = vpop.f32.mrf.mxu1 }
 0xa1d   : > { %v8379_v31 = vadd.f32 %v14033_v63, %v8378_v35 }
 0xa1e   : > { %v8380_v6 = vpop.f32.mrf.mxu1 }
 0xa1f   : > { %v8604_v22 = vadd.f32 %v8603_v5, %v8379_v31 }
 0xa21   : > { %8642 = vst.msk [vmem:[%s14045_s29 + $0xf0] sm:$0xff] %vm243_vm10, %v8604_v22 }
 0xa28   : > { %v8383_v37 = vpop.f32.mrf.mxu1 }
 0xa29   : > { %v8384_v8 = vadd.f32 %v14033_v63, %v8383_v37 }
 0xa2a   : > { %v8385_v34 = vpop.f32.mrf.mxu1 }
 0xa2b   : > { %v8609_v59 = vadd.f32 %v9309_v25, %v8384_v8 }
 0xa2d   : > { %8643 = vst.msk [vmem:[%s14045_s29 + $0xf8] sm:$0xff] %vm243_vm10, %v8609_v59 }
 0xa2e   : > { %9462 = shalt.err (!%p9459_p3)
}
 0xa2f   : > { %s9463_s14 = scalar_lea.hbm %s14265_s5, 4096  ;;  %s9467_s23 = scalar_lea.hbm %s14318_s4, 8192 }
 0xa30   : > { %p9464_p4 = scmp.ne.s32.totalorder %s14265_s5, %s9463_s14  ;;  %p9468_p9 = scmp.lt.s32.totalorder %s14265_s5, %s14318_s4 }
 0xa31   : > { %p9469_p10 = scmp.lt.s32.totalorder %s9467_s23, %s9463_s14 }
 0xa32   : > { %p9465_p7 = pnand %p9464_p4, %p9587_p5 }
 0xa33   : > { %p9470_p11 = por %p9469_p10, %p9468_p9 }
 0xa34   : > { %p9466_p8 = pneg %p9465_p7 }
 0xa36   : > { %p9471_p12 = pnand %p9470_p11, %p9466_p8 }
 0xa38   : > { %9474 = shalt.err (!%p9471_p12)
}
 0xa39   : > { %s9523_s29 = smov 128  }
 0xa3a   : > { %9374 = dma.vmem_to_hbm [thread:$0]  (%p9587_p5), %s14267_s10, 4096, %s14265_s5, %s14273_s19, %s9523_s29, %s9523_s29, %s9513_s7  }
 0xa3b PF: > { %p9380_p13 = scmp.ge.s32.totalorder %s9509_s18, 2  ;;  %s8673_s6 = sand.u32 1, %s9497_s15  }
 0xa3c   : > { %s8674_s11 = scalar_lea.sflag [#allocation6], %s8673_s6 }
 0xa3d   : > { %p9377_p0 = pnand %p9380_p13, %p9591_p6 }
 0xa3f   : > { %p9378_p1 = pneg %p9377_p0 }
 0xa41   : > { %9492 = dma.done.wait (%p9378_p1), %s8674_s11, 4096  }
 0xa42   : > { %9494 = vsyncadd (%p9378_p1), %s8674_s11, 4294963200  ;;  %p14_p2 = scmp.ge.s32.totalorder %s9574_s21, 4   ;;  %s14474_s15 = smov %s9501_s16 }
 0xa43   : > { %s14475_s16 = smov %s9505_s17  ;;  %s14476_s17 = smov %s9585_s24 }
 0xa44   : > { %s14477_s18 = smov %s9574_s21  ;;  %16 = sbr.rel (!%p14_p2) target bundleno = 3 (0x3), region = 79 }
 0xa49   :  { %8679 = vsyncpa [#allocation6], 1 }
 0xa4a   :  { %8681 = vsyncpa [#allocation6 + $0x1], 1 }

</bundles_post_ra>
